<compile_context>
chip_gen: v6e
topology: v6e:2x2x1
jax: 0.10.0
libtpu: 0.0.40
codegen_flags: <defaults>
</compile_context>

<pallas_src>
import functools

import jax
import jax.numpy as jnp
from jax.experimental import pallas as pl
from jax.experimental.pallas import tpu as pltpu


_ROW_QUANT = 16            # row quantum: bf16 sublane tile, keeps every
                           # blocked row dim aligned for bf16 and f32 operands
_VMEM_LIMIT = 48 * 2**20   # < v7x's 64 MiB physical VMEM; plenty of headroom


def _round_up(a, b):
    return (a + b - 1) // b * b


def _pick_tile_r(rows, width, c_in, cout, vmem_budget=24 * 2**20):
    """Image rows per grid step.

    Targets ~2048 output pixels per step (large tiles amortise the ~0.35us
    fixed per-step cost), keeps at least two tiles so both TensorCores get
    work on v7x, and caps the double-buffered VMEM footprint."""
    target = max(_ROW_QUANT, (2048 // max(width, 1)) // _ROW_QUANT * _ROW_QUANT)
    tile_r = min(target, _round_up(rows, _ROW_QUANT))
    if rows > _ROW_QUANT:
        tile_r = min(tile_r, _round_up((rows + 1) // 2, _ROW_QUANT))

    def footprint(tr):
        stripe = tr * (width + 2) * 3 * c_in * 2           # bf16 stripe tile
        conv = tr * width * max(cout, 128) * 2             # bf16 conv tile
        acc = tr * width * max(cout, 128) * 4              # f32 scratch
        return 2 * stripe + 2 * conv + acc + (2 << 20)

    while tile_r > _ROW_QUANT and footprint(tile_r) > vmem_budget:
        tile_r = max(_ROW_QUANT, _round_up(tile_r // 2, _ROW_QUANT))
    return tile_r


def _make_stripes(t, tile_r):
    """(N,H,W,C) bf16 -> dy row-stripes (R_pad, W+2, 3C) bf16.

    stripes[n*H+h, j, dy*C+c] = zero-padded input[n, h+dy, j, c].  Rows are
    zero-padded to a multiple of tile_r; zero rows give zero conv outputs and
    therefore do not pollute the BatchNorm sums (the conv bias is dropped).
    TODO(synk): replace with a manual halo DMA to remove the 3x replication.
    """
    n, h, width, c = t.shape
    tp = jnp.pad(t, ((0, 0), (1, 1), (1, 1), (0, 0)))
    s = jnp.concatenate([tp[:, dy:dy + h] for dy in range(3)], axis=-1)
    s = s.reshape(n * h, width + 2, 3 * c)
    r_pad = _round_up(n * h, tile_r)
    if r_pad != n * h:
        s = jnp.pad(s, ((0, r_pad - n * h), (0, 0), (0, 0)))
    return s


def _prep_weights(w_oihw):
    """torch (Cout, Cin, ky, kx) -> per-dx slabs (3, 3*Cin, Cout) bf16 whose
    row order (dy-major, channel-minor) matches the stripe channel order."""
    cout, c_in = w_oihw.shape[0], w_oihw.shape[1]
    wt = jnp.transpose(w_oihw, (3, 2, 1, 0))               # (kx, ky, Cin, Cout)
    return wt.reshape(3, 3 * c_in, cout).astype(jnp.bfloat16)


# ---------------------------------------------------------------------------
# Pass 1: conv (3 accumulating MXU dots) -> lane-dense bf16 conv store +
#         per-tile BatchNorm partial statistics (row0 = sum, row1 = sumsq).
# ---------------------------------------------------------------------------
def _conv_stats_kernel(s_ref, w_ref, conv_ref, stats_ref, acc_ref, *,
                       width, cout):
    tile_r = s_ref.shape[0]
    k = s_ref.shape[2]                                      # 3 * C_in
    m = tile_r * width

    # One dx tap per dot; act+label channels are merged, so K = 3*C_in.
    acc_ref[...] = jnp.dot(
        s_ref[:, 0:width, :].reshape(m, k), w_ref[0],
        preferred_element_type=jnp.float32).reshape(tile_r, width, cout)
    acc_ref[...] += jnp.dot(
        s_ref[:, 1:1 + width, :].reshape(m, k), w_ref[1],
        preferred_element_type=jnp.float32).reshape(tile_r, width, cout)
    acc_ref[...] += jnp.dot(
        s_ref[:, 2:2 + width, :].reshape(m, k), w_ref[2],
        preferred_element_type=jnp.float32).reshape(tile_r, width, cout)

    acc = acc_ref[...]                                      # (tile_r, W, Cout)

    # Lane-dense packed store: row-major (r, wx, c) byte order, last dim
    # W*Cout (128 here) -> dense output rows + contiguous DMA instead of an
    # 8/128-lane masked store path.
    for wx in range(width):
        conv_ref[:, wx * cout:(wx + 1) * cout] = (
            acc[:, wx, :].astype(conv_ref.dtype))

    # Per-tile BN partial stats, single (8, Cout) slab (no 8x broadcast).
    acc2 = acc.reshape(m, cout)
    s1 = jnp.sum(acc2, axis=0, keepdims=True)               # (1, Cout)
    s2 = jnp.sum(acc2 * acc2, axis=0, keepdims=True)        # (1, Cout)
    row = jax.lax.broadcasted_iota(jnp.int32, (8, cout), 0)
    stats_ref[...] = jnp.where(row == 0, s1, jnp.where(row == 1, s2, 0.0))


# ---------------------------------------------------------------------------
# Pass 2 (final layer only): elementwise BatchNorm affine + LeakyReLU over the
# lane-dense bf16 conv buffer.  Intermediate layers get the same math fused by
# XLA into the next layer's stripe construction (saves an HBM round trip).
# ---------------------------------------------------------------------------
def _bn_lrelu_kernel(conv_ref, scale_ref, shift_ref, o_ref):
    yv = conv_ref[...].astype(jnp.float32) * scale_ref[...] + shift_ref[...]
    o_ref[...] = jnp.where(yv >= 0, yv, 0.01 * yv).astype(o_ref.dtype)


# ---------------------------------------------------------------------------
# one ConvLayer block: conv + BatchNorm(train) + LeakyReLU
# ---------------------------------------------------------------------------
def _conv_bn_lrelu_layer(act, label, w_oihw, gamma, beta, n, h, width,
                         m_true, last):
    c_in = act.shape[-1] + label.shape[-1]
    cout = w_oihw.shape[0]
    wc = width * cout

    full = jnp.concatenate([act, label], axis=-1)           # one concat/layer
    tile_r = _pick_tile_r(n * h, width, c_in, cout)
    stripes = _make_stripes(full, tile_r)                   # (R_pad, W+2, 3C)
    r_pad = stripes.shape[0]
    num_tiles = r_pad // tile_r
    wk = _prep_weights(w_oihw)                              # (3, 3C, Cout)

    cparams = pltpu.CompilerParams(dimension_semantics=("parallel",),
                                   vmem_limit_bytes=_VMEM_LIMIT)

    conv, stats = pl.pallas_call(
        functools.partial(_conv_stats_kernel, width=width, cout=cout),
        grid=(num_tiles,),
        in_specs=[pl.BlockSpec((tile_r, width + 2, 3 * c_in),
                               lambda i: (i, 0, 0)),
                  pl.BlockSpec((3, 3 * c_in, cout), lambda i: (0, 0, 0))],
        out_specs=[pl.BlockSpec((tile_r, wc), lambda i: (i, 0)),
                   pl.BlockSpec((8, cout), lambda i: (i, 0))],
        out_shape=[jax.ShapeDtypeStruct((r_pad, wc), jnp.bfloat16),
                   jax.ShapeDtypeStruct((num_tiles * 8, cout), jnp.float32)],
        scratch_shapes=[pltpu.VMEM((tile_r, width, cout), jnp.float32)],
        compiler_params=cparams,
    )(stripes, wk)

    # Finish the global (over N,H,W) BatchNorm statistics in JAX -- a few KB.
    st = stats.reshape(num_tiles, 8, cout)
    mean = st[:, 0, :].sum(axis=0) / m_true
    # NOTE: E[x^2] - E[x]^2 in f32, clamped at 0.  Fine at these sizes; switch
    # to a two-pass (mean-subtracted) form if run at much larger N*H*W.
    var = jnp.maximum(st[:, 1, :].sum(axis=0) / m_true - mean * mean, 0.0)
    inv = jax.lax.rsqrt(var + 1e-5)
    scale = gamma * inv
    shift = beta - mean * scale

    if last:
        # Final layer: lane-dense Pallas BN + LeakyReLU, f32 output.
        scale_t = jnp.tile(scale, width).reshape(1, wc)
        shift_t = jnp.tile(shift, width).reshape(1, wc)
        out = pl.pallas_call(
            _bn_lrelu_kernel,
            grid=(num_tiles,),
            in_specs=[pl.BlockSpec((tile_r, wc), lambda i: (i, 0)),
                      pl.BlockSpec((1, wc), lambda i: (0, 0)),
                      pl.BlockSpec((1, wc), lambda i: (0, 0))],
            out_specs=pl.BlockSpec((tile_r, wc), lambda i: (i, 0)),
            out_shape=jax.ShapeDtypeStruct((r_pad, wc), jnp.float32),
            compiler_params=cparams,
        )(conv, scale_t, shift_t)
        out = out.reshape(r_pad, width, cout)[: n * h]
        return out.reshape(n, h, width, cout)

    # Intermediate layer: BN + LeakyReLU are plain elementwise ops that XLA
    # fuses into the next layer's stripe construction, so the bf16 conv buffer
    # is the only per-layer HBM intermediate (no extra read+write of the act).
    convf = conv.reshape(r_pad, width, cout)[: n * h].reshape(n, h, width, cout)
    a = convf.astype(jnp.float32) * scale + shift
    a = jnp.where(a >= 0, a, 0.01 * a)
    return a.astype(jnp.bfloat16)


# ---------------------------------------------------------------------------
# ConvLayer.forward (encoder=True)
# ---------------------------------------------------------------------------
@jax.jit
def conv_layer_forward(params, x, y, label):
    """x, y, label: NHWC float32 (the layout the torch module expects before
    its own transposes).  Returns NCHW f32, matching the torch module."""
    n, h, width, _ = x.shape
    act = jnp.concatenate([x, y], axis=-1).astype(jnp.bfloat16)
    lab = label.astype(jnp.bfloat16)
    m_true = float(n * h * width)
    out = None
    for li, (w, _bias, gamma, beta) in enumerate(params):
        # conv bias intentionally unused: training-mode BN cancels it exactly.
        res = _conv_bn_lrelu_layer(act, lab, w, gamma, beta, n, h, width,
                                   m_true, last=(li == len(params) - 1))
        if li == len(params) - 1:
            out = res
        else:
            act = res
    return jnp.transpose(out, (0, 3, 1, 2))                 # NHWC -> NCHW


# ---------------------------------------------------------------------------
# Pure-JAX reference (f32, includes the conv bias -- BN cancels it)
# ---------------------------------------------------------------------------
def conv_layer_reference(params, x, y, label):
    inp = jnp.concatenate([x, y], axis=-1)
    for (w, b, g, bt) in params:
        inp = jnp.concatenate([inp, label], axis=-1)
        out = jax.lax.conv_general_dilated(
            inp, jnp.transpose(w, (2, 3, 1, 0)),
            window_strides=(1, 1), padding="SAME",
            dimension_numbers=("NHWC", "HWIO", "NHWC"))
        out = out + b
        mean = out.mean(axis=(0, 1, 2), keepdims=True)
        var = ((out - mean) ** 2).mean(axis=(0, 1, 2), keepdims=True)
        out = (out - mean) * jax.lax.rsqrt(var + 1e-5) * g + bt
        inp = jnp.where(out >= 0, out, 0.01 * out)
    return jnp.transpose(inp, (0, 3, 1, 2))


# ---------------------------------------------------------------------------
# Deterministic parameter construction (shapes from ConvLayer.__init__)
# ---------------------------------------------------------------------------
def init_params(key, n_in, hidden_dims, label_dim):
    params = []
    c_in = n_in + label_dim
    for hdim in hidden_dims:
        key, kw, kb = jax.random.split(key, 3)
        w = 0.1 * jax.random.normal(kw, (hdim, c_in, 3, 3), jnp.float32)
        b = 0.1 * jax.random.normal(kb, (hdim,), jnp.float32)
        gamma = jnp.ones((hdim,), jnp.float32)
        beta = jnp.zeros((hdim,), jnp.float32)
        params.append((w, b, gamma, beta))
        c_in = hdim + label_dim
    return params


if __name__ == "__main__":
    key = jax.random.PRNGKey(0)
    k1, k2, k3, kp = jax.random.split(key, 4)

    # Small shapes: batch=2, x/y each 2 channels (module n_in=4), label_dim=2,
    # spatial 16x16, hidden_dims=[8, 8].  -> 2 row-tiles: exercises pipelined
    # tiling, megacore-style parallel grid and cross-tile global BN stats.
    N, H, W = 2, 16, 16
    cx, cy, label_dim = 2, 2, 2
    hidden_dims = [8, 8]

    x = jax.random.normal(k1, (N, H, W, cx), jnp.float32)        # NHWC
    y = jax.random.normal(k2, (N, H, W, cy), jnp.float32)        # NHWC
    label = jax.random.normal(k3, (N, H, W, label_dim), jnp.float32)

    params = init_params(kp, n_in=cx + cy, hidden_dims=hidden_dims,
                         label_dim=label_dim)

    out = conv_layer_forward(params, x, y, label)
    out = jax.block_until_ready(out)

    ref = jax.block_until_ready(conv_layer_reference(params, x, y, label))
    assert out.shape == (N, hidden_dims[-1], H, W), out.shape
    assert jnp.allclose(out, ref, atol=1e-1, rtol=1e-1), float(
        jnp.max(jnp.abs(out - ref)))

    print("KERNEL_OK")
</pallas_src>

<mosaic_0001>
module attributes {stable_mosaic.version = 11 : i64} {
  func.func @_conv_stats_kernel(%arg0: i32, %arg1: memref<16x18x18xbf16, #tpu.memory_space<vmem>>, %arg2: memref<3x18x8xbf16, #tpu.memory_space<vmem>>, %arg3: memref<16x128xbf16, #tpu.memory_space<vmem>>, %arg4: memref<8x8xf32, #tpu.memory_space<vmem>>, %arg5: memref<16x16x8xf32, #tpu.memory_space<vmem>>) attributes {dimension_semantics = [#tpu.dimension_semantics<parallel>], iteration_bounds = array<i64: 2>, scalar_prefetch = 0 : i64, scratch_operands = 1 : i64, tpu.core_type = #tpu.core_type<tc>, window_params = [{transform_indices = @transform_0, window_bounds = array<i64: 16, 18, 18>}, {pipeline_mode = #tpu.pipeline_mode<synchronous>, transform_indices = @transform_1, window_bounds = array<i64: 3, 18, 8>}, {transform_indices = @transform_2, window_bounds = array<i64: 16, 128>}, {transform_indices = @transform_3, window_bounds = array<i64: 8, 8>}]} {
    %c0 = arith.constant 0 : index
    %c0_0 = arith.constant 0 : index
    %c0_1 = arith.constant 0 : index
    %0 = vector.load %arg1[%c0, %c0_0, %c0_1] : memref<16x18x18xbf16, #tpu.memory_space<vmem>>, vector<16x16x18xbf16>
    %1 = vector.shape_cast %0 : vector<16x16x18xbf16> to vector<256x18xbf16>
    %c0_2 = arith.constant 0 : index
    %c0_3 = arith.constant 0 : index
    %c0_4 = arith.constant 0 : index
    %2 = vector.load %arg2[%c0_2, %c0_3, %c0_4] : memref<3x18x8xbf16, #tpu.memory_space<vmem>>, vector<1x18x8xbf16>
    %3 = vector.shape_cast %2 : vector<1x18x8xbf16> to vector<18x8xbf16>
    %cst = arith.constant dense<0.000000e+00> : vector<256x8xf32>
    %4 = tpu.matmul %1, %3, %cst {dimension_numbers = #tpu.dot_dimension_numbers<[1], [0], [0], [1], [0, 0, 1, 1], [], []>} : vector<256x18xbf16>, vector<18x8xbf16>, vector<256x8xf32> -> vector<256x8xf32>
    %5 = vector.shape_cast %4 : vector<256x8xf32> to vector<16x16x8xf32>
    %c0_5 = arith.constant 0 : index
    %c0_6 = arith.constant 0 : index
    %c0_7 = arith.constant 0 : index
    %6 = vector.load %arg5[%c0_5, %c0_6, %c0_7] : memref<16x16x8xf32, #tpu.memory_space<vmem>>, vector<16x16x8xf32>
    tpu.vector_store %arg5[%c0_5, %c0_6, %c0_7], %5 {strides = array<i32>} : memref<16x16x8xf32, #tpu.memory_space<vmem>>, vector<16x16x8xf32>,
    %c0_8 = arith.constant 0 : index
    %c0_9 = arith.constant 0 : index
    %c0_10 = arith.constant 0 : index
    %7 = vector.load %arg5[%c0_8, %c0_9, %c0_10] : memref<16x16x8xf32, #tpu.memory_space<vmem>>, vector<16x16x8xf32>
    %c0_11 = arith.constant 0 : index
    %c1 = arith.constant 1 : index
    %c0_12 = arith.constant 0 : index
    %8 = vector.load %arg1[%c0_11, %c1, %c0_12] : memref<16x18x18xbf16, #tpu.memory_space<vmem>>, vector<16x16x18xbf16>
    %9 = vector.shape_cast %8 : vector<16x16x18xbf16> to vector<256x18xbf16>
    %c1_13 = arith.constant 1 : index
    %c0_14 = arith.constant 0 : index
    %c0_15 = arith.constant 0 : index
    %10 = vector.load %arg2[%c1_13, %c0_14, %c0_15] : memref<3x18x8xbf16, #tpu.memory_space<vmem>>, vector<1x18x8xbf16>
    %11 = vector.shape_cast %10 : vector<1x18x8xbf16> to vector<18x8xbf16>
    %cst_16 = arith.constant dense<0.000000e+00> : vector<256x8xf32>
    %12 = tpu.matmul %9, %11, %cst_16 {dimension_numbers = #tpu.dot_dimension_numbers<[1], [0], [0], [1], [0, 0, 1, 1], [], []>} : vector<256x18xbf16>, vector<18x8xbf16>, vector<256x8xf32> -> vector<256x8xf32>
    %13 = vector.shape_cast %12 : vector<256x8xf32> to vector<16x16x8xf32>
    %14 = arith.addf %7, %13 : vector<16x16x8xf32>
    %c0_17 = arith.constant 0 : index
    %c0_18 = arith.constant 0 : index
    %c0_19 = arith.constant 0 : index
    %15 = vector.load %arg5[%c0_17, %c0_18, %c0_19] : memref<16x16x8xf32, #tpu.memory_space<vmem>>, vector<16x16x8xf32>
    tpu.vector_store %arg5[%c0_17, %c0_18, %c0_19], %14 {strides = array<i32>} : memref<16x16x8xf32, #tpu.memory_space<vmem>>, vector<16x16x8xf32>,
    %c0_20 = arith.constant 0 : index
    %c0_21 = arith.constant 0 : index
    %c0_22 = arith.constant 0 : index
    %16 = vector.load %arg5[%c0_20, %c0_21, %c0_22] : memref<16x16x8xf32, #tpu.memory_space<vmem>>, vector<16x16x8xf32>
    %c0_23 = arith.constant 0 : index
    %c2 = arith.constant 2 : index
    %c0_24 = arith.constant 0 : index
    %17 = vector.load %arg1[%c0_23, %c2, %c0_24] : memref<16x18x18xbf16, #tpu.memory_space<vmem>>, vector<16x16x18xbf16>
    %18 = vector.shape_cast %17 : vector<16x16x18xbf16> to vector<256x18xbf16>
    %c2_25 = arith.constant 2 : index
    %c0_26 = arith.constant 0 : index
    %c0_27 = arith.constant 0 : index
    %19 = vector.load %arg2[%c2_25, %c0_26, %c0_27] : memref<3x18x8xbf16, #tpu.memory_space<vmem>>, vector<1x18x8xbf16>
    %20 = vector.shape_cast %19 : vector<1x18x8xbf16> to vector<18x8xbf16>
    %cst_28 = arith.constant dense<0.000000e+00> : vector<256x8xf32>
    %21 = tpu.matmul %18, %20, %cst_28 {dimension_numbers = #tpu.dot_dimension_numbers<[1], [0], [0], [1], [0, 0, 1, 1], [], []>} : vector<256x18xbf16>, vector<18x8xbf16>, vector<256x8xf32> -> vector<256x8xf32>
    %22 = vector.shape_cast %21 : vector<256x8xf32> to vector<16x16x8xf32>
    %23 = arith.addf %16, %22 : vector<16x16x8xf32>
    %c0_29 = arith.constant 0 : index
    %c0_30 = arith.constant 0 : index
    %c0_31 = arith.constant 0 : index
    %24 = vector.load %arg5[%c0_29, %c0_30, %c0_31] : memref<16x16x8xf32, #tpu.memory_space<vmem>>, vector<16x16x8xf32>
    tpu.vector_store %arg5[%c0_29, %c0_30, %c0_31], %23 {strides = array<i32>} : memref<16x16x8xf32, #tpu.memory_space<vmem>>, vector<16x16x8xf32>,
    %c0_32 = arith.constant 0 : index
    %c0_33 = arith.constant 0 : index
    %c0_34 = arith.constant 0 : index
    %25 = vector.load %arg5[%c0_32, %c0_33, %c0_34] : memref<16x16x8xf32, #tpu.memory_space<vmem>>, vector<16x16x8xf32>
    %26 = vector.extract_strided_slice %25 {offsets = [0, 0, 0], sizes = [16, 1, 8], strides = [1, 1, 1]} : vector<16x16x8xf32> to vector<16x1x8xf32>
    %27 = vector.shape_cast %26 : vector<16x1x8xf32> to vector<16x8xf32>
    %28 = arith.truncf %27 : vector<16x8xf32> to vector<16x8xbf16>
    %c0_35 = arith.constant 0 : index
    %c0_36 = arith.constant 0 : index
    %29 = vector.load %arg3[%c0_35, %c0_36] : memref<16x128xbf16, #tpu.memory_space<vmem>>, vector<16x8xbf16>
    tpu.vector_store %arg3[%c0_35, %c0_36], %28 {strides = array<i32>} : memref<16x128xbf16, #tpu.memory_space<vmem>>, vector<16x8xbf16>,
    %30 = vector.extract_strided_slice %25 {offsets = [0, 1, 0], sizes = [16, 1, 8], strides = [1, 1, 1]} : vector<16x16x8xf32> to vector<16x1x8xf32>
    %31 = vector.shape_cast %30 : vector<16x1x8xf32> to vector<16x8xf32>
    %32 = arith.truncf %31 : vector<16x8xf32> to vector<16x8xbf16>
    %c0_37 = arith.constant 0 : index
    %c8 = arith.constant 8 : index
    %33 = vector.load %arg3[%c0_37, %c8] : memref<16x128xbf16, #tpu.memory_space<vmem>>, vector<16x8xbf16>
    tpu.vector_store %arg3[%c0_37, %c8], %32 {strides = array<i32>} : memref<16x128xbf16, #tpu.memory_space<vmem>>, vector<16x8xbf16>,
    %34 = vector.extract_strided_slice %25 {offsets = [0, 2, 0], sizes = [16, 1, 8], strides = [1, 1, 1]} : vector<16x16x8xf32> to vector<16x1x8xf32>
    %35 = vector.shape_cast %34 : vector<16x1x8xf32> to vector<16x8xf32>
    %36 = arith.truncf %35 : vector<16x8xf32> to vector<16x8xbf16>
    %c0_38 = arith.constant 0 : index
    %c16 = arith.constant 16 : index
    %37 = vector.load %arg3[%c0_38, %c16] : memref<16x128xbf16, #tpu.memory_space<vmem>>, vector<16x8xbf16>
    tpu.vector_store %arg3[%c0_38, %c16], %36 {strides = array<i32>} : memref<16x128xbf16, #tpu.memory_space<vmem>>, vector<16x8xbf16>,
    %38 = vector.extract_strided_slice %25 {offsets = [0, 3, 0], sizes = [16, 1, 8], strides = [1, 1, 1]} : vector<16x16x8xf32> to vector<16x1x8xf32>
    %39 = vector.shape_cast %38 : vector<16x1x8xf32> to vector<16x8xf32>
    %40 = arith.truncf %39 : vector<16x8xf32> to vector<16x8xbf16>
    %c0_39 = arith.constant 0 : index
    %c24 = arith.constant 24 : index
    %41 = vector.load %arg3[%c0_39, %c24] : memref<16x128xbf16, #tpu.memory_space<vmem>>, vector<16x8xbf16>
    tpu.vector_store %arg3[%c0_39, %c24], %40 {strides = array<i32>} : memref<16x128xbf16, #tpu.memory_space<vmem>>, vector<16x8xbf16>,
    %42 = vector.extract_strided_slice %25 {offsets = [0, 4, 0], sizes = [16, 1, 8], strides = [1, 1, 1]} : vector<16x16x8xf32> to vector<16x1x8xf32>
    %43 = vector.shape_cast %42 : vector<16x1x8xf32> to vector<16x8xf32>
    %44 = arith.truncf %43 : vector<16x8xf32> to vector<16x8xbf16>
    %c0_40 = arith.constant 0 : index
    %c32 = arith.constant 32 : index
    %45 = vector.load %arg3[%c0_40, %c32] : memref<16x128xbf16, #tpu.memory_space<vmem>>, vector<16x8xbf16>
    tpu.vector_store %arg3[%c0_40, %c32], %44 {strides = array<i32>} : memref<16x128xbf16, #tpu.memory_space<vmem>>, vector<16x8xbf16>,
    %46 = vector.extract_strided_slice %25 {offsets = [0, 5, 0], sizes = [16, 1, 8], strides = [1, 1, 1]} : vector<16x16x8xf32> to vector<16x1x8xf32>
    %47 = vector.shape_cast %46 : vector<16x1x8xf32> to vector<16x8xf32>
    %48 = arith.truncf %47 : vector<16x8xf32> to vector<16x8xbf16>
    %c0_41 = arith.constant 0 : index
    %c40 = arith.constant 40 : index
    %49 = vector.load %arg3[%c0_41, %c40] : memref<16x128xbf16, #tpu.memory_space<vmem>>, vector<16x8xbf16>
    tpu.vector_store %arg3[%c0_41, %c40], %48 {strides = array<i32>} : memref<16x128xbf16, #tpu.memory_space<vmem>>, vector<16x8xbf16>,
    %50 = vector.extract_strided_slice %25 {offsets = [0, 6, 0], sizes = [16, 1, 8], strides = [1, 1, 1]} : vector<16x16x8xf32> to vector<16x1x8xf32>
    %51 = vector.shape_cast %50 : vector<16x1x8xf32> to vector<16x8xf32>
    %52 = arith.truncf %51 : vector<16x8xf32> to vector<16x8xbf16>
    %c0_42 = arith.constant 0 : index
    %c48 = arith.constant 48 : index
    %53 = vector.load %arg3[%c0_42, %c48] : memref<16x128xbf16, #tpu.memory_space<vmem>>, vector<16x8xbf16>
    tpu.vector_store %arg3[%c0_42, %c48], %52 {strides = array<i32>} : memref<16x128xbf16, #tpu.memory_space<vmem>>, vector<16x8xbf16>,
    %54 = vector.extract_strided_slice %25 {offsets = [0, 7, 0], sizes = [16, 1, 8], strides = [1, 1, 1]} : vector<16x16x8xf32> to vector<16x1x8xf32>
    %55 = vector.shape_cast %54 : vector<16x1x8xf32> to vector<16x8xf32>
    %56 = arith.truncf %55 : vector<16x8xf32> to vector<16x8xbf16>
    %c0_43 = arith.constant 0 : index
    %c56 = arith.constant 56 : index
    %57 = vector.load %arg3[%c0_43, %c56] : memref<16x128xbf16, #tpu.memory_space<vmem>>, vector<16x8xbf16>
    tpu.vector_store %arg3[%c0_43, %c56], %56 {strides = array<i32>} : memref<16x128xbf16, #tpu.memory_space<vmem>>, vector<16x8xbf16>,
    %58 = vector.extract_strided_slice %25 {offsets = [0, 8, 0], sizes = [16, 1, 8], strides = [1, 1, 1]} : vector<16x16x8xf32> to vector<16x1x8xf32>
    %59 = vector.shape_cast %58 : vector<16x1x8xf32> to vector<16x8xf32>
    %60 = arith.truncf %59 : vector<16x8xf32> to vector<16x8xbf16>
    %c0_44 = arith.constant 0 : index
    %c64 = arith.constant 64 : index
    %61 = vector.load %arg3[%c0_44, %c64] : memref<16x128xbf16, #tpu.memory_space<vmem>>, vector<16x8xbf16>
    tpu.vector_store %arg3[%c0_44, %c64], %60 {strides = array<i32>} : memref<16x128xbf16, #tpu.memory_space<vmem>>, vector<16x8xbf16>,
    %62 = vector.extract_strided_slice %25 {offsets = [0, 9, 0], sizes = [16, 1, 8], strides = [1, 1, 1]} : vector<16x16x8xf32> to vector<16x1x8xf32>
    %63 = vector.shape_cast %62 : vector<16x1x8xf32> to vector<16x8xf32>
    %64 = arith.truncf %63 : vector<16x8xf32> to vector<16x8xbf16>
    %c0_45 = arith.constant 0 : index
    %c72 = arith.constant 72 : index
    %65 = vector.load %arg3[%c0_45, %c72] : memref<16x128xbf16, #tpu.memory_space<vmem>>, vector<16x8xbf16>
    tpu.vector_store %arg3[%c0_45, %c72], %64 {strides = array<i32>} : memref<16x128xbf16, #tpu.memory_space<vmem>>, vector<16x8xbf16>,
    %66 = vector.extract_strided_slice %25 {offsets = [0, 10, 0], sizes = [16, 1, 8], strides = [1, 1, 1]} : vector<16x16x8xf32> to vector<16x1x8xf32>
    %67 = vector.shape_cast %66 : vector<16x1x8xf32> to vector<16x8xf32>
    %68 = arith.truncf %67 : vector<16x8xf32> to vector<16x8xbf16>
    %c0_46 = arith.constant 0 : index
    %c80 = arith.constant 80 : index
    %69 = vector.load %arg3[%c0_46, %c80] : memref<16x128xbf16, #tpu.memory_space<vmem>>, vector<16x8xbf16>
    tpu.vector_store %arg3[%c0_46, %c80], %68 {strides = array<i32>} : memref<16x128xbf16, #tpu.memory_space<vmem>>, vector<16x8xbf16>,
    %70 = vector.extract_strided_slice %25 {offsets = [0, 11, 0], sizes = [16, 1, 8], strides = [1, 1, 1]} : vector<16x16x8xf32> to vector<16x1x8xf32>
    %71 = vector.shape_cast %70 : vector<16x1x8xf32> to vector<16x8xf32>
    %72 = arith.truncf %71 : vector<16x8xf32> to vector<16x8xbf16>
    %c0_47 = arith.constant 0 : index
    %c88 = arith.constant 88 : index
    %73 = vector.load %arg3[%c0_47, %c88] : memref<16x128xbf16, #tpu.memory_space<vmem>>, vector<16x8xbf16>
    tpu.vector_store %arg3[%c0_47, %c88], %72 {strides = array<i32>} : memref<16x128xbf16, #tpu.memory_space<vmem>>, vector<16x8xbf16>,
    %74 = vector.extract_strided_slice %25 {offsets = [0, 12, 0], sizes = [16, 1, 8], strides = [1, 1, 1]} : vector<16x16x8xf32> to vector<16x1x8xf32>
    %75 = vector.shape_cast %74 : vector<16x1x8xf32> to vector<16x8xf32>
    %76 = arith.truncf %75 : vector<16x8xf32> to vector<16x8xbf16>
    %c0_48 = arith.constant 0 : index
    %c96 = arith.constant 96 : index
    %77 = vector.load %arg3[%c0_48, %c96] : memref<16x128xbf16, #tpu.memory_space<vmem>>, vector<16x8xbf16>
    tpu.vector_store %arg3[%c0_48, %c96], %76 {strides = array<i32>} : memref<16x128xbf16, #tpu.memory_space<vmem>>, vector<16x8xbf16>,
    %78 = vector.extract_strided_slice %25 {offsets = [0, 13, 0], sizes = [16, 1, 8], strides = [1, 1, 1]} : vector<16x16x8xf32> to vector<16x1x8xf32>
    %79 = vector.shape_cast %78 : vector<16x1x8xf32> to vector<16x8xf32>
    %80 = arith.truncf %79 : vector<16x8xf32> to vector<16x8xbf16>
    %c0_49 = arith.constant 0 : index
    %c104 = arith.constant 104 : index
    %81 = vector.load %arg3[%c0_49, %c104] : memref<16x128xbf16, #tpu.memory_space<vmem>>, vector<16x8xbf16>
    tpu.vector_store %arg3[%c0_49, %c104], %80 {strides = array<i32>} : memref<16x128xbf16, #tpu.memory_space<vmem>>, vector<16x8xbf16>,
    %82 = vector.extract_strided_slice %25 {offsets = [0, 14, 0], sizes = [16, 1, 8], strides = [1, 1, 1]} : vector<16x16x8xf32> to vector<16x1x8xf32>
    %83 = vector.shape_cast %82 : vector<16x1x8xf32> to vector<16x8xf32>
    %84 = arith.truncf %83 : vector<16x8xf32> to vector<16x8xbf16>
    %c0_50 = arith.constant 0 : index
    %c112 = arith.constant 112 : index
    %85 = vector.load %arg3[%c0_50, %c112] : memref<16x128xbf16, #tpu.memory_space<vmem>>, vector<16x8xbf16>
    tpu.vector_store %arg3[%c0_50, %c112], %84 {strides = array<i32>} : memref<16x128xbf16, #tpu.memory_space<vmem>>, vector<16x8xbf16>,
    %86 = vector.extract_strided_slice %25 {offsets = [0, 15, 0], sizes = [16, 1, 8], strides = [1, 1, 1]} : vector<16x16x8xf32> to vector<16x1x8xf32>
    %87 = vector.shape_cast %86 : vector<16x1x8xf32> to vector<16x8xf32>
    %88 = arith.truncf %87 : vector<16x8xf32> to vector<16x8xbf16>
    %c0_51 = arith.constant 0 : index
    %c120 = arith.constant 120 : index
    %89 = vector.load %arg3[%c0_51, %c120] : memref<16x128xbf16, #tpu.memory_space<vmem>>, vector<16x8xbf16>
    tpu.vector_store %arg3[%c0_51, %c120], %88 {strides = array<i32>} : memref<16x128xbf16, #tpu.memory_space<vmem>>, vector<16x8xbf16>,
    %90 = vector.shape_cast %25 : vector<16x16x8xf32> to vector<256x8xf32>
    %cst_52 = arith.constant dense<0.000000e+00> : vector<8xf32>
    %91 = vector.multi_reduction <add>, %90, %cst_52 [0] : vector<256x8xf32> to vector<8xf32>
    %92 = vector.shape_cast %91 : vector<8xf32> to vector<1x8xf32>
    %93 = arith.mulf %90, %90 : vector<256x8xf32>
    %cst_53 = arith.constant dense<0.000000e+00> : vector<8xf32>
    %94 = vector.multi_reduction <add>, %93, %cst_53 [0] : vector<256x8xf32> to vector<8xf32>
    %95 = vector.shape_cast %94 : vector<8xf32> to vector<1x8xf32>
    %96 = tpu.iota {dimensions = array<i32: 0>} : vector<8x8xi32>
    %c0_i32 = arith.constant 0 : i32
    %97 = vector.broadcast %c0_i32 : i32 to vector<8x8xi32>
    %98 = arith.cmpi eq, %96, %97 : vector<8x8xi32>
    %c1_i32 = arith.constant 1 : i32
    %99 = vector.broadcast %c1_i32 : i32 to vector<8x8xi32>
    %100 = arith.cmpi eq, %96, %99 : vector<8x8xi32>
    %cst_54 = arith.constant 0.000000e+00 : f32
    %101 = vector.shape_cast %95 : vector<1x8xf32> to vector<1x8xf32>
    %102 = vector.broadcast %101 : vector<1x8xf32> to vector<8x8xf32>
    %103 = vector.broadcast %cst_54 : f32 to vector<8x8xf32>
    %104 = arith.select %100, %102, %103 : vector<8x8xi1>, vector<8x8xf32>
    %105 = vector.shape_cast %92 : vector<1x8xf32> to vector<1x8xf32>
    %106 = vector.broadcast %105 : vector<1x8xf32> to vector<8x8xf32>
    %107 = arith.select %98, %106, %104 : vector<8x8xi1>, vector<8x8xf32>
    %c0_55 = arith.constant 0 : index
    %c0_56 = arith.constant 0 : index
    %108 = vector.load %arg4[%c0_55, %c0_56] : memref<8x8xf32, #tpu.memory_space<vmem>>, vector<8x8xf32>
    tpu.vector_store %arg4[%c0_55, %c0_56], %107 {strides = array<i32>} : memref<8x8xf32, #tpu.memory_space<vmem>>, vector<8x8xf32>,
    return
  }
  func.func @transform_0(%arg0: i32) -> (i32, i32, i32) {
    %c0_i32 = arith.constant 0 : i32
    %c0_i32_0 = arith.constant 0 : i32
    %c0_i32_1 = arith.constant 0 : i32
    return %arg0, %c0_i32, %c0_i32_0 : i32, i32, i32
  }
  func.func @transform_1(%arg0: i32) -> (i32, i32, i32) {
    %c0_i32 = arith.constant 0 : i32
    %c0_i32_0 = arith.constant 0 : i32
    %c0_i32_1 = arith.constant 0 : i32
    %c0_i32_2 = arith.constant 0 : i32
    return %c0_i32, %c0_i32_0, %c0_i32_1 : i32, i32, i32
  }
  func.func @transform_2(%arg0: i32) -> (i32, i32) {
    %c0_i32 = arith.constant 0 : i32
    %c0_i32_0 = arith.constant 0 : i32
    return %arg0, %c0_i32 : i32, i32
  }
  func.func @transform_3(%arg0: i32) -> (i32, i32) {
    %c0_i32 = arith.constant 0 : i32
    %c0_i32_0 = arith.constant 0 : i32
    return %arg0, %c0_i32 : i32, i32
  }
}

module attributes {stable_mosaic.version = 11 : i64} {
  func.func @_conv_stats_kernel(%arg0: i32, %arg1: memref<16x18x30xbf16, #tpu.memory_space<vmem>>, %arg2: memref<3x30x8xbf16, #tpu.memory_space<vmem>>, %arg3: memref<16x128xbf16, #tpu.memory_space<vmem>>, %arg4: memref<8x8xf32, #tpu.memory_space<vmem>>, %arg5: memref<16x16x8xf32, #tpu.memory_space<vmem>>) attributes {dimension_semantics = [#tpu.dimension_semantics<parallel>], iteration_bounds = array<i64: 2>, scalar_prefetch = 0 : i64, scratch_operands = 1 : i64, tpu.core_type = #tpu.core_type<tc>, window_params = [{transform_indices = @transform_0, window_bounds = array<i64: 16, 18, 30>}, {pipeline_mode = #tpu.pipeline_mode<synchronous>, transform_indices = @transform_1, window_bounds = array<i64: 3, 30, 8>}, {transform_indices = @transform_2, window_bounds = array<i64: 16, 128>}, {transform_indices = @transform_3, window_bounds = array<i64: 8, 8>}]} {
    %c0 = arith.constant 0 : index
    %c0_0 = arith.constant 0 : index
    %c0_1 = arith.constant 0 : index
    %0 = vector.load %arg1[%c0, %c0_0, %c0_1] : memref<16x18x30xbf16, #tpu.memory_space<vmem>>, vector<16x16x30xbf16>
    %1 = vector.shape_cast %0 : vector<16x16x30xbf16> to vector<256x30xbf16>
    %c0_2 = arith.constant 0 : index
    %c0_3 = arith.constant 0 : index
    %c0_4 = arith.constant 0 : index
    %2 = vector.load %arg2[%c0_2, %c0_3, %c0_4] : memref<3x30x8xbf16, #tpu.memory_space<vmem>>, vector<1x30x8xbf16>
    %3 = vector.shape_cast %2 : vector<1x30x8xbf16> to vector<30x8xbf16>
    %cst = arith.constant dense<0.000000e+00> : vector<256x8xf32>
    %4 = tpu.matmul %1, %3, %cst {dimension_numbers = #tpu.dot_dimension_numbers<[1], [0], [0], [1], [0, 0, 1, 1], [], []>} : vector<256x30xbf16>, vector<30x8xbf16>, vector<256x8xf32> -> vector<256x8xf32>
    %5 = vector.shape_cast %4 : vector<256x8xf32> to vector<16x16x8xf32>
    %c0_5 = arith.constant 0 : index
    %c0_6 = arith.constant 0 : index
    %c0_7 = arith.constant 0 : index
    %6 = vector.load %arg5[%c0_5, %c0_6, %c0_7] : memref<16x16x8xf32, #tpu.memory_space<vmem>>, vector<16x16x8xf32>
    tpu.vector_store %arg5[%c0_5, %c0_6, %c0_7], %5 {strides = array<i32>} : memref<16x16x8xf32, #tpu.memory_space<vmem>>, vector<16x16x8xf32>,
    %c0_8 = arith.constant 0 : index
    %c0_9 = arith.constant 0 : index
    %c0_10 = arith.constant 0 : index
    %7 = vector.load %arg5[%c0_8, %c0_9, %c0_10] : memref<16x16x8xf32, #tpu.memory_space<vmem>>, vector<16x16x8xf32>
    %c0_11 = arith.constant 0 : index
    %c1 = arith.constant 1 : index
    %c0_12 = arith.constant 0 : index
    %8 = vector.load %arg1[%c0_11, %c1, %c0_12] : memref<16x18x30xbf16, #tpu.memory_space<vmem>>, vector<16x16x30xbf16>
    %9 = vector.shape_cast %8 : vector<16x16x30xbf16> to vector<256x30xbf16>
    %c1_13 = arith.constant 1 : index
    %c0_14 = arith.constant 0 : index
    %c0_15 = arith.constant 0 : index
    %10 = vector.load %arg2[%c1_13, %c0_14, %c0_15] : memref<3x30x8xbf16, #tpu.memory_space<vmem>>, vector<1x30x8xbf16>
    %11 = vector.shape_cast %10 : vector<1x30x8xbf16> to vector<30x8xbf16>
    %cst_16 = arith.constant dense<0.000000e+00> : vector<256x8xf32>
    %12 = tpu.matmul %9, %11, %cst_16 {dimension_numbers = #tpu.dot_dimension_numbers<[1], [0], [0], [1], [0, 0, 1, 1], [], []>} : vector<256x30xbf16>, vector<30x8xbf16>, vector<256x8xf32> -> vector<256x8xf32>
    %13 = vector.shape_cast %12 : vector<256x8xf32> to vector<16x16x8xf32>
    %14 = arith.addf %7, %13 : vector<16x16x8xf32>
    %c0_17 = arith.constant 0 : index
    %c0_18 = arith.constant 0 : index
    %c0_19 = arith.constant 0 : index
    %15 = vector.load %arg5[%c0_17, %c0_18, %c0_19] : memref<16x16x8xf32, #tpu.memory_space<vmem>>, vector<16x16x8xf32>
    tpu.vector_store %arg5[%c0_17, %c0_18, %c0_19], %14 {strides = array<i32>} : memref<16x16x8xf32, #tpu.memory_space<vmem>>, vector<16x16x8xf32>,
    %c0_20 = arith.constant 0 : index
    %c0_21 = arith.constant 0 : index
    %c0_22 = arith.constant 0 : index
    %16 = vector.load %arg5[%c0_20, %c0_21, %c0_22] : memref<16x16x8xf32, #tpu.memory_space<vmem>>, vector<16x16x8xf32>
    %c0_23 = arith.constant 0 : index
    %c2 = arith.constant 2 : index
    %c0_24 = arith.constant 0 : index
    %17 = vector.load %arg1[%c0_23, %c2, %c0_24] : memref<16x18x30xbf16, #tpu.memory_space<vmem>>, vector<16x16x30xbf16>
    %18 = vector.shape_cast %17 : vector<16x16x30xbf16> to vector<256x30xbf16>
    %c2_25 = arith.constant 2 : index
    %c0_26 = arith.constant 0 : index
    %c0_27 = arith.constant 0 : index
    %19 = vector.load %arg2[%c2_25, %c0_26, %c0_27] : memref<3x30x8xbf16, #tpu.memory_space<vmem>>, vector<1x30x8xbf16>
    %20 = vector.shape_cast %19 : vector<1x30x8xbf16> to vector<30x8xbf16>
    %cst_28 = arith.constant dense<0.000000e+00> : vector<256x8xf32>
    %21 = tpu.matmul %18, %20, %cst_28 {dimension_numbers = #tpu.dot_dimension_numbers<[1], [0], [0], [1], [0, 0, 1, 1], [], []>} : vector<256x30xbf16>, vector<30x8xbf16>, vector<256x8xf32> -> vector<256x8xf32>
    %22 = vector.shape_cast %21 : vector<256x8xf32> to vector<16x16x8xf32>
    %23 = arith.addf %16, %22 : vector<16x16x8xf32>
    %c0_29 = arith.constant 0 : index
    %c0_30 = arith.constant 0 : index
    %c0_31 = arith.constant 0 : index
    %24 = vector.load %arg5[%c0_29, %c0_30, %c0_31] : memref<16x16x8xf32, #tpu.memory_space<vmem>>, vector<16x16x8xf32>
    tpu.vector_store %arg5[%c0_29, %c0_30, %c0_31], %23 {strides = array<i32>} : memref<16x16x8xf32, #tpu.memory_space<vmem>>, vector<16x16x8xf32>,
    %c0_32 = arith.constant 0 : index
    %c0_33 = arith.constant 0 : index
    %c0_34 = arith.constant 0 : index
    %25 = vector.load %arg5[%c0_32, %c0_33, %c0_34] : memref<16x16x8xf32, #tpu.memory_space<vmem>>, vector<16x16x8xf32>
    %26 = vector.extract_strided_slice %25 {offsets = [0, 0, 0], sizes = [16, 1, 8], strides = [1, 1, 1]} : vector<16x16x8xf32> to vector<16x1x8xf32>
    %27 = vector.shape_cast %26 : vector<16x1x8xf32> to vector<16x8xf32>
    %28 = arith.truncf %27 : vector<16x8xf32> to vector<16x8xbf16>
    %c0_35 = arith.constant 0 : index
    %c0_36 = arith.constant 0 : index
    %29 = vector.load %arg3[%c0_35, %c0_36] : memref<16x128xbf16, #tpu.memory_space<vmem>>, vector<16x8xbf16>
    tpu.vector_store %arg3[%c0_35, %c0_36], %28 {strides = array<i32>} : memref<16x128xbf16, #tpu.memory_space<vmem>>, vector<16x8xbf16>,
    %30 = vector.extract_strided_slice %25 {offsets = [0, 1, 0], sizes = [16, 1, 8], strides = [1, 1, 1]} : vector<16x16x8xf32> to vector<16x1x8xf32>
    %31 = vector.shape_cast %30 : vector<16x1x8xf32> to vector<16x8xf32>
    %32 = arith.truncf %31 : vector<16x8xf32> to vector<16x8xbf16>
    %c0_37 = arith.constant 0 : index
    %c8 = arith.constant 8 : index
    %33 = vector.load %arg3[%c0_37, %c8] : memref<16x128xbf16, #tpu.memory_space<vmem>>, vector<16x8xbf16>
    tpu.vector_store %arg3[%c0_37, %c8], %32 {strides = array<i32>} : memref<16x128xbf16, #tpu.memory_space<vmem>>, vector<16x8xbf16>,
    %34 = vector.extract_strided_slice %25 {offsets = [0, 2, 0], sizes = [16, 1, 8], strides = [1, 1, 1]} : vector<16x16x8xf32> to vector<16x1x8xf32>
    %35 = vector.shape_cast %34 : vector<16x1x8xf32> to vector<16x8xf32>
    %36 = arith.truncf %35 : vector<16x8xf32> to vector<16x8xbf16>
    %c0_38 = arith.constant 0 : index
    %c16 = arith.constant 16 : index
    %37 = vector.load %arg3[%c0_38, %c16] : memref<16x128xbf16, #tpu.memory_space<vmem>>, vector<16x8xbf16>
    tpu.vector_store %arg3[%c0_38, %c16], %36 {strides = array<i32>} : memref<16x128xbf16, #tpu.memory_space<vmem>>, vector<16x8xbf16>,
    %38 = vector.extract_strided_slice %25 {offsets = [0, 3, 0], sizes = [16, 1, 8], strides = [1, 1, 1]} : vector<16x16x8xf32> to vector<16x1x8xf32>
    %39 = vector.shape_cast %38 : vector<16x1x8xf32> to vector<16x8xf32>
    %40 = arith.truncf %39 : vector<16x8xf32> to vector<16x8xbf16>
    %c0_39 = arith.constant 0 : index
    %c24 = arith.constant 24 : index
    %41 = vector.load %arg3[%c0_39, %c24] : memref<16x128xbf16, #tpu.memory_space<vmem>>, vector<16x8xbf16>
    tpu.vector_store %arg3[%c0_39, %c24], %40 {strides = array<i32>} : memref<16x128xbf16, #tpu.memory_space<vmem>>, vector<16x8xbf16>,
    %42 = vector.extract_strided_slice %25 {offsets = [0, 4, 0], sizes = [16, 1, 8], strides = [1, 1, 1]} : vector<16x16x8xf32> to vector<16x1x8xf32>
    %43 = vector.shape_cast %42 : vector<16x1x8xf32> to vector<16x8xf32>
    %44 = arith.truncf %43 : vector<16x8xf32> to vector<16x8xbf16>
    %c0_40 = arith.constant 0 : index
    %c32 = arith.constant 32 : index
    %45 = vector.load %arg3[%c0_40, %c32] : memref<16x128xbf16, #tpu.memory_space<vmem>>, vector<16x8xbf16>
    tpu.vector_store %arg3[%c0_40, %c32], %44 {strides = array<i32>} : memref<16x128xbf16, #tpu.memory_space<vmem>>, vector<16x8xbf16>,
    %46 = vector.extract_strided_slice %25 {offsets = [0, 5, 0], sizes = [16, 1, 8], strides = [1, 1, 1]} : vector<16x16x8xf32> to vector<16x1x8xf32>
    %47 = vector.shape_cast %46 : vector<16x1x8xf32> to vector<16x8xf32>
    %48 = arith.truncf %47 : vector<16x8xf32> to vector<16x8xbf16>
    %c0_41 = arith.constant 0 : index
    %c40 = arith.constant 40 : index
    %49 = vector.load %arg3[%c0_41, %c40] : memref<16x128xbf16, #tpu.memory_space<vmem>>, vector<16x8xbf16>
    tpu.vector_store %arg3[%c0_41, %c40], %48 {strides = array<i32>} : memref<16x128xbf16, #tpu.memory_space<vmem>>, vector<16x8xbf16>,
    %50 = vector.extract_strided_slice %25 {offsets = [0, 6, 0], sizes = [16, 1, 8], strides = [1, 1, 1]} : vector<16x16x8xf32> to vector<16x1x8xf32>
    %51 = vector.shape_cast %50 : vector<16x1x8xf32> to vector<16x8xf32>
    %52 = arith.truncf %51 : vector<16x8xf32> to vector<16x8xbf16>
    %c0_42 = arith.constant 0 : index
    %c48 = arith.constant 48 : index
    %53 = vector.load %arg3[%c0_42, %c48] : memref<16x128xbf16, #tpu.memory_space<vmem>>, vector<16x8xbf16>
    tpu.vector_store %arg3[%c0_42, %c48], %52 {strides = array<i32>} : memref<16x128xbf16, #tpu.memory_space<vmem>>, vector<16x8xbf16>,
    %54 = vector.extract_strided_slice %25 {offsets = [0, 7, 0], sizes = [16, 1, 8], strides = [1, 1, 1]} : vector<16x16x8xf32> to vector<16x1x8xf32>
    %55 = vector.shape_cast %54 : vector<16x1x8xf32> to vector<16x8xf32>
    %56 = arith.truncf %55 : vector<16x8xf32> to vector<16x8xbf16>
    %c0_43 = arith.constant 0 : index
    %c56 = arith.constant 56 : index
    %57 = vector.load %arg3[%c0_43, %c56] : memref<16x128xbf16, #tpu.memory_space<vmem>>, vector<16x8xbf16>
    tpu.vector_store %arg3[%c0_43, %c56], %56 {strides = array<i32>} : memref<16x128xbf16, #tpu.memory_space<vmem>>, vector<16x8xbf16>,
    %58 = vector.extract_strided_slice %25 {offsets = [0, 8, 0], sizes = [16, 1, 8], strides = [1, 1, 1]} : vector<16x16x8xf32> to vector<16x1x8xf32>
    %59 = vector.shape_cast %58 : vector<16x1x8xf32> to vector<16x8xf32>
    %60 = arith.truncf %59 : vector<16x8xf32> to vector<16x8xbf16>
    %c0_44 = arith.constant 0 : index
    %c64 = arith.constant 64 : index
    %61 = vector.load %arg3[%c0_44, %c64] : memref<16x128xbf16, #tpu.memory_space<vmem>>, vector<16x8xbf16>
    tpu.vector_store %arg3[%c0_44, %c64], %60 {strides = array<i32>} : memref<16x128xbf16, #tpu.memory_space<vmem>>, vector<16x8xbf16>,
    %62 = vector.extract_strided_slice %25 {offsets = [0, 9, 0], sizes = [16, 1, 8], strides = [1, 1, 1]} : vector<16x16x8xf32> to vector<16x1x8xf32>
    %63 = vector.shape_cast %62 : vector<16x1x8xf32> to vector<16x8xf32>
    %64 = arith.truncf %63 : vector<16x8xf32> to vector<16x8xbf16>
    %c0_45 = arith.constant 0 : index
    %c72 = arith.constant 72 : index
    %65 = vector.load %arg3[%c0_45, %c72] : memref<16x128xbf16, #tpu.memory_space<vmem>>, vector<16x8xbf16>
    tpu.vector_store %arg3[%c0_45, %c72], %64 {strides = array<i32>} : memref<16x128xbf16, #tpu.memory_space<vmem>>, vector<16x8xbf16>,
    %66 = vector.extract_strided_slice %25 {offsets = [0, 10, 0], sizes = [16, 1, 8], strides = [1, 1, 1]} : vector<16x16x8xf32> to vector<16x1x8xf32>
    %67 = vector.shape_cast %66 : vector<16x1x8xf32> to vector<16x8xf32>
    %68 = arith.truncf %67 : vector<16x8xf32> to vector<16x8xbf16>
    %c0_46 = arith.constant 0 : index
    %c80 = arith.constant 80 : index
    %69 = vector.load %arg3[%c0_46, %c80] : memref<16x128xbf16, #tpu.memory_space<vmem>>, vector<16x8xbf16>
    tpu.vector_store %arg3[%c0_46, %c80], %68 {strides = array<i32>} : memref<16x128xbf16, #tpu.memory_space<vmem>>, vector<16x8xbf16>,
    %70 = vector.extract_strided_slice %25 {offsets = [0, 11, 0], sizes = [16, 1, 8], strides = [1, 1, 1]} : vector<16x16x8xf32> to vector<16x1x8xf32>
    %71 = vector.shape_cast %70 : vector<16x1x8xf32> to vector<16x8xf32>
    %72 = arith.truncf %71 : vector<16x8xf32> to vector<16x8xbf16>
    %c0_47 = arith.constant 0 : index
    %c88 = arith.constant 88 : index
    %73 = vector.load %arg3[%c0_47, %c88] : memref<16x128xbf16, #tpu.memory_space<vmem>>, vector<16x8xbf16>
    tpu.vector_store %arg3[%c0_47, %c88], %72 {strides = array<i32>} : memref<16x128xbf16, #tpu.memory_space<vmem>>, vector<16x8xbf16>,
    %74 = vector.extract_strided_slice %25 {offsets = [0, 12, 0], sizes = [16, 1, 8], strides = [1, 1, 1]} : vector<16x16x8xf32> to vector<16x1x8xf32>
    %75 = vector.shape_cast %74 : vector<16x1x8xf32> to vector<16x8xf32>
    %76 = arith.truncf %75 : vector<16x8xf32> to vector<16x8xbf16>
    %c0_48 = arith.constant 0 : index
    %c96 = arith.constant 96 : index
    %77 = vector.load %arg3[%c0_48, %c96] : memref<16x128xbf16, #tpu.memory_space<vmem>>, vector<16x8xbf16>
    tpu.vector_store %arg3[%c0_48, %c96], %76 {strides = array<i32>} : memref<16x128xbf16, #tpu.memory_space<vmem>>, vector<16x8xbf16>,
    %78 = vector.extract_strided_slice %25 {offsets = [0, 13, 0], sizes = [16, 1, 8], strides = [1, 1, 1]} : vector<16x16x8xf32> to vector<16x1x8xf32>
    %79 = vector.shape_cast %78 : vector<16x1x8xf32> to vector<16x8xf32>
    %80 = arith.truncf %79 : vector<16x8xf32> to vector<16x8xbf16>
    %c0_49 = arith.constant 0 : index
    %c104 = arith.constant 104 : index
    %81 = vector.load %arg3[%c0_49, %c104] : memref<16x128xbf16, #tpu.memory_space<vmem>>, vector<16x8xbf16>
    tpu.vector_store %arg3[%c0_49, %c104], %80 {strides = array<i32>} : memref<16x128xbf16, #tpu.memory_space<vmem>>, vector<16x8xbf16>,
    %82 = vector.extract_strided_slice %25 {offsets = [0, 14, 0], sizes = [16, 1, 8], strides = [1, 1, 1]} : vector<16x16x8xf32> to vector<16x1x8xf32>
    %83 = vector.shape_cast %82 : vector<16x1x8xf32> to vector<16x8xf32>
    %84 = arith.truncf %83 : vector<16x8xf32> to vector<16x8xbf16>
    %c0_50 = arith.constant 0 : index
    %c112 = arith.constant 112 : index
    %85 = vector.load %arg3[%c0_50, %c112] : memref<16x128xbf16, #tpu.memory_space<vmem>>, vector<16x8xbf16>
    tpu.vector_store %arg3[%c0_50, %c112], %84 {strides = array<i32>} : memref<16x128xbf16, #tpu.memory_space<vmem>>, vector<16x8xbf16>,
    %86 = vector.extract_strided_slice %25 {offsets = [0, 15, 0], sizes = [16, 1, 8], strides = [1, 1, 1]} : vector<16x16x8xf32> to vector<16x1x8xf32>
    %87 = vector.shape_cast %86 : vector<16x1x8xf32> to vector<16x8xf32>
    %88 = arith.truncf %87 : vector<16x8xf32> to vector<16x8xbf16>
    %c0_51 = arith.constant 0 : index
    %c120 = arith.constant 120 : index
    %89 = vector.load %arg3[%c0_51, %c120] : memref<16x128xbf16, #tpu.memory_space<vmem>>, vector<16x8xbf16>
    tpu.vector_store %arg3[%c0_51, %c120], %88 {strides = array<i32>} : memref<16x128xbf16, #tpu.memory_space<vmem>>, vector<16x8xbf16>,
    %90 = vector.shape_cast %25 : vector<16x16x8xf32> to vector<256x8xf32>
    %cst_52 = arith.constant dense<0.000000e+00> : vector<8xf32>
    %91 = vector.multi_reduction <add>, %90, %cst_52 [0] : vector<256x8xf32> to vector<8xf32>
    %92 = vector.shape_cast %91 : vector<8xf32> to vector<1x8xf32>
    %93 = arith.mulf %90, %90 : vector<256x8xf32>
    %cst_53 = arith.constant dense<0.000000e+00> : vector<8xf32>
    %94 = vector.multi_reduction <add>, %93, %cst_53 [0] : vector<256x8xf32> to vector<8xf32>
    %95 = vector.shape_cast %94 : vector<8xf32> to vector<1x8xf32>
    %96 = tpu.iota {dimensions = array<i32: 0>} : vector<8x8xi32>
    %c0_i32 = arith.constant 0 : i32
    %97 = vector.broadcast %c0_i32 : i32 to vector<8x8xi32>
    %98 = arith.cmpi eq, %96, %97 : vector<8x8xi32>
    %c1_i32 = arith.constant 1 : i32
    %99 = vector.broadcast %c1_i32 : i32 to vector<8x8xi32>
    %100 = arith.cmpi eq, %96, %99 : vector<8x8xi32>
    %cst_54 = arith.constant 0.000000e+00 : f32
    %101 = vector.shape_cast %95 : vector<1x8xf32> to vector<1x8xf32>
    %102 = vector.broadcast %101 : vector<1x8xf32> to vector<8x8xf32>
    %103 = vector.broadcast %cst_54 : f32 to vector<8x8xf32>
    %104 = arith.select %100, %102, %103 : vector<8x8xi1>, vector<8x8xf32>
    %105 = vector.shape_cast %92 : vector<1x8xf32> to vector<1x8xf32>
    %106 = vector.broadcast %105 : vector<1x8xf32> to vector<8x8xf32>
    %107 = arith.select %98, %106, %104 : vector<8x8xi1>, vector<8x8xf32>
    %c0_55 = arith.constant 0 : index
    %c0_56 = arith.constant 0 : index
    %108 = vector.load %arg4[%c0_55, %c0_56] : memref<8x8xf32, #tpu.memory_space<vmem>>, vector<8x8xf32>
    tpu.vector_store %arg4[%c0_55, %c0_56], %107 {strides = array<i32>} : memref<8x8xf32, #tpu.memory_space<vmem>>, vector<8x8xf32>,
    return
  }
  func.func @transform_0(%arg0: i32) -> (i32, i32, i32) {
    %c0_i32 = arith.constant 0 : i32
    %c0_i32_0 = arith.constant 0 : i32
    %c0_i32_1 = arith.constant 0 : i32
    return %arg0, %c0_i32, %c0_i32_0 : i32, i32, i32
  }
  func.func @transform_1(%arg0: i32) -> (i32, i32, i32) {
    %c0_i32 = arith.constant 0 : i32
    %c0_i32_0 = arith.constant 0 : i32
    %c0_i32_1 = arith.constant 0 : i32
    %c0_i32_2 = arith.constant 0 : i32
    return %c0_i32, %c0_i32_0, %c0_i32_1 : i32, i32, i32
  }
  func.func @transform_2(%arg0: i32) -> (i32, i32) {
    %c0_i32 = arith.constant 0 : i32
    %c0_i32_0 = arith.constant 0 : i32
    return %arg0, %c0_i32 : i32, i32
  }
  func.func @transform_3(%arg0: i32) -> (i32, i32) {
    %c0_i32 = arith.constant 0 : i32
    %c0_i32_0 = arith.constant 0 : i32
    return %arg0, %c0_i32 : i32, i32
  }
}

module attributes {stable_mosaic.version = 11 : i64} {
  func.func @_bn_lrelu_kernel(%arg0: i32, %arg1: memref<16x128xbf16, #tpu.memory_space<vmem>>, %arg2: memref<1x128xf32, #tpu.memory_space<vmem>>, %arg3: memref<1x128xf32, #tpu.memory_space<vmem>>, %arg4: memref<16x128xf32, #tpu.memory_space<vmem>>) attributes {dimension_semantics = [#tpu.dimension_semantics<parallel>], iteration_bounds = array<i64: 2>, scalar_prefetch = 0 : i64, scratch_operands = 0 : i64, tpu.core_type = #tpu.core_type<tc>, window_params = [{transform_indices = @transform_0, window_bounds = array<i64: 16, 128>}, {pipeline_mode = #tpu.pipeline_mode<synchronous>, transform_indices = @transform_1, window_bounds = array<i64: 1, 128>}, {pipeline_mode = #tpu.pipeline_mode<synchronous>, transform_indices = @transform_2, window_bounds = array<i64: 1, 128>}, {transform_indices = @transform_3, window_bounds = array<i64: 16, 128>}]} {
    %c0 = arith.constant 0 : index
    %c0_0 = arith.constant 0 : index
    %0 = vector.load %arg1[%c0, %c0_0] : memref<16x128xbf16, #tpu.memory_space<vmem>>, vector<16x128xbf16>
    %1 = arith.extf %0 : vector<16x128xbf16> to vector<16x128xf32>
    %c0_1 = arith.constant 0 : index
    %c0_2 = arith.constant 0 : index
    %2 = vector.load %arg2[%c0_1, %c0_2] : memref<1x128xf32, #tpu.memory_space<vmem>>, vector<1x128xf32>
    %3 = vector.broadcast %2 : vector<1x128xf32> to vector<16x128xf32>
    %4 = arith.mulf %1, %3 : vector<16x128xf32>
    %c0_3 = arith.constant 0 : index
    %c0_4 = arith.constant 0 : index
    %5 = vector.load %arg3[%c0_3, %c0_4] : memref<1x128xf32, #tpu.memory_space<vmem>>, vector<1x128xf32>
    %6 = vector.broadcast %5 : vector<1x128xf32> to vector<16x128xf32>
    %7 = arith.addf %4, %6 : vector<16x128xf32>
    %cst = arith.constant 0.000000e+00 : f32
    %8 = vector.broadcast %cst : f32 to vector<16x128xf32>
    %9 = arith.cmpf oge, %7, %8 : vector<16x128xf32>
    %cst_5 = arith.constant 0.00999999977 : f32
    %10 = vector.broadcast %cst_5 : f32 to vector<16x128xf32>
    %11 = arith.mulf %10, %7 : vector<16x128xf32>
    %12 = arith.select %9, %7, %11 : vector<16x128xi1>, vector<16x128xf32>
    %c0_6 = arith.constant 0 : index
    %c0_7 = arith.constant 0 : index
    %13 = vector.load %arg4[%c0_6, %c0_7] : memref<16x128xf32, #tpu.memory_space<vmem>>, vector<16x128xf32>
    tpu.vector_store %arg4[%c0_6, %c0_7], %12 {strides = array<i32>} : memref<16x128xf32, #tpu.memory_space<vmem>>, vector<16x128xf32>,
    return
  }
  func.func @transform_0(%arg0: i32) -> (i32, i32) {
    %c0_i32 = arith.constant 0 : i32
    %c0_i32_0 = arith.constant 0 : i32
    return %arg0, %c0_i32 : i32, i32
  }
  func.func @transform_1(%arg0: i32) -> (i32, i32) {
    %c0_i32 = arith.constant 0 : i32
    %c0_i32_0 = arith.constant 0 : i32
    %c0_i32_1 = arith.constant 0 : i32
    return %c0_i32, %c0_i32_0 : i32, i32
  }
  func.func @transform_2(%arg0: i32) -> (i32, i32) {
    %c0_i32 = arith.constant 0 : i32
    %c0_i32_0 = arith.constant 0 : i32
    %c0_i32_1 = arith.constant 0 : i32
    return %c0_i32, %c0_i32_0 : i32, i32
  }
  func.func @transform_3(%arg0: i32) -> (i32, i32) {
    %c0_i32 = arith.constant 0 : i32
    %c0_i32_0 = arith.constant 0 : i32
    return %arg0, %c0_i32 : i32, i32
  }
}

</mosaic_0001>

<bundles_post_ra>
// kernel: conv_layer_forward.3
= control target key start
LH: loop header
LB: loop body
LE: loop exit
PB: predicated region body
PF: predicated region fallthrough
CT: control target
= control target key end

     0   :  { %s3486_s12 = smov 0   ;;  %s4766_s0 = inlined_call_operand.vmem [shape: bf16[32,18,18], index: 0, kind: input, shape index: {}]   ;;  %s4767_s1 = inlined_call_operand.vmem [shape: bf16[3,18,8], index: 1, kind: input, shape index: {}]   ;;  %s4768_s2 = inlined_call_operand.vmem [shape: bf16[32,128], index: 2, kind: output, shape index: {0}]   ;;  %s4769_s3 = inlined_call_operand.vmem [shape: f32[16,8], index: 3, kind: output, shape index: {1}]  }
   0x1 LB: > { %s3492_s13 = sadd.s32 4294967295, %s3449_s12   ;;  %p3031_p0 = scmp.ge.s32.totalorder %s3449_s12, 1  ;;  %s3449_s12 = sphi %s3486_s12, %s14_s12  }
   0x2   : > { %p142_p1 = scmp.lt.s32.totalorder %s3449_s12, 3 }
   0x4   : > { %p143_p2 = pnand %p3031_p0, %p142_p1 }
   0x5   : > { %s3032_s18 = sshll.u32 (!%p143_p2), %s3492_s13, 4  ;;  %s3451_s4 = smov (!%p143_p2), 48  }
   0x6   : > { %146 = sbr.rel (%p143_p2) target bundleno = 572 (0x23c), region = 28  ;;  %p172_p3 = scmp.lt.s32.totalorder (!%p143_p2), %s3032_s18, 31 }
   0x7   : > { %s3452_s5 = smov (!%p143_p2), 16   ;;  %s3453_s6 = smov (!%p143_p2), 8  }
   0x8   : > { %s3454_s7 = smov (!%p143_p2), 24   ;;  %s3455_s8 = smov (!%p143_p2), 32  }
   0x9   : > { %s3456_s9 = smov (!%p143_p2), 40   ;;  %s3457_s10 = smov (!%p143_p2), 56  }
   0xa   : > { %p184_p4 = scmp.lt.s32.totalorder (!%p143_p2), %s3492_s13, 1  ;;  %s3458_s11 = smov (!%p143_p2), 64  }
   0xb   : > { %v3421_v0 = vld [vmem:[%s4767_s1 + $0x8] ss:$0 sps:$4 sm:$0x11]   ;;  %vm362_vm0 = vcmask 1040384   ;;  %v3422_v1 = vld [vmem:[%s4767_s1] sm:$0xff]   ;;  %s4776_s18 = smov (!%p172_p3, %s3032_s18), 31 }
   0xc   : > { %3394 = vmatprep.subr.msk.bf16.mxu1 %vm362_vm0, %v3421_v0  ;;  %v364_v2 = vsel %vm362_vm0, %v3421_v0, 0  ;;  %3393 = vmatprep.subr.msk.bf16.mxu0 %vm362_vm0, %v3421_v0  ;;  %v3424_v3 = vld [vmem:[%s4767_s1 + $0x14] ss:$0 sps:$4 sm:$0x11]   ;;  %s3397_s23 = smul.u32 12, %s4776_s18  ;;  %vm313_vm1 = vcmask 146432  }
   0xd   : > { %3391 = vmatpush3.bf16.msra.mxu1 %v364_v2  ;;  %3282 = vmatpush3.bf16.msra.mxu0 %v364_v2  ;;  %v3430_v4 = vld [vmem:[%s4767_s1 + $0x20] ss:$0 sps:$4 sm:$0x11]   ;;  %v3434_v5 = vld [vmem:[%s4767_s1 + $0xc] sm:$0xff]   ;;  %v1137_v8 = vsel %vm362_vm0, %v3424_v3, 0  ;;  %v3440_v9 = vld [vmem:[%s4767_s1 + $0x18] sm:$0xff]  }
   0xe   : > { %3390 = vmatprep.subr.bf16.mxu1 %v3422_v1  ;;  %3283 = vmatprep.subr.bf16.mxu0 %v3422_v1  ;;  %s3515_s26 = scalar_lea.vmem %s4766_s0, %s3397_s23  ;;  %v1717_v12 = vsel %vm362_vm0, %v3430_v4, 0  ;;  %vm640_vm2 = vsmask.f32 3328  ;;  %vm641_vm3 = vsmask.f32 7440  ;;  %vm1492_vm4 = vcmask 1042432  }
   0xf   : > { %v3423_v6 = vld [vmem:[%s3515_s26 + $0x60] sm:$0xff]   ;;  %v3425_v7 = vld [vmem:[%s3515_s26 + $0x6c] sm:$0xff]   ;;  %v3428_v13 = vld [vmem:[%s3515_s26 + $0x78] sm:$0xff]   ;;  %vm1493_vm5 = vcmask 1046532   ;;  %vm527_vm8 = vcmask 64512   ;;  %vm2057_vm9 = vcmask 1041409  }
  0x10   : > { %3301 = vmatprep.mubr.msk.bf16.mxu1 %vm313_vm1, %v3423_v6  ;;  %v3426_v10 = vld [vmem:[%s3515_s26] sm:$0xff]   ;;  %v3427_v11 = vld [vmem:[%s3515_s26 + $0xc] sm:$0xff]   ;;  %v3431_v14 = vld [vmem:[%s3515_s26 + $0x18] sm:$0xff]   ;;  %vm2060_vm10 = vcmask 1042434   ;;  %vm2063_vm11 = vcmask 1043459   ;;  %vm2066_vm12 = vcmask 1044484  }
  0x11   : > { %3392 = vmatpush3.bf16.msra.mxu1 %v3422_v1  ;;  %3284 = vmatpush3.bf16.msra.mxu0 %v3422_v1  ;;  %v3429_v15 = vld [vmem:[%s3515_s26 + $0x84] sm:$0xff]   ;;  %v3433_v16 = vld [vmem:[%s3515_s26 + $0x90] sm:$0xff]   ;;  %v3435_v19 = vld [vmem:[%s3515_s26 + $0x9c] sm:$0xff]   ;;  %vm2069_vm13 = vcmask 1045509   ;;  %vm2072_vm14 = vcmask 1046534   ;;  %vm2075_vm15 = vcmask 1047559  }
  0x12   : > { %3395 = vmatprep.subr.msk.bf16.mxu1 %vm362_vm0, %v3424_v3  ;;  %3396 = vmatprep.subr.msk.bf16.mxu0 %vm362_vm0, %v3430_v4  ;;  %v3432_v17 = vld [vmem:[%s3515_s26 + $0x24] sm:$0xff]   ;;  %v3436_v18 = vld [vmem:[%s3515_s26 + $0x30] sm:$0xff]   ;;  %v3437_v20 = vld [vmem:[%s3515_s26 + $0x3c] sm:$0xff]   ;;  %s4331_s14 = scalar_select %p184_p4, %s3492_s13, 1 }
  0x13   : > { %3285 = vmatprep.mubr.msk.bf16.mxu0 %vm313_vm1, %v3426_v10  ;;  %v3438_v21 = vld [vmem:[%s3515_s26 + $0xa8] sm:$0xff]   ;;  %v592_v23 = vld [vmem:[%s3515_s26] sm:$0xf]  ;;  %v593_v24 = vld [vmem:[%s3515_s26 + $0x4] sm:$0xf]  ;;  %s3459_s19 = smov 72  }
  0x14   : > { %3302 = vmatmul.mubr.msk.bf16.vlgmr.msra.gmra.mxu1 %vm313_vm1, %v3425_v7  ;;  %3286 = vmatmul.mubr.msk.bf16.vlgmr.msra.gmra.mxu0 %vm313_vm1, %v3427_v11  ;;  %v3441_v22 = vld [vmem:[%s3515_s26 + $0x48] sm:$0xff]   ;;  %v644_v26 = vshrl.u32 %v592_v23, 16  ;;  %v647_v27 = vshll.u32 %v592_v23, 16  ;;  %v653_v28 = vshll.u32 %v593_v24, 16  ;;  %v657_v29 = vshrl.u32 %v593_v24, 16  ;;  %v3439_v45 = vld [vmem:[%s3515_s26 + $0xb4] sm:$0xff]   ;;  %vm3566_vm6 = vmor %vm1492_vm4, %vm1493_vm5 }
  0x15   : > { %3318 = vmatpush3.bf16.msra.mxu1 %v1137_v8  ;;  %3305 = vmatprep.mubr.msk.bf16.mxu1 %vm313_vm1, %v3428_v13  ;;  %v594_v25 = vld [vmem:[%s3515_s26 + $0x8] sm:$0x1]  ;;  %v595_v30 = vld [vmem:[%s3515_s26 + $0xc] sm:$0xf]  ;;  %v596_v32 = vld [vmem:[%s3515_s26 + $0x10] sm:$0xf] }
  0x16   : > { %3319 = vmatprep.subr.bf16.mxu1 %v3434_v5  ;;  %3354 = vmatpush3.bf16.msra.mxu0 %v1717_v12  ;;  %v663_v31 = vshll.u32 %v594_v25, 16  ;;  %v597_v33 = vld [vmem:[%s3515_s26 + $0x14] sm:$0x1]  ;;  %v668_v34 = vshrl.u32 %v595_v30, 16  ;;  %v646_v35 = vrot.slane %v644_v26, 4  ;;  %v649_v36 = vrot.slane %v647_v27, 5  ;;  %vm3573_vm7 = vmor %vm640_vm2, %vm641_vm3 }
  0x17   : > { %3355 = vmatprep.subr.bf16.mxu0 %v3440_v9  ;;  %3289 = vmatprep.mubr.msk.bf16.mxu0 %vm313_vm1, %v3431_v14  ;;  %v655_v37 = vrot.slane %v653_v28, 5  ;;  %v659_v38 = vrot.slane %v657_v29, 4  ;;  %v1396_v39 = vld [vmem:[%s3515_s26] sm:$0xe]  ;;  %v671_v42 = vshll.u32 %v595_v30, 16  ;;  %v677_v43 = vshll.u32 %v596_v32, 16 }
  0x18   : > { %v665_v40 = vrot.slane %v663_v31, 5  ;;  %v670_v41 = vrot.slane %v668_v34, 4  ;;  %v1397_v44 = vld [vmem:[%s3515_s26 + $0x4] sm:$0xf]  ;;  %v650_v46 = vor.u32 %v649_v36, %v646_v35  ;;  %v681_v48 = vshrl.u32 %v596_v32, 16  ;;  %s3036_s15 = sshll.u32 %s4331_s14, 3 }
  0x19   : > { %3320 = vmatpush3.bf16.msra.mxu1 %v3434_v5  ;;  %v660_v47 = vor.u32 %v659_v38, %v655_v37  ;;  %v687_v49 = vshll.u32 %v597_v33, 16  ;;  %v1398_v50 = vld [vmem:[%s3515_s26 + $0x8] sm:$0x1]  ;;  %v673_v53 = vrot.slane %v671_v42, 5  ;;  %v679_v54 = vrot.slane %v677_v43, 5  ;;  %v3442_v5 = vld [vmem:[%s3515_s26 + $0x54] sm:$0xff]   ;;  %s187_s18 = scalar_lea.vmem %s4769_s3, %s3036_s15 }
  0x1a   : > { %3356 = vmatpush3.bf16.msra.mxu0 %v3440_v9  ;;  %v3108_v55 = vrot.slane %v1396_v39, 9  ;;  %v1497_v56 = vrot.slane %v1397_v44, 5  ;;  %v1399_v57 = vld [vmem:[%s3515_s26 + $0xc] sm:$0xe]  ;;  %v651_v58 = vrot.slane %v650_v46, 4  ;;  %v683_v60 = vrot.slane %v681_v48, 4 }
  0x1b   : > { %v661_v59 = vrot.slane %v660_v47, 4  ;;  %v689_v61 = vrot.slane %v687_v49, 5  ;;  %v1400_v62 = vld [vmem:[%s3515_s26 + $0x10] sm:$0xf]  ;;  %v674_v63 = vor.u32 %v673_v53, %v670_v41  ;;  %v1500_v2 = vrot.slane %v1398_v50, 5  ;;  %s3460_s20 = smov 80  }
  0x1c   : > { %3306 = vmatmul.mubr.msk.bf16.gmra.mxu1 %vm313_vm1, %v3429_v15  ;;  %3290 = vmatmul.mubr.msk.bf16.gmra.mxu0 %vm313_vm1, %v3432_v17  ;;  %v1498_v0 = vsel %vm3566_vm6, %v3108_v55, %v1497_v56  ;;  %v1499_v1 = vrot.slane %v1497_v56, 4  ;;  %v1401_v3 = vld [vmem:[%s3515_s26 + $0x14] sm:$0x1]  ;;  %v598_v4 = vld [vmem:[%s3515_s26 + $0x18] sm:$0xf]  ;;  %v656_v6 = vsel %vm3573_vm7, %v651_v58, %v655_v37  ;;  %v684_v8 = vor.u32 %v683_v60, %v679_v54  ;;  %s3461_s21 = smov 88  }
  0x1d   : > { %3309 = vmatprep.mubr.msk.bf16.mxu1 %vm313_vm1, %v3433_v16  ;;  %3293 = vmatprep.mubr.msk.bf16.mxu0 %vm313_vm1, %v3436_v18  ;;  %v666_v7 = vsel %vm3573_vm7, %v661_v59, %v665_v40  ;;  %v3109_v9 = vrot.slane %v1399_v57, 9  ;;  %v675_v11 = vrot.slane %v674_v63, 4  ;;  %v1504_v13 = vrot.slane %v1400_v62, 5  ;;  %v599_v14 = vld [vmem:[%s3515_s26 + $0x1c] sm:$0xf]  ;;  %s3462_s22 = smov 96  }
  0x1e   : > { %v3074_v10 = vcombine.low %v656_v6, %v666_v7  ;;  %v1501_v12 = vsel %vm3566_vm6, %v1499_v1, %v1500_v2  ;;  %v685_v15 = vrot.slane %v684_v8, 4  ;;  %v1507_v17 = vrot.slane %v1401_v3, 5  ;;  %v600_v18 = vld [vmem:[%s3515_s26 + $0x20] sm:$0x1]  ;;  %v601_v24 = vld [vmem:[%s3515_s26 + $0x24] sm:$0xf] }
  0x1f   : > { %v3127_v16 = vcombine.low %v1498_v0, %v1501_v12  ;;  %v695_v23 = vshll.u32 %v598_v4, 16  ;;  %v701_v27 = vshll.u32 %v599_v14, 16  ;;  %v705_v28 = vshrl.u32 %v599_v14, 16  ;;  %v602_v29 = vld [vmem:[%s3515_s26 + $0x28] sm:$0xf]  ;;  %s3463_s23 = smov 104  }
  0x20   : > { %v690_v25 = vsel %vm3573_vm7, %v685_v15, %v689_v61  ;;  %v711_v33 = vshll.u32 %v600_v18, 16  ;;  %v603_v34 = vld [vmem:[%s3515_s26 + $0x2c] sm:$0x1]  ;;  %v1402_v35 = vld [vmem:[%s3515_s26 + $0x18] sm:$0xe]  ;;  %v716_v39 = vshrl.u32 %v601_v24, 16 }
  0x21   : > { %v697_v32 = vrot.slane %v695_v23, 5  ;;  %v703_v37 = vrot.slane %v701_v27, 5  ;;  %v707_v38 = vrot.slane %v705_v28, 4  ;;  %v1403_v40 = vld [vmem:[%s3515_s26 + $0x1c] sm:$0xf]  ;;  %v719_v43 = vshll.u32 %v601_v24, 16 }
  0x22   : > { %v713_v42 = vrot.slane %v711_v33, 5  ;;  %v725_v44 = vshll.u32 %v602_v29, 16  ;;  %v718_v47 = vrot.slane %v716_v39, 4  ;;  %v729_v48 = vshrl.u32 %v602_v29, 16  ;;  %v1405_v50 = vld [vmem:[%s3515_s26 + $0x24] sm:$0xe] }
  0x23   : > { %v708_v46 = vor.u32 %v707_v38, %v703_v37  ;;  %v735_v49 = vshll.u32 %v603_v34, 16  ;;  %v3110_v56 = vrot.slane %v1402_v35, 9  ;;  %v1406_v57 = vld [vmem:[%s3515_s26 + $0x28] sm:$0xf]  ;;  %v1511_v61 = vrot.slane %v1403_v40, 5  ;;  %s3464_s24 = smov 112  }
  0x24   : > { %3310 = vmatmul.mubr.msk.bf16.gmra.mxu1 %vm313_vm1, %v3435_v19  ;;  %3294 = vmatmul.mubr.msk.bf16.gmra.mxu0 %vm313_vm1, %v3437_v20  ;;  %v692_v19 = vshrl.u32 %v598_v4, 16  ;;  %v680_v20 = vsel %vm3573_vm7, %v675_v11, %v679_v54  ;;  %v721_v54 = vrot.slane %v719_v43, 5  ;;  %v727_v55 = vrot.slane %v725_v44, 5  ;;  %v1407_v62 = vld [vmem:[%s3515_s26 + $0x2c] sm:$0x1]  ;;  %s3465_s25 = smov 120  }
  0x25   : > { %3313 = vmatprep.mubr.msk.bf16.mxu1 %vm313_vm1, %v3438_v21  ;;  %3297 = vmatprep.mubr.msk.bf16.mxu0 %vm313_vm1, %v3441_v22  ;;  %v1505_v21 = vsel %vm3566_vm6, %v3109_v9, %v1504_v13  ;;  %v1506_v22 = vrot.slane %v1504_v13, 4  ;;  %v3075_v30 = vcombine.low %v680_v20, %v690_v25  ;;  %v709_v58 = vrot.slane %v708_v46, 4  ;;  %v604_v3 = vld [vmem:[%s3515_s26 + $0x30] sm:$0xf]  ;;  %v605_v12 = vld [vmem:[%s3515_s26 + $0x34] sm:$0xf] }
  0x26   : > { %v694_v26 = vrot.slane %v692_v19, 4  ;;  %v731_v59 = vrot.slane %v729_v48, 4  ;;  %v737_v60 = vrot.slane %v735_v49, 5  ;;  %v722_v0 = vor.u32 %v721_v54, %v718_v47  ;;  %v606_v15 = vld [vmem:[%s3515_s26 + $0x38] sm:$0x1] }
  0x27   : > { %v1508_v31 = vsel %vm3566_vm6, %v1506_v22, %v1507_v17  ;;  %v3111_v2 = vrot.slane %v1405_v50, 9  ;;  %v714_v4 = vsel %vm3573_vm7, %v709_v58, %v713_v42  ;;  %v1512_v6 = vsel %vm3566_vm6, %v3110_v56, %v1511_v61  ;;  %v607_v22 = vld [vmem:[%s3515_s26 + $0x3c] sm:$0xf]  ;;  %v608_v27 = vld [vmem:[%s3515_s26 + $0x40] sm:$0xf] }
  0x28   : > { %v3128_v36 = vcombine.low %v1505_v21, %v1508_v31  ;;  %v698_v41 = vor.u32 %v697_v32, %v694_v26  ;;  %v1513_v7 = vrot.slane %v1511_v61, 4  ;;  %v723_v9 = vrot.slane %v722_v0, 4  ;;  %v609_v32 = vld [vmem:[%s3515_s26 + $0x44] sm:$0x1]  ;;  %v1408_v33 = vld [vmem:[%s3515_s26 + $0x30] sm:$0xe] }
  0x29   : > { %v1521_v11 = vrot.slane %v1407_v62, 5  ;;  %v743_v17 = vshll.u32 %v604_v3, 16  ;;  %v749_v26 = vshll.u32 %v605_v12, 16  ;;  %v759_v31 = vshll.u32 %v606_v15, 16  ;;  %v1409_v38 = vld [vmem:[%s3515_s26 + $0x34] sm:$0xf] }
  0x2a   : > { %v699_v53 = vrot.slane %v698_v41, 4  ;;  %v728_v18 = vsel %vm3573_vm7, %v723_v9, %v727_v55  ;;  %v1410_v39 = vld [vmem:[%s3515_s26 + $0x38] sm:$0x1]  ;;  %v767_v42 = vshll.u32 %v607_v22, 16  ;;  %v773_v43 = vshll.u32 %v608_v27, 16 }
  0x2b   : > { %v745_v25 = vrot.slane %v743_v17, 5  ;;  %v761_v41 = vrot.slane %v759_v31, 5  ;;  %v1411_v44 = vld [vmem:[%s3515_s26 + $0x3c] sm:$0xe]  ;;  %v777_v47 = vshrl.u32 %v608_v27, 16  ;;  %v783_v48 = vshll.u32 %v609_v32, 16 }
  0x2c   : > { %3314 = vmatmul.mubr.msk.bf16.gmra.mxu1 %vm313_vm1, %v3439_v45  ;;  %3298 = vmatmul.mubr.msk.bf16.gmra.mxu0 %vm313_vm1, %v3442_v5  ;;  %v1404_v45 = vld [vmem:[%s3515_s26 + $0x20] sm:$0x1]  ;;  %v704_v63 = vsel %vm3573_vm7, %v699_v53, %v703_v37  ;;  %v732_v5 = vor.u32 %v731_v59, %v727_v55  ;;  %v764_v37 = vshrl.u32 %v607_v22, 16  ;;  %v769_v53 = vrot.slane %v767_v42, 5  ;;  %v1413_v56 = vld [vmem:[%s3515_s26 + $0x44] sm:$0x1] }
  0x2d   : > { %3321 = vmatprep.mubr.msk.bf16.mxu1 %vm313_vm1, %v3074_v10  ;;  %3357 = vmatprep.mubr.msk.bf16.mxu0 %vm313_vm1, %v3127_v16  ;;  %v1514_v1 = vrot.slane %v1404_v45, 5  ;;  %v3076_v8 = vcombine.low %v704_v63, %v714_v4  ;;  %v1518_v10 = vrot.slane %v1406_v57, 5  ;;  %v740_v16 = vshrl.u32 %v604_v3, 16  ;;  %v1412_v49 = vld [vmem:[%s3515_s26 + $0x40] sm:$0xf] }
  0x2e   : > { %v733_v13 = vrot.slane %v732_v5, 4  ;;  %v766_v46 = vrot.slane %v764_v37, 4  ;;  %v775_v54 = vrot.slane %v773_v43, 5  ;;  %v3112_v55 = vrot.slane %v1408_v33, 9  ;;  %v610_v61 = vld [vmem:[%s3515_s26 + $0x48] sm:$0xf] }
  0x2f   : > { %v1515_v14 = vsel %vm3566_vm6, %v1513_v7, %v1514_v1  ;;  %v1519_v20 = vsel %vm3566_vm6, %v3111_v2, %v1518_v10  ;;  %v1520_v21 = vrot.slane %v1518_v10, 4  ;;  %v742_v24 = vrot.slane %v740_v16, 4  ;;  %v611_v9 = vld [vmem:[%s3515_s26 + $0x4c] sm:$0xf]  ;;  %v612_v15 = vld [vmem:[%s3515_s26 + $0x50] sm:$0x1] }
  0x30   : > { %v3129_v19 = vcombine.low %v1512_v6, %v1515_v14  ;;  %v738_v23 = vsel %vm3573_vm7, %v733_v13, %v737_v60  ;;  %v779_v58 = vrot.slane %v777_v47, 4  ;;  %v785_v59 = vrot.slane %v783_v48, 5  ;;  %v613_v16 = vld [vmem:[%s3515_s26 + $0x54] sm:$0xf]  ;;  %v1414_v31 = vld [vmem:[%s3515_s26 + $0x48] sm:$0xe] }
  0x31   : > { %v3077_v28 = vcombine.low %v728_v18, %v738_v23  ;;  %v1522_v29 = vsel %vm3566_vm6, %v1520_v21, %v1521_v11  ;;  %v746_v35 = vor.u32 %v745_v25, %v742_v24  ;;  %v1525_v60 = vrot.slane %v1409_v38, 5  ;;  %v614_v25 = vld [vmem:[%s3515_s26 + $0x58] sm:$0xf] }
  0x32   : > { %v3130_v34 = vcombine.low %v1519_v20, %v1522_v29  ;;  %v770_v63 = vor.u32 %v769_v53, %v766_v46  ;;  %v1528_v0 = vrot.slane %v1410_v39, 5  ;;  %v3113_v1 = vrot.slane %v1411_v44, 9  ;;  %v615_v29 = vld [vmem:[%s3515_s26 + $0x5c] sm:$0x1] }
  0x33   : > { %v747_v45 = vrot.slane %v746_v35, 4  ;;  %v780_v2 = vor.u32 %v779_v58, %v775_v54  ;;  %v1526_v3 = vsel %vm3566_vm6, %v3112_v55, %v1525_v60  ;;  %v1527_v4 = vrot.slane %v1525_v60, 4 }
  0x34   : > { %3322 = vmatmul.mubr.msk.bf16.vlgmr.msra.gmra.mxu1 %vm313_vm1, %v3075_v30  ;;  %3358 = vmatmul.mubr.msk.bf16.vlgmr.msra.gmra.mxu0 %vm313_vm1, %v3128_v36  ;;  %v753_v30 = vshrl.u32 %v605_v12, 16  ;;  %v751_v36 = vrot.slane %v749_v26, 5  ;;  %v1532_v5 = vrot.slane %v1412_v49, 5  ;;  %v771_v7 = vrot.slane %v770_v63, 4  ;;  %v616_v63 = vld [vmem:[%s3515_s26 + $0x60] sm:$0xf] }
  0x35   : > { %3325 = vmatprep.mubr.msk.bf16.mxu1 %vm313_vm1, %v3076_v8  ;;  %3361 = vmatprep.mubr.msk.bf16.mxu0 %vm313_vm1, %v3129_v19  ;;  %v1535_v8 = vrot.slane %v1413_v56, 5  ;;  %v788_v10 = vshrl.u32 %v610_v61, 16  ;;  %v781_v12 = vrot.slane %v780_v2, 4  ;;  %v1529_v13 = vsel %vm3566_vm6, %v1527_v4, %v1528_v0 }
  0x36   : > { %v755_v40 = vrot.slane %v753_v30, 4  ;;  %v752_v57 = vsel %vm3573_vm7, %v747_v45, %v751_v36  ;;  %v1533_v14 = vsel %vm3566_vm6, %v3113_v1, %v1532_v5  ;;  %v776_v17 = vsel %vm3573_vm7, %v771_v7, %v775_v54  ;;  %v1416_v45 = vld [vmem:[%s3515_s26 + $0x50] sm:$0x1] }
  0x37   : > { %v3131_v18 = vcombine.low %v1526_v3, %v1529_v13  ;;  %v1534_v19 = vrot.slane %v1532_v5, 4  ;;  %v790_v20 = vrot.slane %v788_v10, 4  ;;  %v786_v21 = vsel %vm3573_vm7, %v781_v12, %v785_v59  ;;  %v618_v12 = vld [vmem:[%s3515_s26 + $0x68] sm:$0x1] }
  0x38   : > { %v756_v50 = vor.u32 %v755_v40, %v751_v36  ;;  %v791_v22 = vshll.u32 %v610_v61, 16  ;;  %v797_v23 = vshll.u32 %v611_v9, 16  ;;  %v801_v24 = vshrl.u32 %v611_v9, 16  ;;  %v1415_v36 = vld [vmem:[%s3515_s26 + $0x4c] sm:$0xf] }
  0x39   : > { %v3079_v26 = vcombine.low %v776_v17, %v786_v21  ;;  %v1536_v27 = vsel %vm3566_vm6, %v1534_v19, %v1535_v8  ;;  %v812_v30 = vshrl.u32 %v613_v16, 16  ;;  %v815_v39 = vshll.u32 %v613_v16, 16  ;;  %v617_v8 = vld [vmem:[%s3515_s26 + $0x64] sm:$0xf] }
  0x3a   : > { %v757_v62 = vrot.slane %v756_v50, 4  ;;  %v3132_v32 = vcombine.low %v1533_v14, %v1536_v27  ;;  %v793_v33 = vrot.slane %v791_v22, 5  ;;  %v803_v35 = vrot.slane %v801_v24, 4  ;;  %v1417_v50 = vld [vmem:[%s3515_s26 + $0x54] sm:$0xe] }
  0x3b   : > { %v814_v38 = vrot.slane %v812_v30, 4  ;;  %v821_v40 = vshll.u32 %v614_v25, 16  ;;  %v825_v43 = vshrl.u32 %v614_v25, 16  ;;  %v831_v44 = vshll.u32 %v615_v29, 16  ;;  %v1420_v29 = vld [vmem:[%s3515_s26 + $0x60] sm:$0xe] }
  0x3c   : > { %3326 = vmatmul.mubr.msk.bf16.gmra.mxu1 %vm313_vm1, %v3077_v28  ;;  %3362 = vmatmul.mubr.msk.bf16.gmra.mxu0 %vm313_vm1, %v3130_v34  ;;  %v762_v6 = vsel %vm3573_vm7, %v757_v62, %v761_v41  ;;  %v807_v28 = vshll.u32 %v612_v15, 16  ;;  %v799_v34 = vrot.slane %v797_v23, 5  ;;  %v794_v41 = vor.u32 %v793_v33, %v790_v20  ;;  %v1419_v62 = vld [vmem:[%s3515_s26 + $0x5c] sm:$0x1]  ;;  %v620_v23 = vld [vmem:[%s3515_s26 + $0x70] sm:$0xf] }
  0x3d   : > { %v3078_v11 = vcombine.low %v752_v57, %v762_v6  ;;  %3365 = vmatprep.mubr.msk.bf16.mxu0 %vm313_vm1, %v3131_v18  ;;  %v817_v46 = vrot.slane %v815_v39, 5  ;;  %v823_v47 = vrot.slane %v821_v40, 5  ;;  %v3114_v48 = vrot.slane %v1414_v31, 9  ;;  %v1418_v57 = vld [vmem:[%s3515_s26 + $0x58] sm:$0xf] }
  0x3e   : > { %v809_v37 = vrot.slane %v807_v28, 5  ;;  %v804_v42 = vor.u32 %v803_v35, %v799_v34  ;;  %v1539_v49 = vrot.slane %v1415_v36, 5  ;;  %v795_v53 = vrot.slane %v794_v41, 4  ;;  %v619_v18 = vld [vmem:[%s3515_s26 + $0x6c] sm:$0xf] }
  0x3f   : > { %3329 = vmatprep.mubr.msk.bf16.mxu1 %vm313_vm1, %v3078_v11  ;;  %v827_v55 = vrot.slane %v825_v43, 4  ;;  %v833_v56 = vrot.slane %v831_v44, 5  ;;  %v818_v58 = vor.u32 %v817_v46, %v814_v38  ;;  %v1542_v61 = vrot.slane %v1416_v45, 5  ;;  %v621_v28 = vld [vmem:[%s3515_s26 + $0x74] sm:$0x1] }
  0x40   : > { %v805_v54 = vrot.slane %v804_v42, 4  ;;  %v1540_v59 = vsel %vm3566_vm6, %v3114_v48, %v1539_v49  ;;  %v1541_v60 = vrot.slane %v1539_v49, 4  ;;  %v800_v0 = vsel %vm3573_vm7, %v795_v53, %v799_v34  ;;  %v1421_v34 = vld [vmem:[%s3515_s26 + $0x64] sm:$0xf]  ;;  %v1422_v39 = vld [vmem:[%s3515_s26 + $0x68] sm:$0x1] }
  0x41   : > { %v828_v2 = vor.u32 %v827_v55, %v823_v47  ;;  %v3115_v3 = vrot.slane %v1417_v50, 9  ;;  %v819_v5 = vrot.slane %v818_v58, 4  ;;  %v1546_v7 = vrot.slane %v1418_v57, 5  ;;  %v1423_v44 = vld [vmem:[%s3515_s26 + $0x6c] sm:$0xe] }
  0x42   : > { %v810_v1 = vsel %vm3573_vm7, %v805_v54, %v809_v37  ;;  %v1543_v6 = vsel %vm3566_vm6, %v1541_v60, %v1542_v61  ;;  %v1549_v11 = vrot.slane %v1419_v62, 5  ;;  %v836_v13 = vshrl.u32 %v616_v63, 16  ;;  %v1424_v49 = vld [vmem:[%s3515_s26 + $0x70] sm:$0xf]  ;;  %v622_v61 = vld [vmem:[%s3515_s26 + $0x78] sm:$0xf] }
  0x43   : > { %v3080_v4 = vcombine.low %v800_v0, %v810_v1  ;;  %v829_v9 = vrot.slane %v828_v2, 4  ;;  %v3133_v10 = vcombine.low %v1540_v59, %v1543_v6  ;;  %v824_v14 = vsel %vm3573_vm7, %v819_v5, %v823_v47  ;;  %v623_v6 = vld [vmem:[%s3515_s26 + $0x7c] sm:$0xf] }
  0x44   : > { %3330 = vmatmul.mubr.msk.bf16.gmra.mxu1 %vm313_vm1, %v3079_v26  ;;  %3366 = vmatmul.mubr.msk.bf16.gmra.mxu0 %vm313_vm1, %v3132_v32  ;;  %v1547_v15 = vsel %vm3566_vm6, %v3115_v3, %v1546_v7  ;;  %v1548_v16 = vrot.slane %v1546_v7, 4  ;;  %v839_v17 = vshll.u32 %v616_v63, 16  ;;  %v838_v20 = vrot.slane %v836_v13, 4 }
  0x45   : > { %3333 = vmatprep.mubr.msk.bf16.mxu1 %vm313_vm1, %v3080_v4  ;;  %v834_v19 = vsel %vm3573_vm7, %v829_v9, %v833_v56  ;;  %3369 = vmatprep.mubr.msk.bf16.mxu0 %vm313_vm1, %v3133_v10  ;;  %v845_v21 = vshll.u32 %v617_v8, 16  ;;  %v849_v22 = vshrl.u32 %v617_v8, 16  ;;  %v855_v27 = vshll.u32 %v618_v12, 16  ;;  %v1425_v56 = vld [vmem:[%s3515_s26 + $0x74] sm:$0x1] }
  0x46   : > { %v3081_v24 = vcombine.low %v824_v14, %v834_v19  ;;  %v1550_v25 = vsel %vm3566_vm6, %v1548_v16, %v1549_v11  ;;  %v841_v26 = vrot.slane %v839_v17, 5  ;;  %v860_v33 = vshrl.u32 %v619_v18, 16  ;;  %v624_v9 = vld [vmem:[%s3515_s26 + $0x80] sm:$0x1]  ;;  %v625_v16 = vld [vmem:[%s3515_s26 + $0x84] sm:$0xf] }
  0x47   : > { %v3134_v30 = vcombine.low %v1547_v15, %v1550_v25  ;;  %v847_v31 = vrot.slane %v845_v21, 5  ;;  %v851_v32 = vrot.slane %v849_v22, 4  ;;  %v857_v36 = vrot.slane %v855_v27, 5  ;;  %v626_v21 = vld [vmem:[%s3515_s26 + $0x88] sm:$0xf] }
  0x48   : > { %v842_v35 = vor.u32 %v841_v26, %v838_v20  ;;  %v863_v37 = vshll.u32 %v619_v18, 16  ;;  %v869_v38 = vshll.u32 %v620_v23, 16  ;;  %v862_v41 = vrot.slane %v860_v33, 4  ;;  %v627_v26 = vld [vmem:[%s3515_s26 + $0x8c] sm:$0x1] }
  0x49   : > { %v852_v40 = vor.u32 %v851_v32, %v847_v31  ;;  %v873_v42 = vshrl.u32 %v620_v23, 16  ;;  %v879_v43 = vshll.u32 %v621_v28, 16  ;;  %v3116_v48 = vrot.slane %v1420_v29, 9  ;;  %v1426_v27 = vld [vmem:[%s3515_s26 + $0x78] sm:$0xe] }
  0x4a   : > { %v843_v45 = vrot.slane %v842_v35, 4  ;;  %v865_v46 = vrot.slane %v863_v37, 5  ;;  %v871_v47 = vrot.slane %v869_v38, 5  ;;  %v1553_v55 = vrot.slane %v1421_v34, 5  ;;  %v1427_v32 = vld [vmem:[%s3515_s26 + $0x7c] sm:$0xf] }
  0x4b   : > { %v853_v50 = vrot.slane %v852_v40, 4  ;;  %v875_v53 = vrot.slane %v873_v42, 4  ;;  %v881_v54 = vrot.slane %v879_v43, 5  ;;  %v1556_v59 = vrot.slane %v1422_v39, 5  ;;  %v1428_v33 = vld [vmem:[%s3515_s26 + $0x80] sm:$0x1] }
  0x4c   : > { %3334 = vmatmul.mubr.msk.bf16.gmra.mxu1 %vm313_vm1, %v3081_v24  ;;  %3370 = vmatmul.mubr.msk.bf16.gmra.mxu0 %vm313_vm1, %v3134_v30  ;;  %v848_v57 = vsel %vm3573_vm7, %v843_v45, %v847_v31  ;;  %v866_v58 = vor.u32 %v865_v46, %v862_v41  ;;  %v3117_v60 = vrot.slane %v1423_v44, 9  ;;  %v1554_v0 = vsel %vm3566_vm6, %v3116_v48, %v1553_v55  ;;  %v1429_v38 = vld [vmem:[%s3515_s26 + $0x84] sm:$0xe]  ;;  %v1430_v43 = vld [vmem:[%s3515_s26 + $0x88] sm:$0xf] }
  0x4d   : > { %v858_v62 = vsel %vm3573_vm7, %v853_v50, %v857_v36  ;;  %v876_v63 = vor.u32 %v875_v53, %v871_v47  ;;  %v1555_v1 = vrot.slane %v1553_v55, 4  ;;  %v1560_v4 = vrot.slane %v1424_v49, 5  ;;  %v1431_v48 = vld [vmem:[%s3515_s26 + $0x8c] sm:$0x1]  ;;  %v628_v55 = vld [vmem:[%s3515_s26 + $0x90] sm:$0xf] }
  0x4e   : > { %v3082_v2 = vcombine.low %v848_v57, %v858_v62  ;;  %v867_v3 = vrot.slane %v866_v58, 4  ;;  %v1563_v5 = vrot.slane %v1425_v56, 5  ;;  %v884_v10 = vshrl.u32 %v622_v61, 16 }
  0x4f   : > { %v877_v7 = vrot.slane %v876_v63, 4  ;;  %v1557_v8 = vsel %vm3566_vm6, %v1555_v1, %v1556_v59  ;;  %v887_v11 = vshll.u32 %v622_v61, 16  ;;  %v1561_v14 = vsel %vm3566_vm6, %v3117_v60, %v1560_v4 }
  0x50   : > { %3337 = vmatprep.mubr.msk.bf16.mxu1 %vm313_vm1, %v3082_v2  ;;  %v872_v12 = vsel %vm3573_vm7, %v867_v3, %v871_v47  ;;  %v3135_v13 = vcombine.low %v1554_v0, %v1557_v8  ;;  %v1562_v15 = vrot.slane %v1560_v4, 4  ;;  %v886_v18 = vrot.slane %v884_v10, 4  ;;  %v629_v3 = vld [vmem:[%s3515_s26 + $0x94] sm:$0xf]  ;;  %v631_v10 = vld [vmem:[%s3515_s26 + $0x9c] sm:$0xf] }
  0x51   : > { %v882_v17 = vsel %vm3573_vm7, %v877_v7, %v881_v54  ;;  %v889_v19 = vrot.slane %v887_v11, 5  ;;  %v893_v20 = vshll.u32 %v623_v6, 16  ;;  %v897_v24 = vshrl.u32 %v623_v6, 16 }
  0x52   : > { %v3083_v22 = vcombine.low %v872_v12, %v882_v17  ;;  %3373 = vmatprep.mubr.msk.bf16.mxu0 %vm313_vm1, %v3135_v13  ;;  %v1564_v23 = vsel %vm3566_vm6, %v1562_v15, %v1563_v5  ;;  %v903_v25 = vshll.u32 %v624_v9, 16  ;;  %v908_v31 = vshrl.u32 %v625_v16, 16  ;;  %v630_v9 = vld [vmem:[%s3515_s26 + $0x98] sm:$0x1] }
  0x53   : > { %v3136_v28 = vcombine.low %v1561_v14, %v1564_v23  ;;  %v890_v29 = vor.u32 %v889_v19, %v886_v18  ;;  %v895_v30 = vrot.slane %v893_v20, 5  ;;  %v899_v34 = vrot.slane %v897_v24, 4  ;;  %v632_v19 = vld [vmem:[%s3515_s26 + $0xa0] sm:$0xf]  ;;  %v633_v23 = vld [vmem:[%s3515_s26 + $0xa4] sm:$0x1] }
  0x54   : > { %3338 = vmatmul.mubr.msk.bf16.gmra.mxu1 %vm313_vm1, %v3083_v22  ;;  %v905_v35 = vrot.slane %v903_v25, 5  ;;  %v911_v36 = vshll.u32 %v625_v16, 16  ;;  %v917_v37 = vshll.u32 %v626_v21, 16  ;;  %v910_v40 = vrot.slane %v908_v31, 4  ;;  %v1432_v25 = vld [vmem:[%s3515_s26 + $0x90] sm:$0xe] }
  0x55   : > { %3374 = vmatmul.mubr.msk.bf16.gmra.mxu0 %vm313_vm1, %v3136_v28  ;;  %v891_v39 = vrot.slane %v890_v29, 4  ;;  %v921_v41 = vshrl.u32 %v626_v21, 16  ;;  %v927_v42 = vshll.u32 %v627_v26, 16  ;;  %v900_v44 = vor.u32 %v899_v34, %v895_v30 }
  0x56   : > { %v913_v45 = vrot.slane %v911_v36, 5  ;;  %v919_v46 = vrot.slane %v917_v37, 5  ;;  %v3118_v47 = vrot.slane %v1426_v27, 9  ;;  %v1567_v54 = vrot.slane %v1427_v32, 5 }
  0x57   : > { %v896_v49 = vsel %vm3573_vm7, %v891_v39, %v895_v30  ;;  %v923_v50 = vrot.slane %v921_v41, 4  ;;  %v929_v53 = vrot.slane %v927_v42, 5  ;;  %v901_v56 = vrot.slane %v900_v44, 4  ;;  %v1433_v30 = vld [vmem:[%s3515_s26 + $0x94] sm:$0xf] }
  0x58   : > { %v914_v57 = vor.u32 %v913_v45, %v910_v40  ;;  %v1570_v58 = vrot.slane %v1428_v33, 5  ;;  %v3119_v59 = vrot.slane %v1429_v38, 9  ;;  %v1568_v61 = vsel %vm3566_vm6, %v3118_v47, %v1567_v54  ;;  %v1434_v39 = vld [vmem:[%s3515_s26 + $0x98] sm:$0x1]  ;;  %v1435_v44 = vld [vmem:[%s3515_s26 + $0x9c] sm:$0xe] }
  0x59   : > { %v924_v60 = vor.u32 %v923_v50, %v919_v46  ;;  %v1569_v62 = vrot.slane %v1567_v54, 4  ;;  %v1574_v63 = vrot.slane %v1430_v43, 5  ;;  %v906_v0 = vsel %vm3573_vm7, %v901_v56, %v905_v35  ;;  %v1437_v56 = vld [vmem:[%s3515_s26 + $0xa4] sm:$0x1] }
  0x5a   : > { %v915_v1 = vrot.slane %v914_v57, 4  ;;  %v1577_v2 = vrot.slane %v1431_v48, 5  ;;  %v932_v4 = vshrl.u32 %v628_v55, 16  ;;  %v3084_v5 = vcombine.low %v896_v49, %v906_v0  ;;  %v1436_v49 = vld [vmem:[%s3515_s26 + $0xa0] sm:$0xf] }
  0x5b   : > { %v925_v6 = vrot.slane %v924_v60, 4  ;;  %v1571_v7 = vsel %vm3566_vm6, %v1569_v62, %v1570_v58  ;;  %v1575_v8 = vsel %vm3566_vm6, %v3119_v59, %v1574_v63  ;;  %v1576_v13 = vrot.slane %v1574_v63, 4  ;;  %v634_v57 = vld [vmem:[%s3515_s26 + $0xa8] sm:$0xf] }
  0x5c   : > { %v920_v11 = vsel %vm3573_vm7, %v915_v1, %v919_v46  ;;  %v3137_v12 = vcombine.low %v1568_v61, %v1571_v7  ;;  %v934_v14 = vrot.slane %v932_v4, 4  ;;  %3341 = vmatprep.mubr.msk.bf16.mxu1 %vm313_vm1, %v3084_v5  ;;  %v935_v16 = vshll.u32 %v628_v55, 16 }
  0x5d   : > { %v930_v15 = vsel %vm3573_vm7, %v925_v6, %v929_v53  ;;  %v941_v17 = vshll.u32 %v629_v3, 16  ;;  %v945_v18 = vshrl.u32 %v629_v3, 16  ;;  %v1578_v21 = vsel %vm3566_vm6, %v1576_v13, %v1577_v2  ;;  %v635_v2 = vld [vmem:[%s3515_s26 + $0xac] sm:$0xf]  ;;  %v636_v6 = vld [vmem:[%s3515_s26 + $0xb0] sm:$0x1] }
  0x5e   : > { %v3085_v20 = vcombine.low %v920_v11, %v930_v15  ;;  %3377 = vmatprep.mubr.msk.bf16.mxu0 %vm313_vm1, %v3137_v12  ;;  %v951_v22 = vshll.u32 %v630_v9, 16  ;;  %v956_v24 = vshrl.u32 %v631_v10, 16  ;;  %v3138_v26 = vcombine.low %v1575_v8, %v1578_v21  ;;  %v637_v12 = vld [vmem:[%s3515_s26 + $0xb4] sm:$0xf] }
  0x5f   : > { %v937_v27 = vrot.slane %v935_v16, 5  ;;  %v943_v28 = vrot.slane %v941_v17, 5  ;;  %v947_v29 = vrot.slane %v945_v18, 4  ;;  %v959_v33 = vshll.u32 %v631_v10, 16  ;;  %v638_v17 = vld [vmem:[%s3515_s26 + $0xb8] sm:$0xf] }
  0x60   : > { %3342 = vmatmul.mubr.msk.bf16.gmra.mxu1 %vm313_vm1, %v3085_v20  ;;  %v953_v31 = vrot.slane %v951_v22, 5  ;;  %v958_v32 = vrot.slane %v956_v24, 4  ;;  %v965_v34 = vshll.u32 %v632_v19, 16  ;;  %3378 = vmatmul.mubr.msk.bf16.gmra.mxu0 %vm313_vm1, %v3138_v26  ;;  %v969_v37 = vshrl.u32 %v632_v19, 16  ;;  %v639_v22 = vld [vmem:[%s3515_s26 + $0xbc] sm:$0x1] }
  0x61   : > { %v938_v35 = vor.u32 %v937_v27, %v934_v14  ;;  %v948_v36 = vor.u32 %v947_v29, %v943_v28  ;;  %v975_v38 = vshll.u32 %v633_v23, 16  ;;  %v961_v40 = vrot.slane %v959_v33, 5  ;;  %v1438_v23 = vld [vmem:[%s3515_s26 + $0xa8] sm:$0xe]  ;;  %v1440_v33 = vld [vmem:[%s3515_s26 + $0xb0] sm:$0x1] }
  0x62   : > { %v967_v41 = vrot.slane %v965_v34, 5  ;;  %v3120_v42 = vrot.slane %v1432_v25, 9  ;;  %v1581_v43 = vrot.slane %v1433_v30, 5  ;;  %v971_v47 = vrot.slane %v969_v37, 4 }
  0x63   : > { %v939_v45 = vrot.slane %v938_v35, 4  ;;  %v949_v46 = vrot.slane %v948_v36, 4  ;;  %v977_v48 = vrot.slane %v975_v38, 5  ;;  %v962_v50 = vor.u32 %v961_v40, %v958_v32  ;;  %v1441_v38 = vld [vmem:[%s3515_s26 + $0xb4] sm:$0xe] }
  0x64   : > { %v1582_v53 = vsel %vm3566_vm6, %v3120_v42, %v1581_v43  ;;  %v1583_v54 = vrot.slane %v1581_v43, 4  ;;  %v1584_v55 = vrot.slane %v1434_v39, 5  ;;  %v972_v60 = vor.u32 %v971_v47, %v967_v41  ;;  %v1442_v43 = vld [vmem:[%s3515_s26 + $0xb8] sm:$0xf] }
  0x65   : > { %v944_v58 = vsel %vm3573_vm7, %v939_v45, %v943_v28  ;;  %v954_v59 = vsel %vm3573_vm7, %v949_v46, %v953_v31  ;;  %v3121_v61 = vrot.slane %v1435_v44, 9  ;;  %v963_v63 = vrot.slane %v962_v50, 4  ;;  %v1439_v28 = vld [vmem:[%s3515_s26 + $0xac] sm:$0xf] }
  0x66   : > { %v3086_v62 = vcombine.low %v944_v58, %v954_v59  ;;  %v1585_v0 = vsel %vm3566_vm6, %v1583_v54, %v1584_v55  ;;  %v1588_v1 = vrot.slane %v1436_v49, 5  ;;  %v973_v3 = vrot.slane %v972_v60, 4 }
  0x67   : > { %v3139_v4 = vcombine.low %v1582_v53, %v1585_v0  ;;  %v1591_v5 = vrot.slane %v1437_v56, 5  ;;  %v980_v7 = vshrl.u32 %v634_v57, 16  ;;  %v968_v8 = vsel %vm3573_vm7, %v963_v63, %v967_v41 }
  0x68   : > { %3345 = vmatprep.mubr.msk.bf16.mxu1 %vm313_vm1, %v3086_v62  ;;  %v1589_v9 = vsel %vm3566_vm6, %v3121_v61, %v1588_v1  ;;  %v1590_v10 = vrot.slane %v1588_v1, 4  ;;  %v983_v11 = vshll.u32 %v634_v57, 16  ;;  %v978_v13 = vsel %vm3573_vm7, %v973_v3, %v977_v48  ;;  %v1443_v48 = vld [vmem:[%s3515_s26 + $0xbc] sm:$0x1]  ;;  %s3034_s26 = sshll.u32 %s3492_s13, 1 }
  0x69   : > { %3381 = vmatprep.mubr.msk.bf16.mxu0 %vm313_vm1, %v3139_v4  ;;  %v982_v14 = vrot.slane %v980_v7, 4  ;;  %v989_v15 = vshll.u32 %v635_v2, 16  ;;  %v993_v16 = vshrl.u32 %v635_v2, 16  ;;  %v3087_v18 = vcombine.low %v968_v8, %v978_v13  ;;  %p4664_p5 = scmp.lt.s32.totalorder %s3034_s26, 3 }
  0x6a   : > { %v1592_v19 = vsel %vm3566_vm6, %v1590_v10, %v1591_v5  ;;  %v985_v20 = vrot.slane %v983_v11, 5  ;;  %v999_v21 = vshll.u32 %v636_v6, 16  ;;  %v1004_v27 = vshrl.u32 %v637_v12, 16 }
  0x6b   : > { %v3140_v24 = vcombine.low %v1589_v9, %v1592_v19  ;;  %v991_v25 = vrot.slane %v989_v15, 5  ;;  %v995_v26 = vrot.slane %v993_v16, 4  ;;  %3346 = vmatmul.mubr.msk.bf16.gmra.mxu1 %vm313_vm1, %v3087_v18  ;;  %v1007_v31 = vshll.u32 %v637_v12, 16  ;;  %s4778_s26 = smov (!%p4664_p5, %s3034_s26), 3 }
  0x6c   : > { %v986_v29 = vor.u32 %v985_v20, %v982_v14  ;;  %v1001_v30 = vrot.slane %v999_v21, 5  ;;  %v1013_v32 = vshll.u32 %v638_v17, 16  ;;  %v1006_v35 = vrot.slane %v1004_v27, 4  ;;  %s3035_s13 = sshll.u32 %s4778_s26, 2 }
  0x6d   : > { %3382 = vmatmul.mubr.msk.bf16.gmra.mxu0 %vm313_vm1, %v3140_v24  ;;  %v996_v34 = vor.u32 %v995_v26, %v991_v25  ;;  %v1017_v36 = vshrl.u32 %v638_v17, 16  ;;  %v1023_v37 = vshll.u32 %v639_v22, 16  ;;  %v1009_v40 = vrot.slane %v1007_v31, 5  ;;  %s4715_s30 = scalar_lea.vmem %s4768_s2, %s3035_s13 }
  0x6e   : > { %v987_v39 = vrot.slane %v986_v29, 4  ;;  %v1015_v41 = vrot.slane %v1013_v32, 5  ;;  %v3122_v42 = vrot.slane %v1438_v23, 9  ;;  %v1595_v47 = vrot.slane %v1439_v28, 5 }
  0x6f   : > { %v997_v44 = vrot.slane %v996_v34, 4  ;;  %v1019_v45 = vrot.slane %v1017_v36, 4  ;;  %v1025_v46 = vrot.slane %v1023_v37, 5  ;;  %v1010_v50 = vor.u32 %v1009_v40, %v1006_v35 }
  0x70   : > { %v992_v49 = vsel %vm3573_vm7, %v987_v39, %v991_v25  ;;  %v1598_v53 = vrot.slane %v1440_v33, 5  ;;  %v3123_v54 = vrot.slane %v1441_v38, 9  ;;  %v1596_v57 = vsel %vm3566_vm6, %v3122_v42, %v1595_v47 }
  0x71   : > { %v1002_v55 = vsel %vm3573_vm7, %v997_v44, %v1001_v30  ;;  %v1020_v56 = vor.u32 %v1019_v45, %v1015_v41  ;;  %v1597_v58 = vrot.slane %v1595_v47, 4  ;;  %v1011_v60 = vrot.slane %v1010_v50, 4 }
  0x72   : > { %v3088_v59 = vcombine.low %v992_v49, %v1002_v55  ;;  %v1602_v61 = vrot.slane %v1442_v43, 5  ;;  %v1605_v62 = vrot.slane %v1443_v48, 5  ;;  %vm2095_vm2 = vcmask 60416  }
  0x73   : > { %v1021_v63 = vrot.slane %v1020_v56, 4  ;;  %v1599_v0 = vsel %vm3566_vm6, %v1597_v58, %v1598_v53  ;;  %v1016_v1 = vsel %vm3573_vm7, %v1011_v60, %v1015_v41  ;;  %vm2134_vm3 = vcmask 126016  }
  0x74   : > { %3349 = vmatprep.mubr.msk.bf16.mxu1 %vm313_vm1, %v3088_v59  ;;  %v3141_v2 = vcombine.low %v1596_v57, %v1599_v0  ;;  %v1603_v3 = vsel %vm3566_vm6, %v3123_v54, %v1602_v61  ;;  %v1604_v4 = vrot.slane %v1602_v61, 4  ;;  %vm2173_vm4 = vcmask 191616  }
  0x75   : > { %v1026_v5 = vsel %vm3573_vm7, %v1021_v63, %v1025_v46  ;;  %vm2212_vm5 = vcmask 257216   ;;  %vm2290_vm7 = vcmask 388416  }
  0x76   : > { %v3089_v6 = vcombine.low %v1016_v1, %v1026_v5  ;;  %3385 = vmatprep.mubr.msk.bf16.mxu0 %vm313_vm1, %v3141_v2  ;;  %v1606_v7 = vsel %vm3566_vm6, %v1604_v4, %v1605_v62  ;;  %vm2251_vm6 = vcmask 322816  }
  0x77   : > { %v3142_v8 = vcombine.low %v1603_v3, %v1606_v7 }
  0x78   : > { %3350 = vmatmul.mubr.msk.bf16.gmra.mxu1 %vm313_vm1, %v3089_v6 }
  0x79   : > { %3386 = vmatmul.mubr.msk.bf16.gmra.mxu0 %vm313_vm1, %v3142_v8 }
  0xd4   : > { %v3303_v9 = vpop.f32.mrf.mxu1  ;;  %v3287_v11 = vpop.f32.mrf.mxu0 }
  0xd5   : > { %546 = vst.msk [vmem:[#allocation2 + $0x90] sm:$0xff] %vm527_vm8, %v3303_v9  ;;  %530 = vst.msk [vmem:[#allocation2 + $0x10] sm:$0xff] %vm527_vm8, %v3287_v11 }
  0xd6   : > { %v464_v10 = vpop.f32.mrf.mxu1  ;;  %v400_v12 = vpop.f32.mrf.mxu0 }
  0xd7   : > { %544 = vst.msk [vmem:[#allocation2 + $0x80] sm:$0xff] %vm527_vm8, %v464_v10  ;;  %528 = vst.msk [vmem:[#allocation2] sm:$0xff] %vm527_vm8, %v400_v12 }
  0xd8   : > { %v3304_v52 = vpop.f32.mrf.mxu1  ;;  %v3288_v13 = vpop.f32.mrf.mxu0 }
  0xd9   : > { %547 = vst.msk [vmem:[#allocation2 + $0x98] sm:$0xff] %vm527_vm8, %v3304_v52  ;;  %531 = vst.msk [vmem:[#allocation2 + $0x18] sm:$0xff] %vm527_vm8, %v3288_v13 }
  0xda   : > { %v467_v51 = vpop.f32.mrf.mxu1  ;;  %v403_v15 = vpop.f32.mrf.mxu0 }
  0xdb   : > { %545 = vst.msk [vmem:[#allocation2 + $0x88] sm:$0xff] %vm527_vm8, %v467_v51  ;;  %529 = vst.msk [vmem:[#allocation2 + $0x8] sm:$0xff] %vm527_vm8, %v403_v15  ;;  %v2933_v15 = vlaneseq }
  0xdc   : > { %v3307_v14 = vpop.f32.mrf.mxu1  ;;  %v3291_v17 = vpop.f32.mrf.mxu0  ;;  %v562_v38 = vld [vmem:[#allocation2 + $0x10] sm:$0xff] }
  0xdd   : > { %550 = vst.msk [vmem:[#allocation2 + $0xb0] sm:$0xff] %vm527_vm8, %v3307_v14  ;;  %534 = vst.msk [vmem:[#allocation2 + $0x30] sm:$0xff] %vm527_vm8, %v3291_v17 }
  0xde   : > { %v480_v16 = vpop.f32.mrf.mxu1  ;;  %v416_v19 = vpop.f32.mrf.mxu0  ;;  %v560_v42 = vld [vmem:[#allocation2] sm:$0xff] }
  0xdf   : > { %548 = vst.msk [vmem:[#allocation2 + $0xa0] sm:$0xff] %vm527_vm8, %v480_v16  ;;  %532 = vst.msk [vmem:[#allocation2 + $0x20] sm:$0xff] %vm527_vm8, %v416_v19 }
  0xe0   : > { %v3308_v18 = vpop.f32.mrf.mxu1  ;;  %v3292_v21 = vpop.f32.mrf.mxu0  ;;  %v563_v46 = vld [vmem:[#allocation2 + $0x18] sm:$0xff] }
  0xe1   : > { %551 = vst.msk [vmem:[#allocation2 + $0xb8] sm:$0xff] %vm527_vm8, %v3308_v18  ;;  %535 = vst.msk [vmem:[#allocation2 + $0x38] sm:$0xff] %vm527_vm8, %v3292_v21 }
  0xe2   : > { %v483_v20 = vpop.f32.mrf.mxu1  ;;  %v419_v23 = vpop.f32.mrf.mxu0  ;;  %v561_v50 = vld [vmem:[#allocation2 + $0x8] sm:$0xff] }
  0xe3   : > { %549 = vst.msk [vmem:[#allocation2 + $0xa8] sm:$0xff] %vm527_vm8, %v483_v20  ;;  %533 = vst.msk [vmem:[#allocation2 + $0x28] sm:$0xff] %vm527_vm8, %v419_v23 }
  0xe4   : > { %v3311_v22 = vpop.f32.mrf.mxu1  ;;  %v3295_v25 = vpop.f32.mrf.mxu0  ;;  %v566_v57 = vld [vmem:[#allocation2 + $0x30] sm:$0xff] }
  0xe5   : > { %554 = vst.msk [vmem:[#allocation2 + $0xd0] sm:$0xff] %vm527_vm8, %v3311_v22  ;;  %538 = vst.msk [vmem:[#allocation2 + $0x50] sm:$0xff] %vm527_vm8, %v3295_v25 }
  0xe6   : > { %v496_v24 = vpop.f32.mrf.mxu1  ;;  %v432_v27 = vpop.f32.mrf.mxu0  ;;  %v564_v63 = vld [vmem:[#allocation2 + $0x20] sm:$0xff] }
  0xe7   : > { %552 = vst.msk [vmem:[#allocation2 + $0xc0] sm:$0xff] %vm527_vm8, %v496_v24  ;;  %536 = vst.msk [vmem:[#allocation2 + $0x40] sm:$0xff] %vm527_vm8, %v432_v27 }
  0xe8   : > { %v3312_v26 = vpop.f32.mrf.mxu1  ;;  %v3296_v29 = vpop.f32.mrf.mxu0  ;;  %v567_v5 = vld [vmem:[#allocation2 + $0x38] sm:$0xff] }
  0xe9   : > { %555 = vst.msk [vmem:[#allocation2 + $0xd8] sm:$0xff] %vm527_vm8, %v3312_v26  ;;  %539 = vst.msk [vmem:[#allocation2 + $0x58] sm:$0xff] %vm527_vm8, %v3296_v29 }
  0xea   : > { %v499_v28 = vpop.f32.mrf.mxu1  ;;  %v435_v31 = vpop.f32.mrf.mxu0  ;;  %v565_v11 = vld [vmem:[#allocation2 + $0x28] sm:$0xff] }
  0xeb   : > { %553 = vst.msk [vmem:[#allocation2 + $0xc8] sm:$0xff] %vm527_vm8, %v499_v28  ;;  %537 = vst.msk [vmem:[#allocation2 + $0x48] sm:$0xff] %vm527_vm8, %v435_v31  ;;  %v3874_v28 = vshrl.u32 %v2933_v15, 7 }
  0xec   : > { %v3315_v30 = vpop.f32.mrf.mxu1  ;;  %v3299_v33 = vpop.f32.mrf.mxu0  ;;  %v570_v22 = vld [vmem:[#allocation2 + $0x50] sm:$0xff] }
  0xed   : > { %558 = vst.msk [vmem:[#allocation2 + $0xf0] sm:$0xff] %vm527_vm8, %v3315_v30  ;;  %542 = vst.msk [vmem:[#allocation2 + $0x70] sm:$0xff] %vm527_vm8, %v3299_v33  ;;  %vm2936_vm0 = vcmp.eq.s32.totalorder %v3874_v28, 1  ;;  %vm2935_vm1 = vcmp.eq.s32.totalorder %v3874_v28, 0 }
  0xee   : > { %v512_v32 = vpop.f32.mrf.mxu1  ;;  %v448_v35 = vpop.f32.mrf.mxu0 }
  0xef   : > { %556 = vst.msk [vmem:[#allocation2 + $0xe0] sm:$0xff] %vm527_vm8, %v512_v32  ;;  %540 = vst.msk [vmem:[#allocation2 + $0x60] sm:$0xff] %vm527_vm8, %v448_v35 }
  0xf0   : > { %v3316_v34 = vpop.f32.mrf.mxu1  ;;  %v3300_v37 = vpop.f32.mrf.mxu0 }
  0xf1   : > { %559 = vst.msk [vmem:[#allocation2 + $0xf8] sm:$0xff] %vm527_vm8, %v3316_v34  ;;  %543 = vst.msk [vmem:[#allocation2 + $0x78] sm:$0xff] %vm527_vm8, %v3300_v37  ;;  %v568_v34 = vld [vmem:[#allocation2 + $0x40] sm:$0xff] }
  0xf2   : > { %v515_v36 = vpop.f32.mrf.mxu1  ;;  %v451_v40 = vpop.f32.mrf.mxu0 }
  0xf3   : > { %557 = vst.msk [vmem:[#allocation2 + $0xe8] sm:$0xff] %vm527_vm8, %v515_v36  ;;  %541 = vst.msk [vmem:[#allocation2 + $0x68] sm:$0xff] %vm527_vm8, %v451_v40 }
  0xf4   : > { %v3323_v39 = vpop.f32.mrf.mxu1  ;;  %v3359_v44 = vpop.f32.mrf.mxu0 }
  0xf5   : > { %v1302_v41 = vadd.f32 %v3323_v39, %v562_v38 }
  0xf6   : > { %v1173_v43 = vpop.f32.mrf.mxu1  ;;  %v1753_v48 = vpop.f32.mrf.mxu0 }
  0xf7   : > { %1334 = vst.msk [vmem:[#allocation2 + $0x10] sm:$0xff] %vm527_vm8, %v1302_v41  ;;  %v1300_v45 = vadd.f32 %v1173_v43, %v560_v42 }
  0xf8   : > { %v3324_v47 = vpop.f32.mrf.mxu1  ;;  %v3360_v54 = vpop.f32.mrf.mxu0 }
  0xf9   : > { %1332 = vst.msk [vmem:[#allocation2] sm:$0xff] %vm527_vm8, %v1300_v45  ;;  %v1303_v49 = vadd.f32 %v3324_v47, %v563_v46  ;;  %v571_v47 = vld [vmem:[#allocation2 + $0x58] sm:$0xff] }
  0xfa   : > { %v1176_v53 = vpop.f32.mrf.mxu1  ;;  %v1756_v56 = vpop.f32.mrf.mxu0 }
  0xfb   : > { %1335 = vst.msk [vmem:[#allocation2 + $0x18] sm:$0xff] %vm527_vm8, %v1303_v49  ;;  %v1301_v55 = vadd.f32 %v1176_v53, %v561_v50 }
  0xfc   : > { %v3327_v58 = vpop.f32.mrf.mxu1  ;;  %v3363_v61 = vpop.f32.mrf.mxu0 }
  0xfd   : > { %1333 = vst.msk [vmem:[#allocation2 + $0x8] sm:$0xff] %vm527_vm8, %v1301_v55  ;;  %v1306_v60 = vadd.f32 %v3327_v58, %v566_v57 }
  0xfe   : > { %v1366_v59 = vld [vmem:[#allocation2 + $0x10] sm:$0xff]  ;;  %v1189_v0 = vpop.f32.mrf.mxu1  ;;  %v1769_v3 = vpop.f32.mrf.mxu0 }
  0xff   : > { %v1882_v62 = vadd.f32 %v3359_v44, %v1366_v59  ;;  %1338 = vst.msk [vmem:[#allocation2 + $0x30] sm:$0xff] %vm527_vm8, %v1306_v60  ;;  %v1304_v2 = vadd.f32 %v1189_v0, %v564_v63 }
 0x100   : > { %v1364_v1 = vld [vmem:[#allocation2] sm:$0xff]  ;;  %v3328_v6 = vpop.f32.mrf.mxu1  ;;  %v3364_v9 = vpop.f32.mrf.mxu0 }
 0x101   : > { %1914 = vst.msk [vmem:[#allocation2 + $0x10] sm:$0xff] %vm527_vm8, %v1882_v62  ;;  %v1880_v4 = vadd.f32 %v1753_v48, %v1364_v1  ;;  %1336 = vst.msk [vmem:[#allocation2 + $0x20] sm:$0xff] %vm527_vm8, %v1304_v2  ;;  %v1307_v8 = vadd.f32 %v3328_v6, %v567_v5 }
 0x102   : > { %v1367_v7 = vld [vmem:[#allocation2 + $0x18] sm:$0xff]  ;;  %v1192_v52 = vpop.f32.mrf.mxu1  ;;  %v1772_v14 = vpop.f32.mrf.mxu0 }
 0x103   : > { %1912 = vst.msk [vmem:[#allocation2] sm:$0xff] %vm527_vm8, %v1880_v4  ;;  %v1883_v10 = vadd.f32 %v3360_v54, %v1367_v7  ;;  %1339 = vst.msk [vmem:[#allocation2 + $0x38] sm:$0xff] %vm527_vm8, %v1307_v8  ;;  %v1305_v51 = vadd.f32 %v1192_v52, %v565_v11 }
 0x104   : > { %v1365_v12 = vld [vmem:[#allocation2 + $0x8] sm:$0xff]  ;;  %v3331_v23 = vpop.f32.mrf.mxu1  ;;  %v3872_v27 = vpop.f32.mrf.mxu0 }
 0x105   : > { %1915 = vst.msk [vmem:[#allocation2 + $0x18] sm:$0xff] %vm527_vm8, %v1883_v10  ;;  %v1881_v13 = vadd.f32 %v1756_v56, %v1365_v12  ;;  %1337 = vst.msk [vmem:[#allocation2 + $0x28] sm:$0xff] %vm527_vm8, %v1305_v51  ;;  %v1310_v26 = vadd.f32 %v3331_v23, %v570_v22 }
 0x106   : > { %v1370_v16 = vld [vmem:[#allocation2 + $0x30] sm:$0xff]  ;;  %v1205_v35 = vpop.f32.mrf.mxu1  ;;  %v3883_v41 = vpop.f32.mrf.mxu0 }
 0x107   : > { %1913 = vst.msk [vmem:[#allocation2 + $0x8] sm:$0xff] %vm527_vm8, %v1881_v13  ;;  %v1886_v18 = vadd.f32 %v3363_v61, %v1370_v16  ;;  %1342 = vst.msk [vmem:[#allocation2 + $0x50] sm:$0xff] %vm527_vm8, %v1310_v26  ;;  %v1308_v40 = vadd.f32 %v1205_v35, %v568_v34  ;;  %v569_v61 = vld [vmem:[#allocation2 + $0x48] sm:$0xff] }
 0x108   : > { %v1946_v17 = vld [vmem:[#allocation2 + $0x10] sm:$0xff]  ;;  %v1368_v21 = vld [vmem:[#allocation2 + $0x20] sm:$0xff]  ;;  %v3332_v48 = vpop.f32.mrf.mxu1  ;;  %v3891_v55 = vpop.f32.mrf.mxu0 }
 0x109   : > { %v3196_v19 = vpack.c.bf16 %v1946_v17, %v1946_v17  ;;  %v2834_v20 = vmul.f32 %v1946_v17, %v1946_v17  ;;  %1918 = vst.msk [vmem:[#allocation2 + $0x30] sm:$0xff] %vm527_vm8, %v1886_v18  ;;  %v1884_v25 = vadd.f32 %v1769_v3, %v1368_v21  ;;  %v2766_v30 = vsel %vm527_vm8, %v1946_v17, 0.0  ;;  %1340 = vst.msk [vmem:[#allocation2 + $0x40] sm:$0xff] %vm527_vm8, %v1308_v40 }
 0x10a   : > { %v1944_v24 = vld [vmem:[#allocation2] sm:$0xff]  ;;  %v1371_v33 = vld [vmem:[#allocation2 + $0x38] sm:$0xff]  ;;  %v1311_v54 = vadd.f32 %v3332_v48, %v571_v47  ;;  %v1208_v62 = vpop.f32.mrf.mxu1  ;;  %v1788_v52 = vpop.f32.mrf.mxu0  ;;  %v574_v48 = vld [vmem:[#allocation2 + $0x70] sm:$0xff] }
 0x10b   : > { %v3876_v29 = vunpack.c.l.b16 %v3196_v19  ;;  %v2867_v31 = vsel %vm527_vm8, %v2834_v20, 0.0  ;;  %v3195_v32 = vpack.c.bf16 %v1944_v24, %v1944_v24  ;;  %v2763_v36 = vsel %vm527_vm8, %v1944_v24, 0.0  ;;  %1916 = vst.msk [vmem:[#allocation2 + $0x20] sm:$0xff] %vm527_vm8, %v1884_v25 }
 0x10c   : > { %v2832_v37 = vmul.f32 %v1944_v24, %v1944_v24  ;;  %v1947_v38 = vld [vmem:[#allocation2 + $0x18] sm:$0xff]  ;;  %v1887_v39 = vadd.f32 %v3364_v9, %v1371_v33  ;;  %v1369_v46 = vld [vmem:[#allocation2 + $0x28] sm:$0xff]  ;;  %1343 = vst.msk [vmem:[#allocation2 + $0x58] sm:$0xff] %vm527_vm8, %v1311_v54  ;;  %v1309_v1 = vadd.f32 %v1208_v62, %v569_v61 }
 0x10d   : > { %v3885_v42 = vunpack.c.l.b16 %v3195_v32  ;;  %v3212_v43 = vpack.c.bf16 %v1947_v38, %v1947_v38  ;;  %v2768_v44 = vsel %vm527_vm8, %v1947_v38, 0.0  ;;  %v2835_v45 = vmul.f32 %v1947_v38, %v1947_v38 }
 0x10e   : > { %v2864_v49 = vsel %vm527_vm8, %v2832_v37, 0.0  ;;  %v1945_v50 = vld [vmem:[#allocation2 + $0x8] sm:$0xff]  ;;  %1919 = vst.msk [vmem:[#allocation2 + $0x38] sm:$0xff] %vm527_vm8, %v1887_v39  ;;  %v1885_v53 = vadd.f32 %v1772_v14, %v1369_v46  ;;  %v2294_v56 = vrot.slane %v3876_v29, 5  ;;  %v2138_v6 = vrot.slane %v3876_v29, 1  ;;  %1341 = vst.msk [vmem:[#allocation2 + $0x48] sm:$0xff] %vm527_vm8, %v1309_v1 }
 0x10f   : > { %v3894_v57 = vunpack.c.l.b16 %v3212_v43  ;;  %v2869_v58 = vsel %vm527_vm8, %v2835_v45, 0.0  ;;  %v3211_v59 = vpack.c.bf16 %v1945_v50, %v1945_v50  ;;  %v2764_v60 = vsel %vm527_vm8, %v1945_v50, 0.0  ;;  %v1374_v14 = vld [vmem:[#allocation2 + $0x50] sm:$0xff] }
 0x110   : > { %v2765_v63 = vadd.f32 %v2764_v60, %v2763_v36  ;;  %v2833_v0 = vmul.f32 %v1945_v50, %v1945_v50  ;;  %1917 = vst.msk [vmem:[#allocation2 + $0x28] sm:$0xff] %vm527_vm8, %v1885_v53  ;;  %v2293_v2 = vrot.slane %v3885_v42, 6  ;;  %v1950_v4 = vld [vmem:[#allocation2 + $0x30] sm:$0xff]  ;;  %v2137_v5 = vrot.slane %v3885_v42, 2  ;;  %v1372_v26 = vld [vmem:[#allocation2 + $0x40] sm:$0xff]  ;;  %v3921_v36 = vpop.f32.mrf.mxu0 }
 0x111   : > { %v3901_v3 = vunpack.c.l.b16 %v3211_v59  ;;  %v2098_v7 = vrot.slane %v3885_v42, 1  ;;  %v3198_v10 = vpack.c.bf16 %v1950_v4, %v1950_v4  ;;  %v2774_v11 = vsel %vm527_vm8, %v1950_v4, 0.0 }
 0x112   : > { %v2767_v8 = vadd.f32 %v2766_v30, %v2765_v63  ;;  %v2865_v9 = vsel %vm527_vm8, %v2833_v0, 0.0  ;;  %v2838_v51 = vmul.f32 %v1950_v4, %v1950_v4  ;;  %v1948_v13 = vld [vmem:[#allocation2 + $0x20] sm:$0xff]  ;;  %v3910_v15 = vsel %vm2057_vm9, %v2294_v56, %v2293_v2  ;;  %v3335_v30 = vpop.f32.mrf.mxu1  ;;  %v575_v0 = vld [vmem:[#allocation2 + $0x78] sm:$0xff] }
 0x113   : > { %v2866_v12 = vadd.f32 %v2865_v9, %v2864_v49  ;;  %v2139_v16 = vsel %vm2057_vm9, %v2138_v6, %v2137_v5  ;;  %v3913_v17 = vunpack.c.l.b16 %v3198_v10  ;;  %v3197_v18 = vpack.c.bf16 %v1948_v13, %v1948_v13  ;;  %v1375_v40 = vld [vmem:[#allocation2 + $0x58] sm:$0xff]  ;;  %v3929_v49 = vpop.f32.mrf.mxu0 }
 0x114   : > { %v2769_v19 = vadd.f32 %v2768_v44, %v2767_v8  ;;  %v2770_v20 = vsel %vm527_vm8, %v1948_v13, 0.0  ;;  %v2875_v22 = vsel %vm527_vm8, %v2838_v51, 0.0  ;;  %v2836_v23 = vmul.f32 %v1948_v13, %v1948_v13  ;;  %v1221_v43 = vpop.f32.mrf.mxu1  ;;  %v573_v8 = vld [vmem:[#allocation2 + $0x68] sm:$0xff] }
 0x115   : > { %v2868_v21 = vadd.f32 %v2867_v31, %v2866_v12  ;;  %v1951_v24 = vld [vmem:[#allocation2 + $0x38] sm:$0xff]  ;;  %v1890_v25 = vadd.f32 %v3872_v27, %v1374_v14  ;;  %v3918_v32 = vunpack.c.l.b16 %v3197_v18  ;;  %v1888_v27 = vadd.f32 %v3883_v41, %v1372_v26  ;;  %v1373_v41 = vld [vmem:[#allocation2 + $0x48] sm:$0xff]  ;;  %v3937_v1 = vpop.f32.mrf.mxu0 }
 0x116   : > { %v2771_v33 = vadd.f32 %v2770_v20, %v2769_v19  ;;  %v3214_v34 = vpack.c.bf16 %v1951_v24, %v1951_v24  ;;  %v2776_v35 = vsel %vm527_vm8, %v1951_v24, 0.0  ;;  %v2871_v31 = vsel %vm527_vm8, %v2836_v23, 0.0  ;;  %v3336_v59 = vpop.f32.mrf.mxu1 }
 0x117   : > { %v2870_v37 = vadd.f32 %v2869_v58, %v2868_v21  ;;  %v2839_v38 = vmul.f32 %v1951_v24, %v1951_v24  ;;  %v1949_v39 = vld [vmem:[#allocation2 + $0x28] sm:$0xff]  ;;  %1922 = vst.msk [vmem:[#allocation2 + $0x50] sm:$0xff] %vm527_vm8, %v1890_v25  ;;  %1920 = vst.msk [vmem:[#allocation2 + $0x40] sm:$0xff] %vm527_vm8, %v1888_v27  ;;  %v1314_v56 = vadd.f32 %v3335_v30, %v574_v48  ;;  %v572_v58 = vld [vmem:[#allocation2 + $0x60] sm:$0xff]  ;;  %v2296_v12 = vrot.slane %v3918_v32, 4  ;;  %v3954_v19 = vpop.f32.mrf.mxu0 }
 0x118   : > { %v3926_v44 = vunpack.c.l.b16 %v3214_v34  ;;  %v3213_v45 = vpack.c.bf16 %v1949_v39, %v1949_v39  ;;  %v2772_v46 = vsel %vm527_vm8, %v1949_v39, 0.0  ;;  %v2837_v47 = vmul.f32 %v1949_v39, %v1949_v39  ;;  %v1224_v9 = vpop.f32.mrf.mxu1  ;;  %v578_v39 = vld [vmem:[#allocation2 + $0x90] sm:$0xff] }
 0x119   : > { %v2872_v50 = vadd.f32 %v2871_v31, %v2870_v37  ;;  %v2877_v53 = vsel %vm527_vm8, %v2839_v38, 0.0  ;;  %v2773_v54 = vadd.f32 %v2772_v46, %v2771_v33  ;;  %v1891_v62 = vadd.f32 %v3891_v55, %v1375_v40  ;;  %1346 = vst.msk [vmem:[#allocation2 + $0x70] sm:$0xff] %vm527_vm8, %v1314_v56 }
 0x11a   : > { %v3933_v60 = vunpack.c.l.b16 %v3213_v45  ;;  %v2873_v61 = vsel %vm527_vm8, %v2837_v47, 0.0  ;;  %v1312_v63 = vadd.f32 %v1221_v43, %v572_v58  ;;  %v1889_v5 = vadd.f32 %v1788_v52, %v1373_v41  ;;  %v3339_v27 = vpop.f32.mrf.mxu1  ;;  %v3974_v47 = vpop.f32.mrf.mxu0 }
 0x11b   : > { %v2775_v2 = vadd.f32 %v2774_v11, %v2773_v54  ;;  %v2874_v4 = vadd.f32 %v2873_v61, %v2872_v50  ;;  %v1315_v6 = vadd.f32 %v3336_v59, %v575_v0  ;;  %1923 = vst.msk [vmem:[#allocation2 + $0x58] sm:$0xff] %vm527_vm8, %v1891_v62  ;;  %v1313_v10 = vadd.f32 %v1224_v9, %v573_v8 }
 0x11c   : > { %1344 = vst.msk [vmem:[#allocation2 + $0x60] sm:$0xff] %vm527_vm8, %v1312_v63  ;;  %v2298_v55 = vrot.slane %v3913_v17, 3  ;;  %v2140_v51 = vsel %vm2060_vm10, %v3918_v32, %v2139_v16  ;;  %1921 = vst.msk [vmem:[#allocation2 + $0x48] sm:$0xff] %vm527_vm8, %v1889_v5  ;;  %v2141_v52 = vrot.slane %v3913_v17, 7  ;;  %v2099_v14 = vsel %vm2057_vm9, %v3876_v29, %v2098_v7  ;;  %v1237_v58 = vpop.f32.mrf.mxu1  ;;  %v3985_v5 = vpop.f32.mrf.mxu0 }
 0x11d   : > { %v2876_v11 = vadd.f32 %v2875_v22, %v2874_v4  ;;  %v2777_v13 = vadd.f32 %v2776_v35, %v2775_v2  ;;  %1347 = vst.msk [vmem:[#allocation2 + $0x78] sm:$0xff] %vm527_vm8, %v1315_v6  ;;  %1345 = vst.msk [vmem:[#allocation2 + $0x68] sm:$0xff] %vm527_vm8, %v1313_v10  ;;  %v2297_v16 = vsel %vm2060_vm10, %v2296_v12, %v3910_v15  ;;  %v2100_v20 = vrot.slane %v3918_v32, 7 }
 0x11e   : > { %v1954_v18 = vld [vmem:[#allocation2 + $0x50] sm:$0xff]  ;;  %v2102_v21 = vrot.slane %v3913_v17, 6  ;;  %v2176_v22 = vrot.slane %v3885_v42, 3  ;;  %v1952_v7 = vld [vmem:[#allocation2 + $0x40] sm:$0xff]  ;;  %v3963_v30 = vsel %vm2063_vm11, %v2298_v55, %v2297_v16  ;;  %v3966_v33 = vsel %vm2063_vm11, %v2141_v52, %v2140_v51  ;;  %v3340_v12 = vpop.f32.mrf.mxu1 }
 0x11f   : > { %v3200_v23 = vpack.c.bf16 %v1954_v18, %v1954_v18  ;;  %v2782_v24 = vsel %vm527_vm8, %v1954_v18, 0.0  ;;  %v2842_v25 = vmul.f32 %v1954_v18, %v1954_v18  ;;  %v2878_v26 = vadd.f32 %v2877_v53, %v2876_v11  ;;  %v576_v52 = vld [vmem:[#allocation2 + $0x80] sm:$0xff] }
 0x120   : > { %v2101_v15 = vsel %vm2060_vm10, %v2100_v20, %v2099_v14  ;;  %v2177_v34 = vrot.slane %v3876_v29, 2  ;;  %v3199_v31 = vpack.c.bf16 %v1952_v7, %v1952_v7  ;;  %v2778_v38 = vsel %vm527_vm8, %v1952_v7, 0.0  ;;  %v1378_v45 = vld [vmem:[#allocation2 + $0x70] sm:$0xff]  ;;  %v3993_v14 = vpop.f32.mrf.mxu0 }
 0x121   : > { %v3970_v35 = vunpack.c.l.b16 %v3200_v23  ;;  %v2883_v37 = vsel %vm527_vm8, %v2842_v25, 0.0  ;;  %v2779_v40 = vadd.f32 %v2778_v38, %v2777_v13  ;;  %v2840_v43 = vmul.f32 %v1952_v7, %v1952_v7  ;;  %v579_v23 = vld [vmem:[#allocation2 + $0x98] sm:$0xff]  ;;  %v1240_v25 = vpop.f32.mrf.mxu1 }
 0x122   : > { %v1318_v46 = vadd.f32 %v3339_v27, %v578_v39  ;;  %v2103_v48 = vsel %vm2063_vm11, %v2102_v21, %v2101_v15  ;;  %v3977_v50 = vunpack.c.l.b16 %v3199_v31  ;;  %v1955_v53 = vld [vmem:[#allocation2 + $0x58] sm:$0xff]  ;;  %v1894_v54 = vadd.f32 %v3921_v36, %v1378_v45 }
 0x123   : > { %v1376_v56 = vld [vmem:[#allocation2 + $0x60] sm:$0xff]  ;;  %v2302_v41 = vrot.slane %v3970_v35, 1  ;;  %v2145_v59 = vrot.slane %v3970_v35, 5  ;;  %v2879_v61 = vsel %vm527_vm8, %v2840_v43, 0.0  ;;  %v3216_v62 = vpack.c.bf16 %v1955_v53, %v1955_v53  ;;  %v1953_v2 = vld [vmem:[#allocation2 + $0x48] sm:$0xff] }
 0x124   : > { %v2784_v63 = vsel %vm527_vm8, %v1955_v53, 0.0  ;;  %v2843_v0 = vmul.f32 %v1955_v53, %v1955_v53  ;;  %1350 = vst.msk [vmem:[#allocation2 + $0x90] sm:$0xff] %vm527_vm8, %v1318_v46  ;;  %v1379_v4 = vld [vmem:[#allocation2 + $0x78] sm:$0xff]  ;;  %v2880_v36 = vadd.f32 %v2879_v61, %v2878_v26  ;;  %v3215_v6 = vpack.c.bf16 %v1953_v2, %v1953_v2  ;;  %1926 = vst.msk [vmem:[#allocation2 + $0x70] sm:$0xff] %vm527_vm8, %v1894_v54  ;;  %v1377_v10 = vld [vmem:[#allocation2 + $0x68] sm:$0xff] }
 0x125   : > { %v2780_v8 = vsel %vm527_vm8, %v1953_v2, 0.0  ;;  %v2841_v9 = vmul.f32 %v1953_v2, %v1953_v2  ;;  %v3989_v55 = vunpack.c.l.b16 %v3216_v62  ;;  %v1892_v13 = vadd.f32 %v3929_v49, %v1376_v56  ;;  %v577_v49 = vld [vmem:[#allocation2 + $0x88] sm:$0xff]  ;;  %v3343_v2 = vpop.f32.mrf.mxu1 }
 0x126   : > { %v2885_v51 = vsel %vm527_vm8, %v2843_v0, 0.0  ;;  %v2781_v11 = vadd.f32 %v2780_v8, %v2779_v40  ;;  %v3995_v18 = vunpack.c.l.b16 %v3215_v6  ;;  %v1895_v20 = vadd.f32 %v3937_v1, %v1379_v4  ;;  %v582_v0 = vld [vmem:[#allocation2 + $0xb0] sm:$0xff] }
 0x127   : > { %v2881_v16 = vsel %vm527_vm8, %v2841_v9, 0.0  ;;  %v1316_v21 = vadd.f32 %v1237_v58, %v576_v52  ;;  %1924 = vst.msk [vmem:[#allocation2 + $0x60] sm:$0xff] %vm527_vm8, %v1892_v13  ;;  %v1893_v15 = vadd.f32 %v3954_v19, %v1377_v10  ;;  %v1319_v31 = vadd.f32 %v3340_v12, %v579_v23  ;;  %v4008_v19 = vpop.f32.mrf.mxu0  ;;  %v580_v9 = vld [vmem:[#allocation2 + $0xa0] sm:$0xff]  ;;  %v1253_v10 = vpop.f32.mrf.mxu1 }
 0x128   : > { %v2783_v26 = vadd.f32 %v2782_v24, %v2781_v11  ;;  %v2882_v7 = vadd.f32 %v2881_v16, %v2880_v36  ;;  %1927 = vst.msk [vmem:[#allocation2 + $0x78] sm:$0xff] %vm527_vm8, %v1895_v20  ;;  %v1317_v38 = vadd.f32 %v1240_v25, %v577_v49  ;;  %v2300_v39 = vrot.slane %v3977_v50, 2 }
 0x129   : > { %1348 = vst.msk [vmem:[#allocation2 + $0x80] sm:$0xff] %vm527_vm8, %v1316_v21  ;;  %v2143_v1 = vrot.slane %v3977_v50, 6  ;;  %v2104_v27 = vrot.slane %v3977_v50, 5  ;;  %1925 = vst.msk [vmem:[#allocation2 + $0x68] sm:$0xff] %vm527_vm8, %v1893_v15  ;;  %v2106_v43 = vrot.slane %v3970_v35, 4  ;;  %v2178_v45 = vsel %vm2057_vm9, %v2177_v34, %v2176_v22  ;;  %v4035_v36 = vpop.f32.mrf.mxu0 }
 0x12a   : > { %v2884_v40 = vadd.f32 %v2883_v37, %v2882_v7  ;;  %v2785_v24 = vadd.f32 %v2784_v63, %v2783_v26  ;;  %1351 = vst.msk [vmem:[#allocation2 + $0x98] sm:$0xff] %vm527_vm8, %v1319_v31  ;;  %1349 = vst.msk [vmem:[#allocation2 + $0x88] sm:$0xff] %vm527_vm8, %v1317_v38  ;;  %v2301_v37 = vsel %vm2066_vm12, %v2300_v39, %v3963_v30  ;;  %v2179_v56 = vrot.slane %v3918_v32, 1  ;;  %v3344_v39 = vpop.f32.mrf.mxu1 }
 0x12b   : > { %v1382_v46 = vld [vmem:[#allocation2 + $0x90] sm:$0xff]  ;;  %v2144_v53 = vsel %vm2066_vm12, %v2143_v1, %v3966_v33  ;;  %v2105_v54 = vsel %vm2066_vm12, %v2104_v27, %v2103_v48  ;;  %v4025_v63 = vsel %vm2069_vm13, %v2302_v41, %v2301_v37  ;;  %v1322_v4 = vadd.f32 %v3343_v2, %v582_v0  ;;  %v1833_v21 = vpop.f32.mrf.mxu0  ;;  %v583_v2 = vld [vmem:[#allocation2 + $0xb8] sm:$0xff] }
 0x12c   : > { %v1958_v58 = vld [vmem:[#allocation2 + $0x70] sm:$0xff]  ;;  %v2886_v61 = vadd.f32 %v2885_v51, %v2884_v40  ;;  %v1898_v62 = vadd.f32 %v3974_v47, %v1382_v46  ;;  %v4028_v22 = vsel %vm2069_vm13, %v2145_v59, %v2144_v53  ;;  %v4032_v48 = vsel %vm2069_vm13, %v2106_v43, %v2105_v54 }
 0x12d   : > { %v2790_v34 = vsel %vm527_vm8, %v1958_v58, 0.0  ;;  %v2846_v30 = vmul.f32 %v1958_v58, %v1958_v58  ;;  %v3202_v33 = vpack.c.bf16 %v1958_v58, %v1958_v58  ;;  %v2180_v47 = vsel %vm2060_vm10, %v2179_v56, %v2178_v45  ;;  %1354 = vst.msk [vmem:[#allocation2 + $0xb0] sm:$0xff] %vm527_vm8, %v1322_v4  ;;  %v4054_v46 = vpop.f32.mrf.mxu0  ;;  %v1256_v56 = vpop.f32.mrf.mxu1 }
 0x12e   : > { %1930 = vst.msk [vmem:[#allocation2 + $0x90] sm:$0xff] %vm527_vm8, %v1898_v62  ;;  %v2182_v41 = vrot.slane %v3977_v50, 7  ;;  %v2184_v59 = vrot.slane %v3970_v35, 6  ;;  %v1956_v8 = vld [vmem:[#allocation2 + $0x60] sm:$0xff]  ;;  %v4045_v51 = vsel %vm2063_vm11, %v3913_v17, %v2180_v47  ;;  %v2215_v11 = vrot.slane %v3885_v42, 4 }
 0x12f   : > { %v2891_v6 = vsel %vm527_vm8, %v2846_v30, 0.0  ;;  %v4041_v12 = vunpack.c.l.b16 %v3202_v33  ;;  %v2786_v13 = vsel %vm527_vm8, %v1956_v8, 0.0  ;;  %v2844_v52 = vmul.f32 %v1956_v8, %v1956_v8  ;;  %v1959_v16 = vld [vmem:[#allocation2 + $0x78] sm:$0xff] }
 0x130   : > { %v1320_v20 = vadd.f32 %v1253_v10, %v580_v9  ;;  %v3201_v23 = vpack.c.bf16 %v1956_v8, %v1956_v8  ;;  %v2787_v25 = vadd.f32 %v2786_v13, %v2785_v24  ;;  %v3218_v26 = vpack.c.bf16 %v1959_v16, %v1959_v16  ;;  %v1957_v31 = vld [vmem:[#allocation2 + $0x68] sm:$0xff]  ;;  %v1380_v49 = vld [vmem:[#allocation2 + $0x80] sm:$0xff] }
 0x131   : > { %v2792_v7 = vsel %vm527_vm8, %v1959_v16, 0.0  ;;  %v2847_v15 = vmul.f32 %v1959_v16, %v1959_v16  ;;  %v1383_v38 = vld [vmem:[#allocation2 + $0x98] sm:$0xff]  ;;  %v2887_v1 = vsel %vm527_vm8, %v2844_v52, 0.0  ;;  %v3217_v27 = vpack.c.bf16 %v1957_v31, %v1957_v31  ;;  %v1381_v45 = vld [vmem:[#allocation2 + $0x88] sm:$0xff]  ;;  %v4070_v16 = vpop.f32.mrf.mxu0 }
 0x132   : > { %v2788_v40 = vsel %vm527_vm8, %v1957_v31, 0.0  ;;  %v2845_v43 = vmul.f32 %v1957_v31, %v1957_v31  ;;  %1352 = vst.msk [vmem:[#allocation2 + $0xa0] sm:$0xff] %vm527_vm8, %v1320_v20  ;;  %v2888_v24 = vadd.f32 %v2887_v1, %v2886_v61  ;;  %v4056_v37 = vunpack.c.l.b16 %v3218_v26  ;;  %v581_v9 = vld [vmem:[#allocation2 + $0xa8] sm:$0xff] }
 0x133   : > { %v2893_v53 = vsel %vm527_vm8, %v2847_v15, 0.0  ;;  %v2789_v54 = vadd.f32 %v2788_v40, %v2787_v25  ;;  %v4059_v58 = vunpack.c.l.b16 %v3217_v27  ;;  %v1896_v30 = vadd.f32 %v3985_v5, %v1380_v49 }
 0x134   : > { %v2889_v62 = vsel %vm527_vm8, %v2845_v43, 0.0  ;;  %v1899_v0 = vadd.f32 %v3993_v14, %v1383_v38  ;;  %v1897_v61 = vadd.f32 %v4008_v19, %v1381_v45  ;;  %v1323_v8 = vadd.f32 %v3344_v39, %v583_v2  ;;  %v1386_v19 = vld [vmem:[#allocation2 + $0xb0] sm:$0xff]  ;;  %v3347_v39 = vpop.f32.mrf.mxu1  ;;  %v4091_v43 = vpop.f32.mrf.mxu0 }
 0x135   : > { %v2791_v33 = vadd.f32 %v2790_v34, %v2789_v54  ;;  %v2890_v4 = vadd.f32 %v2889_v62, %v2888_v24  ;;  %v1962_v47 = vld [vmem:[#allocation2 + $0x90] sm:$0xff]  ;;  %1928 = vst.msk [vmem:[#allocation2 + $0x80] sm:$0xff] %vm527_vm8, %v1896_v30  ;;  %v1321_v5 = vadd.f32 %v1256_v56, %v581_v9  ;;  %v4074_v20 = vunpack.c.l.b16 %v3201_v23 }
 0x136   : > { %v3204_v10 = vpack.c.bf16 %v1962_v47, %v1962_v47  ;;  %v4066_v13 = vsel %vm527_vm8, %v1962_v47, 0.0  ;;  %v2850_v52 = vmul.f32 %v1962_v47, %v1962_v47  ;;  %1931 = vst.msk [vmem:[#allocation2 + $0x98] sm:$0xff] %vm527_vm8, %v1899_v0  ;;  %1929 = vst.msk [vmem:[#allocation2 + $0x88] sm:$0xff] %vm527_vm8, %v1897_v61  ;;  %v2305_v25 = vrot.slane %v4041_v12, 7  ;;  %v586_v38 = vld [vmem:[#allocation2 + $0xd0] sm:$0xff]  ;;  %v1269_v54 = vpop.f32.mrf.mxu1  ;;  %v4112_v47 = vpop.f32.mrf.mxu0 }
 0x137   : > { %v2892_v14 = vadd.f32 %v2891_v6, %v2890_v4  ;;  %v2793_v34 = vadd.f32 %v2792_v7, %v2791_v33  ;;  %1355 = vst.msk [vmem:[#allocation2 + $0xb8] sm:$0xff] %vm527_vm8, %v1323_v8  ;;  %v1902_v31 = vadd.f32 %v4035_v36, %v1386_v19  ;;  %1353 = vst.msk [vmem:[#allocation2 + $0xa8] sm:$0xff] %vm527_vm8, %v1321_v5  ;;  %v2149_v6 = vrot.slane %v4041_v12, 3 }
 0x138   : > { %v4077_v26 = vunpack.c.l.b16 %v3204_v10  ;;  %v4080_v15 = vsel %vm527_vm8, %v2850_v52, 0.0  ;;  %v2304_v23 = vsel %vm2072_vm14, %v4074_v20, %v4025_v63  ;;  %v2147_v1 = vrot.slane %v4074_v20, 4  ;;  %v3348_v4 = vpop.f32.mrf.mxu1 }
 0x139   : > { %v2894_v7 = vadd.f32 %v2893_v53, %v2892_v14  ;;  %v1384_v49 = vld [vmem:[#allocation2 + $0xa0] sm:$0xff]  ;;  %v2108_v27 = vrot.slane %v4074_v20, 3  ;;  %1934 = vst.msk [vmem:[#allocation2 + $0xb0] sm:$0xff] %vm527_vm8, %v1902_v31  ;;  %v1326_v36 = vadd.f32 %v3347_v39, %v586_v38  ;;  %v2306_v45 = vsel %vm2075_vm15, %v2305_v25, %v2304_v23 }
 0x13a   : > { %v1900_v40 = vadd.f32 %v1833_v21, %v1384_v49  ;;  %v2110_v24 = vrot.slane %v4041_v12, 2  ;;  %v584_v53 = vld [vmem:[#allocation2 + $0xc0] sm:$0xff]  ;;  %v2321_v56 = vpack.c.b16 %v2306_v45, %v2306_v45  ;;  %v2148_v63 = vsel %vm2072_vm14, %v2147_v1, %v4028_v22 }
 0x13b   : > { %v2109_v62 = vsel %vm2072_vm14, %v2108_v27, %v4032_v48  ;;  %v2183_v21 = vsel %vm2066_vm12, %v2182_v41, %v4045_v51  ;;  %1358 = vst.msk [vmem:[#allocation2 + $0xd0] sm:$0xff] %vm527_vm8, %v1326_v36  ;;  %v1324_v30 = vadd.f32 %v1269_v54, %v584_v53  ;;  %v2150_v0 = vsel %vm2075_vm15, %v2149_v6, %v2148_v63  ;;  %v4130_v53 = vpop.f32.mrf.mxu0 }
 0x13c   : > { %1932 = vst.msk [vmem:[#allocation2 + $0xa0] sm:$0xff] %vm527_vm8, %v1900_v40  ;;  %v2111_v2 = vsel %vm2075_vm15, %v2110_v24, %v2109_v62  ;;  %v4110_v22 = vsel %vm2069_vm13, %v2184_v59, %v2183_v21  ;;  %v1960_v48 = vld [vmem:[#allocation2 + $0x80] sm:$0xff]  ;;  %2323 = vrot.lane.b32.xlu0 %v2321_v56, %s3451_s4  ;;  %v2165_v41 = vpack.c.b16 %v2150_v0, %v2150_v0  ;;  %v2186_v61 = vrot.slane %v4074_v20, 5  ;;  %v1272_v24 = vpop.f32.mrf.mxu1  ;;  %v587_v21 = vld [vmem:[#allocation2 + $0xd8] sm:$0xff] }
 0x13d   : > { %v1963_v33 = vld [vmem:[#allocation2 + $0x98] sm:$0xff]  ;;  %v2126_v51 = vpack.c.b16 %v2111_v2, %v2111_v2  ;;  %v2188_v8 = vrot.slane %v4041_v12, 4  ;;  %v3203_v9 = vpack.c.bf16 %v1960_v48, %v1960_v48  ;;  %v2794_v10 = vsel %vm527_vm8, %v1960_v48, 0.0  ;;  %v1961_v5 = vld [vmem:[#allocation2 + $0x88] sm:$0xff]  ;;  %1356 = vst.msk [vmem:[#allocation2 + $0xc0] sm:$0xff] %vm527_vm8, %v1324_v30 }
 0x13e   : > { %v2848_v52 = vmul.f32 %v1960_v48, %v1960_v48  ;;  %v3220_v59 = vpack.c.bf16 %v1963_v33, %v1963_v33  ;;  %v2795_v14 = vadd.f32 %v2794_v10, %v2793_v34  ;;  %v2800_v19 = vsel %vm527_vm8, %v1963_v33, 0.0  ;;  %2167 = vrot.lane.b32.xlu1 %v2165_v41, %s3452_s5  ;;  %v1387_v23 = vld [vmem:[#allocation2 + $0xb8] sm:$0xff]  ;;  %v1385_v1 = vld [vmem:[#allocation2 + $0xa8] sm:$0xff] }
 0x13f   : > { %v2851_v25 = vmul.f32 %v1963_v33, %v1963_v33  ;;  %v3219_v31 = vpack.c.bf16 %v1961_v5, %v1961_v5  ;;  %v4121_v6 = vunpack.c.l.b16 %v3203_v9  ;;  %v2796_v39 = vsel %vm527_vm8, %v1961_v5, 0.0 }
 0x140   : > { %v2895_v49 = vsel %vm527_vm8, %v2848_v52, 0.0  ;;  %v4124_v38 = vunpack.c.l.b16 %v3220_v59  ;;  %v2797_v36 = vadd.f32 %v2796_v39, %v2795_v14  ;;  %v1966_v45 = vld [vmem:[#allocation2 + $0xb0] sm:$0xff]  ;;  %2128 = vrot.lane.b32.xlu0 %v2126_v51, %s3453_s6  ;;  %v2849_v54 = vmul.f32 %v1961_v5, %v1961_v5  ;;  %v4149_v14 = vpop.f32.mrf.mxu0 }
 0x141   : > { %v2896_v27 = vadd.f32 %v2895_v49, %v2894_v7  ;;  %v2901_v34 = vsel %vm527_vm8, %v2851_v25, 0.0  ;;  %v4128_v40 = vunpack.c.l.b16 %v3219_v31  ;;  %v3206_v56 = vpack.c.bf16 %v1966_v45, %v1966_v45  ;;  %v590_v39 = vld [vmem:[#allocation2 + $0xf0] sm:$0xff] }
 0x142   : > { %v4134_v63 = vsel %vm527_vm8, %v1966_v45, 0.0  ;;  %v2854_v62 = vmul.f32 %v1966_v45, %v1966_v45  ;;  %v2799_v7 = vadd.f32 %v4066_v13, %v2797_v36  ;;  %v1903_v0 = vadd.f32 %v4054_v46, %v1387_v23  ;;  %v1390_v33 = vld [vmem:[#allocation2 + $0xd0] sm:$0xff]  ;;  %v585_v46 = vld [vmem:[#allocation2 + $0xc8] sm:$0xff]  ;;  %v588_v45 = vld [vmem:[#allocation2 + $0xe0] sm:$0xff] }
 0x143   : > { %v1964_v30 = vld [vmem:[#allocation2 + $0xa0] sm:$0xff]  ;;  %v1901_v2 = vadd.f32 %v4070_v16, %v1385_v1  ;;  %v1327_v48 = vadd.f32 %v3348_v4, %v587_v21  ;;  %v2897_v41 = vsel %vm527_vm8, %v2849_v54, 0.0  ;;  %v4140_v9 = vunpack.c.l.b16 %v3206_v56  ;;  %v3351_v4 = vpop.f32.mrf.mxu1 }
 0x144   : > { %v4143_v51 = vsel %vm527_vm8, %v2854_v62, 0.0  ;;  %v3205_v10 = vpack.c.bf16 %v1964_v30, %v1964_v30  ;;  %v2898_v52 = vadd.f32 %v2897_v41, %v2896_v27  ;;  %v2801_v59 = vadd.f32 %v2800_v19, %v2799_v7  ;;  %1935 = vst.msk [vmem:[#allocation2 + $0xb8] sm:$0xff] %vm527_vm8, %v1903_v0  ;;  %v1388_v16 = vld [vmem:[#allocation2 + $0xc0] sm:$0xff]  ;;  %v591_v62 = vld [vmem:[#allocation2 + $0xf8] sm:$0xff]  ;;  %v3387_v7 = vpop.f32.mrf.mxu0  ;;  %v589_v41 = vld [vmem:[#allocation2 + $0xe8] sm:$0xff] }
 0x145   : > { %v2802_v5 = vsel %vm527_vm8, %v1964_v30, 0.0  ;;  %v2852_v13 = vmul.f32 %v1964_v30, %v1964_v30  ;;  %1933 = vst.msk [vmem:[#allocation2 + $0xa8] sm:$0xff] %vm527_vm8, %v1901_v2  ;;  %1359 = vst.msk [vmem:[#allocation2 + $0xd8] sm:$0xff] %vm527_vm8, %v1327_v48  ;;  %v1906_v31 = vadd.f32 %v4091_v43, %v1390_v33  ;;  %v1325_v49 = vadd.f32 %v1272_v24, %v585_v46  ;;  %v1285_v54 = vpop.f32.mrf.mxu1 }
 0x146   : > { %v4151_v25 = vunpack.c.l.b16 %v3205_v10  ;;  %v1904_v19 = vadd.f32 %v4112_v47, %v1388_v16  ;;  %v2900_v23 = vadd.f32 %v4080_v15, %v2898_v52  ;;  %v2803_v1 = vadd.f32 %v2802_v5, %v2801_v59 }
 0x147   : > { %v2903_v27 = vsel %vm527_vm8, %v2852_v13, 0.0  ;;  %v1330_v36 = vadd.f32 %v3351_v4, %v590_v39  ;;  %1938 = vst.msk [vmem:[#allocation2 + $0xd0] sm:$0xff] %vm527_vm8, %v1906_v31  ;;  %1357 = vst.msk [vmem:[#allocation2 + $0xc8] sm:$0xff] %vm527_vm8, %v1325_v49  ;;  %v1328_v56 = vadd.f32 %v1285_v54, %v588_v45  ;;  %v2187_v43 = vsel %vm2072_vm14, %v2186_v61, %v4110_v22  ;;  %v3352_v21 = vpop.f32.mrf.mxu1 }
 0x148   : > { %1936 = vst.msk [vmem:[#allocation2 + $0xc0] sm:$0xff] %vm527_vm8, %v1904_v19  ;;  %v2216_v15 = vrot.slane %v3876_v29, 3  ;;  %v2218_v47 = vrot.slane %v3918_v32, 2  ;;  %v2902_v24 = vadd.f32 %v2901_v34, %v2900_v23  ;;  %v2189_v30 = vsel %vm2075_vm15, %v2188_v8, %v2187_v43 }
 0x149   : > { %1362 = vst.msk [vmem:[#allocation2 + $0xf0] sm:$0xff] %vm527_vm8, %v1330_v36  ;;  %v2220_v0 = vrot.slane %v3913_v17, 1  ;;  %v2223_v2 = vrot.slane %v3970_v35, 7  ;;  %1360 = vst.msk [vmem:[#allocation2 + $0xe0] sm:$0xff] %vm527_vm8, %v1328_v56  ;;  %v1331_v22 = vadd.f32 %v3352_v21, %v591_v62  ;;  %v2204_v61 = vpack.c.b16 %v2189_v30, %v2189_v30  ;;  %v1288_v10 = vpop.f32.mrf.mxu1 }
 0x14a   : > { %v2217_v34 = vsel %vm2057_vm9, %v2216_v15, %v2215_v11  ;;  %v2225_v48 = vrot.slane %v4074_v20, 6  ;;  %v2904_v33 = vadd.f32 %v2903_v27, %v2902_v24  ;;  %v2227_v8 = vrot.slane %v4041_v12, 5  ;;  %v1865_v27 = vpop.f32.mrf.mxu0 }
 0x14b   : > { %v2219_v52 = vsel %vm2060_vm10, %v2218_v47, %v2217_v34  ;;  %v2254_v59 = vrot.slane %v3885_v42, 5  ;;  %v1967_v5 = vld [vmem:[#allocation2 + $0xb8] sm:$0xff]  ;;  %1363 = vst.msk [vmem:[#allocation2 + $0xf8] sm:$0xff] %vm527_vm8, %v1331_v22  ;;  %v1329_v16 = vadd.f32 %v1288_v10, %v589_v41  ;;  %2206 = vrot.lane.b32.xlu0 %v2204_v61, %s3454_s7  ;;  %v2255_v4 = vrot.slane %v3876_v29, 4 }
 0x14c   : > { %v1965_v13 = vld [vmem:[#allocation2 + $0xa8] sm:$0xff]  ;;  %v1391_v46 = vld [vmem:[#allocation2 + $0xd8] sm:$0xff]  ;;  %v2221_v11 = vsel %vm2063_vm11, %v2220_v0, %v2219_v52  ;;  %v2257_v31 = vrot.slane %v3918_v32, 3  ;;  %v3222_v49 = vpack.c.bf16 %v1967_v5, %v1967_v5  ;;  %v2808_v19 = vsel %vm527_vm8, %v1967_v5, 0.0 }
 0x14d   : > { %v2855_v39 = vmul.f32 %v1967_v5, %v1967_v5  ;;  %v3221_v23 = vpack.c.bf16 %v1965_v13, %v1965_v13  ;;  %v2804_v36 = vsel %vm527_vm8, %v1965_v13, 0.0  ;;  %v2853_v45 = vmul.f32 %v1965_v13, %v1965_v13  ;;  %1361 = vst.msk [vmem:[#allocation2 + $0xe8] sm:$0xff] %vm527_vm8, %v1329_v16  ;;  %v3388_v13 = vpop.f32.mrf.mxu0 }
 0x14e   : > { %v1907_v54 = vadd.f32 %v4130_v53, %v1391_v46  ;;  %v2222_v56 = vsel %vm2066_vm12, %v3977_v50, %v2221_v11  ;;  %v4191_v43 = vunpack.c.l.b16 %v3222_v49  ;;  %v2805_v24 = vadd.f32 %v2804_v36, %v2803_v1  ;;  %v1970_v62 = vld [vmem:[#allocation2 + $0xd0] sm:$0xff]  ;;  %v1389_v30 = vld [vmem:[#allocation2 + $0xc8] sm:$0xff] }
 0x14f   : > { %v2909_v15 = vsel %vm527_vm8, %v2855_v39, 0.0  ;;  %v4194_v47 = vunpack.c.l.b16 %v3221_v23  ;;  %v1968_v21 = vld [vmem:[#allocation2 + $0xc0] sm:$0xff]  ;;  %v2905_v0 = vsel %vm527_vm8, %v2853_v45, 0.0  ;;  %v3208_v22 = vpack.c.bf16 %v1970_v62, %v1970_v62 }
 0x150   : > { %v4198_v53 = vsel %vm527_vm8, %v1970_v62, 0.0  ;;  %v2858_v61 = vmul.f32 %v1970_v62, %v1970_v62  ;;  %1939 = vst.msk [vmem:[#allocation2 + $0xd8] sm:$0xff] %vm527_vm8, %v1907_v54  ;;  %v1394_v34 = vld [vmem:[#allocation2 + $0xf0] sm:$0xff]  ;;  %v2807_v41 = vadd.f32 %v4134_v63, %v2805_v24  ;;  %v2906_v10 = vadd.f32 %v2905_v0, %v2904_v33  ;;  %v1392_v1 = vld [vmem:[#allocation2 + $0xe0] sm:$0xff] }
 0x151   : > { %v3207_v52 = vpack.c.bf16 %v1968_v21, %v1968_v21  ;;  %v2810_v5 = vsel %vm527_vm8, %v1968_v21, 0.0  ;;  %v4203_v46 = vunpack.c.l.b16 %v3208_v22  ;;  %v2856_v11 = vmul.f32 %v1968_v21, %v1968_v21 }
 0x152   : > { %v4206_v16 = vsel %vm527_vm8, %v2858_v61, 0.0  ;;  %v1905_v49 = vadd.f32 %v4149_v14, %v1389_v30  ;;  %v2908_v39 = vadd.f32 %v4143_v51, %v2906_v10  ;;  %v2809_v36 = vadd.f32 %v2808_v19, %v2807_v41  ;;  %v1395_v33 = vld [vmem:[#allocation2 + $0xf8] sm:$0xff]  ;;  %v1868_v14 = vpop.f32.mrf.mxu0 }
 0x153   : > { %v4210_v23 = vunpack.c.l.b16 %v3207_v52  ;;  %v1910_v63 = vadd.f32 %v3387_v7, %v1394_v34  ;;  %v2911_v45 = vsel %vm527_vm8, %v2856_v11, 0.0  ;;  %v1908_v54 = vadd.f32 %v1865_v27, %v1392_v1 }
 0x154   : > { %1937 = vst.msk [vmem:[#allocation2 + $0xc8] sm:$0xff] %vm527_vm8, %v1905_v49  ;;  %v1911_v24 = vadd.f32 %v3388_v13, %v1395_v33  ;;  %v2224_v62 = vsel %vm2069_vm13, %v2223_v2, %v2222_v56  ;;  %v2811_v21 = vadd.f32 %v2810_v5, %v2809_v36  ;;  %v2910_v0 = vadd.f32 %v2909_v15, %v2908_v39  ;;  %v1393_v51 = vld [vmem:[#allocation2 + $0xe8] sm:$0xff] }
 0x155   : > { %1942 = vst.msk [vmem:[#allocation2 + $0xf0] sm:$0xff] %vm527_vm8, %v1910_v63  ;;  %v2226_v7 = vsel %vm2072_vm14, %v2225_v48, %v2224_v62  ;;  %v2256_v19 = vsel %vm2057_vm9, %v2255_v4, %v2254_v59  ;;  %1940 = vst.msk [vmem:[#allocation2 + $0xe0] sm:$0xff] %vm527_vm8, %v1908_v54  ;;  %v1909_v27 = vadd.f32 %v1868_v14, %v1393_v51  ;;  %v2259_v15 = vrot.slane %v3913_v17, 2 }
 0x156   : > { %1943 = vst.msk [vmem:[#allocation2 + $0xf8] sm:$0xff] %vm527_vm8, %v1911_v24  ;;  %v2228_v2 = vsel %vm2075_vm15, %v2227_v8, %v2226_v7  ;;  %v2258_v56 = vsel %vm2060_vm10, %v2257_v31, %v2256_v19  ;;  %v2912_v30 = vadd.f32 %v2911_v45, %v2910_v0  ;;  %v2261_v48 = vrot.slane %v3977_v50, 1 }
 0x157   : > { %v1971_v22 = vld [vmem:[#allocation2 + $0xd8] sm:$0xff]  ;;  %v2243_v61 = vpack.c.b16 %v2228_v2, %v2228_v2  ;;  %v2264_v59 = vrot.slane %v4074_v20, 7  ;;  %1941 = vst.msk [vmem:[#allocation2 + $0xe8] sm:$0xff] %vm527_vm8, %v1909_v27  ;;  %v2260_v10 = vsel %vm2063_vm11, %v2259_v15, %v2258_v56  ;;  %v2266_v31 = vrot.slane %v4041_v12, 6 }
 0x158   : > { %v3224_v4 = vpack.c.bf16 %v1971_v22, %v1971_v22  ;;  %v2816_v34 = vsel %vm527_vm8, %v1971_v22, 0.0  ;;  %v2859_v41 = vmul.f32 %v1971_v22, %v1971_v22  ;;  %v2262_v8 = vsel %vm2066_vm12, %v2261_v48, %v2260_v10 }
 0x159   : > { %2245 = vrot.lane.b32.xlu0 %v2243_v61, %s3455_s8  ;;  %v2332_v52 = vrot.slane %v3885_v42, 7  ;;  %v2333_v5 = vrot.slane %v3876_v29, 6  ;;  %v2263_v11 = vsel %vm2069_vm13, %v3970_v35, %v2262_v8  ;;  %v2335_v49 = vrot.slane %v3918_v32, 5 }
 0x15a   : > { %v4239_v1 = vunpack.c.l.b16 %v3224_v4  ;;  %v2917_v13 = vsel %vm527_vm8, %v2859_v41, 0.0  ;;  %v2265_v36 = vsel %vm2072_vm14, %v2264_v59, %v2263_v11  ;;  %v2337_v33 = vrot.slane %v3913_v17, 4 }
 0x15b   : > { %v1969_v39 = vld [vmem:[#allocation2 + $0xc8] sm:$0xff]  ;;  %v2334_v63 = vsel %vm2057_vm9, %v2333_v5, %v2332_v52  ;;  %v2339_v45 = vrot.slane %v3977_v50, 3  ;;  %v2267_v51 = vsel %vm2075_vm15, %v2266_v31, %v2265_v36  ;;  %v2500_v28 = vrot.slane %v4059_v58, 3 }
 0x15c   : > { %v3223_v54 = vpack.c.bf16 %v1969_v39, %v1969_v39  ;;  %v2812_v24 = vsel %vm527_vm8, %v1969_v39, 0.0  ;;  %v2857_v62 = vmul.f32 %v1969_v39, %v1969_v39  ;;  %v1974_v0 = vld [vmem:[#allocation2 + $0xf0] sm:$0xff]  ;;  %v4252_v2 = vld [vmem:[#allocation2 + $0xe0] sm:$0xff] }
 0x15d   : > { %v2813_v14 = vadd.f32 %v2812_v24, %v2811_v21  ;;  %v3210_v7 = vpack.c.bf16 %v1974_v0, %v1974_v0  ;;  %v2822_v19 = vsel %vm527_vm8, %v1974_v0, 0.0  ;;  %v2862_v27 = vmul.f32 %v1974_v0, %v1974_v0  ;;  %v1975_v56 = vld [vmem:[#allocation2 + $0xf8] sm:$0xff] }
 0x15e   : > { %v4254_v15 = vunpack.c.l.b16 %v3223_v54  ;;  %v2913_v22 = vsel %vm527_vm8, %v2857_v62, 0.0  ;;  %v2818_v61 = vsel %vm527_vm8, %v4252_v2, 0.0  ;;  %v2860_v48 = vmul.f32 %v4252_v2, %v4252_v2  ;;  %v4265_v10 = vld [vmem:[#allocation2 + $0xe8] sm:$0xff] }
 0x15f   : > { %v2815_v59 = vadd.f32 %v4198_v53, %v2813_v14  ;;  %v2914_v21 = vadd.f32 %v2913_v22, %v2912_v30  ;;  %v4262_v4 = vunpack.c.l.b16 %v3210_v7  ;;  %v2923_v41 = vsel %vm527_vm8, %v2862_v27, 0.0 }
 0x160   : > { %v2919_v8 = vsel %vm527_vm8, %v2860_v48, 0.0  ;;  %v3226_v31 = vpack.c.bf16 %v1975_v56, %v1975_v56  ;;  %v2824_v52 = vsel %vm527_vm8, %v1975_v56, 0.0  ;;  %v2863_v5 = vmul.f32 %v1975_v56, %v1975_v56 }
 0x161   : > { %v2916_v11 = vadd.f32 %v4206_v16, %v2914_v21  ;;  %v2817_v39 = vadd.f32 %v2816_v34, %v2815_v59  ;;  %v2820_v36 = vsel %vm527_vm8, %v4265_v10, 0.0  ;;  %v2861_v53 = vmul.f32 %v4265_v10, %v4265_v10 }
 0x162   : > { %v4274_v30 = vunpack.c.l.b16 %v3226_v31  ;;  %v2925_v54 = vsel %vm527_vm8, %v2863_v5, 0.0  ;;  %v2282_v24 = vpack.c.b16 %v2267_v51, %v2267_v51  ;;  %v2336_v62 = vsel %vm2060_vm10, %v2335_v49, %v2334_v63 }
 0x163   : > { %v2819_v0 = vadd.f32 %v2818_v61, %v2817_v39  ;;  %v2918_v14 = vadd.f32 %v2917_v13, %v2916_v11  ;;  %v2921_v7 = vsel %vm527_vm8, %v2861_v53, 0.0  ;;  %v2338_v16 = vsel %vm2063_vm11, %v2337_v33, %v2336_v62 }
 0x164   : > { %2284 = vrot.lane.b32.xlu0 %v2282_v24, %s3456_s9  ;;  %v2340_v34 = vsel %vm2066_vm12, %v2339_v45, %v2338_v16  ;;  %v2341_v27 = vrot.slane %v3970_v35, 2  ;;  %v2343_v56 = vrot.slane %v4074_v20, 1  ;;  %v2451_v22 = vrot.slane %v3894_v57, 7 }
 0x165   : > { %v2920_v51 = vadd.f32 %v2919_v8, %v2918_v14  ;;  %v2821_v48 = vadd.f32 %v2820_v36, %v2819_v0  ;;  %v2453_v49 = vrot.slane %v3933_v60, 6  ;;  %v2455_v13 = vrot.slane %v3926_v44, 5 }
 0x166   : > { %v2342_v63 = vsel %vm2069_vm13, %v2341_v27, %v2340_v34  ;;  %v2452_v33 = vsel %vm2057_vm9, %v2451_v22, %v3901_v3  ;;  %v2457_v61 = vrot.slane %v3995_v18, 4  ;;  %v2459_v45 = vrot.slane %v3989_v55, 3 }
 0x167   : > { %v2823_v59 = vadd.f32 %v2822_v19, %v2821_v48  ;;  %v2922_v21 = vadd.f32 %v2921_v7, %v2920_v51  ;;  %v2344_v31 = vsel %vm2072_vm14, %v2343_v56, %v2342_v63  ;;  %v2454_v8 = vsel %vm2060_vm10, %v2453_v49, %v2452_v33 }
 0x168   : > { %v2345_v5 = vsel %vm2075_vm15, %v4041_v12, %v2344_v31  ;;  %v2456_v11 = vsel %vm2063_vm11, %v2455_v13, %v2454_v8  ;;  %v2461_v39 = vrot.slane %v4059_v58, 2  ;;  %v2463_v36 = vrot.slane %v4056_v37, 1 }
 0x169   : > { %v2825_v53 = vadd.f32 %v2824_v52, %v2823_v59  ;;  %v2924_v24 = vadd.f32 %v2923_v41, %v2922_v21  ;;  %v2360_v62 = vpack.c.b16 %v2345_v5, %v2345_v5  ;;  %v2458_v19 = vsel %vm2066_vm12, %v2457_v61, %v2456_v11 }
 0x16a   : > { %v2460_v0 = vsel %vm2069_vm13, %v2459_v45, %v2458_v19  ;;  %v3209_v14 = vpack.c.bf16 %v4252_v2, %v4252_v2  ;;  %v2307_v7 = vrot.slane %v4121_v6, 6  ;;  %v2308_v16 = vrot.slane %v4077_v26, 5 }
 0x16b   : > { %v2826_v34 = vrot.slane %v2825_v53, 4  ;;  %v2926_v27 = vadd.f32 %v2925_v54, %v2924_v24  ;;  %2362 = vrot.lane.b32.xlu0 %v2360_v62, %s3457_s10  ;;  %v2462_v41 = vsel %vm2072_vm14, %v2461_v39, %v2460_v0  ;;  %v2310_v52 = vrot.slane %v4151_v25, 4 }
 0x16c   : > { %v2464_v56 = vsel %vm2075_vm15, %v2463_v36, %v2462_v41  ;;  %v4309_v22 = vunpack.c.l.b16 %v3209_v14  ;;  %v2309_v51 = vsel %vm2057_vm9, %v2308_v16, %v2307_v7  ;;  %v2312_v2 = vrot.slane %v4140_v9, 3 }
 0x16d   : > { %v2827_v48 = vadd.f32 %v2826_v34, %v2825_v53  ;;  %v2927_v49 = vrot.slane %v2926_v27, 4  ;;  %v2479_v13 = vpack.c.b16 %v2464_v56, %v2464_v56  ;;  %v2311_v54 = vsel %vm2060_vm10, %v2310_v52, %v2309_v51 }
 0x16e   : > { %v2313_v63 = vsel %vm2063_vm11, %v2312_v2, %v2311_v54  ;;  %v2314_v33 = vrot.slane %v4210_v23, 2  ;;  %v2316_v61 = vrot.slane %v4203_v46, 1  ;;  %v2319_v45 = vrot.slane %v4262_v4, 7 }
 0x16f   : > { %v2828_v59 = vrot.slane %v2827_v48, 2  ;;  %v2928_v21 = vadd.f32 %v2927_v49, %v2926_v27  ;;  %2481 = vrot.lane.b32.xlu0 %v2479_v13, %s3458_s11  ;;  %v2112_v31 = vrot.slane %v4121_v6, 1  ;;  %v2114_v8 = vrot.slane %v4151_v25, 7 }
 0x170   : > { %v2315_v5 = vsel %vm2066_vm12, %v2314_v33, %v2313_v63  ;;  %v2116_v11 = vrot.slane %v4140_v9, 6  ;;  %v2118_v39 = vrot.slane %v4210_v23, 5  ;;  %v2120_v36 = vrot.slane %v4203_v46, 4 }
 0x171   : > { %v2829_v53 = vadd.f32 %v2828_v59, %v2827_v48  ;;  %v2929_v24 = vrot.slane %v2928_v21, 2  ;;  %v2317_v62 = vsel %vm2069_vm13, %v2316_v61, %v2315_v5  ;;  %v2113_v19 = vsel %vm2057_vm9, %v4077_v26, %v2112_v31 }
 0x172   : > { %v2318_v0 = vsel %vm2072_vm14, %v4309_v22, %v2317_v62  ;;  %v2115_v14 = vsel %vm2060_vm10, %v2114_v8, %v2113_v19  ;;  %v2122_v7 = vrot.slane %v4309_v22, 3  ;;  %v2124_v16 = vrot.slane %v4262_v4, 2 }
 0x173   : > { %v2830_v34 = vrot.slane %v2829_v53, 1  ;;  %v2930_v27 = vadd.f32 %v2929_v24, %v2928_v21  ;;  %v2320_v41 = vsel %vm2075_vm15, %v2319_v45, %v2318_v0  ;;  %v2117_v52 = vsel %vm2063_vm11, %v2116_v11, %v2115_v14 }
 0x174   : > { %v2322_v56 = vpack.c.b16 %v2320_v41, %v2320_v41  ;;  %v2119_v51 = vsel %vm2066_vm12, %v2118_v39, %v2117_v52  ;;  %v2151_v2 = vrot.slane %v4121_v6, 2  ;;  %v2152_v48 = vrot.slane %v4077_v26, 1 }
 0x175   : > { %v2831_v49 = vadd.f32 %v2830_v34, %v2829_v53  ;;  %v2931_v13 = vrot.slane %v2930_v27, 1  ;;  %v2121_v54 = vsel %vm2069_vm13, %v2120_v36, %v2119_v51  ;;  %v2155_v63 = vrot.slane %v4140_v9, 7 }
 0x176   : > { %2325 = vrot.lane.b32.xlu1 %v2322_v56, %s3451_s4  ;;  %v2123_v33 = vsel %vm2072_vm14, %v2122_v7, %v2121_v54  ;;  %v2153_v61 = vsel %vm2057_vm9, %v2152_v48, %v2151_v2  ;;  %v2157_v45 = vrot.slane %v4210_v23, 6  ;;  %v2159_v59 = vrot.slane %v4203_v46, 5 }
 0x177   : > { %v2932_v21 = vadd.f32 %v2931_v13, %v2930_v27  ;;  %v2125_v31 = vsel %vm2075_vm15, %v2124_v16, %v2123_v33  ;;  %v2154_v8 = vsel %vm2060_vm10, %v4151_v25, %v2153_v61  ;;  %v2161_v5 = vrot.slane %v4309_v22, 4 }
 0x178   : > { %v2127_v11 = vpack.c.b16 %v2125_v31, %v2125_v31  ;;  %v2156_v39 = vsel %vm2063_vm11, %v2155_v63, %v2154_v8  ;;  %v2163_v36 = vrot.slane %v4262_v4, 3  ;;  %v2490_v53 = vrot.slane %v3901_v3, 1 }
 0x179   : > { %v2937_v24 = vsel %vm2936_vm0, %v2932_v21, 0.0  ;;  %v2158_v62 = vsel %vm2066_vm12, %v2157_v45, %v2156_v39  ;;  %v2492_v19 = vrot.slane %v3933_v60, 7  ;;  %v2494_v0 = vrot.slane %v3926_v44, 6 }
 0x17a   : > { %v2938_v14 = vsel %vm2935_vm1, %v2831_v49, %v2937_v24  ;;  %2130 = vrot.lane.b32.xlu0 %v2127_v11, %s3453_s6  ;;  %v2160_v7 = vsel %vm2069_vm13, %v2159_v59, %v2158_v62  ;;  %v2491_v16 = vsel %vm2057_vm9, %v3894_v57, %v2490_v53  ;;  %v2496_v34 = vrot.slane %v3995_v18, 5 }
 0x17b   : > { %2939 = vst.msk [vmem:[%s187_s18] sm:$0xff] %vm527_vm8, %v2938_v14  ;;  %v2162_v27 = vsel %vm2072_vm14, %v2161_v5, %v2160_v7  ;;  %v2493_v41 = vsel %vm2060_vm10, %v2492_v19, %v2491_v16  ;;  %v2498_v52 = vrot.slane %v3989_v55, 4  ;;  %v2502_v2 = vrot.slane %v4056_v37, 2 }
 0x17c   : > { %v2164_v56 = vsel %vm2075_vm15, %v2163_v36, %v2162_v27  ;;  %v2495_v51 = vsel %vm2063_vm11, %v2494_v0, %v2493_v41  ;;  %v2190_v48 = vrot.slane %v4121_v6, 3  ;;  %v2191_v54 = vrot.slane %v4077_v26, 2 }
 0x17d   : > { %v2166_v49 = vpack.c.b16 %v2164_v56, %v2164_v56  ;;  %v2497_v13 = vsel %vm2066_vm12, %v2496_v34, %v2495_v51  ;;  %v2193_v63 = vrot.slane %v4151_v25, 1  ;;  %v2196_v61 = vrot.slane %v4210_v23, 7 }
 0x17e   : > { %v2499_v33 = vsel %vm2069_vm13, %v2498_v52, %v2497_v13  ;;  %v2198_v45 = vrot.slane %v4203_v46, 6  ;;  %v2200_v59 = vrot.slane %v4309_v22, 5  ;;  %v2192_v31 = vsel %vm2057_vm9, %v2191_v54, %v2190_v48 }
 0x17f   : > { %2169 = vrot.lane.b32.xlu1 %v2166_v49, %s3452_s5  ;;  %v2501_v21 = vsel %vm2072_vm14, %v2500_v28, %v2499_v33  ;;  %v2202_v8 = vrot.slane %v4262_v4, 4  ;;  %v2529_v5 = vrot.slane %v3901_v3, 2  ;;  %v2194_v39 = vsel %vm2060_vm10, %v2193_v63, %v2192_v31 }
 0x180   : > { %v2503_v11 = vsel %vm2075_vm15, %v2502_v2, %v2501_v21  ;;  %v2530_v36 = vrot.slane %v3894_v57, 1  ;;  %v2533_v53 = vrot.slane %v3926_v44, 7  ;;  %v2195_v62 = vsel %vm2063_vm11, %v4140_v9, %v2194_v39 }
 0x181   : > { %v2518_v24 = vpack.c.b16 %v2503_v11, %v2503_v11  ;;  %v2535_v19 = vrot.slane %v3995_v18, 6  ;;  %v2537_v0 = vrot.slane %v3989_v55, 5  ;;  %v2197_v14 = vsel %vm2066_vm12, %v2196_v61, %v2195_v62 }
 0x182   : > { %v2531_v7 = vsel %vm2057_vm9, %v2530_v36, %v2529_v5  ;;  %v2539_v16 = vrot.slane %v4059_v58, 4  ;;  %v2541_v34 = vrot.slane %v4056_v37, 3  ;;  %v2199_v27 = vsel %vm2069_vm13, %v2198_v45, %v2197_v14 }
 0x183   : > { %2520 = vrot.lane.b32.xlu0 %v2518_v24, %s3459_s19  ;;  %v2532_v41 = vsel %vm2060_vm10, %v3933_v60, %v2531_v7  ;;  %v2229_v52 = vrot.slane %v4121_v6, 4  ;;  %v2230_v28 = vrot.slane %v4077_v26, 3  ;;  %v2201_v56 = vsel %vm2072_vm14, %v2200_v59, %v2199_v27 }
 0x184   : > { %v2534_v51 = vsel %vm2063_vm11, %v2533_v53, %v2532_v41  ;;  %v2232_v2 = vrot.slane %v4151_v25, 2  ;;  %v2234_v48 = vrot.slane %v4140_v9, 1  ;;  %v2203_v49 = vsel %vm2075_vm15, %v2202_v8, %v2201_v56 }
 0x185   : > { %v2536_v13 = vsel %vm2066_vm12, %v2535_v19, %v2534_v51  ;;  %v2231_v54 = vsel %vm2057_vm9, %v2230_v28, %v2229_v52  ;;  %v2237_v63 = vrot.slane %v4203_v46, 7  ;;  %v2205_v33 = vpack.c.b16 %v2203_v49, %v2203_v49 }
 0x186   : > { %v2538_v61 = vsel %vm2069_vm13, %v2537_v0, %v2536_v13  ;;  %v2233_v45 = vsel %vm2060_vm10, %v2232_v2, %v2231_v54  ;;  %v2239_v59 = vrot.slane %v4309_v22, 6  ;;  %v2241_v5 = vrot.slane %v4262_v4, 5 }
 0x187   : > { %v2540_v21 = vsel %vm2072_vm14, %v2539_v16, %v2538_v61  ;;  %v2235_v31 = vsel %vm2063_vm11, %v2234_v48, %v2233_v45  ;;  %v2568_v8 = vrot.slane %v3901_v3, 3  ;;  %2208 = vrot.lane.b32.xlu1 %v2205_v33, %s3454_s7  ;;  %v2569_v36 = vrot.slane %v3894_v57, 2 }
 0x188   : > { %v2542_v11 = vsel %vm2075_vm15, %v2541_v34, %v2540_v21  ;;  %v2236_v39 = vsel %vm2066_vm12, %v4210_v23, %v2235_v31  ;;  %v2571_v53 = vrot.slane %v3933_v60, 1  ;;  %v2574_v19 = vrot.slane %v3995_v18, 7 }
 0x189   : > { %v2557_v24 = vpack.c.b16 %v2542_v11, %v2542_v11  ;;  %v2238_v62 = vsel %vm2069_vm13, %v2237_v63, %v2236_v39  ;;  %v2576_v0 = vrot.slane %v3989_v55, 6  ;;  %v2570_v7 = vsel %vm2057_vm9, %v2569_v36, %v2568_v8 }
 0x18a   : > { %v2240_v14 = vsel %vm2072_vm14, %v2239_v59, %v2238_v62  ;;  %v2578_v16 = vrot.slane %v4059_v58, 5  ;;  %v2580_v34 = vrot.slane %v4056_v37, 4  ;;  %v2572_v41 = vsel %vm2060_vm10, %v2571_v53, %v2570_v7 }
 0x18b   : > { %2559 = vrot.lane.b32.xlu0 %v2557_v24, %s3460_s20  ;;  %v2242_v27 = vsel %vm2075_vm15, %v2241_v5, %v2240_v14  ;;  %v2268_v52 = vrot.slane %v4121_v6, 5  ;;  %v2269_v28 = vrot.slane %v4077_v26, 4  ;;  %v2573_v51 = vsel %vm2063_vm11, %v3926_v44, %v2572_v41 }
 0x18c   : > { %v2244_v56 = vpack.c.b16 %v2242_v27, %v2242_v27  ;;  %v2271_v2 = vrot.slane %v4151_v25, 3  ;;  %v2273_v48 = vrot.slane %v4140_v9, 2  ;;  %v2575_v49 = vsel %vm2066_vm12, %v2574_v19, %v2573_v51 }
 0x18d   : > { %v2270_v13 = vsel %vm2057_vm9, %v2269_v28, %v2268_v52  ;;  %v2275_v54 = vrot.slane %v4210_v23, 1  ;;  %v2278_v63 = vrot.slane %v4309_v22, 7  ;;  %v2577_v33 = vsel %vm2069_vm13, %v2576_v0, %v2575_v49 }
 0x18e   : > { %2247 = vrot.lane.b32.xlu1 %v2244_v56, %s3455_s8  ;;  %v2272_v61 = vsel %vm2060_vm10, %v2271_v2, %v2270_v13  ;;  %v2280_v45 = vrot.slane %v4262_v4, 6  ;;  %v2607_v59 = vrot.slane %v3901_v3, 4  ;;  %v2579_v21 = vsel %vm2072_vm14, %v2578_v16, %v2577_v33 }
 0x18f   : > { %v2274_v31 = vsel %vm2063_vm11, %v2273_v48, %v2272_v61  ;;  %v2608_v5 = vrot.slane %v3894_v57, 3  ;;  %v2610_v8 = vrot.slane %v3933_v60, 2  ;;  %v2581_v11 = vsel %vm2075_vm15, %v2580_v34, %v2579_v21 }
 0x190   : > { %v2276_v39 = vsel %vm2066_vm12, %v2275_v54, %v2274_v31  ;;  %v2612_v36 = vrot.slane %v3926_v44, 1  ;;  %v2615_v53 = vrot.slane %v3989_v55, 7  ;;  %v2596_v24 = vpack.c.b16 %v2581_v11, %v2581_v11 }
 0x191   : > { %v2277_v62 = vsel %vm2069_vm13, %v4203_v46, %v2276_v39  ;;  %v2609_v19 = vsel %vm2057_vm9, %v2608_v5, %v2607_v59  ;;  %v2617_v0 = vrot.slane %v4059_v58, 6  ;;  %v2619_v16 = vrot.slane %v4056_v37, 5 }
 0x192   : > { %v2279_v14 = vsel %vm2072_vm14, %v2278_v63, %v2277_v62  ;;  %v2611_v7 = vsel %vm2060_vm10, %v2610_v8, %v2609_v19  ;;  %v2346_v34 = vrot.slane %v4121_v6, 7  ;;  %2598 = vrot.lane.b32.xlu0 %v2596_v24, %s3461_s21  ;;  %v2347_v52 = vrot.slane %v4077_v26, 6 }
 0x193   : > { %v2281_v27 = vsel %vm2075_vm15, %v2280_v45, %v2279_v14  ;;  %v2613_v41 = vsel %vm2063_vm11, %v2612_v36, %v2611_v7  ;;  %v2349_v28 = vrot.slane %v4151_v25, 5  ;;  %v2351_v2 = vrot.slane %v4140_v9, 4 }
 0x194   : > { %v2283_v56 = vpack.c.b16 %v2281_v27, %v2281_v27  ;;  %v2614_v51 = vsel %vm2066_vm12, %v3995_v18, %v2613_v41  ;;  %v2353_v48 = vrot.slane %v4210_v23, 3  ;;  %v2348_v13 = vsel %vm2057_vm9, %v2347_v52, %v2346_v34 }
 0x195   : > { %v2616_v49 = vsel %vm2069_vm13, %v2615_v53, %v2614_v51  ;;  %v2355_v54 = vrot.slane %v4203_v46, 2  ;;  %v2357_v63 = vrot.slane %v4309_v22, 1  ;;  %v2350_v61 = vsel %vm2060_vm10, %v2349_v28, %v2348_v13 }
 0x196   : > { %2286 = vrot.lane.b32.xlu1 %v2283_v56, %s3456_s9  ;;  %v2618_v33 = vsel %vm2072_vm14, %v2617_v0, %v2616_v49  ;;  %v2646_v45 = vrot.slane %v3901_v3, 5  ;;  %v2647_v59 = vrot.slane %v3894_v57, 4  ;;  %v2352_v31 = vsel %vm2063_vm11, %v2351_v2, %v2350_v61 }
 0x197   : > { %v2620_v21 = vsel %vm2075_vm15, %v2619_v16, %v2618_v33  ;;  %v2649_v5 = vrot.slane %v3933_v60, 3  ;;  %v2651_v8 = vrot.slane %v3926_v44, 2  ;;  %v2354_v39 = vsel %vm2066_vm12, %v2353_v48, %v2352_v31 }
 0x198   : > { %v2635_v11 = vpack.c.b16 %v2620_v21, %v2620_v21  ;;  %v2648_v36 = vsel %vm2057_vm9, %v2647_v59, %v2646_v45  ;;  %v2653_v53 = vrot.slane %v3995_v18, 1  ;;  %v2356_v24 = vsel %vm2069_vm13, %v2355_v54, %v2354_v39 }
 0x199   : > { %v2650_v62 = vsel %vm2060_vm10, %v2649_v5, %v2648_v36  ;;  %v2656_v19 = vrot.slane %v4059_v58, 7  ;;  %v2658_v0 = vrot.slane %v4056_v37, 6  ;;  %v2358_v14 = vsel %vm2072_vm14, %v2357_v63, %v2356_v24 }
 0x19a   : > { %2637 = vrot.lane.b32.xlu0 %v2635_v11, %s3462_s22  ;;  %v2652_v7 = vsel %vm2063_vm11, %v2651_v8, %v2650_v62  ;;  %v3225_v16 = vpack.c.bf16 %v4265_v10, %v4265_v10  ;;  %v2699_v34 = vrot.slane %v4128_v40, 6  ;;  %v2359_v27 = vsel %vm2075_vm15, %v4262_v4, %v2358_v14 }
 0x19b   : > { %v2654_v41 = vsel %vm2066_vm12, %v2653_v53, %v2652_v7  ;;  %v2700_v52 = vrot.slane %v4124_v38, 5  ;;  %v2702_v28 = vrot.slane %v4194_v47, 4  ;;  %v2361_v56 = vpack.c.b16 %v2359_v27, %v2359_v27 }
 0x19c   : > { %v2655_v51 = vsel %vm2069_vm13, %v3989_v55, %v2654_v41  ;;  %v4519_v2 = vunpack.c.l.b16 %v3225_v16  ;;  %v2704_v48 = vrot.slane %v4191_v43, 3  ;;  %v2706_v13 = vrot.slane %v4254_v15, 2 }
 0x19d   : > { %v2657_v10 = vsel %vm2072_vm14, %v2656_v19, %v2655_v51  ;;  %v2701_v49 = vsel %vm2057_vm9, %v2700_v52, %v2699_v34  ;;  %v2708_v54 = vrot.slane %v4239_v1, 1  ;;  %2364 = vrot.lane.b32.xlu1 %v2361_v56, %s3457_s10  ;;  %v2711_v61 = vrot.slane %v4274_v30, 7 }
 0x19e   : > { %v2659_v63 = vsel %vm2075_vm15, %v2658_v0, %v2657_v10  ;;  %v2703_v33 = vsel %vm2060_vm10, %v2702_v28, %v2701_v49  ;;  %v2685_v45 = vrot.slane %v3901_v3, 6  ;;  %v2686_v31 = vrot.slane %v3894_v57, 5 }
 0x19f   : > { %v2674_v59 = vpack.c.b16 %v2659_v63, %v2659_v63  ;;  %v2705_v21 = vsel %vm2063_vm11, %v2704_v48, %v2703_v33  ;;  %v2688_v5 = vrot.slane %v3933_v60, 4  ;;  %v2690_v11 = vrot.slane %v3926_v44, 3 }
 0x1a0   : > { %v2707_v8 = vsel %vm2066_vm12, %v2706_v13, %v2705_v21  ;;  %v2692_v39 = vrot.slane %v3995_v18, 2  ;;  %v2694_v36 = vrot.slane %v3989_v55, 1  ;;  %v2687_v24 = vsel %vm2057_vm9, %v2686_v31, %v2685_v45 }
 0x1a1   : > { %2676 = vrot.lane.b32.xlu0 %v2674_v59, %s3463_s23  ;;  %v2709_v53 = vsel %vm2069_vm13, %v2708_v54, %v2707_v8  ;;  %v2697_v62 = vrot.slane %v4056_v37, 7  ;;  %v2465_v19 = vrot.slane %v4124_v38, 7  ;;  %v2689_v14 = vsel %vm2060_vm10, %v2688_v5, %v2687_v24 }
 0x1a2   : > { %v2710_v0 = vsel %vm2072_vm14, %v4519_v2, %v2709_v53  ;;  %v2467_v7 = vrot.slane %v4194_v47, 6  ;;  %v2469_v16 = vrot.slane %v4191_v43, 5  ;;  %v2691_v27 = vsel %vm2063_vm11, %v2690_v11, %v2689_v14 }
 0x1a3   : > { %v2712_v34 = vsel %vm2075_vm15, %v2711_v61, %v2710_v0  ;;  %v2466_v41 = vsel %vm2057_vm9, %v2465_v19, %v4128_v40  ;;  %v2471_v52 = vrot.slane %v4254_v15, 4  ;;  %v2693_v56 = vsel %vm2066_vm12, %v2692_v39, %v2691_v27 }
 0x1a4   : > { %v2714_v28 = vpack.c.b16 %v2712_v34, %v2712_v34  ;;  %v2468_v51 = vsel %vm2060_vm10, %v2467_v7, %v2466_v41  ;;  %v2473_v48 = vrot.slane %v4239_v1, 3  ;;  %v2695_v10 = vsel %vm2069_vm13, %v2694_v36, %v2693_v56 }
 0x1a5   : > { %v2470_v49 = vsel %vm2063_vm11, %v2469_v16, %v2468_v51  ;;  %v2475_v13 = vrot.slane %v4519_v2, 2  ;;  %v2477_v54 = vrot.slane %v4274_v30, 1  ;;  %v2696_v63 = vsel %vm2072_vm14, %v4059_v58, %v2695_v10 }
 0x1a6   : > { %2717 = vrot.lane.b32.xlu1 %v2714_v28, %s3464_s24  ;;  %v2472_v33 = vsel %vm2066_vm12, %v2471_v52, %v2470_v49  ;;  %v2724_v61 = vrot.slane %v3901_v3, 7  ;;  %v2725_v45 = vrot.slane %v3894_v57, 6  ;;  %v2698_v59 = vsel %vm2075_vm15, %v2697_v62, %v2696_v63 }
 0x1a7   : > { %v2474_v21 = vsel %vm2069_vm13, %v2473_v48, %v2472_v33  ;;  %v2727_v31 = vrot.slane %v3933_v60, 5  ;;  %v2729_v5 = vrot.slane %v3926_v44, 4  ;;  %v2713_v8 = vpack.c.b16 %v2698_v59, %v2698_v59 }
 0x1a8   : > { %v2476_v11 = vsel %vm2072_vm14, %v2475_v13, %v2474_v21  ;;  %v2726_v39 = vsel %vm2057_vm9, %v2725_v45, %v2724_v61  ;;  %v2731_v36 = vrot.slane %v3995_v18, 3  ;;  %v2733_v57 = vrot.slane %v3989_v55, 2 }
 0x1a9   : > { %v2478_v53 = vsel %vm2075_vm15, %v2477_v54, %v2476_v11  ;;  %v2728_v3 = vsel %vm2060_vm10, %v2727_v31, %v2726_v39  ;;  %v2735_v24 = vrot.slane %v4059_v58, 1  ;;  %2715 = vrot.lane.b32.xlu0 %v2713_v8, %s3464_s24  ;;  %v2504_v44 = vrot.slane %v4128_v40, 1 }
 0x1aa   : > { %v2480_v62 = vpack.c.b16 %v2478_v53, %v2478_v53  ;;  %v2730_v60 = vsel %vm2063_vm11, %v2729_v5, %v2728_v3  ;;  %v2506_v19 = vrot.slane %v4194_v47, 7  ;;  %v2508_v18 = vrot.slane %v4191_v43, 6 }
 0x1ab   : > { %v2732_v0 = vsel %vm2066_vm12, %v2731_v36, %v2730_v60  ;;  %v2510_v14 = vrot.slane %v4254_v15, 5  ;;  %v2512_v7 = vrot.slane %v4239_v1, 4  ;;  %v2505_v58 = vsel %vm2057_vm9, %v4124_v38, %v2504_v44 }
 0x1ac   : > { %2483 = vrot.lane.b32.xlu1 %v2480_v62, %s3458_s11  ;;  %v2734_v55 = vsel %vm2069_vm13, %v2733_v57, %v2732_v0  ;;  %v2514_v16 = vrot.slane %v4519_v2, 3  ;;  %v2516_v34 = vrot.slane %v4274_v30, 2  ;;  %v2507_v41 = vsel %vm2060_vm10, %v2506_v19, %v2505_v58 }
 0x1ad   : > { %v2736_v27 = vsel %vm2072_vm14, %v2735_v24, %v2734_v55  ;;  %v2543_v52 = vrot.slane %v4128_v40, 2  ;;  %v2544_v28 = vrot.slane %v4124_v38, 1  ;;  %v2509_v51 = vsel %vm2063_vm11, %v2508_v18, %v2507_v41 }
 0x1ae   : > { %v2737_v56 = vsel %vm2075_vm15, %v4056_v37, %v2736_v27  ;;  %v2547_v48 = vrot.slane %v4191_v43, 7  ;;  %v2549_v10 = vrot.slane %v4254_v15, 6  ;;  %v2511_v13 = vsel %vm2066_vm12, %v2510_v14, %v2509_v51 }
 0x1af   : > { %v2752_v49 = vpack.c.b16 %v2737_v56, %v2737_v56  ;;  %v2545_v54 = vsel %vm2057_vm9, %v2544_v28, %v2543_v52  ;;  %v2551_v63 = vrot.slane %v4239_v1, 5  ;;  %v2513_v33 = vsel %vm2069_vm13, %v2512_v7, %v2511_v13 }
 0x1b0   : > { %v2546_v61 = vsel %vm2060_vm10, %v4194_v47, %v2545_v54  ;;  %v2553_v37 = vrot.slane %v4519_v2, 4  ;;  %v2555_v45 = vrot.slane %v4274_v30, 3  ;;  %v2515_v59 = vsel %vm2072_vm14, %v2514_v16, %v2513_v33 }
 0x1b1   : > { %2754 = vrot.lane.b32.xlu0 %v2752_v49, %s3465_s25  ;;  %v2548_v21 = vsel %vm2063_vm11, %v2547_v48, %v2546_v61  ;;  %v2582_v31 = vrot.slane %v4128_v40, 3  ;;  %v2583_v5 = vrot.slane %v4124_v38, 2  ;;  %v2517_v8 = vsel %vm2075_vm15, %v2516_v34, %v2515_v59 }
 0x1b2   : > { %v2550_v11 = vsel %vm2066_vm12, %v2549_v10, %v2548_v21  ;;  %v2585_v39 = vrot.slane %v4194_v47, 1  ;;  %v2588_v36 = vrot.slane %v4254_v15, 7  ;;  %v2519_v53 = vpack.c.b16 %v2517_v8, %v2517_v8 }
 0x1b3   : > { %v2552_v3 = vsel %vm2069_vm13, %v2551_v63, %v2550_v11  ;;  %v2584_v57 = vsel %vm2057_vm9, %v2583_v5, %v2582_v31  ;;  %v2590_v24 = vrot.slane %v4239_v1, 6  ;;  %v2592_v44 = vrot.slane %v4519_v2, 5 }
 0x1b4   : > { %v2554_v62 = vsel %vm2072_vm14, %v2553_v37, %v2552_v3  ;;  %v2586_v60 = vsel %vm2060_vm10, %v2585_v39, %v2584_v57  ;;  %v2594_v19 = vrot.slane %v4274_v30, 4  ;;  %2522 = vrot.lane.b32.xlu1 %v2519_v53, %s3459_s19  ;;  %v2621_v14 = vrot.slane %v4128_v40, 4 }
 0x1b5   : > { %v2556_v0 = vsel %vm2075_vm15, %v2555_v45, %v2554_v62  ;;  %v2587_v18 = vsel %vm2063_vm11, %v4191_v43, %v2586_v60  ;;  %v2622_v7 = vrot.slane %v4124_v38, 3  ;;  %v2624_v16 = vrot.slane %v4194_v47, 2 }
 0x1b6   : > { %v2558_v55 = vpack.c.b16 %v2556_v0, %v2556_v0  ;;  %v2589_v58 = vsel %vm2066_vm12, %v2588_v36, %v2587_v18  ;;  %v2626_v34 = vrot.slane %v4191_v43, 1  ;;  %v2629_v52 = vrot.slane %v4239_v1, 7 }
 0x1b7   : > { %v2591_v27 = vsel %vm2069_vm13, %v2590_v24, %v2589_v58  ;;  %v2623_v41 = vsel %vm2057_vm9, %v2622_v7, %v2621_v14  ;;  %v2631_v28 = vrot.slane %v4519_v2, 6  ;;  %v2633_v48 = vrot.slane %v4274_v30, 5 }
 0x1b8   : > { %v2593_v56 = vsel %vm2072_vm14, %v2592_v44, %v2591_v27  ;;  %v2625_v51 = vsel %vm2060_vm10, %v2624_v16, %v2623_v41  ;;  %v2660_v10 = vrot.slane %v4128_v40, 5  ;;  %2561 = vrot.lane.b32.xlu1 %v2558_v55, %s3460_s20  ;;  %v2661_v54 = vrot.slane %v4124_v38, 4  ;;  %v4696_v41 = vpop.permute.xlu0 %2323 }
 0x1b9   : > { %v2595_v49 = vsel %vm2075_vm15, %v2594_v19, %v2593_v56  ;;  %v2627_v13 = vsel %vm2063_vm11, %v2626_v34, %v2625_v51  ;;  %v2663_v63 = vrot.slane %v4194_v47, 3  ;;  %v2665_v37 = vrot.slane %v4191_v43, 2 }
 0x1ba   : > { %v2597_v33 = vpack.c.b16 %v2595_v49, %v2595_v49  ;;  %v2628_v61 = vsel %vm2066_vm12, %v4254_v15, %v2627_v13  ;;  %v2667_v45 = vrot.slane %v4254_v15, 1  ;;  %v2662_v21 = vsel %vm2057_vm9, %v2661_v54, %v2660_v10 }
 0x1bb   : > { %v2630_v59 = vsel %vm2069_vm13, %v2629_v52, %v2628_v61  ;;  %v2670_v31 = vrot.slane %v4519_v2, 7  ;;  %v2672_v5 = vrot.slane %v4274_v30, 6  ;;  %v2664_v11 = vsel %vm2060_vm10, %v2663_v63, %v2662_v21  ;;  %v2168_v21 = vpop.permute.xlu1 %2167 }
 0x1bc   : > { %v2632_v8 = vsel %vm2072_vm14, %v2631_v28, %v2630_v59  ;;  %v2738_v39 = vrot.slane %v4128_v40, 7  ;;  %v2739_v36 = vrot.slane %v4124_v38, 6  ;;  %2600 = vrot.lane.b32.xlu1 %v2597_v33, %s3461_s21  ;;  %v2666_v3 = vsel %vm2063_vm11, %v2665_v37, %v2664_v11  ;;  %v2129_v13 = vpop.permute.xlu0 %2128 }
 0x1bd   : > { %v2634_v53 = vsel %vm2075_vm15, %v2633_v48, %v2632_v8  ;;  %v2741_v57 = vrot.slane %v4194_v47, 5  ;;  %v2743_v24 = vrot.slane %v4191_v43, 4  ;;  %v2668_v38 = vsel %vm2066_vm12, %v2667_v45, %v2666_v3 }
 0x1be   : > { %v2636_v40 = vpack.c.b16 %v2634_v53, %v2634_v53  ;;  %v2740_v62 = vsel %vm2057_vm9, %v2739_v36, %v2738_v39  ;;  %v2745_v60 = vrot.slane %v4254_v15, 3  ;;  %v2669_v44 = vsel %vm2069_vm13, %v4239_v1, %v2668_v38 }
 0x1bf   : > { %v2742_v47 = vsel %vm2060_vm10, %v2741_v57, %v2740_v62  ;;  %v2747_v43 = vrot.slane %v4239_v1, 2  ;;  %v2749_v19 = vrot.slane %v4519_v2, 1  ;;  %v2671_v0 = vsel %vm2072_vm14, %v2670_v31, %v2669_v44 }
 0x1c0   : > { %v2744_v18 = vsel %vm2063_vm11, %v2743_v24, %v2742_v47  ;;  %v2056_v14 = vrot.slane %v3876_v29, 7  ;;  %v2059_v7 = vrot.slane %v3918_v32, 6  ;;  %2639 = vrot.lane.b32.xlu1 %v2636_v40, %s3462_s22  ;;  %v2673_v15 = vsel %vm2075_vm15, %v2672_v5, %v2671_v0 }
 0x1c1   : > { %v2746_v55 = vsel %vm2066_vm12, %v2745_v60, %v2744_v18  ;;  %v2065_v1 = vrot.slane %v3977_v50, 4  ;;  %v2062_v29 = vrot.slane %v3913_v17, 5  ;;  %v2675_v16 = vpack.c.b16 %v2673_v15, %v2673_v15 }
 0x1c2   : > { %v2748_v2 = vsel %vm2069_vm13, %v2747_v43, %v2746_v55  ;;  %v2058_v58 = vsel %vm2057_vm9, %v2056_v14, %v3885_v42  ;;  %v2068_v50 = vrot.slane %v3970_v35, 3  ;;  %v2071_v28 = vrot.slane %v4074_v20, 2 }
 0x1c3   : > { %v2750_v32 = vsel %vm2072_vm14, %v2749_v19, %v2748_v2  ;;  %v2061_v34 = vsel %vm2060_vm10, %v2059_v7, %v2058_v58  ;;  %v2077_v17 = vrot.slane %v4077_v26, 7  ;;  %v2079_v56 = vrot.slane %v4151_v25, 6 }
 0x1c4   : > { %v2751_v27 = vsel %vm2075_vm15, %v4274_v30, %v2750_v32  ;;  %v2064_v52 = vsel %vm2063_vm11, %v2062_v29, %v2061_v34  ;;  %2678 = vrot.lane.b32.xlu1 %v2675_v16, %s3463_s23  ;;  %v2074_v30 = vrot.slane %v4041_v12, 1  ;;  %v2083_v48 = vrot.slane %v4210_v23, 4 }
 0x1c5   : > { %v2067_v42 = vsel %vm2066_vm12, %v2065_v1, %v2064_v52  ;;  %v2753_v10 = vpack.c.b16 %v2751_v27, %v2751_v27  ;;  %v2078_v20 = vsel %vm2057_vm9, %v2077_v17, %v4121_v6  ;;  %v2081_v49 = vrot.slane %v4140_v9, 5 }
 0x1c6   : > { %v2070_v51 = vsel %vm2069_vm13, %v2068_v50, %v2067_v42  ;;  %v2080_v12 = vsel %vm2060_vm10, %v2079_v56, %v2078_v20  ;;  %v2087_v25 = vrot.slane %v4309_v22, 2  ;;  %v2085_v9 = vrot.slane %v4203_v46, 3  ;;  %v2207_v46 = vpop.permute.xlu0 %2206 }
 0x1c7   : > { %v2073_v35 = vsel %vm2072_vm14, %v2071_v28, %v2070_v51  ;;  %v2082_v6 = vsel %vm2063_vm11, %v2081_v49, %v2080_v12  ;;  %v2089_v33 = vrot.slane %v4262_v4, 1  ;;  %vm2329_vm8 = vcmask 454016  }
 0x1c8   : > { %v2076_v26 = vsel %vm2075_vm15, %v2074_v30, %v2073_v35  ;;  %2756 = vrot.lane.b32.xlu1 %v2753_v10, %s3465_s25  ;;  %v2084_v54 = vsel %vm2066_vm12, %v2083_v48, %v2082_v6  ;;  %vm2368_vm9 = vcmask 519616   ;;  %vm2487_vm10 = vcmask 585216  }
 0x1c9   : > { %v2091_v23 = vpack.c.b16 %v2076_v26, %v2076_v26  ;;  %v2086_v63 = vsel %vm2069_vm13, %v2085_v9, %v2084_v54  ;;  %vm2526_vm11 = vcmask 650816   ;;  %vm2565_vm12 = vcmask 716416  }
 0x1ca   : > { %v2088_v22 = vsel %vm2072_vm14, %v2087_v25, %v2086_v63  ;;  %vm2604_vm13 = vcmask 782016   ;;  %vm2643_vm14 = vcmask 847616   ;;  %vm2721_vm0 = vcmask 978816  }
 0x1cb   : > { %2096 = vst.msk [vmem:[%s4715_s30] sm:$0xf] %vm2095_vm2, %v2091_v23  ;;  %v2090_v61 = vsel %vm2075_vm15, %v2089_v33, %v2088_v22  ;;  %v2246_v45 = vpop.permute.xlu0 %2245  ;;  %vm2682_vm15 = vcmask 913216   ;;  %vm2760_vm1 = vcmask 1044416  }
 0x1cc   : > { %v2092_v37 = vpack.c.b16 %v2090_v61, %v2090_v61  ;;  %2135 = vst.msk [vmem:[%s4715_s30] sm:$0xf] %vm2134_vm3, %v2129_v13 }
 0x1cd   : > { %2174 = vst.msk [vmem:[%s4715_s30] sm:$0xf] %vm2173_vm4, %v2168_v21 }
 0x1ce   : > { %2097 = vst.msk [vmem:[%s4715_s30 + $0x4] sm:$0xf] %vm2095_vm2, %v2092_v37 }
 0x1cf   : > { %2213 = vst.msk [vmem:[%s4715_s30] sm:$0xf] %vm2212_vm5, %v2207_v46 }
 0x1d0   : > { %2252 = vst.msk [vmem:[%s4715_s30] sm:$0xf] %vm2251_vm6, %v2246_v45 }
 0x1d6   : > { %v2285_v59 = vpop.permute.xlu0 %2284 }
 0x1d7   : > { %2291 = vst.msk [vmem:[%s4715_s30] sm:$0xf] %vm2290_vm7, %v2285_v59 }
 0x1d8   : > { %2330 = vst.msk [vmem:[%s4715_s30] sm:$0xf] %vm2329_vm8, %v4696_v41 }
 0x1dd   : > { %v2363_v4 = vpop.permute.xlu0 %2362 }
 0x1de   : > { %2369 = vst.msk [vmem:[%s4715_s30] sm:$0xf] %vm2368_vm9, %v2363_v4 }
 0x1e1   : > { %v2482_v31 = vpop.permute.xlu0 %2481 }
 0x1e2   : > { %2488 = vst.msk [vmem:[%s4715_s30] sm:$0xf] %vm2487_vm10, %v2482_v31 }
 0x1e8   : > { %v2326_v5 = vpop.permute.xlu1 %2325 }
 0x1ec   : > { %v2131_v8 = vpop.permute.xlu0 %2130 }
 0x1ed   : > { %2136 = vst.msk [vmem:[%s4715_s30 + $0x4] sm:$0xf] %vm2134_vm3, %v2131_v8 }
 0x1f1   : > { %v2170_v11 = vpop.permute.xlu1 %2169 }
 0x1f2   : > { %2175 = vst.msk [vmem:[%s4715_s30 + $0x4] sm:$0xf] %vm2173_vm4, %v2170_v11 }
 0x1f5   : > { %v2521_v57 = vpop.permute.xlu0 %2520 }
 0x1f6   : > { %2527 = vst.msk [vmem:[%s4715_s30] sm:$0xf] %vm2526_vm11, %v2521_v57 }
 0x1f9   : > { %v2209_v39 = vpop.permute.xlu1 %2208 }
 0x1fa   : > { %2214 = vst.msk [vmem:[%s4715_s30 + $0x4] sm:$0xf] %vm2212_vm5, %v2209_v39 }
 0x1fd   : > { %v2560_v40 = vpop.permute.xlu0 %2559 }
 0x1fe   : > { %2566 = vst.msk [vmem:[%s4715_s30] sm:$0xf] %vm2565_vm12, %v2560_v40 }
 0x200   : > { %v2248_v36 = vpop.permute.xlu1 %2247 }
 0x201   : > { %2253 = vst.msk [vmem:[%s4715_s30 + $0x4] sm:$0xf] %vm2251_vm6, %v2248_v36 }
 0x204   : > { %v2599_v62 = vpop.permute.xlu0 %2598 }
 0x205   : > { %2605 = vst.msk [vmem:[%s4715_s30] sm:$0xf] %vm2604_vm13, %v2599_v62 }
 0x208   : > { %v2287_v53 = vpop.permute.xlu1 %2286 }
 0x209   : > { %2292 = vst.msk [vmem:[%s4715_s30 + $0x4] sm:$0xf] %vm2290_vm7, %v2287_v53 }
 0x20a   : > { %2331 = vst.msk [vmem:[%s4715_s30 + $0x4] sm:$0xf] %vm2329_vm8, %v2326_v5 }
 0x20c   : > { %v2638_v44 = vpop.permute.xlu0 %2637 }
 0x20d   : > { %2644 = vst.msk [vmem:[%s4715_s30] sm:$0xf] %vm2643_vm14, %v2638_v44 }
 0x20f   : > { %v2365_v3 = vpop.permute.xlu1 %2364 }
 0x210   : > { %2370 = vst.msk [vmem:[%s4715_s30 + $0x4] sm:$0xf] %vm2368_vm9, %v2365_v3 }
 0x213   : > { %v2677_v43 = vpop.permute.xlu0 %2676 }
 0x214   : > { %2683 = vst.msk [vmem:[%s4715_s30] sm:$0xf] %vm2682_vm15, %v2677_v43 }
 0x218   : > { %v2718_v24 = vpop.permute.xlu1 %2717 }
 0x21b   : > { %v2716_v18 = vpop.permute.xlu0 %2715 }
 0x21c   : > { %2722 = vst.msk [vmem:[%s4715_s30] sm:$0xf] %vm2721_vm0, %v2716_v18 }
 0x21e   : > { %v2484_v38 = vpop.permute.xlu1 %2483 }
 0x21f   : > { %2489 = vst.msk [vmem:[%s4715_s30 + $0x4] sm:$0xf] %vm2487_vm10, %v2484_v38 }
 0x223   : > { %v2755_v7 = vpop.permute.xlu0 %2754 }
 0x224   : > { %2761 = vst.msk [vmem:[%s4715_s30] sm:$0xf] %vm2760_vm1, %v2755_v7 }
 0x226   : > { %v2523_v60 = vpop.permute.xlu1 %2522 }
 0x227   : > { %2528 = vst.msk [vmem:[%s4715_s30 + $0x4] sm:$0xf] %vm2526_vm11, %v2523_v60 }
 0x22a   : > { %v2562_v47 = vpop.permute.xlu1 %2561 }
 0x22b   : > { %2567 = vst.msk [vmem:[%s4715_s30 + $0x4] sm:$0xf] %vm2565_vm12, %v2562_v47 }
 0x22e   : > { %v2601_v19 = vpop.permute.xlu1 %2600 }
 0x22f   : > { %2606 = vst.msk [vmem:[%s4715_s30 + $0x4] sm:$0xf] %vm2604_vm13, %v2601_v19 }
 0x232   : > { %v2640_v0 = vpop.permute.xlu1 %2639 }
 0x233   : > { %2645 = vst.msk [vmem:[%s4715_s30 + $0x4] sm:$0xf] %vm2643_vm14, %v2640_v0 }
 0x236   : > { %v2679_v14 = vpop.permute.xlu1 %2678 }
 0x237   : > { %2684 = vst.msk [vmem:[%s4715_s30 + $0x4] sm:$0xf] %vm2682_vm15, %v2679_v14 }
 0x238   : > { %2723 = vst.msk [vmem:[%s4715_s30 + $0x4] sm:$0xf] %vm2721_vm0, %v2718_v24 }
 0x23a   : > { %v2757_v15 = vpop.permute.xlu1 %2756 }
 0x23b   : > { %2762 = vst.msk [vmem:[%s4715_s30 + $0x4] sm:$0xf] %vm2760_vm1, %v2757_v15 }
 0x23c PF: > { %s14_s12 = sadd.s32 1, %s3449_s12  }
 0x23d   : > { %p11_p6 = scmp.ge.s32.totalorder %s14_s12, 4  }
 0x23f   :  { %13 = sbr.rel (!%p11_p6) target bundleno = 1 (0x1), region = 72 }

// kernel: tile.13
= control target key start
LH: loop header
LB: loop body
LE: loop exit
PB: predicated region body
PF: predicated region fallthrough
CT: control target
= control target key end

     0   :  { %s28_s0 = inlined_call_operand.vmem [shape: f32[8], index: 0, kind: input, shape index: {}]   ;;  %s29_s1 = inlined_call_operand.vmem [shape: f32[16,8], index: 1, kind: output, shape index: {}]  }
   0x1   :  { %v4_v0 = vld [vmem:[%s28_s0] ss:$0 sm:$0xff] }
   0x2   :  { %5 = vst [vmem:[%s29_s1] sm:$0xff] %v4_v0  ;;  %8 = vst [vmem:[%s29_s1 + $0x8] sm:$0xff] %v4_v0 }

// kernel: tile.14
= control target key start
LH: loop header
LB: loop body
LE: loop exit
PB: predicated region body
PF: predicated region fallthrough
CT: control target
= control target key end

     0   :  { %s133_s10 = smov 120   ;;  %s134_s11 = smov 104   ;;  %vm3_vm0 = vcmask 64512   ;;  %vm9_vm1 = vcmask 1048512   ;;  %vm15_vm2 = vcmask 982912   ;;  %vm21_vm3 = vcmask 917312   ;;  %s209_s0 = inlined_call_operand.vmem [shape: f32[16,8], index: 0, kind: input, shape index: {}]   ;;  %s210_s1 = inlined_call_operand.vmem [shape: f32[1,128], index: 1, kind: output, shape index: {}]  }
   0x1   :  { %v103_v0 = vld [vmem:[%s209_s0 + $0xf] sm:$0x1]   ;;  %v105_v1 = vld [vmem:[%s209_s0 + $0xd] sm:$0x1]   ;;  %v104_v2 = vld [vmem:[%s209_s0 + $0xe] sm:$0x1]  }
   0x2   :  { %7 = vrot.lane.b32.xlu0 %v103_v0, %s133_s10  ;;  %19 = vrot.lane.b32.xlu1 %v105_v1, %s134_s11  ;;  %v106_v3 = vld [vmem:[%s209_s0 + $0xc] sm:$0x1]   ;;  %s135_s16 = smov 112   ;;  %s136_s17 = smov 96   ;;  %v107_v4 = vld [vmem:[%s209_s0 + $0xb] sm:$0x1]  }
   0x3   :  { %v108_v5 = vld [vmem:[%s209_s0 + $0xa] sm:$0x1]   ;;  %v2_v6 = vld [vmem:[%s209_s0] sm:$0x1]   ;;  %s137_s24 = smov 88   ;;  %s138_s25 = smov 80  }
   0x4   :  { %4 = vst.msk [vmem:[#allocation0] sm:$0x1] %vm3_vm0, %v2_v6   ;;  %v109_v7 = vld [vmem:[%s209_s0 + $0x9] sm:$0x1]   ;;  %v110_v8 = vld [vmem:[%s209_s0 + $0x8] sm:$0x1]  }
   0x5   :  { %s139_s30 = smov 72   ;;  %s140_s2 = smov 64   ;;  %v111_v9 = vld [vmem:[%s209_s0 + $0x7] sm:$0x1]   ;;  %v112_v10 = vld [vmem:[%s209_s0 + $0x6] sm:$0x1]  }
   0x6   :  { %13 = vrot.lane.b32.xlu0 %v104_v2, %s135_s16  ;;  %25 = vrot.lane.b32.xlu1 %v106_v3, %s136_s17  ;;  %s141_s7 = smov 56   ;;  %s142_s8 = smov 48   ;;  %v113_v11 = vld [vmem:[%s209_s0 + $0x5] sm:$0x1]   ;;  %v114_v12 = vld [vmem:[%s209_s0 + $0x4] sm:$0x1]  }
   0x7   :  { %s143_s13 = smov 40   ;;  %s144_s14 = smov 32   ;;  %v115_v13 = vld [vmem:[%s209_s0 + $0x3] sm:$0x1]   ;;  %v116_v14 = vld [vmem:[%s209_s0 + $0x2] sm:$0x1]  }
   0x8   :  { %s145_s19 = smov 24   ;;  %s146_s20 = smov 16   ;;  %v117_v15 = vld [vmem:[%s209_s0 + $0x1] sm:$0x1]   ;;  %vm27_vm4 = vcmask 851712   ;;  %vm33_vm5 = vcmask 786112  }
   0x9   :  { %s147_s0 = smov 8   ;;  %vm39_vm6 = vcmask 720512   ;;  %vm45_vm7 = vcmask 654912   ;;  %vm51_vm8 = vcmask 589312   ;;  %vm57_vm9 = vcmask 523712  }
   0xa   :  { %31 = vrot.lane.b32.xlu0 %v107_v4, %s137_s24  ;;  %37 = vrot.lane.b32.xlu1 %v108_v5, %s138_s25  ;;  %vm63_vm10 = vcmask 458112   ;;  %vm69_vm11 = vcmask 392512   ;;  %vm75_vm12 = vcmask 326912   ;;  %vm81_vm13 = vcmask 261312  }
   0xb   :  { %vm87_vm14 = vcmask 195712   ;;  %vm93_vm15 = vcmask 130112  }
   0xe   :  { %43 = vrot.lane.b32.xlu0 %v109_v7, %s139_s30  ;;  %49 = vrot.lane.b32.xlu1 %v110_v8, %s140_s2 }
  0x12   :  { %55 = vrot.lane.b32.xlu0 %v111_v9, %s141_s7  ;;  %61 = vrot.lane.b32.xlu1 %v112_v10, %s142_s8 }
  0x16   :  { %67 = vrot.lane.b32.xlu0 %v113_v11, %s143_s13  ;;  %73 = vrot.lane.b32.xlu1 %v114_v12, %s144_s14 }
  0x1a   :  { %79 = vrot.lane.b32.xlu0 %v115_v13, %s145_s19  ;;  %85 = vrot.lane.b32.xlu1 %v116_v14, %s146_s20 }
  0x1e   :  { %91 = vrot.lane.b32.xlu0 %v117_v15, %s147_s0 }
  0x74   :  { %v8_v16 = vpop.permute.xlu0 %7   ;;  %v20_v17 = vpop.permute.xlu1 %19  }
  0x75   :  { %10 = vst.msk [vmem:[#allocation0] sm:$0x1] %vm9_vm1, %v8_v16  }
  0x78   :  { %v14_v18 = vpop.permute.xlu0 %13   ;;  %v26_v19 = vpop.permute.xlu1 %25  }
  0x79   :  { %16 = vst.msk [vmem:[#allocation0] sm:$0x1] %vm15_vm2, %v14_v18  }
  0x7a   :  { %22 = vst.msk [vmem:[#allocation0] sm:$0x1] %vm21_vm3, %v20_v17  }
  0x7b   :  { %28 = vst.msk [vmem:[#allocation0] sm:$0x1] %vm27_vm4, %v26_v19  }
  0x7c   :  { %v32_v20 = vpop.permute.xlu0 %31   ;;  %v38_v21 = vpop.permute.xlu1 %37  }
  0x7d   :  { %34 = vst.msk [vmem:[#allocation0] sm:$0x1] %vm33_vm5, %v32_v20  }
  0x7e   :  { %40 = vst.msk [vmem:[#allocation0] sm:$0x1] %vm39_vm6, %v38_v21  }
  0x80   :  { %v44_v22 = vpop.permute.xlu0 %43   ;;  %v50_v23 = vpop.permute.xlu1 %49  }
  0x81   :  { %46 = vst.msk [vmem:[#allocation0] sm:$0x1] %vm45_vm7, %v44_v22  }
  0x82   :  { %52 = vst.msk [vmem:[#allocation0] sm:$0x1] %vm51_vm8, %v50_v23  }
  0x84   :  { %v56_v24 = vpop.permute.xlu0 %55   ;;  %v62_v25 = vpop.permute.xlu1 %61  }
  0x85   :  { %58 = vst.msk [vmem:[#allocation0] sm:$0x1] %vm57_vm9, %v56_v24  }
  0x86   :  { %64 = vst.msk [vmem:[#allocation0] sm:$0x1] %vm63_vm10, %v62_v25  }
  0x88   :  { %v68_v26 = vpop.permute.xlu0 %67   ;;  %v74_v27 = vpop.permute.xlu1 %73  }
  0x89   :  { %70 = vst.msk [vmem:[#allocation0] sm:$0x1] %vm69_vm11, %v68_v26  }
  0x8a   :  { %76 = vst.msk [vmem:[#allocation0] sm:$0x1] %vm75_vm12, %v74_v27  }
  0x8c   :  { %v80_v28 = vpop.permute.xlu0 %79   ;;  %v86_v29 = vpop.permute.xlu1 %85  }
  0x8d   :  { %82 = vst.msk [vmem:[#allocation0] sm:$0x1] %vm81_vm13, %v80_v28  }
  0x8e   :  { %88 = vst.msk [vmem:[#allocation0] sm:$0x1] %vm87_vm14, %v86_v29  }
  0x90   :  { %v92_v30 = vpop.permute.xlu0 %91  }
  0x91   :  { %94 = vst.msk [vmem:[#allocation0] sm:$0x1] %vm93_vm15, %v92_v30  }
  0x98   :  { %v99_v31 = vld [vmem:[#allocation0] sm:$0x1] }
  0x99   :  { %102 = vst [vmem:[%s210_s1] sm:$0x1] %v99_v31 }

// kernel: conv_layer_forward.5
= control target key start
LH: loop header
LB: loop body
LE: loop exit
PB: predicated region body
PF: predicated region fallthrough
CT: control target
= control target key end

     0   :  { %s313_s12 = smov 0   ;;  %s336_s0 = inlined_call_operand.vmem [shape: bf16[32,128], index: 0, kind: input, shape index: {}]   ;;  %s337_s1 = inlined_call_operand.vmem [shape: f32[1,128], index: 1, kind: input, shape index: {}]   ;;  %s338_s2 = inlined_call_operand.vmem [shape: f32[1,128], index: 2, kind: input, shape index: {}]   ;;  %s339_s3 = inlined_call_operand.vmem [shape: f32[32,128], index: 3, kind: output, shape index: {}]  }
   0x1 LB: > { %s260_s13 = sadd.s32 4294967295, %s291_s12   ;;  %p264_p0 = scmp.ge.s32.totalorder %s291_s12, 1  ;;  %s291_s12 = sphi %s313_s12, %s13_s12  }
   0x2   : > { %p138_p1 = scmp.lt.s32.totalorder %s291_s12, 3 }
   0x4   : > { %p139_p2 = pnand %p264_p0, %p138_p1 }
   0x5   : > { %s265_s14 = sshll.u32 (!%p139_p2), %s260_s13, 1 }
   0x6   : > { %142 = sbr.rel (%p139_p2) target bundleno = 25 (0x19), region = 32  ;;  %p163_p3 = scmp.lt.s32.totalorder (!%p139_p2), %s265_s14, 3 }
   0xb   : > { %s341_s14 = smov (!%p163_p3, %s265_s14), 3  ;;  %v269_v1 = vld [vmem:[%s337_s1] ss:$0 sm:$0xff] }
   0xc   : > { %s266_s15 = sshll.u32 %s341_s14, 2  ;;  %v270_v4 = vld [vmem:[%s338_s2] ss:$0 sm:$0xff]  ;;  %s268_s23 = sshll.u32 %s341_s14, 3 }
   0xd   : > { %s166_s18 = scalar_lea.vmem %s336_s0, %s266_s15  ;;  %s172_s26 = scalar_lea.vmem %s339_s3, %s268_s23 }
   0xe   : > { %v274_v0 = vld [vmem:[%s166_s18] sm:$0xff]  }
   0xf   : > { %v275_v2 = vunpack.c.l.bf16 %v274_v0  ;;  %v276_v3 = vunpack.c.h.bf16 %v274_v0 }
  0x11   : > { %v185_v5 = vmul.f32 %v275_v2, %v269_v1  ;;  %v186_v6 = vmul.f32 %v276_v3, %v269_v1 }
  0x13   : > { %v194_v7 = vadd.f32 %v270_v4, %v185_v5  ;;  %v195_v8 = vadd.f32 %v270_v4, %v186_v6 }
  0x15   : > { %vm196_vm0 = vcmp.ge.f32.partialorder %v194_v7, 0.0  ;;  %v198_v9 = vmul.f32 0.01, %v194_v7  ;;  %vm197_vm1 = vcmp.ge.f32.partialorder %v195_v8, 0.0  ;;  %v199_v10 = vmul.f32 0.01, %v195_v8 }
  0x17   : > { %v200_v11 = vsel %vm196_vm0, %v194_v7, %v198_v9  ;;  %v201_v12 = vsel %vm197_vm1, %v195_v8, %v199_v10 }
  0x18   : > { %202 = vst [vmem:[%s172_s26] sm:$0xff] %v200_v11  ;;  %203 = vst [vmem:[%s172_s26 + $0x8] sm:$0xff] %v201_v12 }
  0x19 PF: > { %s13_s12 = sadd.s32 1, %s291_s12  }
  0x1a   : > { %p10_p4 = scmp.ge.s32.totalorder %s13_s12, 4  }
  0x1c   :  { %12 = sbr.rel (!%p10_p4) target bundleno = 1 (0x1), region = 62 }

// kernel: conv_layer_forward.4
= control target key start
LH: loop header
LB: loop body
LE: loop exit
PB: predicated region body
PF: predicated region fallthrough
CT: control target
= control target key end

     0   :  { %s3497_s12 = smov 0   ;;  %s4777_s0 = inlined_call_operand.vmem [shape: bf16[32,18,30], index: 0, kind: input, shape index: {}]   ;;  %s4778_s1 = inlined_call_operand.vmem [shape: bf16[3,30,8], index: 1, kind: input, shape index: {}]   ;;  %s4779_s2 = inlined_call_operand.vmem [shape: bf16[32,128], index: 2, kind: output, shape index: {0}]   ;;  %s4780_s3 = inlined_call_operand.vmem [shape: f32[16,8], index: 3, kind: output, shape index: {1}]  }
   0x1 LB: > { %s3503_s13 = sadd.s32 4294967295, %s3460_s12   ;;  %p3040_p0 = scmp.ge.s32.totalorder %s3460_s12, 1  ;;  %s3460_s12 = sphi %s3497_s12, %s14_s12  }
   0x2   : > { %p142_p1 = scmp.lt.s32.totalorder %s3460_s12, 3 }
   0x4   : > { %p143_p2 = pnand %p3040_p0, %p142_p1 }
   0x5   : > { %s3041_s18 = sshll.u32 (!%p143_p2), %s3503_s13, 4  ;;  %s3462_s4 = smov (!%p143_p2), 48  }
   0x6   : > { %146 = sbr.rel (%p143_p2) target bundleno = 572 (0x23c), region = 28  ;;  %p172_p3 = scmp.lt.s32.totalorder (!%p143_p2), %s3041_s18, 31 }
   0x7   : > { %s3463_s5 = smov (!%p143_p2), 16   ;;  %s3464_s6 = smov (!%p143_p2), 8  }
   0x8   : > { %s3465_s7 = smov (!%p143_p2), 24   ;;  %s3466_s8 = smov (!%p143_p2), 32  }
   0x9   : > { %s3467_s9 = smov (!%p143_p2), 40   ;;  %s3468_s10 = smov (!%p143_p2), 56  }
   0xa   : > { %p184_p4 = scmp.lt.s32.totalorder (!%p143_p2), %s3503_s13, 1  ;;  %s3469_s11 = smov (!%p143_p2), 64  }
   0xb   : > { %v3432_v0 = vld [vmem:[%s4778_s1 + $0x8] sm:$0x7f]   ;;  %vm365_vm0 = vcmask 1046528   ;;  %v3433_v1 = vld [vmem:[%s4778_s1] sm:$0xff]   ;;  %v3435_v3 = vld [vmem:[%s4778_s1 + $0x18] sm:$0x7f]  }
   0xc   : > { %3405 = vmatprep.subr.msk.bf16.mxu1 %vm365_vm0, %v3432_v0  ;;  %v367_v2 = vsel %vm365_vm0, %v3432_v0, 0  ;;  %3404 = vmatprep.subr.msk.bf16.mxu0 %vm365_vm0, %v3432_v0  ;;  %v3441_v4 = vld [vmem:[%s4778_s1 + $0x28] sm:$0x7f]   ;;  %s4787_s18 = smov (!%p172_p3, %s3041_s18), 31  ;;  %vm316_vm1 = vcmask 244736   ;;  %v3445_v5 = vld [vmem:[%s4778_s1 + $0x10] sm:$0xff]  }
   0xd   : > { %3402 = vmatpush3.bf16.msra.mxu1 %v367_v2  ;;  %3293 = vmatpush3.bf16.msra.mxu0 %v367_v2  ;;  %s3408_s23 = smul.u32 12, %s4787_s18  ;;  %v1143_v8 = vsel %vm365_vm0, %v3435_v3, 0  ;;  %v3451_v9 = vld [vmem:[%s4778_s1 + $0x20] sm:$0xff]   ;;  %v1726_v12 = vsel %vm365_vm0, %v3441_v4, 0  ;;  %vm643_vm2 = vsmask.f32 3328 }
   0xe   : > { %3401 = vmatprep.subr.bf16.mxu1 %v3433_v1  ;;  %3294 = vmatprep.subr.bf16.mxu0 %v3433_v1  ;;  %vm644_vm3 = vsmask.f32 7440  ;;  %vm1498_vm4 = vcmask 1042432   ;;  %vm1499_vm5 = vcmask 1046532   ;;  %vm530_vm8 = vcmask 64512   ;;  %s4342_s14 = scalar_select %p184_p4, %s3503_s13, 1 }
   0xf   : > { %s3528_s26 = scalar_lea.vmem %s4777_s0, %s3408_s23  ;;  %vm3577_vm6 = vmor %vm1498_vm4, %vm1499_vm5  ;;  %vm2066_vm9 = vcmask 1041409   ;;  %vm2069_vm10 = vcmask 1042434   ;;  %vm2072_vm11 = vcmask 1043459   ;;  %vm2075_vm12 = vcmask 1044484   ;;  %s3470_s19 = smov 72  }
  0x10   : > { %v3434_v6 = vld [vmem:[%s3528_s26 + $0x60] sm:$0xff]   ;;  %v3436_v7 = vld [vmem:[%s3528_s26 + $0x6c] sm:$0xff]   ;;  %v3439_v13 = vld [vmem:[%s3528_s26 + $0x78] sm:$0xff]   ;;  %vm2078_vm13 = vcmask 1045509   ;;  %vm2081_vm14 = vcmask 1046534   ;;  %vm2084_vm15 = vcmask 1047559  }
  0x11   : > { %3403 = vmatpush3.bf16.msra.mxu1 %v3433_v1  ;;  %3295 = vmatpush3.bf16.msra.mxu0 %v3433_v1  ;;  %v3437_v10 = vld [vmem:[%s3528_s26] sm:$0xff]   ;;  %v3438_v11 = vld [vmem:[%s3528_s26 + $0xc] sm:$0xff]   ;;  %v3442_v14 = vld [vmem:[%s3528_s26 + $0x18] sm:$0xff]   ;;  %s3045_s15 = sshll.u32 %s4342_s14, 3  ;;  %s3471_s20 = smov 80   ;;  %vm2182_vm4 = vcmask 191616  }
  0x12   : > { %3406 = vmatprep.subr.msk.bf16.mxu1 %vm365_vm0, %v3435_v3  ;;  %3407 = vmatprep.subr.msk.bf16.mxu0 %vm365_vm0, %v3441_v4  ;;  %v3440_v15 = vld [vmem:[%s3528_s26 + $0x84] sm:$0xff]   ;;  %v3444_v16 = vld [vmem:[%s3528_s26 + $0x90] sm:$0xff]   ;;  %v3446_v19 = vld [vmem:[%s3528_s26 + $0x9c] sm:$0xff]   ;;  %s187_s18 = scalar_lea.vmem %s4780_s3, %s3045_s15  ;;  %s3472_s21 = smov 88   ;;  %vm2221_vm5 = vcmask 257216  }
  0x13   : > { %3312 = vmatprep.mubr.msk.bf16.mxu1 %vm316_vm1, %v3434_v6  ;;  %3296 = vmatprep.mubr.msk.bf16.mxu0 %vm316_vm1, %v3437_v10  ;;  %v3443_v17 = vld [vmem:[%s3528_s26 + $0x24] sm:$0xff]   ;;  %v3447_v18 = vld [vmem:[%s3528_s26 + $0x30] sm:$0xff]   ;;  %v3448_v20 = vld [vmem:[%s3528_s26 + $0x3c] sm:$0xff]   ;;  %s3473_s22 = smov 96   ;;  %s3474_s23 = smov 104  }
  0x14   : > { %3313 = vmatmul.mubr.msk.bf16.vlgmr.msra.gmra.mxu1 %vm316_vm1, %v3436_v7  ;;  %3297 = vmatmul.mubr.msk.bf16.vlgmr.msra.gmra.mxu0 %vm316_vm1, %v3438_v11  ;;  %v3449_v21 = vld [vmem:[%s3528_s26 + $0xa8] sm:$0xff]   ;;  %v595_v23 = vld [vmem:[%s3528_s26] sm:$0xf]  ;;  %v596_v24 = vld [vmem:[%s3528_s26 + $0x4] sm:$0xf]  ;;  %s3475_s24 = smov 112  }
  0x15   : > { %3329 = vmatpush3.bf16.msra.mxu1 %v1143_v8  ;;  %3316 = vmatprep.mubr.msk.bf16.mxu1 %vm316_vm1, %v3439_v13  ;;  %v3452_v22 = vld [vmem:[%s3528_s26 + $0x48] sm:$0xff]   ;;  %v647_v26 = vshrl.u32 %v595_v23, 16  ;;  %v650_v27 = vshll.u32 %v595_v23, 16  ;;  %v656_v28 = vshll.u32 %v596_v24, 16  ;;  %v660_v29 = vshrl.u32 %v596_v24, 16  ;;  %v3450_v45 = vld [vmem:[%s3528_s26 + $0xb4] sm:$0xff]   ;;  %vm3584_vm7 = vmor %vm643_vm2, %vm644_vm3 }
  0x16   : > { %3330 = vmatprep.subr.bf16.mxu1 %v3445_v5  ;;  %3365 = vmatpush3.bf16.msra.mxu0 %v1726_v12  ;;  %v597_v25 = vld [vmem:[%s3528_s26 + $0x8] sm:$0x1]  ;;  %v598_v30 = vld [vmem:[%s3528_s26 + $0xc] sm:$0xf]  ;;  %v599_v32 = vld [vmem:[%s3528_s26 + $0x10] sm:$0xf] }
  0x17   : > { %3366 = vmatprep.subr.bf16.mxu0 %v3451_v9  ;;  %3300 = vmatprep.mubr.msk.bf16.mxu0 %vm316_vm1, %v3442_v14  ;;  %v666_v31 = vshll.u32 %v597_v25, 16  ;;  %v600_v33 = vld [vmem:[%s3528_s26 + $0x14] sm:$0x1]  ;;  %v671_v34 = vshrl.u32 %v598_v30, 16  ;;  %v649_v35 = vrot.slane %v647_v26, 4  ;;  %v652_v36 = vrot.slane %v650_v27, 5 }
  0x18   : > { %v658_v37 = vrot.slane %v656_v28, 5  ;;  %v662_v38 = vrot.slane %v660_v29, 4  ;;  %v1402_v39 = vld [vmem:[%s3528_s26] sm:$0xe]  ;;  %v674_v42 = vshll.u32 %v598_v30, 16  ;;  %v680_v43 = vshll.u32 %v599_v32, 16 }
  0x19   : > { %3331 = vmatpush3.bf16.msra.mxu1 %v3445_v5  ;;  %v668_v40 = vrot.slane %v666_v31, 5  ;;  %v673_v41 = vrot.slane %v671_v34, 4  ;;  %v1403_v44 = vld [vmem:[%s3528_s26 + $0x4] sm:$0xf]  ;;  %v653_v46 = vor.u32 %v652_v36, %v649_v35  ;;  %v684_v48 = vshrl.u32 %v599_v32, 16  ;;  %v3453_v5 = vld [vmem:[%s3528_s26 + $0x54] sm:$0xff]  }
  0x1a   : > { %3367 = vmatpush3.bf16.msra.mxu0 %v3451_v9  ;;  %v663_v47 = vor.u32 %v662_v38, %v658_v37  ;;  %v690_v49 = vshll.u32 %v600_v33, 16  ;;  %v1404_v50 = vld [vmem:[%s3528_s26 + $0x8] sm:$0x1]  ;;  %v676_v53 = vrot.slane %v674_v42, 5  ;;  %v682_v54 = vrot.slane %v680_v43, 5  ;;  %s3476_s25 = smov 120  }
  0x1b   : > { %v3118_v55 = vrot.slane %v1402_v39, 9  ;;  %v1503_v56 = vrot.slane %v1403_v44, 5  ;;  %v1405_v57 = vld [vmem:[%s3528_s26 + $0xc] sm:$0xe]  ;;  %v654_v58 = vrot.slane %v653_v46, 4  ;;  %v686_v60 = vrot.slane %v684_v48, 4 }
  0x1c   : > { %3317 = vmatmul.mubr.msk.bf16.gmra.mxu1 %vm316_vm1, %v3440_v15  ;;  %3301 = vmatmul.mubr.msk.bf16.gmra.mxu0 %vm316_vm1, %v3443_v17  ;;  %v664_v59 = vrot.slane %v663_v47, 4  ;;  %v692_v61 = vrot.slane %v690_v49, 5  ;;  %v1406_v62 = vld [vmem:[%s3528_s26 + $0x10] sm:$0xf]  ;;  %v677_v63 = vor.u32 %v676_v53, %v673_v41  ;;  %v1506_v2 = vrot.slane %v1404_v50, 5 }
  0x1d   : > { %3320 = vmatprep.mubr.msk.bf16.mxu1 %vm316_vm1, %v3444_v16  ;;  %3304 = vmatprep.mubr.msk.bf16.mxu0 %vm316_vm1, %v3447_v18  ;;  %v1504_v0 = vsel %vm3577_vm6, %v3118_v55, %v1503_v56  ;;  %v1505_v1 = vrot.slane %v1503_v56, 4  ;;  %v1407_v3 = vld [vmem:[%s3528_s26 + $0x14] sm:$0x1]  ;;  %v601_v4 = vld [vmem:[%s3528_s26 + $0x18] sm:$0xf]  ;;  %v659_v6 = vsel %vm3584_vm7, %v654_v58, %v658_v37  ;;  %v687_v8 = vor.u32 %v686_v60, %v682_v54 }
  0x1e   : > { %v669_v7 = vsel %vm3584_vm7, %v664_v59, %v668_v40  ;;  %v3119_v9 = vrot.slane %v1405_v57, 9  ;;  %v678_v11 = vrot.slane %v677_v63, 4  ;;  %v1510_v13 = vrot.slane %v1406_v62, 5  ;;  %v602_v14 = vld [vmem:[%s3528_s26 + $0x1c] sm:$0xf] }
  0x1f   : > { %v3084_v10 = vcombine.low %v659_v6, %v669_v7  ;;  %v1507_v12 = vsel %vm3577_vm6, %v1505_v1, %v1506_v2  ;;  %v688_v15 = vrot.slane %v687_v8, 4  ;;  %v1513_v17 = vrot.slane %v1407_v3, 5  ;;  %v603_v18 = vld [vmem:[%s3528_s26 + $0x20] sm:$0x1]  ;;  %v604_v24 = vld [vmem:[%s3528_s26 + $0x24] sm:$0xf] }
  0x20   : > { %v3138_v16 = vcombine.low %v1504_v0, %v1507_v12  ;;  %v698_v23 = vshll.u32 %v601_v4, 16  ;;  %v704_v27 = vshll.u32 %v602_v14, 16  ;;  %v708_v28 = vshrl.u32 %v602_v14, 16  ;;  %v605_v29 = vld [vmem:[%s3528_s26 + $0x28] sm:$0xf] }
  0x21   : > { %v693_v25 = vsel %vm3584_vm7, %v688_v15, %v692_v61  ;;  %v714_v33 = vshll.u32 %v603_v18, 16  ;;  %v606_v34 = vld [vmem:[%s3528_s26 + $0x2c] sm:$0x1]  ;;  %v1408_v35 = vld [vmem:[%s3528_s26 + $0x18] sm:$0xe]  ;;  %v719_v39 = vshrl.u32 %v604_v24, 16 }
  0x22   : > { %v700_v32 = vrot.slane %v698_v23, 5  ;;  %v706_v37 = vrot.slane %v704_v27, 5  ;;  %v710_v38 = vrot.slane %v708_v28, 4  ;;  %v1409_v40 = vld [vmem:[%s3528_s26 + $0x1c] sm:$0xf]  ;;  %v722_v43 = vshll.u32 %v604_v24, 16 }
  0x23   : > { %v716_v42 = vrot.slane %v714_v33, 5  ;;  %v728_v44 = vshll.u32 %v605_v29, 16  ;;  %v721_v47 = vrot.slane %v719_v39, 4  ;;  %v732_v48 = vshrl.u32 %v605_v29, 16  ;;  %v1411_v50 = vld [vmem:[%s3528_s26 + $0x24] sm:$0xe] }
  0x24   : > { %3321 = vmatmul.mubr.msk.bf16.gmra.mxu1 %vm316_vm1, %v3446_v19  ;;  %3305 = vmatmul.mubr.msk.bf16.gmra.mxu0 %vm316_vm1, %v3448_v20  ;;  %v695_v19 = vshrl.u32 %v601_v4, 16  ;;  %v683_v20 = vsel %vm3584_vm7, %v678_v11, %v682_v54  ;;  %v711_v46 = vor.u32 %v710_v38, %v706_v37  ;;  %v738_v49 = vshll.u32 %v606_v34, 16  ;;  %v1412_v57 = vld [vmem:[%s3528_s26 + $0x28] sm:$0xf]  ;;  %v1413_v62 = vld [vmem:[%s3528_s26 + $0x2c] sm:$0x1] }
  0x25   : > { %3324 = vmatprep.mubr.msk.bf16.mxu1 %vm316_vm1, %v3449_v21  ;;  %3308 = vmatprep.mubr.msk.bf16.mxu0 %vm316_vm1, %v3452_v22  ;;  %v1511_v21 = vsel %vm3577_vm6, %v3119_v9, %v1510_v13  ;;  %v1512_v22 = vrot.slane %v1510_v13, 4  ;;  %v3085_v30 = vcombine.low %v683_v20, %v693_v25  ;;  %v724_v54 = vrot.slane %v722_v43, 5  ;;  %v607_v3 = vld [vmem:[%s3528_s26 + $0x30] sm:$0xf]  ;;  %v608_v12 = vld [vmem:[%s3528_s26 + $0x34] sm:$0xf] }
  0x26   : > { %v697_v26 = vrot.slane %v695_v19, 4  ;;  %v730_v55 = vrot.slane %v728_v44, 5  ;;  %v3120_v56 = vrot.slane %v1408_v35, 9  ;;  %v712_v58 = vrot.slane %v711_v46, 4  ;;  %v609_v15 = vld [vmem:[%s3528_s26 + $0x38] sm:$0x1] }
  0x27   : > { %v1514_v31 = vsel %vm3577_vm6, %v1512_v22, %v1513_v17  ;;  %v734_v59 = vrot.slane %v732_v48, 4  ;;  %v740_v60 = vrot.slane %v738_v49, 5  ;;  %v1517_v61 = vrot.slane %v1409_v40, 5  ;;  %v610_v22 = vld [vmem:[%s3528_s26 + $0x3c] sm:$0xf] }
  0x28   : > { %v3139_v36 = vcombine.low %v1511_v21, %v1514_v31  ;;  %v701_v41 = vor.u32 %v700_v32, %v697_v26  ;;  %v725_v0 = vor.u32 %v724_v54, %v721_v47  ;;  %v3121_v2 = vrot.slane %v1411_v50, 9  ;;  %v611_v27 = vld [vmem:[%s3528_s26 + $0x40] sm:$0xf]  ;;  %v612_v32 = vld [vmem:[%s3528_s26 + $0x44] sm:$0x1] }
  0x29   : > { %v717_v4 = vsel %vm3584_vm7, %v712_v58, %v716_v42  ;;  %v1518_v6 = vsel %vm3577_vm6, %v3120_v56, %v1517_v61  ;;  %v1519_v7 = vrot.slane %v1517_v61, 4  ;;  %v1527_v11 = vrot.slane %v1413_v62, 5  ;;  %v1414_v33 = vld [vmem:[%s3528_s26 + $0x30] sm:$0xe]  ;;  %v1415_v38 = vld [vmem:[%s3528_s26 + $0x34] sm:$0xf] }
  0x2a   : > { %v702_v53 = vrot.slane %v701_v41, 4  ;;  %v726_v9 = vrot.slane %v725_v0, 4  ;;  %v746_v17 = vshll.u32 %v607_v3, 16  ;;  %v752_v26 = vshll.u32 %v608_v12, 16  ;;  %v1416_v39 = vld [vmem:[%s3528_s26 + $0x38] sm:$0x1] }
  0x2b   : > { %v762_v31 = vshll.u32 %v609_v15, 16  ;;  %v770_v42 = vshll.u32 %v610_v22, 16  ;;  %v776_v43 = vshll.u32 %v611_v27, 16  ;;  %v1417_v44 = vld [vmem:[%s3528_s26 + $0x3c] sm:$0xe]  ;;  %v780_v47 = vshrl.u32 %v611_v27, 16 }
  0x2c   : > { %3325 = vmatmul.mubr.msk.bf16.gmra.mxu1 %vm316_vm1, %v3450_v45  ;;  %3309 = vmatmul.mubr.msk.bf16.gmra.mxu0 %vm316_vm1, %v3453_v5  ;;  %v1410_v45 = vld [vmem:[%s3528_s26 + $0x20] sm:$0x1]  ;;  %v707_v63 = vsel %vm3584_vm7, %v702_v53, %v706_v37  ;;  %v735_v5 = vor.u32 %v734_v59, %v730_v55  ;;  %v731_v18 = vsel %vm3584_vm7, %v726_v9, %v730_v55  ;;  %v748_v25 = vrot.slane %v746_v17, 5  ;;  %v1419_v56 = vld [vmem:[%s3528_s26 + $0x44] sm:$0x1] }
  0x2d   : > { %3332 = vmatprep.mubr.msk.bf16.mxu1 %vm316_vm1, %v3084_v10  ;;  %3368 = vmatprep.mubr.msk.bf16.mxu0 %vm316_vm1, %v3138_v16  ;;  %v1520_v1 = vrot.slane %v1410_v45, 5  ;;  %v3086_v8 = vcombine.low %v707_v63, %v717_v4  ;;  %v1524_v10 = vrot.slane %v1412_v57, 5  ;;  %v743_v16 = vshrl.u32 %v607_v3, 16  ;;  %v1418_v49 = vld [vmem:[%s3528_s26 + $0x40] sm:$0xf] }
  0x2e   : > { %v736_v13 = vrot.slane %v735_v5, 4  ;;  %v767_v37 = vshrl.u32 %v610_v22, 16  ;;  %v764_v41 = vrot.slane %v762_v31, 5  ;;  %v786_v48 = vshll.u32 %v612_v32, 16  ;;  %v613_v61 = vld [vmem:[%s3528_s26 + $0x48] sm:$0xf] }
  0x2f   : > { %v1521_v14 = vsel %vm3577_vm6, %v1519_v7, %v1520_v1  ;;  %v1525_v20 = vsel %vm3577_vm6, %v3121_v2, %v1524_v10  ;;  %v1526_v21 = vrot.slane %v1524_v10, 4  ;;  %v745_v24 = vrot.slane %v743_v16, 4  ;;  %v614_v9 = vld [vmem:[%s3528_s26 + $0x4c] sm:$0xf]  ;;  %v615_v15 = vld [vmem:[%s3528_s26 + $0x50] sm:$0x1] }
  0x30   : > { %v3140_v19 = vcombine.low %v1518_v6, %v1521_v14  ;;  %v741_v23 = vsel %vm3584_vm7, %v736_v13, %v740_v60  ;;  %v769_v46 = vrot.slane %v767_v37, 4  ;;  %v772_v53 = vrot.slane %v770_v42, 5  ;;  %v616_v16 = vld [vmem:[%s3528_s26 + $0x54] sm:$0xf]  ;;  %v1420_v31 = vld [vmem:[%s3528_s26 + $0x48] sm:$0xe] }
  0x31   : > { %v3087_v28 = vcombine.low %v731_v18, %v741_v23  ;;  %v1528_v29 = vsel %vm3577_vm6, %v1526_v21, %v1527_v11  ;;  %v749_v35 = vor.u32 %v748_v25, %v745_v24  ;;  %v778_v54 = vrot.slane %v776_v43, 5  ;;  %v617_v25 = vld [vmem:[%s3528_s26 + $0x58] sm:$0xf] }
  0x32   : > { %v3141_v34 = vcombine.low %v1525_v20, %v1528_v29  ;;  %v3122_v55 = vrot.slane %v1414_v33, 9  ;;  %v782_v58 = vrot.slane %v780_v47, 4  ;;  %v788_v59 = vrot.slane %v786_v48, 5  ;;  %v618_v29 = vld [vmem:[%s3528_s26 + $0x5c] sm:$0x1] }
  0x33   : > { %v750_v45 = vrot.slane %v749_v35, 4  ;;  %v1531_v60 = vrot.slane %v1415_v38, 5  ;;  %v773_v63 = vor.u32 %v772_v53, %v769_v46  ;;  %v1534_v0 = vrot.slane %v1416_v39, 5 }
  0x34   : > { %3333 = vmatmul.mubr.msk.bf16.vlgmr.msra.gmra.mxu1 %vm316_vm1, %v3085_v30  ;;  %3369 = vmatmul.mubr.msk.bf16.vlgmr.msra.gmra.mxu0 %vm316_vm1, %v3139_v36  ;;  %v756_v30 = vshrl.u32 %v608_v12, 16  ;;  %v754_v36 = vrot.slane %v752_v26, 5  ;;  %v3123_v1 = vrot.slane %v1417_v44, 9  ;;  %v783_v2 = vor.u32 %v782_v58, %v778_v54 }
  0x35   : > { %3336 = vmatprep.mubr.msk.bf16.mxu1 %vm316_vm1, %v3086_v8  ;;  %3372 = vmatprep.mubr.msk.bf16.mxu0 %vm316_vm1, %v3140_v19  ;;  %v1532_v3 = vsel %vm3577_vm6, %v3122_v55, %v1531_v60  ;;  %v1533_v4 = vrot.slane %v1531_v60, 4  ;;  %v1538_v5 = vrot.slane %v1418_v49, 5  ;;  %v774_v7 = vrot.slane %v773_v63, 4  ;;  %v619_v63 = vld [vmem:[%s3528_s26 + $0x60] sm:$0xf] }
  0x36   : > { %v758_v40 = vrot.slane %v756_v30, 4  ;;  %v755_v57 = vsel %vm3584_vm7, %v750_v45, %v754_v36  ;;  %v1541_v8 = vrot.slane %v1419_v56, 5  ;;  %v791_v10 = vshrl.u32 %v613_v61, 16  ;;  %v1422_v45 = vld [vmem:[%s3528_s26 + $0x50] sm:$0x1] }
  0x37   : > { %v784_v12 = vrot.slane %v783_v2, 4  ;;  %v1535_v13 = vsel %vm3577_vm6, %v1533_v4, %v1534_v0  ;;  %v1539_v14 = vsel %vm3577_vm6, %v3123_v1, %v1538_v5  ;;  %v779_v17 = vsel %vm3584_vm7, %v774_v7, %v778_v54 }
  0x38   : > { %v759_v50 = vor.u32 %v758_v40, %v754_v36  ;;  %v3142_v18 = vcombine.low %v1532_v3, %v1535_v13  ;;  %v1540_v19 = vrot.slane %v1538_v5, 4  ;;  %v793_v20 = vrot.slane %v791_v10, 4  ;;  %v1421_v36 = vld [vmem:[%s3528_s26 + $0x4c] sm:$0xf] }
  0x39   : > { %v789_v21 = vsel %vm3584_vm7, %v784_v12, %v788_v59  ;;  %v794_v22 = vshll.u32 %v613_v61, 16  ;;  %v800_v23 = vshll.u32 %v614_v9, 16  ;;  %v804_v24 = vshrl.u32 %v614_v9, 16  ;;  %v621_v12 = vld [vmem:[%s3528_s26 + $0x68] sm:$0x1] }
  0x3a   : > { %v760_v62 = vrot.slane %v759_v50, 4  ;;  %v3089_v26 = vcombine.low %v779_v17, %v789_v21  ;;  %v1542_v27 = vsel %vm3577_vm6, %v1540_v19, %v1541_v8  ;;  %v815_v30 = vshrl.u32 %v616_v16, 16  ;;  %v1423_v50 = vld [vmem:[%s3528_s26 + $0x54] sm:$0xe]  ;;  %v620_v8 = vld [vmem:[%s3528_s26 + $0x64] sm:$0xf] }
  0x3b   : > { %v3143_v32 = vcombine.low %v1539_v14, %v1542_v27  ;;  %v796_v33 = vrot.slane %v794_v22, 5  ;;  %v806_v35 = vrot.slane %v804_v24, 4  ;;  %v818_v39 = vshll.u32 %v616_v16, 16 }
  0x3c   : > { %3337 = vmatmul.mubr.msk.bf16.gmra.mxu1 %vm316_vm1, %v3087_v28  ;;  %3373 = vmatmul.mubr.msk.bf16.gmra.mxu0 %vm316_vm1, %v3141_v34  ;;  %v765_v6 = vsel %vm3584_vm7, %v760_v62, %v764_v41  ;;  %v810_v28 = vshll.u32 %v615_v15, 16  ;;  %v802_v34 = vrot.slane %v800_v23, 5  ;;  %v817_v38 = vrot.slane %v815_v30, 4  ;;  %v1425_v62 = vld [vmem:[%s3528_s26 + $0x5c] sm:$0x1] }
  0x3d   : > { %v3088_v11 = vcombine.low %v755_v57, %v765_v6  ;;  %3376 = vmatprep.mubr.msk.bf16.mxu0 %vm316_vm1, %v3142_v18  ;;  %v824_v40 = vshll.u32 %v617_v25, 16  ;;  %v797_v41 = vor.u32 %v796_v33, %v793_v20  ;;  %v828_v43 = vshrl.u32 %v617_v25, 16  ;;  %v1424_v57 = vld [vmem:[%s3528_s26 + $0x58] sm:$0xf]  ;;  %v622_v18 = vld [vmem:[%s3528_s26 + $0x6c] sm:$0xf] }
  0x3e   : > { %v812_v37 = vrot.slane %v810_v28, 5  ;;  %v807_v42 = vor.u32 %v806_v35, %v802_v34  ;;  %v834_v44 = vshll.u32 %v618_v29, 16  ;;  %v820_v46 = vrot.slane %v818_v39, 5  ;;  %v623_v23 = vld [vmem:[%s3528_s26 + $0x70] sm:$0xf] }
  0x3f   : > { %3340 = vmatprep.mubr.msk.bf16.mxu1 %vm316_vm1, %v3088_v11  ;;  %v826_v47 = vrot.slane %v824_v40, 5  ;;  %v3124_v48 = vrot.slane %v1420_v31, 9  ;;  %v1545_v49 = vrot.slane %v1421_v36, 5  ;;  %v798_v53 = vrot.slane %v797_v41, 4  ;;  %v624_v28 = vld [vmem:[%s3528_s26 + $0x74] sm:$0x1] }
  0x40   : > { %v808_v54 = vrot.slane %v807_v42, 4  ;;  %v830_v55 = vrot.slane %v828_v43, 4  ;;  %v836_v56 = vrot.slane %v834_v44, 5  ;;  %v821_v58 = vor.u32 %v820_v46, %v817_v38  ;;  %v1426_v29 = vld [vmem:[%s3528_s26 + $0x60] sm:$0xe] }
  0x41   : > { %v1546_v59 = vsel %vm3577_vm6, %v3124_v48, %v1545_v49  ;;  %v1547_v60 = vrot.slane %v1545_v49, 4  ;;  %v1548_v61 = vrot.slane %v1422_v45, 5  ;;  %v803_v0 = vsel %vm3584_vm7, %v798_v53, %v802_v34  ;;  %v1427_v34 = vld [vmem:[%s3528_s26 + $0x64] sm:$0xf]  ;;  %v1428_v39 = vld [vmem:[%s3528_s26 + $0x68] sm:$0x1] }
  0x42   : > { %v813_v1 = vsel %vm3584_vm7, %v808_v54, %v812_v37  ;;  %v831_v2 = vor.u32 %v830_v55, %v826_v47  ;;  %v3125_v3 = vrot.slane %v1423_v50, 9  ;;  %v822_v5 = vrot.slane %v821_v58, 4  ;;  %v1429_v44 = vld [vmem:[%s3528_s26 + $0x6c] sm:$0xe]  ;;  %v1430_v49 = vld [vmem:[%s3528_s26 + $0x70] sm:$0xf] }
  0x43   : > { %v3090_v4 = vcombine.low %v803_v0, %v813_v1  ;;  %v1549_v6 = vsel %vm3577_vm6, %v1547_v60, %v1548_v61  ;;  %v1552_v7 = vrot.slane %v1424_v57, 5  ;;  %v1555_v11 = vrot.slane %v1425_v62, 5  ;;  %v625_v61 = vld [vmem:[%s3528_s26 + $0x78] sm:$0xf] }
  0x44   : > { %3341 = vmatmul.mubr.msk.bf16.gmra.mxu1 %vm316_vm1, %v3089_v26  ;;  %3377 = vmatmul.mubr.msk.bf16.gmra.mxu0 %vm316_vm1, %v3143_v32  ;;  %v832_v9 = vrot.slane %v831_v2, 4  ;;  %v3144_v10 = vcombine.low %v1546_v59, %v1549_v6  ;;  %v839_v13 = vshrl.u32 %v619_v63, 16  ;;  %v827_v14 = vsel %vm3584_vm7, %v822_v5, %v826_v47  ;;  %v626_v6 = vld [vmem:[%s3528_s26 + $0x7c] sm:$0xf] }
  0x45   : > { %3344 = vmatprep.mubr.msk.bf16.mxu1 %vm316_vm1, %v3090_v4  ;;  %v1553_v15 = vsel %vm3577_vm6, %v3125_v3, %v1552_v7  ;;  %v1554_v16 = vrot.slane %v1552_v7, 4  ;;  %v842_v17 = vshll.u32 %v619_v63, 16  ;;  %v848_v21 = vshll.u32 %v620_v8, 16 }
  0x46   : > { %v837_v19 = vsel %vm3584_vm7, %v832_v9, %v836_v56  ;;  %3380 = vmatprep.mubr.msk.bf16.mxu0 %vm316_vm1, %v3144_v10  ;;  %v841_v20 = vrot.slane %v839_v13, 4  ;;  %v852_v22 = vshrl.u32 %v620_v8, 16  ;;  %v858_v27 = vshll.u32 %v621_v12, 16  ;;  %v1431_v56 = vld [vmem:[%s3528_s26 + $0x74] sm:$0x1] }
  0x47   : > { %v3091_v24 = vcombine.low %v827_v14, %v837_v19  ;;  %v1556_v25 = vsel %vm3577_vm6, %v1554_v16, %v1555_v11  ;;  %v844_v26 = vrot.slane %v842_v17, 5  ;;  %v850_v31 = vrot.slane %v848_v21, 5  ;;  %v627_v9 = vld [vmem:[%s3528_s26 + $0x80] sm:$0x1]  ;;  %v628_v16 = vld [vmem:[%s3528_s26 + $0x84] sm:$0xf] }
  0x48   : > { %v3145_v30 = vcombine.low %v1553_v15, %v1556_v25  ;;  %v854_v32 = vrot.slane %v852_v22, 4  ;;  %v863_v33 = vshrl.u32 %v622_v18, 16  ;;  %v860_v36 = vrot.slane %v858_v27, 5  ;;  %v629_v21 = vld [vmem:[%s3528_s26 + $0x88] sm:$0xf] }
  0x49   : > { %v845_v35 = vor.u32 %v844_v26, %v841_v20  ;;  %v866_v37 = vshll.u32 %v622_v18, 16  ;;  %v872_v38 = vshll.u32 %v623_v23, 16  ;;  %v876_v42 = vshrl.u32 %v623_v23, 16  ;;  %v630_v26 = vld [vmem:[%s3528_s26 + $0x8c] sm:$0x1] }
  0x4a   : > { %v855_v40 = vor.u32 %v854_v32, %v850_v31  ;;  %v865_v41 = vrot.slane %v863_v33, 4  ;;  %v882_v43 = vshll.u32 %v624_v28, 16  ;;  %v3126_v48 = vrot.slane %v1426_v29, 9  ;;  %v1432_v27 = vld [vmem:[%s3528_s26 + $0x78] sm:$0xe] }
  0x4b   : > { %v846_v45 = vrot.slane %v845_v35, 4  ;;  %v868_v46 = vrot.slane %v866_v37, 5  ;;  %v874_v47 = vrot.slane %v872_v38, 5  ;;  %v878_v53 = vrot.slane %v876_v42, 4  ;;  %v1433_v32 = vld [vmem:[%s3528_s26 + $0x7c] sm:$0xf] }
  0x4c   : > { %3345 = vmatmul.mubr.msk.bf16.gmra.mxu1 %vm316_vm1, %v3091_v24  ;;  %3381 = vmatmul.mubr.msk.bf16.gmra.mxu0 %vm316_vm1, %v3145_v30  ;;  %v856_v50 = vrot.slane %v855_v40, 4  ;;  %v884_v54 = vrot.slane %v882_v43, 5  ;;  %v1559_v55 = vrot.slane %v1427_v34, 5  ;;  %v1562_v59 = vrot.slane %v1428_v39, 5  ;;  %v1434_v33 = vld [vmem:[%s3528_s26 + $0x80] sm:$0x1] }
  0x4d   : > { %v851_v57 = vsel %vm3584_vm7, %v846_v45, %v850_v31  ;;  %v869_v58 = vor.u32 %v868_v46, %v865_v41  ;;  %v3127_v60 = vrot.slane %v1429_v44, 9  ;;  %v879_v63 = vor.u32 %v878_v53, %v874_v47  ;;  %v1435_v38 = vld [vmem:[%s3528_s26 + $0x84] sm:$0xe]  ;;  %v1436_v43 = vld [vmem:[%s3528_s26 + $0x88] sm:$0xf] }
  0x4e   : > { %v861_v62 = vsel %vm3584_vm7, %v856_v50, %v860_v36  ;;  %v1560_v0 = vsel %vm3577_vm6, %v3126_v48, %v1559_v55  ;;  %v1561_v1 = vrot.slane %v1559_v55, 4  ;;  %v1566_v4 = vrot.slane %v1430_v49, 5  ;;  %v1437_v48 = vld [vmem:[%s3528_s26 + $0x8c] sm:$0x1]  ;;  %v631_v55 = vld [vmem:[%s3528_s26 + $0x90] sm:$0xf] }
  0x4f   : > { %v3092_v2 = vcombine.low %v851_v57, %v861_v62  ;;  %v870_v3 = vrot.slane %v869_v58, 4  ;;  %v1569_v5 = vrot.slane %v1431_v56, 5  ;;  %v880_v7 = vrot.slane %v879_v63, 4 }
  0x50   : > { %v1563_v8 = vsel %vm3577_vm6, %v1561_v1, %v1562_v59  ;;  %v887_v10 = vshrl.u32 %v625_v61, 16  ;;  %v890_v11 = vshll.u32 %v625_v61, 16  ;;  %v1567_v14 = vsel %vm3577_vm6, %v3127_v60, %v1566_v4 }
  0x51   : > { %3348 = vmatprep.mubr.msk.bf16.mxu1 %vm316_vm1, %v3092_v2  ;;  %v875_v12 = vsel %vm3584_vm7, %v870_v3, %v874_v47  ;;  %v3146_v13 = vcombine.low %v1560_v0, %v1563_v8  ;;  %v1568_v15 = vrot.slane %v1566_v4, 4  ;;  %v885_v17 = vsel %vm3584_vm7, %v880_v7, %v884_v54  ;;  %v632_v3 = vld [vmem:[%s3528_s26 + $0x94] sm:$0xf] }
  0x52   : > { %v889_v18 = vrot.slane %v887_v10, 4  ;;  %v892_v19 = vrot.slane %v890_v11, 5  ;;  %v896_v20 = vshll.u32 %v626_v6, 16  ;;  %v3093_v22 = vcombine.low %v875_v12, %v885_v17  ;;  %v634_v10 = vld [vmem:[%s3528_s26 + $0x9c] sm:$0xf] }
  0x53   : > { %3384 = vmatprep.mubr.msk.bf16.mxu0 %vm316_vm1, %v3146_v13  ;;  %v1570_v23 = vsel %vm3577_vm6, %v1568_v15, %v1569_v5  ;;  %v900_v24 = vshrl.u32 %v626_v6, 16  ;;  %v906_v25 = vshll.u32 %v627_v9, 16  ;;  %v911_v31 = vshrl.u32 %v628_v16, 16  ;;  %v633_v9 = vld [vmem:[%s3528_s26 + $0x98] sm:$0x1] }
  0x54   : > { %v3147_v28 = vcombine.low %v1567_v14, %v1570_v23  ;;  %v893_v29 = vor.u32 %v892_v19, %v889_v18  ;;  %v898_v30 = vrot.slane %v896_v20, 5  ;;  %3349 = vmatmul.mubr.msk.bf16.gmra.mxu1 %vm316_vm1, %v3093_v22  ;;  %v914_v36 = vshll.u32 %v628_v16, 16  ;;  %v635_v19 = vld [vmem:[%s3528_s26 + $0xa0] sm:$0xf]  ;;  %v636_v23 = vld [vmem:[%s3528_s26 + $0xa4] sm:$0x1] }
  0x55   : > { %v902_v34 = vrot.slane %v900_v24, 4  ;;  %v908_v35 = vrot.slane %v906_v25, 5  ;;  %v920_v37 = vshll.u32 %v629_v21, 16  ;;  %v913_v40 = vrot.slane %v911_v31, 4  ;;  %v1438_v25 = vld [vmem:[%s3528_s26 + $0x90] sm:$0xe] }
  0x56   : > { %3385 = vmatmul.mubr.msk.bf16.gmra.mxu0 %vm316_vm1, %v3147_v28  ;;  %v894_v39 = vrot.slane %v893_v29, 4  ;;  %v924_v41 = vshrl.u32 %v629_v21, 16  ;;  %v930_v42 = vshll.u32 %v630_v26, 16  ;;  %v916_v45 = vrot.slane %v914_v36, 5 }
  0x57   : > { %v903_v44 = vor.u32 %v902_v34, %v898_v30  ;;  %v922_v46 = vrot.slane %v920_v37, 5  ;;  %v3128_v47 = vrot.slane %v1432_v27, 9  ;;  %v1573_v54 = vrot.slane %v1433_v32, 5 }
  0x58   : > { %v899_v49 = vsel %vm3584_vm7, %v894_v39, %v898_v30  ;;  %v926_v50 = vrot.slane %v924_v41, 4  ;;  %v932_v53 = vrot.slane %v930_v42, 5  ;;  %v917_v57 = vor.u32 %v916_v45, %v913_v40  ;;  %v1439_v30 = vld [vmem:[%s3528_s26 + $0x94] sm:$0xf]  ;;  %v1440_v39 = vld [vmem:[%s3528_s26 + $0x98] sm:$0x1] }
  0x59   : > { %v904_v56 = vrot.slane %v903_v44, 4  ;;  %v1576_v58 = vrot.slane %v1434_v33, 5  ;;  %v3129_v59 = vrot.slane %v1435_v38, 9  ;;  %v1574_v61 = vsel %vm3577_vm6, %v3128_v47, %v1573_v54  ;;  %v1441_v44 = vld [vmem:[%s3528_s26 + $0x9c] sm:$0xe] }
  0x5a   : > { %v927_v60 = vor.u32 %v926_v50, %v922_v46  ;;  %v1575_v62 = vrot.slane %v1573_v54, 4  ;;  %v1580_v63 = vrot.slane %v1436_v43, 5  ;;  %v918_v1 = vrot.slane %v917_v57, 4  ;;  %v637_v57 = vld [vmem:[%s3528_s26 + $0xa8] sm:$0xf] }
  0x5b   : > { %v909_v0 = vsel %vm3584_vm7, %v904_v56, %v908_v35  ;;  %v1583_v2 = vrot.slane %v1437_v48, 5  ;;  %v935_v4 = vshrl.u32 %v631_v55, 16  ;;  %v938_v16 = vshll.u32 %v631_v55, 16  ;;  %v1443_v56 = vld [vmem:[%s3528_s26 + $0xa4] sm:$0x1] }
  0x5c   : > { %v3094_v5 = vcombine.low %v899_v49, %v909_v0  ;;  %v928_v6 = vrot.slane %v927_v60, 4  ;;  %v1577_v7 = vsel %vm3577_vm6, %v1575_v62, %v1576_v58  ;;  %v1581_v8 = vsel %vm3577_vm6, %v3129_v59, %v1580_v63  ;;  %v1442_v49 = vld [vmem:[%s3528_s26 + $0xa0] sm:$0xf] }
  0x5d   : > { %v923_v11 = vsel %vm3584_vm7, %v918_v1, %v922_v46  ;;  %v3148_v12 = vcombine.low %v1574_v61, %v1577_v7  ;;  %v1582_v13 = vrot.slane %v1580_v63, 4  ;;  %v937_v14 = vrot.slane %v935_v4, 4 }
  0x5e   : > { %3352 = vmatprep.mubr.msk.bf16.mxu1 %vm316_vm1, %v3094_v5  ;;  %v933_v15 = vsel %vm3584_vm7, %v928_v6, %v932_v53  ;;  %v944_v17 = vshll.u32 %v632_v3, 16  ;;  %v948_v18 = vshrl.u32 %v632_v3, 16  ;;  %v954_v22 = vshll.u32 %v633_v9, 16  ;;  %v639_v6 = vld [vmem:[%s3528_s26 + $0xb0] sm:$0x1] }
  0x5f   : > { %v3095_v20 = vcombine.low %v923_v11, %v933_v15  ;;  %3388 = vmatprep.mubr.msk.bf16.mxu0 %vm316_vm1, %v3148_v12  ;;  %v1584_v21 = vsel %vm3577_vm6, %v1582_v13, %v1583_v2  ;;  %v959_v24 = vshrl.u32 %v634_v10, 16  ;;  %v940_v27 = vrot.slane %v938_v16, 5  ;;  %v638_v2 = vld [vmem:[%s3528_s26 + $0xac] sm:$0xf]  ;;  %v640_v12 = vld [vmem:[%s3528_s26 + $0xb4] sm:$0xf] }
  0x60   : > { %v3149_v26 = vcombine.low %v1581_v8, %v1584_v21  ;;  %v946_v28 = vrot.slane %v944_v17, 5  ;;  %v950_v29 = vrot.slane %v948_v18, 4  ;;  %v956_v31 = vrot.slane %v954_v22, 5  ;;  %v641_v17 = vld [vmem:[%s3528_s26 + $0xb8] sm:$0xf] }
  0x61   : > { %3353 = vmatmul.mubr.msk.bf16.gmra.mxu1 %vm316_vm1, %v3095_v20  ;;  %v961_v32 = vrot.slane %v959_v24, 4  ;;  %v962_v33 = vshll.u32 %v634_v10, 16  ;;  %v968_v34 = vshll.u32 %v635_v19, 16  ;;  %v941_v35 = vor.u32 %v940_v27, %v937_v14  ;;  %v642_v22 = vld [vmem:[%s3528_s26 + $0xbc] sm:$0x1] }
  0x62   : > { %3389 = vmatmul.mubr.msk.bf16.gmra.mxu0 %vm316_vm1, %v3149_v26  ;;  %v951_v36 = vor.u32 %v950_v29, %v946_v28  ;;  %v972_v37 = vshrl.u32 %v635_v19, 16  ;;  %v978_v38 = vshll.u32 %v636_v23, 16  ;;  %v3130_v42 = vrot.slane %v1438_v25, 9  ;;  %v1444_v23 = vld [vmem:[%s3528_s26 + $0xa8] sm:$0xe] }
  0x63   : > { %v964_v40 = vrot.slane %v962_v33, 5  ;;  %v970_v41 = vrot.slane %v968_v34, 5  ;;  %v1587_v43 = vrot.slane %v1439_v30, 5  ;;  %v942_v45 = vrot.slane %v941_v35, 4  ;;  %v1446_v33 = vld [vmem:[%s3528_s26 + $0xb0] sm:$0x1] }
  0x64   : > { %v952_v46 = vrot.slane %v951_v36, 4  ;;  %v974_v47 = vrot.slane %v972_v37, 4  ;;  %v980_v48 = vrot.slane %v978_v38, 5  ;;  %v1590_v55 = vrot.slane %v1440_v39, 5  ;;  %v1447_v38 = vld [vmem:[%s3528_s26 + $0xb4] sm:$0xe] }
  0x65   : > { %v965_v50 = vor.u32 %v964_v40, %v961_v32  ;;  %v1588_v53 = vsel %vm3577_vm6, %v3130_v42, %v1587_v43  ;;  %v1589_v54 = vrot.slane %v1587_v43, 4  ;;  %v947_v58 = vsel %vm3584_vm7, %v942_v45, %v946_v28  ;;  %v1445_v28 = vld [vmem:[%s3528_s26 + $0xac] sm:$0xf]  ;;  %v1448_v43 = vld [vmem:[%s3528_s26 + $0xb8] sm:$0xf] }
  0x66   : > { %v957_v59 = vsel %vm3584_vm7, %v952_v46, %v956_v31  ;;  %v975_v60 = vor.u32 %v974_v47, %v970_v41  ;;  %v3131_v61 = vrot.slane %v1441_v44, 9  ;;  %v1594_v1 = vrot.slane %v1442_v49, 5 }
  0x67   : > { %v3096_v62 = vcombine.low %v947_v58, %v957_v59  ;;  %v966_v63 = vrot.slane %v965_v50, 4  ;;  %v1591_v0 = vsel %vm3577_vm6, %v1589_v54, %v1590_v55  ;;  %v1597_v5 = vrot.slane %v1443_v56, 5 }
  0x68   : > { %v976_v3 = vrot.slane %v975_v60, 4  ;;  %v3150_v4 = vcombine.low %v1588_v53, %v1591_v0  ;;  %v983_v7 = vshrl.u32 %v637_v57, 16  ;;  %v1595_v9 = vsel %vm3577_vm6, %v3131_v61, %v1594_v1 }
  0x69   : > { %3356 = vmatprep.mubr.msk.bf16.mxu1 %vm316_vm1, %v3096_v62  ;;  %v971_v8 = vsel %vm3584_vm7, %v966_v63, %v970_v41  ;;  %v1596_v10 = vrot.slane %v1594_v1, 4  ;;  %v986_v11 = vshll.u32 %v637_v57, 16  ;;  %v992_v15 = vshll.u32 %v638_v2, 16 }
  0x6a   : > { %v981_v13 = vsel %vm3584_vm7, %v976_v3, %v980_v48  ;;  %3392 = vmatprep.mubr.msk.bf16.mxu0 %vm316_vm1, %v3150_v4  ;;  %v985_v14 = vrot.slane %v983_v7, 4  ;;  %v996_v16 = vshrl.u32 %v638_v2, 16  ;;  %v1002_v21 = vshll.u32 %v639_v6, 16  ;;  %v1449_v48 = vld [vmem:[%s3528_s26 + $0xbc] sm:$0x1]  ;;  %s3043_s26 = sshll.u32 %s3503_s13, 1 }
  0x6b   : > { %v3097_v18 = vcombine.low %v971_v8, %v981_v13  ;;  %v1598_v19 = vsel %vm3577_vm6, %v1596_v10, %v1597_v5  ;;  %v988_v20 = vrot.slane %v986_v11, 5  ;;  %v994_v25 = vrot.slane %v992_v15, 5  ;;  %p4675_p5 = scmp.lt.s32.totalorder %s3043_s26, 3 }
  0x6c   : > { %v3151_v24 = vcombine.low %v1595_v9, %v1598_v19  ;;  %v998_v26 = vrot.slane %v996_v16, 4  ;;  %v1007_v27 = vshrl.u32 %v640_v12, 16  ;;  %v1004_v30 = vrot.slane %v1002_v21, 5 }
  0x6d   : > { %3357 = vmatmul.mubr.msk.bf16.gmra.mxu1 %vm316_vm1, %v3097_v18  ;;  %v989_v29 = vor.u32 %v988_v20, %v985_v14  ;;  %v1010_v31 = vshll.u32 %v640_v12, 16  ;;  %v1016_v32 = vshll.u32 %v641_v17, 16  ;;  %v1020_v36 = vshrl.u32 %v641_v17, 16  ;;  %s4789_s26 = smov (!%p4675_p5, %s3043_s26), 3 }
  0x6e   : > { %3393 = vmatmul.mubr.msk.bf16.gmra.mxu0 %vm316_vm1, %v3151_v24  ;;  %v999_v34 = vor.u32 %v998_v26, %v994_v25  ;;  %v1009_v35 = vrot.slane %v1007_v27, 4  ;;  %v1026_v37 = vshll.u32 %v642_v22, 16  ;;  %v3132_v42 = vrot.slane %v1444_v23, 9  ;;  %s3044_s13 = sshll.u32 %s4789_s26, 2 }
  0x6f   : > { %v990_v39 = vrot.slane %v989_v29, 4  ;;  %v1012_v40 = vrot.slane %v1010_v31, 5  ;;  %v1018_v41 = vrot.slane %v1016_v32, 5  ;;  %v1022_v45 = vrot.slane %v1020_v36, 4  ;;  %s4726_s30 = scalar_lea.vmem %s4779_s2, %s3044_s13 }
  0x70   : > { %v1000_v44 = vrot.slane %v999_v34, 4  ;;  %v1028_v46 = vrot.slane %v1026_v37, 5  ;;  %v1601_v47 = vrot.slane %v1445_v28, 5  ;;  %v1604_v53 = vrot.slane %v1446_v33, 5 }
  0x71   : > { %v995_v49 = vsel %vm3584_vm7, %v990_v39, %v994_v25  ;;  %v1013_v50 = vor.u32 %v1012_v40, %v1009_v35  ;;  %v3133_v54 = vrot.slane %v1447_v38, 9  ;;  %v1023_v56 = vor.u32 %v1022_v45, %v1018_v41 }
  0x72   : > { %v1005_v55 = vsel %vm3584_vm7, %v1000_v44, %v1004_v30  ;;  %v1602_v57 = vsel %vm3577_vm6, %v3132_v42, %v1601_v47  ;;  %v1603_v58 = vrot.slane %v1601_v47, 4  ;;  %v1608_v61 = vrot.slane %v1448_v43, 5 }
  0x73   : > { %v3098_v59 = vcombine.low %v995_v49, %v1005_v55  ;;  %v1014_v60 = vrot.slane %v1013_v50, 4  ;;  %v1611_v62 = vrot.slane %v1449_v48, 5  ;;  %v1024_v63 = vrot.slane %v1023_v56, 4 }
  0x74   : > { %v1605_v0 = vsel %vm3577_vm6, %v1603_v58, %v1604_v53  ;;  %v1609_v3 = vsel %vm3577_vm6, %v3133_v54, %v1608_v61  ;;  %v1610_v4 = vrot.slane %v1608_v61, 4  ;;  %vm2104_vm2 = vcmask 60416  }
  0x75   : > { %3360 = vmatprep.mubr.msk.bf16.mxu1 %vm316_vm1, %v3098_v59  ;;  %v1019_v1 = vsel %vm3584_vm7, %v1014_v60, %v1018_v41  ;;  %v3152_v2 = vcombine.low %v1602_v57, %v1605_v0  ;;  %v1029_v5 = vsel %vm3584_vm7, %v1024_v63, %v1028_v46  ;;  %vm2143_vm3 = vcmask 126016  }
  0x76   : > { %v3099_v6 = vcombine.low %v1019_v1, %v1029_v5  ;;  %v1612_v7 = vsel %vm3577_vm6, %v1610_v4, %v1611_v62  ;;  %vm2260_vm6 = vcmask 322816   ;;  %vm2299_vm7 = vcmask 388416  }
  0x77   : > { %3396 = vmatprep.mubr.msk.bf16.mxu0 %vm316_vm1, %v3152_v2  ;;  %v3153_v8 = vcombine.low %v1609_v3, %v1612_v7 }
  0x78   : > { %3361 = vmatmul.mubr.msk.bf16.gmra.mxu1 %vm316_vm1, %v3099_v6 }
  0x79   : > { %3397 = vmatmul.mubr.msk.bf16.gmra.mxu0 %vm316_vm1, %v3153_v8 }
  0xd4   : > { %v3314_v9 = vpop.f32.mrf.mxu1  ;;  %v3298_v11 = vpop.f32.mrf.mxu0 }
  0xd5   : > { %549 = vst.msk [vmem:[#allocation2 + $0x90] sm:$0xff] %vm530_vm8, %v3314_v9  ;;  %533 = vst.msk [vmem:[#allocation2 + $0x10] sm:$0xff] %vm530_vm8, %v3298_v11 }
  0xd6   : > { %v467_v10 = vpop.f32.mrf.mxu1  ;;  %v403_v12 = vpop.f32.mrf.mxu0 }
  0xd7   : > { %547 = vst.msk [vmem:[#allocation2 + $0x80] sm:$0xff] %vm530_vm8, %v467_v10  ;;  %531 = vst.msk [vmem:[#allocation2] sm:$0xff] %vm530_vm8, %v403_v12 }
  0xd8   : > { %v3315_v52 = vpop.f32.mrf.mxu1  ;;  %v3299_v13 = vpop.f32.mrf.mxu0 }
  0xd9   : > { %550 = vst.msk [vmem:[#allocation2 + $0x98] sm:$0xff] %vm530_vm8, %v3315_v52  ;;  %534 = vst.msk [vmem:[#allocation2 + $0x18] sm:$0xff] %vm530_vm8, %v3299_v13 }
  0xda   : > { %v470_v51 = vpop.f32.mrf.mxu1  ;;  %v406_v15 = vpop.f32.mrf.mxu0 }
  0xdb   : > { %548 = vst.msk [vmem:[#allocation2 + $0x88] sm:$0xff] %vm530_vm8, %v470_v51  ;;  %532 = vst.msk [vmem:[#allocation2 + $0x8] sm:$0xff] %vm530_vm8, %v406_v15  ;;  %v2942_v15 = vlaneseq }
  0xdc   : > { %v3318_v14 = vpop.f32.mrf.mxu1  ;;  %v3302_v17 = vpop.f32.mrf.mxu0  ;;  %v565_v38 = vld [vmem:[#allocation2 + $0x10] sm:$0xff] }
  0xdd   : > { %553 = vst.msk [vmem:[#allocation2 + $0xb0] sm:$0xff] %vm530_vm8, %v3318_v14  ;;  %537 = vst.msk [vmem:[#allocation2 + $0x30] sm:$0xff] %vm530_vm8, %v3302_v17 }
  0xde   : > { %v483_v16 = vpop.f32.mrf.mxu1  ;;  %v419_v19 = vpop.f32.mrf.mxu0  ;;  %v563_v42 = vld [vmem:[#allocation2] sm:$0xff] }
  0xdf   : > { %551 = vst.msk [vmem:[#allocation2 + $0xa0] sm:$0xff] %vm530_vm8, %v483_v16  ;;  %535 = vst.msk [vmem:[#allocation2 + $0x20] sm:$0xff] %vm530_vm8, %v419_v19 }
  0xe0   : > { %v3319_v18 = vpop.f32.mrf.mxu1  ;;  %v3303_v21 = vpop.f32.mrf.mxu0  ;;  %v566_v46 = vld [vmem:[#allocation2 + $0x18] sm:$0xff] }
  0xe1   : > { %554 = vst.msk [vmem:[#allocation2 + $0xb8] sm:$0xff] %vm530_vm8, %v3319_v18  ;;  %538 = vst.msk [vmem:[#allocation2 + $0x38] sm:$0xff] %vm530_vm8, %v3303_v21 }
  0xe2   : > { %v486_v20 = vpop.f32.mrf.mxu1  ;;  %v422_v23 = vpop.f32.mrf.mxu0  ;;  %v564_v50 = vld [vmem:[#allocation2 + $0x8] sm:$0xff] }
  0xe3   : > { %552 = vst.msk [vmem:[#allocation2 + $0xa8] sm:$0xff] %vm530_vm8, %v486_v20  ;;  %536 = vst.msk [vmem:[#allocation2 + $0x28] sm:$0xff] %vm530_vm8, %v422_v23 }
  0xe4   : > { %v3322_v22 = vpop.f32.mrf.mxu1  ;;  %v3306_v25 = vpop.f32.mrf.mxu0  ;;  %v569_v57 = vld [vmem:[#allocation2 + $0x30] sm:$0xff] }
  0xe5   : > { %557 = vst.msk [vmem:[#allocation2 + $0xd0] sm:$0xff] %vm530_vm8, %v3322_v22  ;;  %541 = vst.msk [vmem:[#allocation2 + $0x50] sm:$0xff] %vm530_vm8, %v3306_v25 }
  0xe6   : > { %v499_v24 = vpop.f32.mrf.mxu1  ;;  %v435_v27 = vpop.f32.mrf.mxu0  ;;  %v567_v63 = vld [vmem:[#allocation2 + $0x20] sm:$0xff] }
  0xe7   : > { %555 = vst.msk [vmem:[#allocation2 + $0xc0] sm:$0xff] %vm530_vm8, %v499_v24  ;;  %539 = vst.msk [vmem:[#allocation2 + $0x40] sm:$0xff] %vm530_vm8, %v435_v27 }
  0xe8   : > { %v3323_v26 = vpop.f32.mrf.mxu1  ;;  %v3307_v29 = vpop.f32.mrf.mxu0  ;;  %v570_v5 = vld [vmem:[#allocation2 + $0x38] sm:$0xff] }
  0xe9   : > { %558 = vst.msk [vmem:[#allocation2 + $0xd8] sm:$0xff] %vm530_vm8, %v3323_v26  ;;  %542 = vst.msk [vmem:[#allocation2 + $0x58] sm:$0xff] %vm530_vm8, %v3307_v29 }
  0xea   : > { %v502_v28 = vpop.f32.mrf.mxu1  ;;  %v438_v31 = vpop.f32.mrf.mxu0  ;;  %v568_v11 = vld [vmem:[#allocation2 + $0x28] sm:$0xff] }
  0xeb   : > { %556 = vst.msk [vmem:[#allocation2 + $0xc8] sm:$0xff] %vm530_vm8, %v502_v28  ;;  %540 = vst.msk [vmem:[#allocation2 + $0x48] sm:$0xff] %vm530_vm8, %v438_v31  ;;  %v3885_v28 = vshrl.u32 %v2942_v15, 7 }
  0xec   : > { %v3326_v30 = vpop.f32.mrf.mxu1  ;;  %v3310_v33 = vpop.f32.mrf.mxu0  ;;  %v573_v22 = vld [vmem:[#allocation2 + $0x50] sm:$0xff] }
  0xed   : > { %561 = vst.msk [vmem:[#allocation2 + $0xf0] sm:$0xff] %vm530_vm8, %v3326_v30  ;;  %545 = vst.msk [vmem:[#allocation2 + $0x70] sm:$0xff] %vm530_vm8, %v3310_v33  ;;  %vm2945_vm0 = vcmp.eq.s32.totalorder %v3885_v28, 1  ;;  %vm2944_vm1 = vcmp.eq.s32.totalorder %v3885_v28, 0 }
  0xee   : > { %v515_v32 = vpop.f32.mrf.mxu1  ;;  %v451_v35 = vpop.f32.mrf.mxu0 }
  0xef   : > { %559 = vst.msk [vmem:[#allocation2 + $0xe0] sm:$0xff] %vm530_vm8, %v515_v32  ;;  %543 = vst.msk [vmem:[#allocation2 + $0x60] sm:$0xff] %vm530_vm8, %v451_v35 }
  0xf0   : > { %v3327_v34 = vpop.f32.mrf.mxu1  ;;  %v3311_v37 = vpop.f32.mrf.mxu0 }
  0xf1   : > { %562 = vst.msk [vmem:[#allocation2 + $0xf8] sm:$0xff] %vm530_vm8, %v3327_v34  ;;  %546 = vst.msk [vmem:[#allocation2 + $0x78] sm:$0xff] %vm530_vm8, %v3311_v37  ;;  %v571_v34 = vld [vmem:[#allocation2 + $0x40] sm:$0xff] }
  0xf2   : > { %v518_v36 = vpop.f32.mrf.mxu1  ;;  %v454_v40 = vpop.f32.mrf.mxu0 }
  0xf3   : > { %560 = vst.msk [vmem:[#allocation2 + $0xe8] sm:$0xff] %vm530_vm8, %v518_v36  ;;  %544 = vst.msk [vmem:[#allocation2 + $0x68] sm:$0xff] %vm530_vm8, %v454_v40 }
  0xf4   : > { %v3334_v39 = vpop.f32.mrf.mxu1  ;;  %v3370_v44 = vpop.f32.mrf.mxu0 }
  0xf5   : > { %v1308_v41 = vadd.f32 %v3334_v39, %v565_v38 }
  0xf6   : > { %v1179_v43 = vpop.f32.mrf.mxu1  ;;  %v1762_v48 = vpop.f32.mrf.mxu0 }
  0xf7   : > { %1340 = vst.msk [vmem:[#allocation2 + $0x10] sm:$0xff] %vm530_vm8, %v1308_v41  ;;  %v1306_v45 = vadd.f32 %v1179_v43, %v563_v42 }
  0xf8   : > { %v3335_v47 = vpop.f32.mrf.mxu1  ;;  %v3371_v54 = vpop.f32.mrf.mxu0 }
  0xf9   : > { %1338 = vst.msk [vmem:[#allocation2] sm:$0xff] %vm530_vm8, %v1306_v45  ;;  %v1309_v49 = vadd.f32 %v3335_v47, %v566_v46  ;;  %v574_v47 = vld [vmem:[#allocation2 + $0x58] sm:$0xff] }
  0xfa   : > { %v1182_v53 = vpop.f32.mrf.mxu1  ;;  %v1765_v56 = vpop.f32.mrf.mxu0 }
  0xfb   : > { %1341 = vst.msk [vmem:[#allocation2 + $0x18] sm:$0xff] %vm530_vm8, %v1309_v49  ;;  %v1307_v55 = vadd.f32 %v1182_v53, %v564_v50 }
  0xfc   : > { %v3338_v58 = vpop.f32.mrf.mxu1  ;;  %v3374_v61 = vpop.f32.mrf.mxu0 }
  0xfd   : > { %1339 = vst.msk [vmem:[#allocation2 + $0x8] sm:$0xff] %vm530_vm8, %v1307_v55  ;;  %v1312_v60 = vadd.f32 %v3338_v58, %v569_v57 }
  0xfe   : > { %v1372_v59 = vld [vmem:[#allocation2 + $0x10] sm:$0xff]  ;;  %v1195_v0 = vpop.f32.mrf.mxu1  ;;  %v1778_v3 = vpop.f32.mrf.mxu0 }
  0xff   : > { %v1891_v62 = vadd.f32 %v3370_v44, %v1372_v59  ;;  %1344 = vst.msk [vmem:[#allocation2 + $0x30] sm:$0xff] %vm530_vm8, %v1312_v60  ;;  %v1310_v2 = vadd.f32 %v1195_v0, %v567_v63 }
 0x100   : > { %v1370_v1 = vld [vmem:[#allocation2] sm:$0xff]  ;;  %v3339_v6 = vpop.f32.mrf.mxu1  ;;  %v3375_v9 = vpop.f32.mrf.mxu0 }
 0x101   : > { %1923 = vst.msk [vmem:[#allocation2 + $0x10] sm:$0xff] %vm530_vm8, %v1891_v62  ;;  %v1889_v4 = vadd.f32 %v1762_v48, %v1370_v1  ;;  %1342 = vst.msk [vmem:[#allocation2 + $0x20] sm:$0xff] %vm530_vm8, %v1310_v2  ;;  %v1313_v8 = vadd.f32 %v3339_v6, %v570_v5 }
 0x102   : > { %v1373_v7 = vld [vmem:[#allocation2 + $0x18] sm:$0xff]  ;;  %v1198_v52 = vpop.f32.mrf.mxu1  ;;  %v1781_v14 = vpop.f32.mrf.mxu0 }
 0x103   : > { %1921 = vst.msk [vmem:[#allocation2] sm:$0xff] %vm530_vm8, %v1889_v4  ;;  %v1892_v10 = vadd.f32 %v3371_v54, %v1373_v7  ;;  %1345 = vst.msk [vmem:[#allocation2 + $0x38] sm:$0xff] %vm530_vm8, %v1313_v8  ;;  %v1311_v51 = vadd.f32 %v1198_v52, %v568_v11 }
 0x104   : > { %v1371_v12 = vld [vmem:[#allocation2 + $0x8] sm:$0xff]  ;;  %v3342_v23 = vpop.f32.mrf.mxu1  ;;  %v3883_v27 = vpop.f32.mrf.mxu0 }
 0x105   : > { %1924 = vst.msk [vmem:[#allocation2 + $0x18] sm:$0xff] %vm530_vm8, %v1892_v10  ;;  %v1890_v13 = vadd.f32 %v1765_v56, %v1371_v12  ;;  %1343 = vst.msk [vmem:[#allocation2 + $0x28] sm:$0xff] %vm530_vm8, %v1311_v51  ;;  %v1316_v26 = vadd.f32 %v3342_v23, %v573_v22 }
 0x106   : > { %v1376_v16 = vld [vmem:[#allocation2 + $0x30] sm:$0xff]  ;;  %v1211_v35 = vpop.f32.mrf.mxu1  ;;  %v3894_v41 = vpop.f32.mrf.mxu0 }
 0x107   : > { %1922 = vst.msk [vmem:[#allocation2 + $0x8] sm:$0xff] %vm530_vm8, %v1890_v13  ;;  %v1895_v18 = vadd.f32 %v3374_v61, %v1376_v16  ;;  %1348 = vst.msk [vmem:[#allocation2 + $0x50] sm:$0xff] %vm530_vm8, %v1316_v26  ;;  %v1314_v40 = vadd.f32 %v1211_v35, %v571_v34  ;;  %v572_v61 = vld [vmem:[#allocation2 + $0x48] sm:$0xff] }
 0x108   : > { %v1955_v17 = vld [vmem:[#allocation2 + $0x10] sm:$0xff]  ;;  %v1374_v21 = vld [vmem:[#allocation2 + $0x20] sm:$0xff]  ;;  %v3343_v48 = vpop.f32.mrf.mxu1  ;;  %v3902_v55 = vpop.f32.mrf.mxu0 }
 0x109   : > { %v3207_v19 = vpack.c.bf16 %v1955_v17, %v1955_v17  ;;  %v2843_v20 = vmul.f32 %v1955_v17, %v1955_v17  ;;  %1927 = vst.msk [vmem:[#allocation2 + $0x30] sm:$0xff] %vm530_vm8, %v1895_v18  ;;  %v1893_v25 = vadd.f32 %v1778_v3, %v1374_v21  ;;  %v2775_v30 = vsel %vm530_vm8, %v1955_v17, 0.0  ;;  %1346 = vst.msk [vmem:[#allocation2 + $0x40] sm:$0xff] %vm530_vm8, %v1314_v40 }
 0x10a   : > { %v1953_v24 = vld [vmem:[#allocation2] sm:$0xff]  ;;  %v1377_v33 = vld [vmem:[#allocation2 + $0x38] sm:$0xff]  ;;  %v1317_v54 = vadd.f32 %v3343_v48, %v574_v47  ;;  %v1214_v62 = vpop.f32.mrf.mxu1  ;;  %v1797_v52 = vpop.f32.mrf.mxu0  ;;  %v577_v48 = vld [vmem:[#allocation2 + $0x70] sm:$0xff] }
 0x10b   : > { %v3887_v29 = vunpack.c.l.b16 %v3207_v19  ;;  %v2876_v31 = vsel %vm530_vm8, %v2843_v20, 0.0  ;;  %v3206_v32 = vpack.c.bf16 %v1953_v24, %v1953_v24  ;;  %v2772_v36 = vsel %vm530_vm8, %v1953_v24, 0.0  ;;  %1925 = vst.msk [vmem:[#allocation2 + $0x20] sm:$0xff] %vm530_vm8, %v1893_v25 }
 0x10c   : > { %v2841_v37 = vmul.f32 %v1953_v24, %v1953_v24  ;;  %v1956_v38 = vld [vmem:[#allocation2 + $0x18] sm:$0xff]  ;;  %v1896_v39 = vadd.f32 %v3375_v9, %v1377_v33  ;;  %v1375_v46 = vld [vmem:[#allocation2 + $0x28] sm:$0xff]  ;;  %1349 = vst.msk [vmem:[#allocation2 + $0x58] sm:$0xff] %vm530_vm8, %v1317_v54  ;;  %v1315_v1 = vadd.f32 %v1214_v62, %v572_v61 }
 0x10d   : > { %v3896_v42 = vunpack.c.l.b16 %v3206_v32  ;;  %v3223_v43 = vpack.c.bf16 %v1956_v38, %v1956_v38  ;;  %v2777_v44 = vsel %vm530_vm8, %v1956_v38, 0.0  ;;  %v2844_v45 = vmul.f32 %v1956_v38, %v1956_v38 }
 0x10e   : > { %v2873_v49 = vsel %vm530_vm8, %v2841_v37, 0.0  ;;  %v1954_v50 = vld [vmem:[#allocation2 + $0x8] sm:$0xff]  ;;  %1928 = vst.msk [vmem:[#allocation2 + $0x38] sm:$0xff] %vm530_vm8, %v1896_v39  ;;  %v1894_v53 = vadd.f32 %v1781_v14, %v1375_v46  ;;  %v2303_v56 = vrot.slane %v3887_v29, 5  ;;  %v2147_v6 = vrot.slane %v3887_v29, 1  ;;  %1347 = vst.msk [vmem:[#allocation2 + $0x48] sm:$0xff] %vm530_vm8, %v1315_v1 }
 0x10f   : > { %v3905_v57 = vunpack.c.l.b16 %v3223_v43  ;;  %v2878_v58 = vsel %vm530_vm8, %v2844_v45, 0.0  ;;  %v3222_v59 = vpack.c.bf16 %v1954_v50, %v1954_v50  ;;  %v2773_v60 = vsel %vm530_vm8, %v1954_v50, 0.0  ;;  %v1380_v14 = vld [vmem:[#allocation2 + $0x50] sm:$0xff] }
 0x110   : > { %v2774_v63 = vadd.f32 %v2773_v60, %v2772_v36  ;;  %v2842_v0 = vmul.f32 %v1954_v50, %v1954_v50  ;;  %1926 = vst.msk [vmem:[#allocation2 + $0x28] sm:$0xff] %vm530_vm8, %v1894_v53  ;;  %v2302_v2 = vrot.slane %v3896_v42, 6  ;;  %v1959_v4 = vld [vmem:[#allocation2 + $0x30] sm:$0xff]  ;;  %v2146_v5 = vrot.slane %v3896_v42, 2  ;;  %v1378_v26 = vld [vmem:[#allocation2 + $0x40] sm:$0xff]  ;;  %v3932_v36 = vpop.f32.mrf.mxu0 }
 0x111   : > { %v3912_v3 = vunpack.c.l.b16 %v3222_v59  ;;  %v2107_v7 = vrot.slane %v3896_v42, 1  ;;  %v3209_v10 = vpack.c.bf16 %v1959_v4, %v1959_v4  ;;  %v2783_v11 = vsel %vm530_vm8, %v1959_v4, 0.0 }
 0x112   : > { %v2776_v8 = vadd.f32 %v2775_v30, %v2774_v63  ;;  %v2874_v9 = vsel %vm530_vm8, %v2842_v0, 0.0  ;;  %v2847_v51 = vmul.f32 %v1959_v4, %v1959_v4  ;;  %v1957_v13 = vld [vmem:[#allocation2 + $0x20] sm:$0xff]  ;;  %v3921_v15 = vsel %vm2066_vm9, %v2303_v56, %v2302_v2  ;;  %v3346_v30 = vpop.f32.mrf.mxu1  ;;  %v578_v0 = vld [vmem:[#allocation2 + $0x78] sm:$0xff] }
 0x113   : > { %v2875_v12 = vadd.f32 %v2874_v9, %v2873_v49  ;;  %v2148_v16 = vsel %vm2066_vm9, %v2147_v6, %v2146_v5  ;;  %v3924_v17 = vunpack.c.l.b16 %v3209_v10  ;;  %v3208_v18 = vpack.c.bf16 %v1957_v13, %v1957_v13  ;;  %v1381_v40 = vld [vmem:[#allocation2 + $0x58] sm:$0xff]  ;;  %v3940_v49 = vpop.f32.mrf.mxu0 }
 0x114   : > { %v2778_v19 = vadd.f32 %v2777_v44, %v2776_v8  ;;  %v2779_v20 = vsel %vm530_vm8, %v1957_v13, 0.0  ;;  %v2884_v22 = vsel %vm530_vm8, %v2847_v51, 0.0  ;;  %v2845_v23 = vmul.f32 %v1957_v13, %v1957_v13  ;;  %v1227_v43 = vpop.f32.mrf.mxu1  ;;  %v576_v8 = vld [vmem:[#allocation2 + $0x68] sm:$0xff] }
 0x115   : > { %v2877_v21 = vadd.f32 %v2876_v31, %v2875_v12  ;;  %v1960_v24 = vld [vmem:[#allocation2 + $0x38] sm:$0xff]  ;;  %v1899_v25 = vadd.f32 %v3883_v27, %v1380_v14  ;;  %v3929_v32 = vunpack.c.l.b16 %v3208_v18  ;;  %v1897_v27 = vadd.f32 %v3894_v41, %v1378_v26  ;;  %v1379_v41 = vld [vmem:[#allocation2 + $0x48] sm:$0xff]  ;;  %v3948_v1 = vpop.f32.mrf.mxu0 }
 0x116   : > { %v2780_v33 = vadd.f32 %v2779_v20, %v2778_v19  ;;  %v3225_v34 = vpack.c.bf16 %v1960_v24, %v1960_v24  ;;  %v2785_v35 = vsel %vm530_vm8, %v1960_v24, 0.0  ;;  %v2880_v31 = vsel %vm530_vm8, %v2845_v23, 0.0  ;;  %v3347_v59 = vpop.f32.mrf.mxu1 }
 0x117   : > { %v2879_v37 = vadd.f32 %v2878_v58, %v2877_v21  ;;  %v2848_v38 = vmul.f32 %v1960_v24, %v1960_v24  ;;  %v1958_v39 = vld [vmem:[#allocation2 + $0x28] sm:$0xff]  ;;  %1931 = vst.msk [vmem:[#allocation2 + $0x50] sm:$0xff] %vm530_vm8, %v1899_v25  ;;  %1929 = vst.msk [vmem:[#allocation2 + $0x40] sm:$0xff] %vm530_vm8, %v1897_v27  ;;  %v1320_v56 = vadd.f32 %v3346_v30, %v577_v48  ;;  %v575_v58 = vld [vmem:[#allocation2 + $0x60] sm:$0xff]  ;;  %v2305_v12 = vrot.slane %v3929_v32, 4  ;;  %v3965_v19 = vpop.f32.mrf.mxu0 }
 0x118   : > { %v3937_v44 = vunpack.c.l.b16 %v3225_v34  ;;  %v3224_v45 = vpack.c.bf16 %v1958_v39, %v1958_v39  ;;  %v2781_v46 = vsel %vm530_vm8, %v1958_v39, 0.0  ;;  %v2846_v47 = vmul.f32 %v1958_v39, %v1958_v39  ;;  %v1230_v9 = vpop.f32.mrf.mxu1  ;;  %v581_v39 = vld [vmem:[#allocation2 + $0x90] sm:$0xff] }
 0x119   : > { %v2881_v50 = vadd.f32 %v2880_v31, %v2879_v37  ;;  %v2886_v53 = vsel %vm530_vm8, %v2848_v38, 0.0  ;;  %v2782_v54 = vadd.f32 %v2781_v46, %v2780_v33  ;;  %v1900_v62 = vadd.f32 %v3902_v55, %v1381_v40  ;;  %1352 = vst.msk [vmem:[#allocation2 + $0x70] sm:$0xff] %vm530_vm8, %v1320_v56 }
 0x11a   : > { %v3944_v60 = vunpack.c.l.b16 %v3224_v45  ;;  %v2882_v61 = vsel %vm530_vm8, %v2846_v47, 0.0  ;;  %v1318_v63 = vadd.f32 %v1227_v43, %v575_v58  ;;  %v1898_v5 = vadd.f32 %v1797_v52, %v1379_v41  ;;  %v3350_v27 = vpop.f32.mrf.mxu1  ;;  %v3985_v47 = vpop.f32.mrf.mxu0 }
 0x11b   : > { %v2784_v2 = vadd.f32 %v2783_v11, %v2782_v54  ;;  %v2883_v4 = vadd.f32 %v2882_v61, %v2881_v50  ;;  %v1321_v6 = vadd.f32 %v3347_v59, %v578_v0  ;;  %1932 = vst.msk [vmem:[#allocation2 + $0x58] sm:$0xff] %vm530_vm8, %v1900_v62  ;;  %v1319_v10 = vadd.f32 %v1230_v9, %v576_v8 }
 0x11c   : > { %1350 = vst.msk [vmem:[#allocation2 + $0x60] sm:$0xff] %vm530_vm8, %v1318_v63  ;;  %v2307_v55 = vrot.slane %v3924_v17, 3  ;;  %v2149_v51 = vsel %vm2069_vm10, %v3929_v32, %v2148_v16  ;;  %1930 = vst.msk [vmem:[#allocation2 + $0x48] sm:$0xff] %vm530_vm8, %v1898_v5  ;;  %v2150_v52 = vrot.slane %v3924_v17, 7  ;;  %v2108_v14 = vsel %vm2066_vm9, %v3887_v29, %v2107_v7  ;;  %v1243_v58 = vpop.f32.mrf.mxu1  ;;  %v3996_v5 = vpop.f32.mrf.mxu0 }
 0x11d   : > { %v2885_v11 = vadd.f32 %v2884_v22, %v2883_v4  ;;  %v2786_v13 = vadd.f32 %v2785_v35, %v2784_v2  ;;  %1353 = vst.msk [vmem:[#allocation2 + $0x78] sm:$0xff] %vm530_vm8, %v1321_v6  ;;  %1351 = vst.msk [vmem:[#allocation2 + $0x68] sm:$0xff] %vm530_vm8, %v1319_v10  ;;  %v2306_v16 = vsel %vm2069_vm10, %v2305_v12, %v3921_v15  ;;  %v2109_v20 = vrot.slane %v3929_v32, 7 }
 0x11e   : > { %v1963_v18 = vld [vmem:[#allocation2 + $0x50] sm:$0xff]  ;;  %v2111_v21 = vrot.slane %v3924_v17, 6  ;;  %v2185_v22 = vrot.slane %v3896_v42, 3  ;;  %v1961_v7 = vld [vmem:[#allocation2 + $0x40] sm:$0xff]  ;;  %v3974_v30 = vsel %vm2072_vm11, %v2307_v55, %v2306_v16  ;;  %v3977_v33 = vsel %vm2072_vm11, %v2150_v52, %v2149_v51  ;;  %v3351_v12 = vpop.f32.mrf.mxu1 }
 0x11f   : > { %v3211_v23 = vpack.c.bf16 %v1963_v18, %v1963_v18  ;;  %v2791_v24 = vsel %vm530_vm8, %v1963_v18, 0.0  ;;  %v2851_v25 = vmul.f32 %v1963_v18, %v1963_v18  ;;  %v2887_v26 = vadd.f32 %v2886_v53, %v2885_v11  ;;  %v579_v52 = vld [vmem:[#allocation2 + $0x80] sm:$0xff] }
 0x120   : > { %v2110_v15 = vsel %vm2069_vm10, %v2109_v20, %v2108_v14  ;;  %v2186_v34 = vrot.slane %v3887_v29, 2  ;;  %v3210_v31 = vpack.c.bf16 %v1961_v7, %v1961_v7  ;;  %v2787_v38 = vsel %vm530_vm8, %v1961_v7, 0.0  ;;  %v1384_v45 = vld [vmem:[#allocation2 + $0x70] sm:$0xff]  ;;  %v4004_v14 = vpop.f32.mrf.mxu0 }
 0x121   : > { %v3981_v35 = vunpack.c.l.b16 %v3211_v23  ;;  %v2892_v37 = vsel %vm530_vm8, %v2851_v25, 0.0  ;;  %v2788_v40 = vadd.f32 %v2787_v38, %v2786_v13  ;;  %v2849_v43 = vmul.f32 %v1961_v7, %v1961_v7  ;;  %v582_v23 = vld [vmem:[#allocation2 + $0x98] sm:$0xff]  ;;  %v1246_v25 = vpop.f32.mrf.mxu1 }
 0x122   : > { %v1324_v46 = vadd.f32 %v3350_v27, %v581_v39  ;;  %v2112_v48 = vsel %vm2072_vm11, %v2111_v21, %v2110_v15  ;;  %v3988_v50 = vunpack.c.l.b16 %v3210_v31  ;;  %v1964_v53 = vld [vmem:[#allocation2 + $0x58] sm:$0xff]  ;;  %v1903_v54 = vadd.f32 %v3932_v36, %v1384_v45 }
 0x123   : > { %v1382_v56 = vld [vmem:[#allocation2 + $0x60] sm:$0xff]  ;;  %v2311_v41 = vrot.slane %v3981_v35, 1  ;;  %v2154_v59 = vrot.slane %v3981_v35, 5  ;;  %v2888_v61 = vsel %vm530_vm8, %v2849_v43, 0.0  ;;  %v3227_v62 = vpack.c.bf16 %v1964_v53, %v1964_v53  ;;  %v1962_v2 = vld [vmem:[#allocation2 + $0x48] sm:$0xff] }
 0x124   : > { %v2793_v63 = vsel %vm530_vm8, %v1964_v53, 0.0  ;;  %v2852_v0 = vmul.f32 %v1964_v53, %v1964_v53  ;;  %1356 = vst.msk [vmem:[#allocation2 + $0x90] sm:$0xff] %vm530_vm8, %v1324_v46  ;;  %v1385_v4 = vld [vmem:[#allocation2 + $0x78] sm:$0xff]  ;;  %v2889_v36 = vadd.f32 %v2888_v61, %v2887_v26  ;;  %v3226_v6 = vpack.c.bf16 %v1962_v2, %v1962_v2  ;;  %1935 = vst.msk [vmem:[#allocation2 + $0x70] sm:$0xff] %vm530_vm8, %v1903_v54  ;;  %v1383_v10 = vld [vmem:[#allocation2 + $0x68] sm:$0xff] }
 0x125   : > { %v2789_v8 = vsel %vm530_vm8, %v1962_v2, 0.0  ;;  %v2850_v9 = vmul.f32 %v1962_v2, %v1962_v2  ;;  %v4000_v55 = vunpack.c.l.b16 %v3227_v62  ;;  %v1901_v13 = vadd.f32 %v3940_v49, %v1382_v56  ;;  %v580_v49 = vld [vmem:[#allocation2 + $0x88] sm:$0xff]  ;;  %v3354_v2 = vpop.f32.mrf.mxu1 }
 0x126   : > { %v2894_v51 = vsel %vm530_vm8, %v2852_v0, 0.0  ;;  %v2790_v11 = vadd.f32 %v2789_v8, %v2788_v40  ;;  %v4006_v18 = vunpack.c.l.b16 %v3226_v6  ;;  %v1904_v20 = vadd.f32 %v3948_v1, %v1385_v4  ;;  %v585_v0 = vld [vmem:[#allocation2 + $0xb0] sm:$0xff] }
 0x127   : > { %v2890_v16 = vsel %vm530_vm8, %v2850_v9, 0.0  ;;  %v1322_v21 = vadd.f32 %v1243_v58, %v579_v52  ;;  %1933 = vst.msk [vmem:[#allocation2 + $0x60] sm:$0xff] %vm530_vm8, %v1901_v13  ;;  %v1902_v15 = vadd.f32 %v3965_v19, %v1383_v10  ;;  %v1325_v31 = vadd.f32 %v3351_v12, %v582_v23  ;;  %v4019_v19 = vpop.f32.mrf.mxu0  ;;  %v583_v9 = vld [vmem:[#allocation2 + $0xa0] sm:$0xff]  ;;  %v1259_v10 = vpop.f32.mrf.mxu1 }
 0x128   : > { %v2792_v26 = vadd.f32 %v2791_v24, %v2790_v11  ;;  %v2891_v7 = vadd.f32 %v2890_v16, %v2889_v36  ;;  %1936 = vst.msk [vmem:[#allocation2 + $0x78] sm:$0xff] %vm530_vm8, %v1904_v20  ;;  %v1323_v38 = vadd.f32 %v1246_v25, %v580_v49  ;;  %v2309_v39 = vrot.slane %v3988_v50, 2 }
 0x129   : > { %1354 = vst.msk [vmem:[#allocation2 + $0x80] sm:$0xff] %vm530_vm8, %v1322_v21  ;;  %v2152_v1 = vrot.slane %v3988_v50, 6  ;;  %v2113_v27 = vrot.slane %v3988_v50, 5  ;;  %1934 = vst.msk [vmem:[#allocation2 + $0x68] sm:$0xff] %vm530_vm8, %v1902_v15  ;;  %v2115_v43 = vrot.slane %v3981_v35, 4  ;;  %v2187_v45 = vsel %vm2066_vm9, %v2186_v34, %v2185_v22  ;;  %v4046_v36 = vpop.f32.mrf.mxu0 }
 0x12a   : > { %v2893_v40 = vadd.f32 %v2892_v37, %v2891_v7  ;;  %v2794_v24 = vadd.f32 %v2793_v63, %v2792_v26  ;;  %1357 = vst.msk [vmem:[#allocation2 + $0x98] sm:$0xff] %vm530_vm8, %v1325_v31  ;;  %1355 = vst.msk [vmem:[#allocation2 + $0x88] sm:$0xff] %vm530_vm8, %v1323_v38  ;;  %v2310_v37 = vsel %vm2075_vm12, %v2309_v39, %v3974_v30  ;;  %v2188_v56 = vrot.slane %v3929_v32, 1  ;;  %v3355_v39 = vpop.f32.mrf.mxu1 }
 0x12b   : > { %v1388_v46 = vld [vmem:[#allocation2 + $0x90] sm:$0xff]  ;;  %v2153_v53 = vsel %vm2075_vm12, %v2152_v1, %v3977_v33  ;;  %v2114_v54 = vsel %vm2075_vm12, %v2113_v27, %v2112_v48  ;;  %v4036_v63 = vsel %vm2078_vm13, %v2311_v41, %v2310_v37  ;;  %v1328_v4 = vadd.f32 %v3354_v2, %v585_v0  ;;  %v1842_v21 = vpop.f32.mrf.mxu0  ;;  %v586_v2 = vld [vmem:[#allocation2 + $0xb8] sm:$0xff] }
 0x12c   : > { %v1967_v58 = vld [vmem:[#allocation2 + $0x70] sm:$0xff]  ;;  %v2895_v61 = vadd.f32 %v2894_v51, %v2893_v40  ;;  %v1907_v62 = vadd.f32 %v3985_v47, %v1388_v46  ;;  %v4039_v22 = vsel %vm2078_vm13, %v2154_v59, %v2153_v53  ;;  %v4043_v48 = vsel %vm2078_vm13, %v2115_v43, %v2114_v54 }
 0x12d   : > { %v2799_v34 = vsel %vm530_vm8, %v1967_v58, 0.0  ;;  %v2855_v30 = vmul.f32 %v1967_v58, %v1967_v58  ;;  %v3213_v33 = vpack.c.bf16 %v1967_v58, %v1967_v58  ;;  %v2189_v47 = vsel %vm2069_vm10, %v2188_v56, %v2187_v45  ;;  %1360 = vst.msk [vmem:[#allocation2 + $0xb0] sm:$0xff] %vm530_vm8, %v1328_v4  ;;  %v4065_v46 = vpop.f32.mrf.mxu0  ;;  %v1262_v56 = vpop.f32.mrf.mxu1 }
 0x12e   : > { %1939 = vst.msk [vmem:[#allocation2 + $0x90] sm:$0xff] %vm530_vm8, %v1907_v62  ;;  %v2191_v41 = vrot.slane %v3988_v50, 7  ;;  %v2193_v59 = vrot.slane %v3981_v35, 6  ;;  %v1965_v8 = vld [vmem:[#allocation2 + $0x60] sm:$0xff]  ;;  %v4056_v51 = vsel %vm2072_vm11, %v3924_v17, %v2189_v47  ;;  %v2224_v11 = vrot.slane %v3896_v42, 4 }
 0x12f   : > { %v2900_v6 = vsel %vm530_vm8, %v2855_v30, 0.0  ;;  %v4052_v12 = vunpack.c.l.b16 %v3213_v33  ;;  %v2795_v13 = vsel %vm530_vm8, %v1965_v8, 0.0  ;;  %v2853_v52 = vmul.f32 %v1965_v8, %v1965_v8  ;;  %v1968_v16 = vld [vmem:[#allocation2 + $0x78] sm:$0xff] }
 0x130   : > { %v1326_v20 = vadd.f32 %v1259_v10, %v583_v9  ;;  %v3212_v23 = vpack.c.bf16 %v1965_v8, %v1965_v8  ;;  %v2796_v25 = vadd.f32 %v2795_v13, %v2794_v24  ;;  %v3229_v26 = vpack.c.bf16 %v1968_v16, %v1968_v16  ;;  %v1966_v31 = vld [vmem:[#allocation2 + $0x68] sm:$0xff]  ;;  %v1386_v49 = vld [vmem:[#allocation2 + $0x80] sm:$0xff] }
 0x131   : > { %v2801_v7 = vsel %vm530_vm8, %v1968_v16, 0.0  ;;  %v2856_v15 = vmul.f32 %v1968_v16, %v1968_v16  ;;  %v1389_v38 = vld [vmem:[#allocation2 + $0x98] sm:$0xff]  ;;  %v2896_v1 = vsel %vm530_vm8, %v2853_v52, 0.0  ;;  %v3228_v27 = vpack.c.bf16 %v1966_v31, %v1966_v31  ;;  %v1387_v45 = vld [vmem:[#allocation2 + $0x88] sm:$0xff]  ;;  %v4081_v16 = vpop.f32.mrf.mxu0 }
 0x132   : > { %v2797_v40 = vsel %vm530_vm8, %v1966_v31, 0.0  ;;  %v2854_v43 = vmul.f32 %v1966_v31, %v1966_v31  ;;  %1358 = vst.msk [vmem:[#allocation2 + $0xa0] sm:$0xff] %vm530_vm8, %v1326_v20  ;;  %v2897_v24 = vadd.f32 %v2896_v1, %v2895_v61  ;;  %v4067_v37 = vunpack.c.l.b16 %v3229_v26  ;;  %v584_v9 = vld [vmem:[#allocation2 + $0xa8] sm:$0xff] }
 0x133   : > { %v2902_v53 = vsel %vm530_vm8, %v2856_v15, 0.0  ;;  %v2798_v54 = vadd.f32 %v2797_v40, %v2796_v25  ;;  %v4070_v58 = vunpack.c.l.b16 %v3228_v27  ;;  %v1905_v30 = vadd.f32 %v3996_v5, %v1386_v49 }
 0x134   : > { %v2898_v62 = vsel %vm530_vm8, %v2854_v43, 0.0  ;;  %v1908_v0 = vadd.f32 %v4004_v14, %v1389_v38  ;;  %v1906_v61 = vadd.f32 %v4019_v19, %v1387_v45  ;;  %v1329_v8 = vadd.f32 %v3355_v39, %v586_v2  ;;  %v1392_v19 = vld [vmem:[#allocation2 + $0xb0] sm:$0xff]  ;;  %v3358_v39 = vpop.f32.mrf.mxu1  ;;  %v4102_v43 = vpop.f32.mrf.mxu0 }
 0x135   : > { %v2800_v33 = vadd.f32 %v2799_v34, %v2798_v54  ;;  %v2899_v4 = vadd.f32 %v2898_v62, %v2897_v24  ;;  %v1971_v47 = vld [vmem:[#allocation2 + $0x90] sm:$0xff]  ;;  %1937 = vst.msk [vmem:[#allocation2 + $0x80] sm:$0xff] %vm530_vm8, %v1905_v30  ;;  %v1327_v5 = vadd.f32 %v1262_v56, %v584_v9  ;;  %v4085_v20 = vunpack.c.l.b16 %v3212_v23 }
 0x136   : > { %v3215_v10 = vpack.c.bf16 %v1971_v47, %v1971_v47  ;;  %v4077_v13 = vsel %vm530_vm8, %v1971_v47, 0.0  ;;  %v2859_v52 = vmul.f32 %v1971_v47, %v1971_v47  ;;  %1940 = vst.msk [vmem:[#allocation2 + $0x98] sm:$0xff] %vm530_vm8, %v1908_v0  ;;  %1938 = vst.msk [vmem:[#allocation2 + $0x88] sm:$0xff] %vm530_vm8, %v1906_v61  ;;  %v2314_v25 = vrot.slane %v4052_v12, 7  ;;  %v589_v38 = vld [vmem:[#allocation2 + $0xd0] sm:$0xff]  ;;  %v1275_v54 = vpop.f32.mrf.mxu1  ;;  %v4123_v47 = vpop.f32.mrf.mxu0 }
 0x137   : > { %v2901_v14 = vadd.f32 %v2900_v6, %v2899_v4  ;;  %v2802_v34 = vadd.f32 %v2801_v7, %v2800_v33  ;;  %1361 = vst.msk [vmem:[#allocation2 + $0xb8] sm:$0xff] %vm530_vm8, %v1329_v8  ;;  %v1911_v31 = vadd.f32 %v4046_v36, %v1392_v19  ;;  %1359 = vst.msk [vmem:[#allocation2 + $0xa8] sm:$0xff] %vm530_vm8, %v1327_v5  ;;  %v2158_v6 = vrot.slane %v4052_v12, 3 }
 0x138   : > { %v4088_v26 = vunpack.c.l.b16 %v3215_v10  ;;  %v4091_v15 = vsel %vm530_vm8, %v2859_v52, 0.0  ;;  %v2313_v23 = vsel %vm2081_vm14, %v4085_v20, %v4036_v63  ;;  %v2156_v1 = vrot.slane %v4085_v20, 4  ;;  %v3359_v4 = vpop.f32.mrf.mxu1 }
 0x139   : > { %v2903_v7 = vadd.f32 %v2902_v53, %v2901_v14  ;;  %v1390_v49 = vld [vmem:[#allocation2 + $0xa0] sm:$0xff]  ;;  %v2117_v27 = vrot.slane %v4085_v20, 3  ;;  %1943 = vst.msk [vmem:[#allocation2 + $0xb0] sm:$0xff] %vm530_vm8, %v1911_v31  ;;  %v1332_v36 = vadd.f32 %v3358_v39, %v589_v38  ;;  %v2315_v45 = vsel %vm2084_vm15, %v2314_v25, %v2313_v23 }
 0x13a   : > { %v1909_v40 = vadd.f32 %v1842_v21, %v1390_v49  ;;  %v2119_v24 = vrot.slane %v4052_v12, 2  ;;  %v587_v53 = vld [vmem:[#allocation2 + $0xc0] sm:$0xff]  ;;  %v2330_v56 = vpack.c.b16 %v2315_v45, %v2315_v45  ;;  %v2157_v63 = vsel %vm2081_vm14, %v2156_v1, %v4039_v22 }
 0x13b   : > { %v2118_v62 = vsel %vm2081_vm14, %v2117_v27, %v4043_v48  ;;  %v2192_v21 = vsel %vm2075_vm12, %v2191_v41, %v4056_v51  ;;  %1364 = vst.msk [vmem:[#allocation2 + $0xd0] sm:$0xff] %vm530_vm8, %v1332_v36  ;;  %v1330_v30 = vadd.f32 %v1275_v54, %v587_v53  ;;  %v2159_v0 = vsel %vm2084_vm15, %v2158_v6, %v2157_v63  ;;  %v4141_v53 = vpop.f32.mrf.mxu0 }
 0x13c   : > { %1941 = vst.msk [vmem:[#allocation2 + $0xa0] sm:$0xff] %vm530_vm8, %v1909_v40  ;;  %v2120_v2 = vsel %vm2084_vm15, %v2119_v24, %v2118_v62  ;;  %v4121_v22 = vsel %vm2078_vm13, %v2193_v59, %v2192_v21  ;;  %v1969_v48 = vld [vmem:[#allocation2 + $0x80] sm:$0xff]  ;;  %2332 = vrot.lane.b32.xlu0 %v2330_v56, %s3462_s4  ;;  %v2174_v41 = vpack.c.b16 %v2159_v0, %v2159_v0  ;;  %v2195_v61 = vrot.slane %v4085_v20, 5  ;;  %v1278_v24 = vpop.f32.mrf.mxu1  ;;  %v590_v21 = vld [vmem:[#allocation2 + $0xd8] sm:$0xff] }
 0x13d   : > { %v1972_v33 = vld [vmem:[#allocation2 + $0x98] sm:$0xff]  ;;  %v2135_v51 = vpack.c.b16 %v2120_v2, %v2120_v2  ;;  %v2197_v8 = vrot.slane %v4052_v12, 4  ;;  %v3214_v9 = vpack.c.bf16 %v1969_v48, %v1969_v48  ;;  %v2803_v10 = vsel %vm530_vm8, %v1969_v48, 0.0  ;;  %v1970_v5 = vld [vmem:[#allocation2 + $0x88] sm:$0xff]  ;;  %1362 = vst.msk [vmem:[#allocation2 + $0xc0] sm:$0xff] %vm530_vm8, %v1330_v30 }
 0x13e   : > { %v2857_v52 = vmul.f32 %v1969_v48, %v1969_v48  ;;  %v3231_v59 = vpack.c.bf16 %v1972_v33, %v1972_v33  ;;  %v2804_v14 = vadd.f32 %v2803_v10, %v2802_v34  ;;  %v2809_v19 = vsel %vm530_vm8, %v1972_v33, 0.0  ;;  %2176 = vrot.lane.b32.xlu1 %v2174_v41, %s3463_s5  ;;  %v1393_v23 = vld [vmem:[#allocation2 + $0xb8] sm:$0xff]  ;;  %v1391_v1 = vld [vmem:[#allocation2 + $0xa8] sm:$0xff] }
 0x13f   : > { %v2860_v25 = vmul.f32 %v1972_v33, %v1972_v33  ;;  %v3230_v31 = vpack.c.bf16 %v1970_v5, %v1970_v5  ;;  %v4132_v6 = vunpack.c.l.b16 %v3214_v9  ;;  %v2805_v39 = vsel %vm530_vm8, %v1970_v5, 0.0 }
 0x140   : > { %v2904_v49 = vsel %vm530_vm8, %v2857_v52, 0.0  ;;  %v4135_v38 = vunpack.c.l.b16 %v3231_v59  ;;  %v2806_v36 = vadd.f32 %v2805_v39, %v2804_v14  ;;  %v1975_v45 = vld [vmem:[#allocation2 + $0xb0] sm:$0xff]  ;;  %2137 = vrot.lane.b32.xlu0 %v2135_v51, %s3464_s6  ;;  %v2858_v54 = vmul.f32 %v1970_v5, %v1970_v5  ;;  %v4160_v14 = vpop.f32.mrf.mxu0 }
 0x141   : > { %v2905_v27 = vadd.f32 %v2904_v49, %v2903_v7  ;;  %v2910_v34 = vsel %vm530_vm8, %v2860_v25, 0.0  ;;  %v4139_v40 = vunpack.c.l.b16 %v3230_v31  ;;  %v3217_v56 = vpack.c.bf16 %v1975_v45, %v1975_v45  ;;  %v593_v39 = vld [vmem:[#allocation2 + $0xf0] sm:$0xff] }
 0x142   : > { %v4145_v63 = vsel %vm530_vm8, %v1975_v45, 0.0  ;;  %v2863_v62 = vmul.f32 %v1975_v45, %v1975_v45  ;;  %v2808_v7 = vadd.f32 %v4077_v13, %v2806_v36  ;;  %v1912_v0 = vadd.f32 %v4065_v46, %v1393_v23  ;;  %v1396_v33 = vld [vmem:[#allocation2 + $0xd0] sm:$0xff]  ;;  %v588_v46 = vld [vmem:[#allocation2 + $0xc8] sm:$0xff]  ;;  %v591_v45 = vld [vmem:[#allocation2 + $0xe0] sm:$0xff] }
 0x143   : > { %v1973_v30 = vld [vmem:[#allocation2 + $0xa0] sm:$0xff]  ;;  %v1910_v2 = vadd.f32 %v4081_v16, %v1391_v1  ;;  %v1333_v48 = vadd.f32 %v3359_v4, %v590_v21  ;;  %v2906_v41 = vsel %vm530_vm8, %v2858_v54, 0.0  ;;  %v4151_v9 = vunpack.c.l.b16 %v3217_v56  ;;  %v3362_v4 = vpop.f32.mrf.mxu1 }
 0x144   : > { %v4154_v51 = vsel %vm530_vm8, %v2863_v62, 0.0  ;;  %v3216_v10 = vpack.c.bf16 %v1973_v30, %v1973_v30  ;;  %v2907_v52 = vadd.f32 %v2906_v41, %v2905_v27  ;;  %v2810_v59 = vadd.f32 %v2809_v19, %v2808_v7  ;;  %1944 = vst.msk [vmem:[#allocation2 + $0xb8] sm:$0xff] %vm530_vm8, %v1912_v0  ;;  %v1394_v16 = vld [vmem:[#allocation2 + $0xc0] sm:$0xff]  ;;  %v594_v62 = vld [vmem:[#allocation2 + $0xf8] sm:$0xff]  ;;  %v3398_v7 = vpop.f32.mrf.mxu0  ;;  %v592_v41 = vld [vmem:[#allocation2 + $0xe8] sm:$0xff] }
 0x145   : > { %v2811_v5 = vsel %vm530_vm8, %v1973_v30, 0.0  ;;  %v2861_v13 = vmul.f32 %v1973_v30, %v1973_v30  ;;  %1942 = vst.msk [vmem:[#allocation2 + $0xa8] sm:$0xff] %vm530_vm8, %v1910_v2  ;;  %1365 = vst.msk [vmem:[#allocation2 + $0xd8] sm:$0xff] %vm530_vm8, %v1333_v48  ;;  %v1915_v31 = vadd.f32 %v4102_v43, %v1396_v33  ;;  %v1331_v49 = vadd.f32 %v1278_v24, %v588_v46  ;;  %v1291_v54 = vpop.f32.mrf.mxu1 }
 0x146   : > { %v4162_v25 = vunpack.c.l.b16 %v3216_v10  ;;  %v1913_v19 = vadd.f32 %v4123_v47, %v1394_v16  ;;  %v2909_v23 = vadd.f32 %v4091_v15, %v2907_v52  ;;  %v2812_v1 = vadd.f32 %v2811_v5, %v2810_v59 }
 0x147   : > { %v2912_v27 = vsel %vm530_vm8, %v2861_v13, 0.0  ;;  %v1336_v36 = vadd.f32 %v3362_v4, %v593_v39  ;;  %1947 = vst.msk [vmem:[#allocation2 + $0xd0] sm:$0xff] %vm530_vm8, %v1915_v31  ;;  %1363 = vst.msk [vmem:[#allocation2 + $0xc8] sm:$0xff] %vm530_vm8, %v1331_v49  ;;  %v1334_v56 = vadd.f32 %v1291_v54, %v591_v45  ;;  %v2196_v43 = vsel %vm2081_vm14, %v2195_v61, %v4121_v22  ;;  %v3363_v21 = vpop.f32.mrf.mxu1 }
 0x148   : > { %1945 = vst.msk [vmem:[#allocation2 + $0xc0] sm:$0xff] %vm530_vm8, %v1913_v19  ;;  %v2225_v15 = vrot.slane %v3887_v29, 3  ;;  %v2227_v47 = vrot.slane %v3929_v32, 2  ;;  %v2911_v24 = vadd.f32 %v2910_v34, %v2909_v23  ;;  %v2198_v30 = vsel %vm2084_vm15, %v2197_v8, %v2196_v43 }
 0x149   : > { %1368 = vst.msk [vmem:[#allocation2 + $0xf0] sm:$0xff] %vm530_vm8, %v1336_v36  ;;  %v2229_v0 = vrot.slane %v3924_v17, 1  ;;  %v2232_v2 = vrot.slane %v3981_v35, 7  ;;  %1366 = vst.msk [vmem:[#allocation2 + $0xe0] sm:$0xff] %vm530_vm8, %v1334_v56  ;;  %v1337_v22 = vadd.f32 %v3363_v21, %v594_v62  ;;  %v2213_v61 = vpack.c.b16 %v2198_v30, %v2198_v30  ;;  %v1294_v10 = vpop.f32.mrf.mxu1 }
 0x14a   : > { %v2226_v34 = vsel %vm2066_vm9, %v2225_v15, %v2224_v11  ;;  %v2234_v48 = vrot.slane %v4085_v20, 6  ;;  %v2913_v33 = vadd.f32 %v2912_v27, %v2911_v24  ;;  %v2236_v8 = vrot.slane %v4052_v12, 5  ;;  %v1874_v27 = vpop.f32.mrf.mxu0 }
 0x14b   : > { %v2228_v52 = vsel %vm2069_vm10, %v2227_v47, %v2226_v34  ;;  %v2263_v59 = vrot.slane %v3896_v42, 5  ;;  %v1976_v5 = vld [vmem:[#allocation2 + $0xb8] sm:$0xff]  ;;  %1369 = vst.msk [vmem:[#allocation2 + $0xf8] sm:$0xff] %vm530_vm8, %v1337_v22  ;;  %v1335_v16 = vadd.f32 %v1294_v10, %v592_v41  ;;  %2215 = vrot.lane.b32.xlu0 %v2213_v61, %s3465_s7  ;;  %v2264_v4 = vrot.slane %v3887_v29, 4 }
 0x14c   : > { %v1974_v13 = vld [vmem:[#allocation2 + $0xa8] sm:$0xff]  ;;  %v1397_v46 = vld [vmem:[#allocation2 + $0xd8] sm:$0xff]  ;;  %v2230_v11 = vsel %vm2072_vm11, %v2229_v0, %v2228_v52  ;;  %v2266_v31 = vrot.slane %v3929_v32, 3  ;;  %v3233_v49 = vpack.c.bf16 %v1976_v5, %v1976_v5  ;;  %v2817_v19 = vsel %vm530_vm8, %v1976_v5, 0.0 }
 0x14d   : > { %v2864_v39 = vmul.f32 %v1976_v5, %v1976_v5  ;;  %v3232_v23 = vpack.c.bf16 %v1974_v13, %v1974_v13  ;;  %v2813_v36 = vsel %vm530_vm8, %v1974_v13, 0.0  ;;  %v2862_v45 = vmul.f32 %v1974_v13, %v1974_v13  ;;  %1367 = vst.msk [vmem:[#allocation2 + $0xe8] sm:$0xff] %vm530_vm8, %v1335_v16  ;;  %v3399_v13 = vpop.f32.mrf.mxu0 }
 0x14e   : > { %v1916_v54 = vadd.f32 %v4141_v53, %v1397_v46  ;;  %v2231_v56 = vsel %vm2075_vm12, %v3988_v50, %v2230_v11  ;;  %v4202_v43 = vunpack.c.l.b16 %v3233_v49  ;;  %v2814_v24 = vadd.f32 %v2813_v36, %v2812_v1  ;;  %v1979_v62 = vld [vmem:[#allocation2 + $0xd0] sm:$0xff]  ;;  %v1395_v30 = vld [vmem:[#allocation2 + $0xc8] sm:$0xff] }
 0x14f   : > { %v2918_v15 = vsel %vm530_vm8, %v2864_v39, 0.0  ;;  %v4205_v47 = vunpack.c.l.b16 %v3232_v23  ;;  %v1977_v21 = vld [vmem:[#allocation2 + $0xc0] sm:$0xff]  ;;  %v2914_v0 = vsel %vm530_vm8, %v2862_v45, 0.0  ;;  %v3219_v22 = vpack.c.bf16 %v1979_v62, %v1979_v62 }
 0x150   : > { %v4209_v53 = vsel %vm530_vm8, %v1979_v62, 0.0  ;;  %v2867_v61 = vmul.f32 %v1979_v62, %v1979_v62  ;;  %1948 = vst.msk [vmem:[#allocation2 + $0xd8] sm:$0xff] %vm530_vm8, %v1916_v54  ;;  %v1400_v34 = vld [vmem:[#allocation2 + $0xf0] sm:$0xff]  ;;  %v2816_v41 = vadd.f32 %v4145_v63, %v2814_v24  ;;  %v2915_v10 = vadd.f32 %v2914_v0, %v2913_v33  ;;  %v1398_v1 = vld [vmem:[#allocation2 + $0xe0] sm:$0xff] }
 0x151   : > { %v3218_v52 = vpack.c.bf16 %v1977_v21, %v1977_v21  ;;  %v2819_v5 = vsel %vm530_vm8, %v1977_v21, 0.0  ;;  %v4214_v46 = vunpack.c.l.b16 %v3219_v22  ;;  %v2865_v11 = vmul.f32 %v1977_v21, %v1977_v21 }
 0x152   : > { %v4217_v16 = vsel %vm530_vm8, %v2867_v61, 0.0  ;;  %v1914_v49 = vadd.f32 %v4160_v14, %v1395_v30  ;;  %v2917_v39 = vadd.f32 %v4154_v51, %v2915_v10  ;;  %v2818_v36 = vadd.f32 %v2817_v19, %v2816_v41  ;;  %v1401_v33 = vld [vmem:[#allocation2 + $0xf8] sm:$0xff]  ;;  %v1877_v14 = vpop.f32.mrf.mxu0 }
 0x153   : > { %v4221_v23 = vunpack.c.l.b16 %v3218_v52  ;;  %v1919_v63 = vadd.f32 %v3398_v7, %v1400_v34  ;;  %v2920_v45 = vsel %vm530_vm8, %v2865_v11, 0.0  ;;  %v1917_v54 = vadd.f32 %v1874_v27, %v1398_v1 }
 0x154   : > { %1946 = vst.msk [vmem:[#allocation2 + $0xc8] sm:$0xff] %vm530_vm8, %v1914_v49  ;;  %v1920_v24 = vadd.f32 %v3399_v13, %v1401_v33  ;;  %v2233_v62 = vsel %vm2078_vm13, %v2232_v2, %v2231_v56  ;;  %v2820_v21 = vadd.f32 %v2819_v5, %v2818_v36  ;;  %v2919_v0 = vadd.f32 %v2918_v15, %v2917_v39  ;;  %v1399_v51 = vld [vmem:[#allocation2 + $0xe8] sm:$0xff] }
 0x155   : > { %1951 = vst.msk [vmem:[#allocation2 + $0xf0] sm:$0xff] %vm530_vm8, %v1919_v63  ;;  %v2235_v7 = vsel %vm2081_vm14, %v2234_v48, %v2233_v62  ;;  %v2265_v19 = vsel %vm2066_vm9, %v2264_v4, %v2263_v59  ;;  %1949 = vst.msk [vmem:[#allocation2 + $0xe0] sm:$0xff] %vm530_vm8, %v1917_v54  ;;  %v1918_v27 = vadd.f32 %v1877_v14, %v1399_v51  ;;  %v2268_v15 = vrot.slane %v3924_v17, 2 }
 0x156   : > { %1952 = vst.msk [vmem:[#allocation2 + $0xf8] sm:$0xff] %vm530_vm8, %v1920_v24  ;;  %v2237_v2 = vsel %vm2084_vm15, %v2236_v8, %v2235_v7  ;;  %v2267_v56 = vsel %vm2069_vm10, %v2266_v31, %v2265_v19  ;;  %v2921_v30 = vadd.f32 %v2920_v45, %v2919_v0  ;;  %v2270_v48 = vrot.slane %v3988_v50, 1 }
 0x157   : > { %v1980_v22 = vld [vmem:[#allocation2 + $0xd8] sm:$0xff]  ;;  %v2252_v61 = vpack.c.b16 %v2237_v2, %v2237_v2  ;;  %v2273_v59 = vrot.slane %v4085_v20, 7  ;;  %1950 = vst.msk [vmem:[#allocation2 + $0xe8] sm:$0xff] %vm530_vm8, %v1918_v27  ;;  %v2269_v10 = vsel %vm2072_vm11, %v2268_v15, %v2267_v56  ;;  %v2275_v31 = vrot.slane %v4052_v12, 6 }
 0x158   : > { %v3235_v4 = vpack.c.bf16 %v1980_v22, %v1980_v22  ;;  %v2825_v34 = vsel %vm530_vm8, %v1980_v22, 0.0  ;;  %v2868_v41 = vmul.f32 %v1980_v22, %v1980_v22  ;;  %v2271_v8 = vsel %vm2075_vm12, %v2270_v48, %v2269_v10 }
 0x159   : > { %2254 = vrot.lane.b32.xlu0 %v2252_v61, %s3466_s8  ;;  %v2341_v52 = vrot.slane %v3896_v42, 7  ;;  %v2342_v5 = vrot.slane %v3887_v29, 6  ;;  %v2272_v11 = vsel %vm2078_vm13, %v3981_v35, %v2271_v8  ;;  %v2344_v49 = vrot.slane %v3929_v32, 5 }
 0x15a   : > { %v4250_v1 = vunpack.c.l.b16 %v3235_v4  ;;  %v2926_v13 = vsel %vm530_vm8, %v2868_v41, 0.0  ;;  %v2274_v36 = vsel %vm2081_vm14, %v2273_v59, %v2272_v11  ;;  %v2346_v33 = vrot.slane %v3924_v17, 4 }
 0x15b   : > { %v1978_v39 = vld [vmem:[#allocation2 + $0xc8] sm:$0xff]  ;;  %v2343_v63 = vsel %vm2066_vm9, %v2342_v5, %v2341_v52  ;;  %v2348_v45 = vrot.slane %v3988_v50, 3  ;;  %v2276_v51 = vsel %vm2084_vm15, %v2275_v31, %v2274_v36  ;;  %v2509_v28 = vrot.slane %v4070_v58, 3 }
 0x15c   : > { %v3234_v54 = vpack.c.bf16 %v1978_v39, %v1978_v39  ;;  %v2821_v24 = vsel %vm530_vm8, %v1978_v39, 0.0  ;;  %v2866_v62 = vmul.f32 %v1978_v39, %v1978_v39  ;;  %v1983_v0 = vld [vmem:[#allocation2 + $0xf0] sm:$0xff]  ;;  %v4263_v2 = vld [vmem:[#allocation2 + $0xe0] sm:$0xff] }
 0x15d   : > { %v2822_v14 = vadd.f32 %v2821_v24, %v2820_v21  ;;  %v3221_v7 = vpack.c.bf16 %v1983_v0, %v1983_v0  ;;  %v2831_v19 = vsel %vm530_vm8, %v1983_v0, 0.0  ;;  %v2871_v27 = vmul.f32 %v1983_v0, %v1983_v0  ;;  %v1984_v56 = vld [vmem:[#allocation2 + $0xf8] sm:$0xff] }
 0x15e   : > { %v4265_v15 = vunpack.c.l.b16 %v3234_v54  ;;  %v2922_v22 = vsel %vm530_vm8, %v2866_v62, 0.0  ;;  %v2827_v61 = vsel %vm530_vm8, %v4263_v2, 0.0  ;;  %v2869_v48 = vmul.f32 %v4263_v2, %v4263_v2  ;;  %v4276_v10 = vld [vmem:[#allocation2 + $0xe8] sm:$0xff] }
 0x15f   : > { %v2824_v59 = vadd.f32 %v4209_v53, %v2822_v14  ;;  %v2923_v21 = vadd.f32 %v2922_v22, %v2921_v30  ;;  %v4273_v4 = vunpack.c.l.b16 %v3221_v7  ;;  %v2932_v41 = vsel %vm530_vm8, %v2871_v27, 0.0 }
 0x160   : > { %v2928_v8 = vsel %vm530_vm8, %v2869_v48, 0.0  ;;  %v3237_v31 = vpack.c.bf16 %v1984_v56, %v1984_v56  ;;  %v2833_v52 = vsel %vm530_vm8, %v1984_v56, 0.0  ;;  %v2872_v5 = vmul.f32 %v1984_v56, %v1984_v56 }
 0x161   : > { %v2925_v11 = vadd.f32 %v4217_v16, %v2923_v21  ;;  %v2826_v39 = vadd.f32 %v2825_v34, %v2824_v59  ;;  %v2829_v36 = vsel %vm530_vm8, %v4276_v10, 0.0  ;;  %v2870_v53 = vmul.f32 %v4276_v10, %v4276_v10 }
 0x162   : > { %v4285_v30 = vunpack.c.l.b16 %v3237_v31  ;;  %v2934_v54 = vsel %vm530_vm8, %v2872_v5, 0.0  ;;  %v2291_v24 = vpack.c.b16 %v2276_v51, %v2276_v51  ;;  %v2345_v62 = vsel %vm2069_vm10, %v2344_v49, %v2343_v63 }
 0x163   : > { %v2828_v0 = vadd.f32 %v2827_v61, %v2826_v39  ;;  %v2927_v14 = vadd.f32 %v2926_v13, %v2925_v11  ;;  %v2930_v7 = vsel %vm530_vm8, %v2870_v53, 0.0  ;;  %v2347_v16 = vsel %vm2072_vm11, %v2346_v33, %v2345_v62 }
 0x164   : > { %2293 = vrot.lane.b32.xlu0 %v2291_v24, %s3467_s9  ;;  %v2349_v34 = vsel %vm2075_vm12, %v2348_v45, %v2347_v16  ;;  %v2350_v27 = vrot.slane %v3981_v35, 2  ;;  %v2352_v56 = vrot.slane %v4085_v20, 1  ;;  %v2460_v22 = vrot.slane %v3905_v57, 7 }
 0x165   : > { %v2929_v51 = vadd.f32 %v2928_v8, %v2927_v14  ;;  %v2830_v48 = vadd.f32 %v2829_v36, %v2828_v0  ;;  %v2462_v49 = vrot.slane %v3944_v60, 6  ;;  %v2464_v13 = vrot.slane %v3937_v44, 5 }
 0x166   : > { %v2351_v63 = vsel %vm2078_vm13, %v2350_v27, %v2349_v34  ;;  %v2461_v33 = vsel %vm2066_vm9, %v2460_v22, %v3912_v3  ;;  %v2466_v61 = vrot.slane %v4006_v18, 4  ;;  %v2468_v45 = vrot.slane %v4000_v55, 3 }
 0x167   : > { %v2832_v59 = vadd.f32 %v2831_v19, %v2830_v48  ;;  %v2931_v21 = vadd.f32 %v2930_v7, %v2929_v51  ;;  %v2353_v31 = vsel %vm2081_vm14, %v2352_v56, %v2351_v63  ;;  %v2463_v8 = vsel %vm2069_vm10, %v2462_v49, %v2461_v33 }
 0x168   : > { %v2354_v5 = vsel %vm2084_vm15, %v4052_v12, %v2353_v31  ;;  %v2465_v11 = vsel %vm2072_vm11, %v2464_v13, %v2463_v8  ;;  %v2470_v39 = vrot.slane %v4070_v58, 2  ;;  %v2472_v36 = vrot.slane %v4067_v37, 1 }
 0x169   : > { %v2834_v53 = vadd.f32 %v2833_v52, %v2832_v59  ;;  %v2933_v24 = vadd.f32 %v2932_v41, %v2931_v21  ;;  %v2369_v62 = vpack.c.b16 %v2354_v5, %v2354_v5  ;;  %v2467_v19 = vsel %vm2075_vm12, %v2466_v61, %v2465_v11 }
 0x16a   : > { %v2469_v0 = vsel %vm2078_vm13, %v2468_v45, %v2467_v19  ;;  %v3220_v14 = vpack.c.bf16 %v4263_v2, %v4263_v2  ;;  %v2316_v7 = vrot.slane %v4132_v6, 6  ;;  %v2317_v16 = vrot.slane %v4088_v26, 5 }
 0x16b   : > { %v2835_v34 = vrot.slane %v2834_v53, 4  ;;  %v2935_v27 = vadd.f32 %v2934_v54, %v2933_v24  ;;  %2371 = vrot.lane.b32.xlu0 %v2369_v62, %s3468_s10  ;;  %v2471_v41 = vsel %vm2081_vm14, %v2470_v39, %v2469_v0  ;;  %v2319_v52 = vrot.slane %v4162_v25, 4 }
 0x16c   : > { %v2473_v56 = vsel %vm2084_vm15, %v2472_v36, %v2471_v41  ;;  %v4320_v22 = vunpack.c.l.b16 %v3220_v14  ;;  %v2318_v51 = vsel %vm2066_vm9, %v2317_v16, %v2316_v7  ;;  %v2321_v2 = vrot.slane %v4151_v9, 3 }
 0x16d   : > { %v2836_v48 = vadd.f32 %v2835_v34, %v2834_v53  ;;  %v2936_v49 = vrot.slane %v2935_v27, 4  ;;  %v2488_v13 = vpack.c.b16 %v2473_v56, %v2473_v56  ;;  %v2320_v54 = vsel %vm2069_vm10, %v2319_v52, %v2318_v51 }
 0x16e   : > { %v2322_v63 = vsel %vm2072_vm11, %v2321_v2, %v2320_v54  ;;  %v2323_v33 = vrot.slane %v4221_v23, 2  ;;  %v2325_v61 = vrot.slane %v4214_v46, 1  ;;  %v2328_v45 = vrot.slane %v4273_v4, 7 }
 0x16f   : > { %v2837_v59 = vrot.slane %v2836_v48, 2  ;;  %v2937_v21 = vadd.f32 %v2936_v49, %v2935_v27  ;;  %2490 = vrot.lane.b32.xlu0 %v2488_v13, %s3469_s11  ;;  %v2121_v31 = vrot.slane %v4132_v6, 1  ;;  %v2123_v8 = vrot.slane %v4162_v25, 7 }
 0x170   : > { %v2324_v5 = vsel %vm2075_vm12, %v2323_v33, %v2322_v63  ;;  %v2125_v11 = vrot.slane %v4151_v9, 6  ;;  %v2127_v39 = vrot.slane %v4221_v23, 5  ;;  %v2129_v36 = vrot.slane %v4214_v46, 4 }
 0x171   : > { %v2838_v53 = vadd.f32 %v2837_v59, %v2836_v48  ;;  %v2938_v24 = vrot.slane %v2937_v21, 2  ;;  %v2326_v62 = vsel %vm2078_vm13, %v2325_v61, %v2324_v5  ;;  %v2122_v19 = vsel %vm2066_vm9, %v4088_v26, %v2121_v31 }
 0x172   : > { %v2327_v0 = vsel %vm2081_vm14, %v4320_v22, %v2326_v62  ;;  %v2124_v14 = vsel %vm2069_vm10, %v2123_v8, %v2122_v19  ;;  %v2131_v7 = vrot.slane %v4320_v22, 3  ;;  %v2133_v16 = vrot.slane %v4273_v4, 2 }
 0x173   : > { %v2839_v34 = vrot.slane %v2838_v53, 1  ;;  %v2939_v27 = vadd.f32 %v2938_v24, %v2937_v21  ;;  %v2329_v41 = vsel %vm2084_vm15, %v2328_v45, %v2327_v0  ;;  %v2126_v52 = vsel %vm2072_vm11, %v2125_v11, %v2124_v14 }
 0x174   : > { %v2331_v56 = vpack.c.b16 %v2329_v41, %v2329_v41  ;;  %v2128_v51 = vsel %vm2075_vm12, %v2127_v39, %v2126_v52  ;;  %v2160_v2 = vrot.slane %v4132_v6, 2  ;;  %v2161_v48 = vrot.slane %v4088_v26, 1 }
 0x175   : > { %v2840_v49 = vadd.f32 %v2839_v34, %v2838_v53  ;;  %v2940_v13 = vrot.slane %v2939_v27, 1  ;;  %v2130_v54 = vsel %vm2078_vm13, %v2129_v36, %v2128_v51  ;;  %v2164_v63 = vrot.slane %v4151_v9, 7 }
 0x176   : > { %2334 = vrot.lane.b32.xlu1 %v2331_v56, %s3462_s4  ;;  %v2132_v33 = vsel %vm2081_vm14, %v2131_v7, %v2130_v54  ;;  %v2162_v61 = vsel %vm2066_vm9, %v2161_v48, %v2160_v2  ;;  %v2166_v45 = vrot.slane %v4221_v23, 6  ;;  %v2168_v59 = vrot.slane %v4214_v46, 5 }
 0x177   : > { %v2941_v21 = vadd.f32 %v2940_v13, %v2939_v27  ;;  %v2134_v31 = vsel %vm2084_vm15, %v2133_v16, %v2132_v33  ;;  %v2163_v8 = vsel %vm2069_vm10, %v4162_v25, %v2162_v61  ;;  %v2170_v5 = vrot.slane %v4320_v22, 4 }
 0x178   : > { %v2136_v11 = vpack.c.b16 %v2134_v31, %v2134_v31  ;;  %v2165_v39 = vsel %vm2072_vm11, %v2164_v63, %v2163_v8  ;;  %v2172_v36 = vrot.slane %v4273_v4, 3  ;;  %v2499_v53 = vrot.slane %v3912_v3, 1 }
 0x179   : > { %v2946_v24 = vsel %vm2945_vm0, %v2941_v21, 0.0  ;;  %v2167_v62 = vsel %vm2075_vm12, %v2166_v45, %v2165_v39  ;;  %v2501_v19 = vrot.slane %v3944_v60, 7  ;;  %v2503_v0 = vrot.slane %v3937_v44, 6 }
 0x17a   : > { %v2947_v14 = vsel %vm2944_vm1, %v2840_v49, %v2946_v24  ;;  %2139 = vrot.lane.b32.xlu0 %v2136_v11, %s3464_s6  ;;  %v2169_v7 = vsel %vm2078_vm13, %v2168_v59, %v2167_v62  ;;  %v2500_v16 = vsel %vm2066_vm9, %v3905_v57, %v2499_v53  ;;  %v2505_v34 = vrot.slane %v4006_v18, 5 }
 0x17b   : > { %2948 = vst.msk [vmem:[%s187_s18] sm:$0xff] %vm530_vm8, %v2947_v14  ;;  %v2171_v27 = vsel %vm2081_vm14, %v2170_v5, %v2169_v7  ;;  %v2502_v41 = vsel %vm2069_vm10, %v2501_v19, %v2500_v16  ;;  %v2507_v52 = vrot.slane %v4000_v55, 4  ;;  %v2511_v2 = vrot.slane %v4067_v37, 2 }
 0x17c   : > { %v2173_v56 = vsel %vm2084_vm15, %v2172_v36, %v2171_v27  ;;  %v2504_v51 = vsel %vm2072_vm11, %v2503_v0, %v2502_v41  ;;  %v2199_v48 = vrot.slane %v4132_v6, 3  ;;  %v2200_v54 = vrot.slane %v4088_v26, 2 }
 0x17d   : > { %v2175_v49 = vpack.c.b16 %v2173_v56, %v2173_v56  ;;  %v2506_v13 = vsel %vm2075_vm12, %v2505_v34, %v2504_v51  ;;  %v2202_v63 = vrot.slane %v4162_v25, 1  ;;  %v2205_v61 = vrot.slane %v4221_v23, 7 }
 0x17e   : > { %v2508_v33 = vsel %vm2078_vm13, %v2507_v52, %v2506_v13  ;;  %v2207_v45 = vrot.slane %v4214_v46, 6  ;;  %v2209_v59 = vrot.slane %v4320_v22, 5  ;;  %v2201_v31 = vsel %vm2066_vm9, %v2200_v54, %v2199_v48 }
 0x17f   : > { %2178 = vrot.lane.b32.xlu1 %v2175_v49, %s3463_s5  ;;  %v2510_v21 = vsel %vm2081_vm14, %v2509_v28, %v2508_v33  ;;  %v2211_v8 = vrot.slane %v4273_v4, 4  ;;  %v2538_v5 = vrot.slane %v3912_v3, 2  ;;  %v2203_v39 = vsel %vm2069_vm10, %v2202_v63, %v2201_v31 }
 0x180   : > { %v2512_v11 = vsel %vm2084_vm15, %v2511_v2, %v2510_v21  ;;  %v2539_v36 = vrot.slane %v3905_v57, 1  ;;  %v2542_v53 = vrot.slane %v3937_v44, 7  ;;  %v2204_v62 = vsel %vm2072_vm11, %v4151_v9, %v2203_v39 }
 0x181   : > { %v2527_v24 = vpack.c.b16 %v2512_v11, %v2512_v11  ;;  %v2544_v19 = vrot.slane %v4006_v18, 6  ;;  %v2546_v0 = vrot.slane %v4000_v55, 5  ;;  %v2206_v14 = vsel %vm2075_vm12, %v2205_v61, %v2204_v62 }
 0x182   : > { %v2540_v7 = vsel %vm2066_vm9, %v2539_v36, %v2538_v5  ;;  %v2548_v16 = vrot.slane %v4070_v58, 4  ;;  %v2550_v34 = vrot.slane %v4067_v37, 3  ;;  %v2208_v27 = vsel %vm2078_vm13, %v2207_v45, %v2206_v14 }
 0x183   : > { %2529 = vrot.lane.b32.xlu0 %v2527_v24, %s3470_s19  ;;  %v2541_v41 = vsel %vm2069_vm10, %v3944_v60, %v2540_v7  ;;  %v2238_v52 = vrot.slane %v4132_v6, 4  ;;  %v2239_v28 = vrot.slane %v4088_v26, 3  ;;  %v2210_v56 = vsel %vm2081_vm14, %v2209_v59, %v2208_v27 }
 0x184   : > { %v2543_v51 = vsel %vm2072_vm11, %v2542_v53, %v2541_v41  ;;  %v2241_v2 = vrot.slane %v4162_v25, 2  ;;  %v2243_v48 = vrot.slane %v4151_v9, 1  ;;  %v2212_v49 = vsel %vm2084_vm15, %v2211_v8, %v2210_v56 }
 0x185   : > { %v2545_v13 = vsel %vm2075_vm12, %v2544_v19, %v2543_v51  ;;  %v2240_v54 = vsel %vm2066_vm9, %v2239_v28, %v2238_v52  ;;  %v2246_v63 = vrot.slane %v4214_v46, 7  ;;  %v2214_v33 = vpack.c.b16 %v2212_v49, %v2212_v49 }
 0x186   : > { %v2547_v61 = vsel %vm2078_vm13, %v2546_v0, %v2545_v13  ;;  %v2242_v45 = vsel %vm2069_vm10, %v2241_v2, %v2240_v54  ;;  %v2248_v59 = vrot.slane %v4320_v22, 6  ;;  %v2250_v5 = vrot.slane %v4273_v4, 5 }
 0x187   : > { %v2549_v21 = vsel %vm2081_vm14, %v2548_v16, %v2547_v61  ;;  %v2244_v31 = vsel %vm2072_vm11, %v2243_v48, %v2242_v45  ;;  %v2577_v8 = vrot.slane %v3912_v3, 3  ;;  %2217 = vrot.lane.b32.xlu1 %v2214_v33, %s3465_s7  ;;  %v2578_v36 = vrot.slane %v3905_v57, 2 }
 0x188   : > { %v2551_v11 = vsel %vm2084_vm15, %v2550_v34, %v2549_v21  ;;  %v2245_v39 = vsel %vm2075_vm12, %v4221_v23, %v2244_v31  ;;  %v2580_v53 = vrot.slane %v3944_v60, 1  ;;  %v2583_v19 = vrot.slane %v4006_v18, 7 }
 0x189   : > { %v2566_v24 = vpack.c.b16 %v2551_v11, %v2551_v11  ;;  %v2247_v62 = vsel %vm2078_vm13, %v2246_v63, %v2245_v39  ;;  %v2585_v0 = vrot.slane %v4000_v55, 6  ;;  %v2579_v7 = vsel %vm2066_vm9, %v2578_v36, %v2577_v8 }
 0x18a   : > { %v2249_v14 = vsel %vm2081_vm14, %v2248_v59, %v2247_v62  ;;  %v2587_v16 = vrot.slane %v4070_v58, 5  ;;  %v2589_v34 = vrot.slane %v4067_v37, 4  ;;  %v2581_v41 = vsel %vm2069_vm10, %v2580_v53, %v2579_v7 }
 0x18b   : > { %2568 = vrot.lane.b32.xlu0 %v2566_v24, %s3471_s20  ;;  %v2251_v27 = vsel %vm2084_vm15, %v2250_v5, %v2249_v14  ;;  %v2277_v52 = vrot.slane %v4132_v6, 5  ;;  %v2278_v28 = vrot.slane %v4088_v26, 4  ;;  %v2582_v51 = vsel %vm2072_vm11, %v3937_v44, %v2581_v41 }
 0x18c   : > { %v2253_v56 = vpack.c.b16 %v2251_v27, %v2251_v27  ;;  %v2280_v2 = vrot.slane %v4162_v25, 3  ;;  %v2282_v48 = vrot.slane %v4151_v9, 2  ;;  %v2584_v49 = vsel %vm2075_vm12, %v2583_v19, %v2582_v51 }
 0x18d   : > { %v2279_v13 = vsel %vm2066_vm9, %v2278_v28, %v2277_v52  ;;  %v2284_v54 = vrot.slane %v4221_v23, 1  ;;  %v2287_v63 = vrot.slane %v4320_v22, 7  ;;  %v2586_v33 = vsel %vm2078_vm13, %v2585_v0, %v2584_v49 }
 0x18e   : > { %2256 = vrot.lane.b32.xlu1 %v2253_v56, %s3466_s8  ;;  %v2281_v61 = vsel %vm2069_vm10, %v2280_v2, %v2279_v13  ;;  %v2289_v45 = vrot.slane %v4273_v4, 6  ;;  %v2616_v59 = vrot.slane %v3912_v3, 4  ;;  %v2588_v21 = vsel %vm2081_vm14, %v2587_v16, %v2586_v33 }
 0x18f   : > { %v2283_v31 = vsel %vm2072_vm11, %v2282_v48, %v2281_v61  ;;  %v2617_v5 = vrot.slane %v3905_v57, 3  ;;  %v2619_v8 = vrot.slane %v3944_v60, 2  ;;  %v2590_v11 = vsel %vm2084_vm15, %v2589_v34, %v2588_v21 }
 0x190   : > { %v2285_v39 = vsel %vm2075_vm12, %v2284_v54, %v2283_v31  ;;  %v2621_v36 = vrot.slane %v3937_v44, 1  ;;  %v2624_v53 = vrot.slane %v4000_v55, 7  ;;  %v2605_v24 = vpack.c.b16 %v2590_v11, %v2590_v11 }
 0x191   : > { %v2286_v62 = vsel %vm2078_vm13, %v4214_v46, %v2285_v39  ;;  %v2618_v19 = vsel %vm2066_vm9, %v2617_v5, %v2616_v59  ;;  %v2626_v0 = vrot.slane %v4070_v58, 6  ;;  %v2628_v16 = vrot.slane %v4067_v37, 5 }
 0x192   : > { %v2288_v14 = vsel %vm2081_vm14, %v2287_v63, %v2286_v62  ;;  %v2620_v7 = vsel %vm2069_vm10, %v2619_v8, %v2618_v19  ;;  %v2355_v34 = vrot.slane %v4132_v6, 7  ;;  %2607 = vrot.lane.b32.xlu0 %v2605_v24, %s3472_s21  ;;  %v2356_v52 = vrot.slane %v4088_v26, 6 }
 0x193   : > { %v2290_v27 = vsel %vm2084_vm15, %v2289_v45, %v2288_v14  ;;  %v2622_v41 = vsel %vm2072_vm11, %v2621_v36, %v2620_v7  ;;  %v2358_v28 = vrot.slane %v4162_v25, 5  ;;  %v2360_v2 = vrot.slane %v4151_v9, 4 }
 0x194   : > { %v2292_v56 = vpack.c.b16 %v2290_v27, %v2290_v27  ;;  %v2623_v51 = vsel %vm2075_vm12, %v4006_v18, %v2622_v41  ;;  %v2362_v48 = vrot.slane %v4221_v23, 3  ;;  %v2357_v13 = vsel %vm2066_vm9, %v2356_v52, %v2355_v34 }
 0x195   : > { %v2625_v49 = vsel %vm2078_vm13, %v2624_v53, %v2623_v51  ;;  %v2364_v54 = vrot.slane %v4214_v46, 2  ;;  %v2366_v63 = vrot.slane %v4320_v22, 1  ;;  %v2359_v61 = vsel %vm2069_vm10, %v2358_v28, %v2357_v13 }
 0x196   : > { %2295 = vrot.lane.b32.xlu1 %v2292_v56, %s3467_s9  ;;  %v2627_v33 = vsel %vm2081_vm14, %v2626_v0, %v2625_v49  ;;  %v2655_v45 = vrot.slane %v3912_v3, 5  ;;  %v2656_v59 = vrot.slane %v3905_v57, 4  ;;  %v2361_v31 = vsel %vm2072_vm11, %v2360_v2, %v2359_v61 }
 0x197   : > { %v2629_v21 = vsel %vm2084_vm15, %v2628_v16, %v2627_v33  ;;  %v2658_v5 = vrot.slane %v3944_v60, 3  ;;  %v2660_v8 = vrot.slane %v3937_v44, 2  ;;  %v2363_v39 = vsel %vm2075_vm12, %v2362_v48, %v2361_v31 }
 0x198   : > { %v2644_v11 = vpack.c.b16 %v2629_v21, %v2629_v21  ;;  %v2657_v36 = vsel %vm2066_vm9, %v2656_v59, %v2655_v45  ;;  %v2662_v53 = vrot.slane %v4006_v18, 1  ;;  %v2365_v24 = vsel %vm2078_vm13, %v2364_v54, %v2363_v39 }
 0x199   : > { %v2659_v62 = vsel %vm2069_vm10, %v2658_v5, %v2657_v36  ;;  %v2665_v19 = vrot.slane %v4070_v58, 7  ;;  %v2667_v0 = vrot.slane %v4067_v37, 6  ;;  %v2367_v14 = vsel %vm2081_vm14, %v2366_v63, %v2365_v24 }
 0x19a   : > { %2646 = vrot.lane.b32.xlu0 %v2644_v11, %s3473_s22  ;;  %v2661_v7 = vsel %vm2072_vm11, %v2660_v8, %v2659_v62  ;;  %v3236_v16 = vpack.c.bf16 %v4276_v10, %v4276_v10  ;;  %v2708_v34 = vrot.slane %v4139_v40, 6  ;;  %v2368_v27 = vsel %vm2084_vm15, %v4273_v4, %v2367_v14 }
 0x19b   : > { %v2663_v41 = vsel %vm2075_vm12, %v2662_v53, %v2661_v7  ;;  %v2709_v52 = vrot.slane %v4135_v38, 5  ;;  %v2711_v28 = vrot.slane %v4205_v47, 4  ;;  %v2370_v56 = vpack.c.b16 %v2368_v27, %v2368_v27 }
 0x19c   : > { %v2664_v51 = vsel %vm2078_vm13, %v4000_v55, %v2663_v41  ;;  %v4530_v2 = vunpack.c.l.b16 %v3236_v16  ;;  %v2713_v48 = vrot.slane %v4202_v43, 3  ;;  %v2715_v13 = vrot.slane %v4265_v15, 2 }
 0x19d   : > { %v2666_v10 = vsel %vm2081_vm14, %v2665_v19, %v2664_v51  ;;  %v2710_v49 = vsel %vm2066_vm9, %v2709_v52, %v2708_v34  ;;  %v2717_v54 = vrot.slane %v4250_v1, 1  ;;  %2373 = vrot.lane.b32.xlu1 %v2370_v56, %s3468_s10  ;;  %v2720_v61 = vrot.slane %v4285_v30, 7 }
 0x19e   : > { %v2668_v63 = vsel %vm2084_vm15, %v2667_v0, %v2666_v10  ;;  %v2712_v33 = vsel %vm2069_vm10, %v2711_v28, %v2710_v49  ;;  %v2694_v45 = vrot.slane %v3912_v3, 6  ;;  %v2695_v31 = vrot.slane %v3905_v57, 5 }
 0x19f   : > { %v2683_v59 = vpack.c.b16 %v2668_v63, %v2668_v63  ;;  %v2714_v21 = vsel %vm2072_vm11, %v2713_v48, %v2712_v33  ;;  %v2697_v5 = vrot.slane %v3944_v60, 4  ;;  %v2699_v11 = vrot.slane %v3937_v44, 3 }
 0x1a0   : > { %v2716_v8 = vsel %vm2075_vm12, %v2715_v13, %v2714_v21  ;;  %v2701_v39 = vrot.slane %v4006_v18, 2  ;;  %v2703_v36 = vrot.slane %v4000_v55, 1  ;;  %v2696_v24 = vsel %vm2066_vm9, %v2695_v31, %v2694_v45 }
 0x1a1   : > { %2685 = vrot.lane.b32.xlu0 %v2683_v59, %s3474_s23  ;;  %v2718_v53 = vsel %vm2078_vm13, %v2717_v54, %v2716_v8  ;;  %v2706_v62 = vrot.slane %v4067_v37, 7  ;;  %v2474_v19 = vrot.slane %v4135_v38, 7  ;;  %v2698_v14 = vsel %vm2069_vm10, %v2697_v5, %v2696_v24 }
 0x1a2   : > { %v2719_v0 = vsel %vm2081_vm14, %v4530_v2, %v2718_v53  ;;  %v2476_v7 = vrot.slane %v4205_v47, 6  ;;  %v2478_v16 = vrot.slane %v4202_v43, 5  ;;  %v2700_v27 = vsel %vm2072_vm11, %v2699_v11, %v2698_v14 }
 0x1a3   : > { %v2721_v34 = vsel %vm2084_vm15, %v2720_v61, %v2719_v0  ;;  %v2475_v41 = vsel %vm2066_vm9, %v2474_v19, %v4139_v40  ;;  %v2480_v52 = vrot.slane %v4265_v15, 4  ;;  %v2702_v56 = vsel %vm2075_vm12, %v2701_v39, %v2700_v27 }
 0x1a4   : > { %v2723_v28 = vpack.c.b16 %v2721_v34, %v2721_v34  ;;  %v2477_v51 = vsel %vm2069_vm10, %v2476_v7, %v2475_v41  ;;  %v2482_v48 = vrot.slane %v4250_v1, 3  ;;  %v2704_v10 = vsel %vm2078_vm13, %v2703_v36, %v2702_v56 }
 0x1a5   : > { %v2479_v49 = vsel %vm2072_vm11, %v2478_v16, %v2477_v51  ;;  %v2484_v13 = vrot.slane %v4530_v2, 2  ;;  %v2486_v54 = vrot.slane %v4285_v30, 1  ;;  %v2705_v63 = vsel %vm2081_vm14, %v4070_v58, %v2704_v10 }
 0x1a6   : > { %2726 = vrot.lane.b32.xlu1 %v2723_v28, %s3475_s24  ;;  %v2481_v33 = vsel %vm2075_vm12, %v2480_v52, %v2479_v49  ;;  %v2733_v61 = vrot.slane %v3912_v3, 7  ;;  %v2734_v45 = vrot.slane %v3905_v57, 6  ;;  %v2707_v59 = vsel %vm2084_vm15, %v2706_v62, %v2705_v63 }
 0x1a7   : > { %v2483_v21 = vsel %vm2078_vm13, %v2482_v48, %v2481_v33  ;;  %v2736_v31 = vrot.slane %v3944_v60, 5  ;;  %v2738_v5 = vrot.slane %v3937_v44, 4  ;;  %v2722_v8 = vpack.c.b16 %v2707_v59, %v2707_v59 }
 0x1a8   : > { %v2485_v11 = vsel %vm2081_vm14, %v2484_v13, %v2483_v21  ;;  %v2735_v39 = vsel %vm2066_vm9, %v2734_v45, %v2733_v61  ;;  %v2740_v36 = vrot.slane %v4006_v18, 3  ;;  %v2742_v57 = vrot.slane %v4000_v55, 2 }
 0x1a9   : > { %v2487_v53 = vsel %vm2084_vm15, %v2486_v54, %v2485_v11  ;;  %v2737_v3 = vsel %vm2069_vm10, %v2736_v31, %v2735_v39  ;;  %v2744_v24 = vrot.slane %v4070_v58, 1  ;;  %2724 = vrot.lane.b32.xlu0 %v2722_v8, %s3475_s24  ;;  %v2513_v44 = vrot.slane %v4139_v40, 1 }
 0x1aa   : > { %v2489_v62 = vpack.c.b16 %v2487_v53, %v2487_v53  ;;  %v2739_v60 = vsel %vm2072_vm11, %v2738_v5, %v2737_v3  ;;  %v2515_v19 = vrot.slane %v4205_v47, 7  ;;  %v2517_v18 = vrot.slane %v4202_v43, 6 }
 0x1ab   : > { %v2741_v0 = vsel %vm2075_vm12, %v2740_v36, %v2739_v60  ;;  %v2519_v14 = vrot.slane %v4265_v15, 5  ;;  %v2521_v7 = vrot.slane %v4250_v1, 4  ;;  %v2514_v58 = vsel %vm2066_vm9, %v4135_v38, %v2513_v44 }
 0x1ac   : > { %2492 = vrot.lane.b32.xlu1 %v2489_v62, %s3469_s11  ;;  %v2743_v55 = vsel %vm2078_vm13, %v2742_v57, %v2741_v0  ;;  %v2523_v16 = vrot.slane %v4530_v2, 3  ;;  %v2525_v34 = vrot.slane %v4285_v30, 2  ;;  %v2516_v41 = vsel %vm2069_vm10, %v2515_v19, %v2514_v58 }
 0x1ad   : > { %v2745_v27 = vsel %vm2081_vm14, %v2744_v24, %v2743_v55  ;;  %v2552_v52 = vrot.slane %v4139_v40, 2  ;;  %v2553_v28 = vrot.slane %v4135_v38, 1  ;;  %v2518_v51 = vsel %vm2072_vm11, %v2517_v18, %v2516_v41 }
 0x1ae   : > { %v2746_v56 = vsel %vm2084_vm15, %v4067_v37, %v2745_v27  ;;  %v2556_v48 = vrot.slane %v4202_v43, 7  ;;  %v2558_v10 = vrot.slane %v4265_v15, 6  ;;  %v2520_v13 = vsel %vm2075_vm12, %v2519_v14, %v2518_v51 }
 0x1af   : > { %v2761_v49 = vpack.c.b16 %v2746_v56, %v2746_v56  ;;  %v2554_v54 = vsel %vm2066_vm9, %v2553_v28, %v2552_v52  ;;  %v2560_v63 = vrot.slane %v4250_v1, 5  ;;  %v2522_v33 = vsel %vm2078_vm13, %v2521_v7, %v2520_v13 }
 0x1b0   : > { %v2555_v61 = vsel %vm2069_vm10, %v4205_v47, %v2554_v54  ;;  %v2562_v37 = vrot.slane %v4530_v2, 4  ;;  %v2564_v45 = vrot.slane %v4285_v30, 3  ;;  %v2524_v59 = vsel %vm2081_vm14, %v2523_v16, %v2522_v33 }
 0x1b1   : > { %2763 = vrot.lane.b32.xlu0 %v2761_v49, %s3476_s25  ;;  %v2557_v21 = vsel %vm2072_vm11, %v2556_v48, %v2555_v61  ;;  %v2591_v31 = vrot.slane %v4139_v40, 3  ;;  %v2592_v5 = vrot.slane %v4135_v38, 2  ;;  %v2526_v8 = vsel %vm2084_vm15, %v2525_v34, %v2524_v59 }
 0x1b2   : > { %v2559_v11 = vsel %vm2075_vm12, %v2558_v10, %v2557_v21  ;;  %v2594_v39 = vrot.slane %v4205_v47, 1  ;;  %v2597_v36 = vrot.slane %v4265_v15, 7  ;;  %v2528_v53 = vpack.c.b16 %v2526_v8, %v2526_v8 }
 0x1b3   : > { %v2561_v3 = vsel %vm2078_vm13, %v2560_v63, %v2559_v11  ;;  %v2593_v57 = vsel %vm2066_vm9, %v2592_v5, %v2591_v31  ;;  %v2599_v24 = vrot.slane %v4250_v1, 6  ;;  %v2601_v44 = vrot.slane %v4530_v2, 5 }
 0x1b4   : > { %v2563_v62 = vsel %vm2081_vm14, %v2562_v37, %v2561_v3  ;;  %v2595_v60 = vsel %vm2069_vm10, %v2594_v39, %v2593_v57  ;;  %v2603_v19 = vrot.slane %v4285_v30, 4  ;;  %2531 = vrot.lane.b32.xlu1 %v2528_v53, %s3470_s19  ;;  %v2630_v14 = vrot.slane %v4139_v40, 4 }
 0x1b5   : > { %v2565_v0 = vsel %vm2084_vm15, %v2564_v45, %v2563_v62  ;;  %v2596_v18 = vsel %vm2072_vm11, %v4202_v43, %v2595_v60  ;;  %v2631_v7 = vrot.slane %v4135_v38, 3  ;;  %v2633_v16 = vrot.slane %v4205_v47, 2 }
 0x1b6   : > { %v2567_v55 = vpack.c.b16 %v2565_v0, %v2565_v0  ;;  %v2598_v58 = vsel %vm2075_vm12, %v2597_v36, %v2596_v18  ;;  %v2635_v34 = vrot.slane %v4202_v43, 1  ;;  %v2638_v52 = vrot.slane %v4250_v1, 7 }
 0x1b7   : > { %v2600_v27 = vsel %vm2078_vm13, %v2599_v24, %v2598_v58  ;;  %v2632_v41 = vsel %vm2066_vm9, %v2631_v7, %v2630_v14  ;;  %v2640_v28 = vrot.slane %v4530_v2, 6  ;;  %v2642_v48 = vrot.slane %v4285_v30, 5 }
 0x1b8   : > { %v2602_v56 = vsel %vm2081_vm14, %v2601_v44, %v2600_v27  ;;  %v2634_v51 = vsel %vm2069_vm10, %v2633_v16, %v2632_v41  ;;  %v2669_v10 = vrot.slane %v4139_v40, 5  ;;  %2570 = vrot.lane.b32.xlu1 %v2567_v55, %s3471_s20  ;;  %v2670_v54 = vrot.slane %v4135_v38, 4  ;;  %v4707_v41 = vpop.permute.xlu0 %2332 }
 0x1b9   : > { %v2604_v49 = vsel %vm2084_vm15, %v2603_v19, %v2602_v56  ;;  %v2636_v13 = vsel %vm2072_vm11, %v2635_v34, %v2634_v51  ;;  %v2672_v63 = vrot.slane %v4205_v47, 3  ;;  %v2674_v37 = vrot.slane %v4202_v43, 2 }
 0x1ba   : > { %v2606_v33 = vpack.c.b16 %v2604_v49, %v2604_v49  ;;  %v2637_v61 = vsel %vm2075_vm12, %v4265_v15, %v2636_v13  ;;  %v2676_v45 = vrot.slane %v4265_v15, 1  ;;  %v2671_v21 = vsel %vm2066_vm9, %v2670_v54, %v2669_v10 }
 0x1bb   : > { %v2639_v59 = vsel %vm2078_vm13, %v2638_v52, %v2637_v61  ;;  %v2679_v31 = vrot.slane %v4530_v2, 7  ;;  %v2681_v5 = vrot.slane %v4285_v30, 6  ;;  %v2673_v11 = vsel %vm2069_vm10, %v2672_v63, %v2671_v21  ;;  %v2177_v21 = vpop.permute.xlu1 %2176 }
 0x1bc   : > { %v2641_v8 = vsel %vm2081_vm14, %v2640_v28, %v2639_v59  ;;  %v2747_v39 = vrot.slane %v4139_v40, 7  ;;  %v2748_v36 = vrot.slane %v4135_v38, 6  ;;  %2609 = vrot.lane.b32.xlu1 %v2606_v33, %s3472_s21  ;;  %v2675_v3 = vsel %vm2072_vm11, %v2674_v37, %v2673_v11  ;;  %v2138_v13 = vpop.permute.xlu0 %2137 }
 0x1bd   : > { %v2643_v53 = vsel %vm2084_vm15, %v2642_v48, %v2641_v8  ;;  %v2750_v57 = vrot.slane %v4205_v47, 5  ;;  %v2752_v24 = vrot.slane %v4202_v43, 4  ;;  %v2677_v38 = vsel %vm2075_vm12, %v2676_v45, %v2675_v3 }
 0x1be   : > { %v2645_v40 = vpack.c.b16 %v2643_v53, %v2643_v53  ;;  %v2749_v62 = vsel %vm2066_vm9, %v2748_v36, %v2747_v39  ;;  %v2754_v60 = vrot.slane %v4265_v15, 3  ;;  %v2678_v44 = vsel %vm2078_vm13, %v4250_v1, %v2677_v38 }
 0x1bf   : > { %v2751_v47 = vsel %vm2069_vm10, %v2750_v57, %v2749_v62  ;;  %v2756_v43 = vrot.slane %v4250_v1, 2  ;;  %v2758_v19 = vrot.slane %v4530_v2, 1  ;;  %v2680_v0 = vsel %vm2081_vm14, %v2679_v31, %v2678_v44 }
 0x1c0   : > { %v2753_v18 = vsel %vm2072_vm11, %v2752_v24, %v2751_v47  ;;  %v2065_v14 = vrot.slane %v3887_v29, 7  ;;  %v2068_v7 = vrot.slane %v3929_v32, 6  ;;  %2648 = vrot.lane.b32.xlu1 %v2645_v40, %s3473_s22  ;;  %v2682_v15 = vsel %vm2084_vm15, %v2681_v5, %v2680_v0 }
 0x1c1   : > { %v2755_v55 = vsel %vm2075_vm12, %v2754_v60, %v2753_v18  ;;  %v2074_v1 = vrot.slane %v3988_v50, 4  ;;  %v2071_v29 = vrot.slane %v3924_v17, 5  ;;  %v2684_v16 = vpack.c.b16 %v2682_v15, %v2682_v15 }
 0x1c2   : > { %v2757_v2 = vsel %vm2078_vm13, %v2756_v43, %v2755_v55  ;;  %v2067_v58 = vsel %vm2066_vm9, %v2065_v14, %v3896_v42  ;;  %v2077_v50 = vrot.slane %v3981_v35, 3  ;;  %v2080_v28 = vrot.slane %v4085_v20, 2 }
 0x1c3   : > { %v2759_v32 = vsel %vm2081_vm14, %v2758_v19, %v2757_v2  ;;  %v2070_v34 = vsel %vm2069_vm10, %v2068_v7, %v2067_v58  ;;  %v2086_v17 = vrot.slane %v4088_v26, 7  ;;  %v2088_v56 = vrot.slane %v4162_v25, 6 }
 0x1c4   : > { %v2760_v27 = vsel %vm2084_vm15, %v4285_v30, %v2759_v32  ;;  %v2073_v52 = vsel %vm2072_vm11, %v2071_v29, %v2070_v34  ;;  %2687 = vrot.lane.b32.xlu1 %v2684_v16, %s3474_s23  ;;  %v2083_v30 = vrot.slane %v4052_v12, 1  ;;  %v2092_v48 = vrot.slane %v4221_v23, 4 }
 0x1c5   : > { %v2076_v42 = vsel %vm2075_vm12, %v2074_v1, %v2073_v52  ;;  %v2762_v10 = vpack.c.b16 %v2760_v27, %v2760_v27  ;;  %v2087_v20 = vsel %vm2066_vm9, %v2086_v17, %v4132_v6  ;;  %v2090_v49 = vrot.slane %v4151_v9, 5 }
 0x1c6   : > { %v2079_v51 = vsel %vm2078_vm13, %v2077_v50, %v2076_v42  ;;  %v2089_v12 = vsel %vm2069_vm10, %v2088_v56, %v2087_v20  ;;  %v2096_v25 = vrot.slane %v4320_v22, 2  ;;  %v2094_v9 = vrot.slane %v4214_v46, 3  ;;  %v2216_v46 = vpop.permute.xlu0 %2215 }
 0x1c7   : > { %v2082_v35 = vsel %vm2081_vm14, %v2080_v28, %v2079_v51  ;;  %v2091_v6 = vsel %vm2072_vm11, %v2090_v49, %v2089_v12  ;;  %v2098_v33 = vrot.slane %v4273_v4, 1  ;;  %vm2338_vm8 = vcmask 454016  }
 0x1c8   : > { %v2085_v26 = vsel %vm2084_vm15, %v2083_v30, %v2082_v35  ;;  %2765 = vrot.lane.b32.xlu1 %v2762_v10, %s3476_s25  ;;  %v2093_v54 = vsel %vm2075_vm12, %v2092_v48, %v2091_v6  ;;  %vm2377_vm9 = vcmask 519616   ;;  %vm2496_vm10 = vcmask 585216  }
 0x1c9   : > { %v2100_v23 = vpack.c.b16 %v2085_v26, %v2085_v26  ;;  %v2095_v63 = vsel %vm2078_vm13, %v2094_v9, %v2093_v54  ;;  %vm2535_vm11 = vcmask 650816   ;;  %vm2574_vm12 = vcmask 716416  }
 0x1ca   : > { %v2097_v22 = vsel %vm2081_vm14, %v2096_v25, %v2095_v63  ;;  %vm2613_vm13 = vcmask 782016   ;;  %vm2652_vm14 = vcmask 847616   ;;  %vm2730_vm0 = vcmask 978816  }
 0x1cb   : > { %2105 = vst.msk [vmem:[%s4726_s30] sm:$0xf] %vm2104_vm2, %v2100_v23  ;;  %v2099_v61 = vsel %vm2084_vm15, %v2098_v33, %v2097_v22  ;;  %v2255_v45 = vpop.permute.xlu0 %2254  ;;  %vm2691_vm15 = vcmask 913216   ;;  %vm2769_vm1 = vcmask 1044416  }
 0x1cc   : > { %v2101_v37 = vpack.c.b16 %v2099_v61, %v2099_v61  ;;  %2144 = vst.msk [vmem:[%s4726_s30] sm:$0xf] %vm2143_vm3, %v2138_v13 }
 0x1cd   : > { %2183 = vst.msk [vmem:[%s4726_s30] sm:$0xf] %vm2182_vm4, %v2177_v21 }
 0x1ce   : > { %2106 = vst.msk [vmem:[%s4726_s30 + $0x4] sm:$0xf] %vm2104_vm2, %v2101_v37 }
 0x1cf   : > { %2222 = vst.msk [vmem:[%s4726_s30] sm:$0xf] %vm2221_vm5, %v2216_v46 }
 0x1d0   : > { %2261 = vst.msk [vmem:[%s4726_s30] sm:$0xf] %vm2260_vm6, %v2255_v45 }
 0x1d6   : > { %v2294_v59 = vpop.permute.xlu0 %2293 }
 0x1d7   : > { %2300 = vst.msk [vmem:[%s4726_s30] sm:$0xf] %vm2299_vm7, %v2294_v59 }
 0x1d8   : > { %2339 = vst.msk [vmem:[%s4726_s30] sm:$0xf] %vm2338_vm8, %v4707_v41 }
 0x1dd   : > { %v2372_v4 = vpop.permute.xlu0 %2371 }
 0x1de   : > { %2378 = vst.msk [vmem:[%s4726_s30] sm:$0xf] %vm2377_vm9, %v2372_v4 }
 0x1e1   : > { %v2491_v31 = vpop.permute.xlu0 %2490 }
 0x1e2   : > { %2497 = vst.msk [vmem:[%s4726_s30] sm:$0xf] %vm2496_vm10, %v2491_v31 }
 0x1e8   : > { %v2335_v5 = vpop.permute.xlu1 %2334 }
 0x1ec   : > { %v2140_v8 = vpop.permute.xlu0 %2139 }
 0x1ed   : > { %2145 = vst.msk [vmem:[%s4726_s30 + $0x4] sm:$0xf] %vm2143_vm3, %v2140_v8 }
 0x1f1   : > { %v2179_v11 = vpop.permute.xlu1 %2178 }
 0x1f2   : > { %2184 = vst.msk [vmem:[%s4726_s30 + $0x4] sm:$0xf] %vm2182_vm4, %v2179_v11 }
 0x1f5   : > { %v2530_v57 = vpop.permute.xlu0 %2529 }
 0x1f6   : > { %2536 = vst.msk [vmem:[%s4726_s30] sm:$0xf] %vm2535_vm11, %v2530_v57 }
 0x1f9   : > { %v2218_v39 = vpop.permute.xlu1 %2217 }
 0x1fa   : > { %2223 = vst.msk [vmem:[%s4726_s30 + $0x4] sm:$0xf] %vm2221_vm5, %v2218_v39 }
 0x1fd   : > { %v2569_v40 = vpop.permute.xlu0 %2568 }
 0x1fe   : > { %2575 = vst.msk [vmem:[%s4726_s30] sm:$0xf] %vm2574_vm12, %v2569_v40 }
 0x200   : > { %v2257_v36 = vpop.permute.xlu1 %2256 }
 0x201   : > { %2262 = vst.msk [vmem:[%s4726_s30 + $0x4] sm:$0xf] %vm2260_vm6, %v2257_v36 }
 0x204   : > { %v2608_v62 = vpop.permute.xlu0 %2607 }
 0x205   : > { %2614 = vst.msk [vmem:[%s4726_s30] sm:$0xf] %vm2613_vm13, %v2608_v62 }
 0x208   : > { %v2296_v53 = vpop.permute.xlu1 %2295 }
 0x209   : > { %2301 = vst.msk [vmem:[%s4726_s30 + $0x4] sm:$0xf] %vm2299_vm7, %v2296_v53 }
 0x20a   : > { %2340 = vst.msk [vmem:[%s4726_s30 + $0x4] sm:$0xf] %vm2338_vm8, %v2335_v5 }
 0x20c   : > { %v2647_v44 = vpop.permute.xlu0 %2646 }
 0x20d   : > { %2653 = vst.msk [vmem:[%s4726_s30] sm:$0xf] %vm2652_vm14, %v2647_v44 }
 0x20f   : > { %v2374_v3 = vpop.permute.xlu1 %2373 }
 0x210   : > { %2379 = vst.msk [vmem:[%s4726_s30 + $0x4] sm:$0xf] %vm2377_vm9, %v2374_v3 }
 0x213   : > { %v2686_v43 = vpop.permute.xlu0 %2685 }
 0x214   : > { %2692 = vst.msk [vmem:[%s4726_s30] sm:$0xf] %vm2691_vm15, %v2686_v43 }
 0x218   : > { %v2727_v24 = vpop.permute.xlu1 %2726 }
 0x21b   : > { %v2725_v18 = vpop.permute.xlu0 %2724 }
 0x21c   : > { %2731 = vst.msk [vmem:[%s4726_s30] sm:$0xf] %vm2730_vm0, %v2725_v18 }
 0x21e   : > { %v2493_v38 = vpop.permute.xlu1 %2492 }
 0x21f   : > { %2498 = vst.msk [vmem:[%s4726_s30 + $0x4] sm:$0xf] %vm2496_vm10, %v2493_v38 }
 0x223   : > { %v2764_v7 = vpop.permute.xlu0 %2763 }
 0x224   : > { %2770 = vst.msk [vmem:[%s4726_s30] sm:$0xf] %vm2769_vm1, %v2764_v7 }
 0x226   : > { %v2532_v60 = vpop.permute.xlu1 %2531 }
 0x227   : > { %2537 = vst.msk [vmem:[%s4726_s30 + $0x4] sm:$0xf] %vm2535_vm11, %v2532_v60 }
 0x22a   : > { %v2571_v47 = vpop.permute.xlu1 %2570 }
 0x22b   : > { %2576 = vst.msk [vmem:[%s4726_s30 + $0x4] sm:$0xf] %vm2574_vm12, %v2571_v47 }
 0x22e   : > { %v2610_v19 = vpop.permute.xlu1 %2609 }
 0x22f   : > { %2615 = vst.msk [vmem:[%s4726_s30 + $0x4] sm:$0xf] %vm2613_vm13, %v2610_v19 }
 0x232   : > { %v2649_v0 = vpop.permute.xlu1 %2648 }
 0x233   : > { %2654 = vst.msk [vmem:[%s4726_s30 + $0x4] sm:$0xf] %vm2652_vm14, %v2649_v0 }
 0x236   : > { %v2688_v14 = vpop.permute.xlu1 %2687 }
 0x237   : > { %2693 = vst.msk [vmem:[%s4726_s30 + $0x4] sm:$0xf] %vm2691_vm15, %v2688_v14 }
 0x238   : > { %2732 = vst.msk [vmem:[%s4726_s30 + $0x4] sm:$0xf] %vm2730_vm0, %v2727_v24 }
 0x23a   : > { %v2766_v15 = vpop.permute.xlu1 %2765 }
 0x23b   : > { %2771 = vst.msk [vmem:[%s4726_s30 + $0x4] sm:$0xf] %vm2769_vm1, %v2766_v15 }
 0x23c PF: > { %s14_s12 = sadd.s32 1, %s3460_s12  }
 0x23d   : > { %p11_p6 = scmp.ge.s32.totalorder %s14_s12, 4  }
 0x23f   :  { %13 = sbr.rel (!%p11_p6) target bundleno = 1 (0x1), region = 72 }

</bundles_post_ra>
